<compile_context>
chip_gen: v6e
topology: v6e:2x2x1
jax: 0.10.0
libtpu: 0.0.40
codegen_flags: <defaults>
</compile_context>

<pallas_src>
import numpy as np
import jax
import jax.numpy as jnp
from jax.experimental import pallas as pl
from jax.experimental.pallas import tpu as pltpu

# ----------------------- model configuration (small synthetic sizes) ----------
EMB_DIM = 32                 # emb_dim
SEQ_LEN = 16                 # content length L (>= 10, the largest conv kernel)
BATCH = 2
MLP_DIMS = (64,)             # mlp_dims; gate hidden = mlp_dims[-1], classifier hidden = 64
DOMAIN_NUM = 9
NUM_EXPERT = 5
FEATURE_KERNEL = ((1, 64), (2, 64), (3, 64), (5, 64), (10, 64))
MAX_K = max(k for k, _ in FEATURE_KERNEL)                    # 10
SHARED_DIM = sum(c for _, c in FEATURE_KERNEL)               # 320
EXP_PAD = ((SHARED_DIM + 127) // 128) * 128                  # 384 (lane aligned per expert)
TOTAL_PAD = NUM_EXPERT * EXP_PAD                             # 1920 fused conv output lanes
BN_EPS = 1e-5
GATE_H = MLP_DIMS[-1]
CLS_H = MLP_DIMS[0]
OUT_W = 128                                                  # lane-dense output width
BL = BATCH * SEQ_LEN


# ----------------------------------- kernel -----------------------------------
def mdfend_kernel(x_ref, mask_ref, cat_ref,
                  attw_ref, attb_ref, dom_ref,
                  gw1_ref, gb1_ref, gw2_ref, gb2_ref,
                  cw_ref, cb_ref, tlim_ref,
                  clw1_ref, clb1_ref, clw2_ref, clb2_ref,
                  out_ref, acc_ref):
    B, L, E = BATCH, SEQ_LEN, EMB_DIM

    xflat = x_ref[...]                                   # (B*L + MAX_K-1, E), zero padded
    x3 = xflat[0:BL, :].reshape(B, L, E)                 # (B, L, E) free collapse (L % 8 == 0)

    # ---- MaskAttention: Linear(E,1) -> masked softmax over L -> weighted sum ----
    scores = jnp.sum(x3 * attw_ref[...], axis=2, keepdims=True) + attb_ref[...]   # (B,L,1)
    valid = mask_ref[...] > 0.5                                                   # (B,L,1)
    scores = jnp.where(valid, scores, -1e30)
    m = jnp.max(scores, axis=1, keepdims=True)                                    # (B,1,1)
    p = jnp.where(valid, jnp.exp(scores - m), 0.0)
    p = p / (jnp.sum(p, axis=1, keepdims=True) + 1e-30)                           # (B,L,1)
    feature = jnp.sum(p * x3, axis=1)                                             # (B,E)

    # ---- Domain embedding lookup as one-hot @ table (whole batch at once) ----
    onehot = (jax.lax.broadcasted_iota(jnp.int32, (B, DOMAIN_NUM), 1)
              == cat_ref[...]).astype(jnp.float32)                                # (B,9)
    dom = jnp.dot(onehot, dom_ref[...], preferred_element_type=jnp.float32)       # (B,E)

    # ---- Gate: Linear -> ReLU -> Linear -> softmax over experts (no concat needed) ----
    gw1 = gw1_ref[...]                                                            # (2E,H)
    h = (jnp.dot(dom, gw1[0:E, :], preferred_element_type=jnp.float32)
         + jnp.dot(feature, gw1[E:2 * E, :], preferred_element_type=jnp.float32)
         + gb1_ref[...])
    h = jnp.maximum(h, 0.0)
    g = jnp.dot(h, gw2_ref[...], preferred_element_type=jnp.float32) + gb2_ref[...]  # (B,5)
    g = g - jnp.max(g, axis=1, keepdims=True)
    ge = jnp.exp(g)
    gate = ge / jnp.sum(ge, axis=1, keepdims=True)                                # (B,NUM_EXPERT)

    # ---- Fused conv banks: 10 taps of (B*L,E)@(E,1920), masked global max-pool ----
    acc_ref[...] = jnp.dot(xflat[0:BL, :], cw_ref[0],
                           preferred_element_type=jnp.float32)
    for j in range(1, MAX_K):                                                     # static unroll
        acc_ref[...] += jnp.dot(xflat[j:j + BL, :], cw_ref[j],
                                preferred_element_type=jnp.float32)
    acc3 = acc_ref[...].reshape(B, L, TOTAL_PAD)
    t_idx = jax.lax.broadcasted_iota(jnp.int32, (B, L, 1), 1)
    masked = jnp.where(t_idx < tlim_ref[...], acc3 + cb_ref[...], -1e30)          # (B,L,1920)
    pooled = jnp.max(masked, axis=1)                                              # (B,1920)

    # ---- Gate-weighted expert mixture (lane-aligned 384-wide slices) ----
    shared = gate[:, 0:1] * pooled[:, 0:EXP_PAD]
    for i in range(1, NUM_EXPERT):
        shared = shared + gate[:, i:i + 1] * pooled[:, i * EXP_PAD:(i + 1) * EXP_PAD]
    # shared[:, SHARED_DIM:] is exactly zero (zero-weight pad channels).

    # ---- Classifier MLP (BatchNorm eval-mode folded into clw1/clb1 on host) ----
    h1 = jnp.maximum(
        jnp.dot(shared, clw1_ref[...], preferred_element_type=jnp.float32) + clb1_ref[...],
        0.0)                                                                      # (B,CLS_H)
    logit = jnp.dot(h1, clw2_ref[...], preferred_element_type=jnp.float32) + clb2_ref[...]
    out_ref[...] = jax.nn.sigmoid(logit)                                          # (B,OUT_W)


# ----------------------------------- wrapper -----------------------------------
def _full_spec(shape):
    n = len(shape)
    return pl.BlockSpec(shape, lambda i, n=n: (0,) * n)


def mdfend_forward(content, content_masks, category, K):
    B, L, E = content.shape
    assert (B, L, E) == (BATCH, SEQ_LEN, EMB_DIM)

    x_flat = jnp.concatenate(
        [content.reshape(B * L, E),
         jnp.zeros((MAX_K - 1, E), content.dtype)], axis=0)            # (B*L+9, E)
    mask3 = content_masks.reshape(B, L, 1).astype(jnp.float32)
    cat2 = category.reshape(B, 1).astype(jnp.int32)

    args = [x_flat, mask3, cat2,
            K['attw3'], K['attb3'], K['dom'],
            K['gw1'], K['gb1'], K['gw2'], K['gb2'],
            K['cw'], K['cb'], K['tlim'],
            K['clw1'], K['clb1'], K['clw2'], K['clb2']]

    out = pl.pallas_call(
        mdfend_kernel,
        out_shape=jax.ShapeDtypeStruct((B, OUT_W), jnp.float32),
        grid=(1,),
        in_specs=[_full_spec(a.shape) for a in args],
        out_specs=pl.BlockSpec((B, OUT_W), lambda i: (0, 0)),
        scratch_shapes=[pltpu.VMEM((B * L, TOTAL_PAD), jnp.float32)],
        compiler_params=pltpu.CompilerParams(
            dimension_semantics=("arbitrary",)),
    )(*args)
    return out[:, 0]


# ------------------------- deterministic parameter init -------------------------
def init_params(key):
    ks = iter(jax.random.split(key, 32))
    rnd = lambda shape, s=0.1: jax.random.normal(next(ks), shape, jnp.float32) * s
    P = {}
    P['att_w'] = rnd((EMB_DIM, 1))
    P['att_b'] = rnd((1, 1))
    P['dom_table'] = rnd((DOMAIN_NUM, EMB_DIM))
    P['gw1'] = rnd((2 * EMB_DIM, GATE_H))
    P['gb1'] = rnd((1, GATE_H))
    P['gw2'] = rnd((GATE_H, NUM_EXPERT))
    P['gb2'] = rnd((1, NUM_EXPERT))
    # torch Conv1d weight layout per expert: (out=64, in=E, k); keep experts stacked.
    P['conv_w'] = [rnd((NUM_EXPERT, n_ch, EMB_DIM, k)) for (k, n_ch) in FEATURE_KERNEL]
    P['conv_b'] = [rnd((NUM_EXPERT, n_ch)) for (_, n_ch) in FEATURE_KERNEL]
    P['clw1'] = rnd((SHARED_DIM, CLS_H))
    P['clb1'] = rnd((1, CLS_H))
    P['bn_scale'] = jnp.full((1, CLS_H), 1.0 / np.sqrt(1.0 + BN_EPS), jnp.float32)
    P['bn_shift'] = jnp.zeros((1, CLS_H), jnp.float32)
    P['clw2'] = rnd((CLS_H, 1))
    P['clb2'] = rnd((1, 1))
    return P


# ----------------- host-side packing of the fused kernel operands -----------------
def pack_params(P):
    E, L = EMB_DIM, SEQ_LEN
    cw = np.zeros((MAX_K, E, TOTAL_PAD), np.float32)
    cb = np.zeros((1, 1, TOTAL_PAD), np.float32)
    tlim = np.full((1, 1, TOTAL_PAD), L, np.int32)     # pad channels: all positions valid

    bank_off, o = [], 0
    for (_, n_ch) in FEATURE_KERNEL:
        bank_off.append(o)
        o += n_ch

    for bi, (k, n_ch) in enumerate(FEATURE_KERNEL):
        w_b = np.asarray(P['conv_w'][bi])              # (NUM_EXPERT, n_ch, E, k)
        b_b = np.asarray(P['conv_b'][bi])              # (NUM_EXPERT, n_ch)
        for i in range(NUM_EXPERT):
            c0 = i * EXP_PAD + bank_off[bi]
            for j in range(k):
                cw[j, :, c0:c0 + n_ch] = w_b[i, :, :, j].T
            cb[0, 0, c0:c0 + n_ch] = b_b[i]
            tlim[0, 0, c0:c0 + n_ch] = L - k + 1

    bn_s = np.asarray(P['bn_scale'])
    clw1_pad = np.zeros((EXP_PAD, CLS_H), np.float32)
    clw1_pad[:SHARED_DIM] = np.asarray(P['clw1']) * bn_s
    clb1_eff = np.asarray(P['clb1']) * bn_s + np.asarray(P['bn_shift'])
    clw2_wide = np.tile(np.asarray(P['clw2']), (1, OUT_W))
    clb2_wide = np.tile(np.asarray(P['clb2']), (1, OUT_W))

    return dict(
        attw3=jnp.asarray(np.asarray(P['att_w']).T.reshape(1, 1, EMB_DIM)),
        attb3=jnp.asarray(np.asarray(P['att_b']).reshape(1, 1, 1)),
        dom=P['dom_table'],
        gw1=P['gw1'], gb1=P['gb1'], gw2=P['gw2'], gb2=P['gb2'],
        cw=jnp.asarray(cw), cb=jnp.asarray(cb), tlim=jnp.asarray(tlim),
        clw1=jnp.asarray(clw1_pad), clb1=jnp.asarray(clb1_eff),
        clw2=jnp.asarray(clw2_wide), clb2=jnp.asarray(clb2_wide))


# ------------------------------ pure-JAX reference ------------------------------
def mdfend_ref(content, masks, category, P):
    x = content
    scores = jnp.einsum('ble,eo->bl', x, P['att_w']) + P['att_b'][0, 0]
    scores = jnp.where(masks > 0.5, scores, -1e30)
    p = jax.nn.softmax(scores, axis=-1)
    feature = jnp.einsum('bl,ble->be', p, x)
    dom = P['dom_table'][category]
    gate_in = jnp.concatenate([dom, feature], axis=-1)
    h = jax.nn.relu(gate_in @ P['gw1'] + P['gb1'])
    gate = jax.nn.softmax(h @ P['gw2'] + P['gb2'], axis=1)
    expert_outs = []
    for i in range(NUM_EXPERT):
        blocks = []
        for bi, (k, n_ch) in enumerate(FEATURE_KERNEL):
            w = P['conv_w'][bi][i]     # (n_ch, E, k)
            b = P['conv_b'][bi][i]     # (n_ch,)
            t_out = SEQ_LEN - k + 1
            acc = sum(jnp.einsum('bte,ce->btc', x[:, j:j + t_out, :], w[:, :, j])
                      for j in range(k)) + b
            blocks.append(jnp.max(acc, axis=1))                     # (B, n_ch)
        expert_outs.append(jnp.concatenate(blocks, axis=-1))        # (B, 320)
    shared = sum(gate[:, i:i + 1] * expert_outs[i] for i in range(NUM_EXPERT))
    h1 = jax.nn.relu((shared @ P['clw1'] + P['clb1']) * P['bn_scale'] + P['bn_shift'])
    logit = h1 @ P['clw2'] + P['clb2']
    return jax.nn.sigmoid(logit[:, 0])


# ------------------------------------ main ------------------------------------
if __name__ == "__main__":
    key = jax.random.PRNGKey(0)
    k_x, k_p = jax.random.split(key)

    content = jax.random.normal(k_x, (BATCH, SEQ_LEN, EMB_DIM), jnp.float32)  # w2v embeddings
    lengths = jnp.array([SEQ_LEN, 11], dtype=jnp.int32)
    content_masks = (jnp.arange(SEQ_LEN)[None, :] < lengths[:, None]).astype(jnp.float32)
    category = jnp.array([3, 7], dtype=jnp.int32)

    params = init_params(k_p)
    packed = pack_params(params)

    out = jax.block_until_ready(mdfend_forward(content, content_masks, category, packed))

    ref = np.asarray(mdfend_ref(content, content_masks, category, params))
    np.testing.assert_allclose(np.asarray(out), ref, rtol=1e-4, atol=1e-5)

    print("KERNEL_OK")
</pallas_src>

<mosaic_0001>
module attributes {stable_mosaic.version = 11 : i64} {
  func.func @mdfend_kernel(%arg0: i32, %arg1: memref<41x32xf32, #tpu.memory_space<vmem>>, %arg2: memref<2x16x1xf32, #tpu.memory_space<vmem>>, %arg3: memref<2x1xi32, #tpu.memory_space<vmem>>, %arg4: memref<1x1x32xf32, #tpu.memory_space<vmem>>, %arg5: memref<1x1x1xf32, #tpu.memory_space<vmem>>, %arg6: memref<9x32xf32, #tpu.memory_space<vmem>>, %arg7: memref<64x64xf32, #tpu.memory_space<vmem>>, %arg8: memref<1x64xf32, #tpu.memory_space<vmem>>, %arg9: memref<64x5xf32, #tpu.memory_space<vmem>>, %arg10: memref<1x5xf32, #tpu.memory_space<vmem>>, %arg11: memref<10x32x1920xf32, #tpu.memory_space<vmem>>, %arg12: memref<1x1x1920xf32, #tpu.memory_space<vmem>>, %arg13: memref<1x1x1920xi32, #tpu.memory_space<vmem>>, %arg14: memref<384x64xf32, #tpu.memory_space<vmem>>, %arg15: memref<1x64xf32, #tpu.memory_space<vmem>>, %arg16: memref<64x128xf32, #tpu.memory_space<vmem>>, %arg17: memref<1x128xf32, #tpu.memory_space<vmem>>, %arg18: memref<2x128xf32, #tpu.memory_space<vmem>>, %arg19: memref<32x1920xf32, #tpu.memory_space<vmem>>) attributes {dimension_semantics = [#tpu.dimension_semantics<arbitrary>], iteration_bounds = array<i64: 1>, scalar_prefetch = 0 : i64, scratch_operands = 1 : i64, tpu.core_type = #tpu.core_type<tc>, window_params = [{pipeline_mode = #tpu.pipeline_mode<synchronous>, transform_indices = @transform_0, window_bounds = array<i64: 41, 32>}, {pipeline_mode = #tpu.pipeline_mode<synchronous>, transform_indices = @transform_1, window_bounds = array<i64: 2, 16, 1>}, {pipeline_mode = #tpu.pipeline_mode<synchronous>, transform_indices = @transform_2, window_bounds = array<i64: 2, 1>}, {pipeline_mode = #tpu.pipeline_mode<synchronous>, transform_indices = @transform_3, window_bounds = array<i64: 1, 1, 32>}, {pipeline_mode = #tpu.pipeline_mode<synchronous>, transform_indices = @transform_4, window_bounds = array<i64: 1, 1, 1>}, {pipeline_mode = #tpu.pipeline_mode<synchronous>, transform_indices = @transform_5, window_bounds = array<i64: 9, 32>}, {pipeline_mode = #tpu.pipeline_mode<synchronous>, transform_indices = @transform_6, window_bounds = array<i64: 64, 64>}, {pipeline_mode = #tpu.pipeline_mode<synchronous>, transform_indices = @transform_7, window_bounds = array<i64: 1, 64>}, {pipeline_mode = #tpu.pipeline_mode<synchronous>, transform_indices = @transform_8, window_bounds = array<i64: 64, 5>}, {pipeline_mode = #tpu.pipeline_mode<synchronous>, transform_indices = @transform_9, window_bounds = array<i64: 1, 5>}, {pipeline_mode = #tpu.pipeline_mode<synchronous>, transform_indices = @transform_10, window_bounds = array<i64: 10, 32, 1920>}, {pipeline_mode = #tpu.pipeline_mode<synchronous>, transform_indices = @transform_11, window_bounds = array<i64: 1, 1, 1920>}, {pipeline_mode = #tpu.pipeline_mode<synchronous>, transform_indices = @transform_12, window_bounds = array<i64: 1, 1, 1920>}, {pipeline_mode = #tpu.pipeline_mode<synchronous>, transform_indices = @transform_13, window_bounds = array<i64: 384, 64>}, {pipeline_mode = #tpu.pipeline_mode<synchronous>, transform_indices = @transform_14, window_bounds = array<i64: 1, 64>}, {pipeline_mode = #tpu.pipeline_mode<synchronous>, transform_indices = @transform_15, window_bounds = array<i64: 64, 128>}, {pipeline_mode = #tpu.pipeline_mode<synchronous>, transform_indices = @transform_16, window_bounds = array<i64: 1, 128>}, {pipeline_mode = #tpu.pipeline_mode<synchronous>, transform_indices = @transform_17, window_bounds = array<i64: 2, 128>}]} {
    %c0 = arith.constant 0 : index
    %c0_0 = arith.constant 0 : index
    %0 = vector.load %arg1[%c0, %c0_0] : memref<41x32xf32, #tpu.memory_space<vmem>>, vector<41x32xf32>
    %1 = vector.extract_strided_slice %0 {offsets = [0, 0], sizes = [32, 32], strides = [1, 1]} : vector<41x32xf32> to vector<32x32xf32>
    %2 = vector.shape_cast %1 : vector<32x32xf32> to vector<2x16x32xf32>
    %c0_1 = arith.constant 0 : index
    %c0_2 = arith.constant 0 : index
    %c0_3 = arith.constant 0 : index
    %3 = vector.load %arg4[%c0_1, %c0_2, %c0_3] : memref<1x1x32xf32, #tpu.memory_space<vmem>>, vector<1x1x32xf32>
    %4 = vector.broadcast %3 : vector<1x1x32xf32> to vector<2x16x32xf32>
    %5 = arith.mulf %2, %4 : vector<2x16x32xf32>
    %cst = arith.constant dense<0.000000e+00> : vector<2x16xf32>
    %6 = vector.multi_reduction <add>, %5, %cst [2] : vector<2x16x32xf32> to vector<2x16xf32>
    %7 = vector.shape_cast %6 : vector<2x16xf32> to vector<2x16x1xf32>
    %c0_4 = arith.constant 0 : index
    %c0_5 = arith.constant 0 : index
    %c0_6 = arith.constant 0 : index
    %8 = vector.load %arg5[%c0_4, %c0_5, %c0_6] : memref<1x1x1xf32, #tpu.memory_space<vmem>>, vector<1x1x1xf32>
    %9 = vector.broadcast %8 : vector<1x1x1xf32> to vector<2x16x1xf32>
    %10 = arith.addf %7, %9 : vector<2x16x1xf32>
    %c0_7 = arith.constant 0 : index
    %c0_8 = arith.constant 0 : index
    %c0_9 = arith.constant 0 : index
    %11 = vector.load %arg2[%c0_7, %c0_8, %c0_9] : memref<2x16x1xf32, #tpu.memory_space<vmem>>, vector<2x16x1xf32>
    %cst_10 = arith.constant 5.000000e-01 : f32
    %12 = vector.broadcast %cst_10 : f32 to vector<2x16x1xf32>
    %13 = arith.cmpf ogt, %11, %12 : vector<2x16x1xf32>
    %cst_11 = arith.constant -1.000000e+30 : f32
    %14 = vector.broadcast %cst_11 : f32 to vector<2x16x1xf32>
    %15 = arith.select %13, %10, %14 : vector<2x16x1xi1>, vector<2x16x1xf32>
    %cst_12 = arith.constant dense<0xFF800000> : vector<2x1xf32>
    %16 = vector.multi_reduction <maximumf>, %15, %cst_12 [1] : vector<2x16x1xf32> to vector<2x1xf32>
    %17 = vector.shape_cast %16 : vector<2x1xf32> to vector<2x1x1xf32>
    %18 = vector.broadcast %17 : vector<2x1x1xf32> to vector<2x16x1xf32>
    %19 = arith.subf %15, %18 : vector<2x16x1xf32>
    %20 = math.exp %19 : vector<2x16x1xf32>
    %cst_13 = arith.constant 0.000000e+00 : f32
    %21 = vector.broadcast %cst_13 : f32 to vector<2x16x1xf32>
    %22 = arith.select %13, %20, %21 : vector<2x16x1xi1>, vector<2x16x1xf32>
    %cst_14 = arith.constant dense<0.000000e+00> : vector<2x1xf32>
    %23 = vector.multi_reduction <add>, %22, %cst_14 [1] : vector<2x16x1xf32> to vector<2x1xf32>
    %24 = vector.shape_cast %23 : vector<2x1xf32> to vector<2x1x1xf32>
    %cst_15 = arith.constant 1.000000e-30 : f32
    %25 = vector.broadcast %cst_15 : f32 to vector<2x1x1xf32>
    %26 = arith.addf %24, %25 : vector<2x1x1xf32>
    %27 = vector.broadcast %26 : vector<2x1x1xf32> to vector<2x16x1xf32>
    %28 = arith.divf %22, %27 : vector<2x16x1xf32>
    %29 = vector.broadcast %28 : vector<2x16x1xf32> to vector<2x16x32xf32>
    %30 = arith.mulf %29, %2 : vector<2x16x32xf32>
    %cst_16 = arith.constant dense<0.000000e+00> : vector<2x32xf32>
    %31 = vector.multi_reduction <add>, %30, %cst_16 [1] : vector<2x16x32xf32> to vector<2x32xf32>
    %32 = tpu.iota {dimensions = array<i32: 1>} : vector<2x9xi32>
    %c0_17 = arith.constant 0 : index
    %c0_18 = arith.constant 0 : index
    %33 = vector.load %arg3[%c0_17, %c0_18] : memref<2x1xi32, #tpu.memory_space<vmem>>, vector<2x1xi32>
    %34 = vector.broadcast %33 : vector<2x1xi32> to vector<2x9xi32>
    %35 = arith.cmpi eq, %32, %34 : vector<2x9xi32>
    %36 = arith.extui %35 : vector<2x9xi1> to vector<2x9xi32>
    %37 = arith.sitofp %36 : vector<2x9xi32> to vector<2x9xf32>
    %c0_19 = arith.constant 0 : index
    %c0_20 = arith.constant 0 : index
    %38 = vector.load %arg6[%c0_19, %c0_20] : memref<9x32xf32, #tpu.memory_space<vmem>>, vector<9x32xf32>
    %cst_21 = arith.constant dense<0.000000e+00> : vector<2x32xf32>
    %39 = tpu.matmul %37, %38, %cst_21 {dimension_numbers = #tpu.dot_dimension_numbers<[1], [0], [0], [1], [0, 0, 1, 1], [], []>} : vector<2x9xf32>, vector<9x32xf32>, vector<2x32xf32> -> vector<2x32xf32>
    %c0_22 = arith.constant 0 : index
    %c0_23 = arith.constant 0 : index
    %40 = vector.load %arg7[%c0_22, %c0_23] : memref<64x64xf32, #tpu.memory_space<vmem>>, vector<64x64xf32>
    %41 = vector.extract_strided_slice %40 {offsets = [0, 0], sizes = [32, 64], strides = [1, 1]} : vector<64x64xf32> to vector<32x64xf32>
    %cst_24 = arith.constant dense<0.000000e+00> : vector<2x64xf32>
    %42 = tpu.matmul %39, %41, %cst_24 {dimension_numbers = #tpu.dot_dimension_numbers<[1], [0], [0], [1], [0, 0, 1, 1], [], []>} : vector<2x32xf32>, vector<32x64xf32>, vector<2x64xf32> -> vector<2x64xf32>
    %43 = vector.extract_strided_slice %40 {offsets = [32, 0], sizes = [32, 64], strides = [1, 1]} : vector<64x64xf32> to vector<32x64xf32>
    %cst_25 = arith.constant dense<0.000000e+00> : vector<2x64xf32>
    %44 = tpu.matmul %31, %43, %cst_25 {dimension_numbers = #tpu.dot_dimension_numbers<[1], [0], [0], [1], [0, 0, 1, 1], [], []>} : vector<2x32xf32>, vector<32x64xf32>, vector<2x64xf32> -> vector<2x64xf32>
    %45 = arith.addf %42, %44 : vector<2x64xf32>
    %c0_26 = arith.constant 0 : index
    %c0_27 = arith.constant 0 : index
    %46 = vector.load %arg8[%c0_26, %c0_27] : memref<1x64xf32, #tpu.memory_space<vmem>>, vector<1x64xf32>
    %47 = vector.broadcast %46 : vector<1x64xf32> to vector<2x64xf32>
    %48 = arith.addf %45, %47 : vector<2x64xf32>
    %cst_28 = arith.constant 0.000000e+00 : f32
    %49 = vector.broadcast %cst_28 : f32 to vector<2x64xf32>
    %50 = arith.maximumf %48, %49 : vector<2x64xf32>
    %c0_29 = arith.constant 0 : index
    %c0_30 = arith.constant 0 : index
    %51 = vector.load %arg9[%c0_29, %c0_30] : memref<64x5xf32, #tpu.memory_space<vmem>>, vector<64x5xf32>
    %cst_31 = arith.constant dense<0.000000e+00> : vector<2x5xf32>
    %52 = tpu.matmul %50, %51, %cst_31 {dimension_numbers = #tpu.dot_dimension_numbers<[1], [0], [0], [1], [0, 0, 1, 1], [], []>} : vector<2x64xf32>, vector<64x5xf32>, vector<2x5xf32> -> vector<2x5xf32>
    %c0_32 = arith.constant 0 : index
    %c0_33 = arith.constant 0 : index
    %53 = vector.load %arg10[%c0_32, %c0_33] : memref<1x5xf32, #tpu.memory_space<vmem>>, vector<1x5xf32>
    %54 = vector.broadcast %53 : vector<1x5xf32> to vector<2x5xf32>
    %55 = arith.addf %52, %54 : vector<2x5xf32>
    %cst_34 = arith.constant dense<0xFF800000> : vector<2xf32>
    %56 = vector.multi_reduction <maximumf>, %55, %cst_34 [1] : vector<2x5xf32> to vector<2xf32>
    %57 = vector.shape_cast %56 : vector<2xf32> to vector<2x1xf32>
    %58 = vector.broadcast %57 : vector<2x1xf32> to vector<2x5xf32>
    %59 = arith.subf %55, %58 : vector<2x5xf32>
    %60 = math.exp %59 : vector<2x5xf32>
    %cst_35 = arith.constant dense<0.000000e+00> : vector<2xf32>
    %61 = vector.multi_reduction <add>, %60, %cst_35 [1] : vector<2x5xf32> to vector<2xf32>
    %62 = vector.shape_cast %61 : vector<2xf32> to vector<2x1xf32>
    %63 = vector.broadcast %62 : vector<2x1xf32> to vector<2x5xf32>
    %64 = arith.divf %60, %63 : vector<2x5xf32>
    %65 = vector.extract_strided_slice %0 {offsets = [0, 0], sizes = [32, 32], strides = [1, 1]} : vector<41x32xf32> to vector<32x32xf32>
    %c0_36 = arith.constant 0 : index
    %c0_37 = arith.constant 0 : index
    %c0_38 = arith.constant 0 : index
    %66 = vector.load %arg11[%c0_36, %c0_37, %c0_38] : memref<10x32x1920xf32, #tpu.memory_space<vmem>>, vector<1x32x1920xf32>
    %67 = vector.shape_cast %66 : vector<1x32x1920xf32> to vector<32x1920xf32>
    %cst_39 = arith.constant dense<0.000000e+00> : vector<32x1920xf32>
    %68 = tpu.matmul %65, %67, %cst_39 {dimension_numbers = #tpu.dot_dimension_numbers<[1], [0], [0], [1], [0, 0, 1, 1], [], []>} : vector<32x32xf32>, vector<32x1920xf32>, vector<32x1920xf32> -> vector<32x1920xf32>
    %c0_40 = arith.constant 0 : index
    %c0_41 = arith.constant 0 : index
    %69 = vector.load %arg19[%c0_40, %c0_41] : memref<32x1920xf32, #tpu.memory_space<vmem>>, vector<32x1920xf32>
    tpu.vector_store %arg19[%c0_40, %c0_41], %68 {strides = array<i32>} : memref<32x1920xf32, #tpu.memory_space<vmem>>, vector<32x1920xf32>,
    %c0_42 = arith.constant 0 : index
    %c0_43 = arith.constant 0 : index
    %70 = vector.load %arg19[%c0_42, %c0_43] : memref<32x1920xf32, #tpu.memory_space<vmem>>, vector<32x1920xf32>
    %71 = vector.extract_strided_slice %0 {offsets = [1, 0], sizes = [32, 32], strides = [1, 1]} : vector<41x32xf32> to vector<32x32xf32>
    %c1 = arith.constant 1 : index
    %c0_44 = arith.constant 0 : index
    %c0_45 = arith.constant 0 : index
    %72 = vector.load %arg11[%c1, %c0_44, %c0_45] : memref<10x32x1920xf32, #tpu.memory_space<vmem>>, vector<1x32x1920xf32>
    %73 = vector.shape_cast %72 : vector<1x32x1920xf32> to vector<32x1920xf32>
    %cst_46 = arith.constant dense<0.000000e+00> : vector<32x1920xf32>
    %74 = tpu.matmul %71, %73, %cst_46 {dimension_numbers = #tpu.dot_dimension_numbers<[1], [0], [0], [1], [0, 0, 1, 1], [], []>} : vector<32x32xf32>, vector<32x1920xf32>, vector<32x1920xf32> -> vector<32x1920xf32>
    %75 = arith.addf %70, %74 : vector<32x1920xf32>
    %c0_47 = arith.constant 0 : index
    %c0_48 = arith.constant 0 : index
    %76 = vector.load %arg19[%c0_47, %c0_48] : memref<32x1920xf32, #tpu.memory_space<vmem>>, vector<32x1920xf32>
    tpu.vector_store %arg19[%c0_47, %c0_48], %75 {strides = array<i32>} : memref<32x1920xf32, #tpu.memory_space<vmem>>, vector<32x1920xf32>,
    %c0_49 = arith.constant 0 : index
    %c0_50 = arith.constant 0 : index
    %77 = vector.load %arg19[%c0_49, %c0_50] : memref<32x1920xf32, #tpu.memory_space<vmem>>, vector<32x1920xf32>
    %78 = vector.extract_strided_slice %0 {offsets = [2, 0], sizes = [32, 32], strides = [1, 1]} : vector<41x32xf32> to vector<32x32xf32>
    %c2 = arith.constant 2 : index
    %c0_51 = arith.constant 0 : index
    %c0_52 = arith.constant 0 : index
    %79 = vector.load %arg11[%c2, %c0_51, %c0_52] : memref<10x32x1920xf32, #tpu.memory_space<vmem>>, vector<1x32x1920xf32>
    %80 = vector.shape_cast %79 : vector<1x32x1920xf32> to vector<32x1920xf32>
    %cst_53 = arith.constant dense<0.000000e+00> : vector<32x1920xf32>
    %81 = tpu.matmul %78, %80, %cst_53 {dimension_numbers = #tpu.dot_dimension_numbers<[1], [0], [0], [1], [0, 0, 1, 1], [], []>} : vector<32x32xf32>, vector<32x1920xf32>, vector<32x1920xf32> -> vector<32x1920xf32>
    %82 = arith.addf %77, %81 : vector<32x1920xf32>
    %c0_54 = arith.constant 0 : index
    %c0_55 = arith.constant 0 : index
    %83 = vector.load %arg19[%c0_54, %c0_55] : memref<32x1920xf32, #tpu.memory_space<vmem>>, vector<32x1920xf32>
    tpu.vector_store %arg19[%c0_54, %c0_55], %82 {strides = array<i32>} : memref<32x1920xf32, #tpu.memory_space<vmem>>, vector<32x1920xf32>,
    %c0_56 = arith.constant 0 : index
    %c0_57 = arith.constant 0 : index
    %84 = vector.load %arg19[%c0_56, %c0_57] : memref<32x1920xf32, #tpu.memory_space<vmem>>, vector<32x1920xf32>
    %85 = vector.extract_strided_slice %0 {offsets = [3, 0], sizes = [32, 32], strides = [1, 1]} : vector<41x32xf32> to vector<32x32xf32>
    %c3 = arith.constant 3 : index
    %c0_58 = arith.constant 0 : index
    %c0_59 = arith.constant 0 : index
    %86 = vector.load %arg11[%c3, %c0_58, %c0_59] : memref<10x32x1920xf32, #tpu.memory_space<vmem>>, vector<1x32x1920xf32>
    %87 = vector.shape_cast %86 : vector<1x32x1920xf32> to vector<32x1920xf32>
    %cst_60 = arith.constant dense<0.000000e+00> : vector<32x1920xf32>
    %88 = tpu.matmul %85, %87, %cst_60 {dimension_numbers = #tpu.dot_dimension_numbers<[1], [0], [0], [1], [0, 0, 1, 1], [], []>} : vector<32x32xf32>, vector<32x1920xf32>, vector<32x1920xf32> -> vector<32x1920xf32>
    %89 = arith.addf %84, %88 : vector<32x1920xf32>
    %c0_61 = arith.constant 0 : index
    %c0_62 = arith.constant 0 : index
    %90 = vector.load %arg19[%c0_61, %c0_62] : memref<32x1920xf32, #tpu.memory_space<vmem>>, vector<32x1920xf32>
    tpu.vector_store %arg19[%c0_61, %c0_62], %89 {strides = array<i32>} : memref<32x1920xf32, #tpu.memory_space<vmem>>, vector<32x1920xf32>,
    %c0_63 = arith.constant 0 : index
    %c0_64 = arith.constant 0 : index
    %91 = vector.load %arg19[%c0_63, %c0_64] : memref<32x1920xf32, #tpu.memory_space<vmem>>, vector<32x1920xf32>
    %92 = vector.extract_strided_slice %0 {offsets = [4, 0], sizes = [32, 32], strides = [1, 1]} : vector<41x32xf32> to vector<32x32xf32>
    %c4 = arith.constant 4 : index
    %c0_65 = arith.constant 0 : index
    %c0_66 = arith.constant 0 : index
    %93 = vector.load %arg11[%c4, %c0_65, %c0_66] : memref<10x32x1920xf32, #tpu.memory_space<vmem>>, vector<1x32x1920xf32>
    %94 = vector.shape_cast %93 : vector<1x32x1920xf32> to vector<32x1920xf32>
    %cst_67 = arith.constant dense<0.000000e+00> : vector<32x1920xf32>
    %95 = tpu.matmul %92, %94, %cst_67 {dimension_numbers = #tpu.dot_dimension_numbers<[1], [0], [0], [1], [0, 0, 1, 1], [], []>} : vector<32x32xf32>, vector<32x1920xf32>, vector<32x1920xf32> -> vector<32x1920xf32>
    %96 = arith.addf %91, %95 : vector<32x1920xf32>
    %c0_68 = arith.constant 0 : index
    %c0_69 = arith.constant 0 : index
    %97 = vector.load %arg19[%c0_68, %c0_69] : memref<32x1920xf32, #tpu.memory_space<vmem>>, vector<32x1920xf32>
    tpu.vector_store %arg19[%c0_68, %c0_69], %96 {strides = array<i32>} : memref<32x1920xf32, #tpu.memory_space<vmem>>, vector<32x1920xf32>,
    %c0_70 = arith.constant 0 : index
    %c0_71 = arith.constant 0 : index
    %98 = vector.load %arg19[%c0_70, %c0_71] : memref<32x1920xf32, #tpu.memory_space<vmem>>, vector<32x1920xf32>
    %99 = vector.extract_strided_slice %0 {offsets = [5, 0], sizes = [32, 32], strides = [1, 1]} : vector<41x32xf32> to vector<32x32xf32>
    %c5 = arith.constant 5 : index
    %c0_72 = arith.constant 0 : index
    %c0_73 = arith.constant 0 : index
    %100 = vector.load %arg11[%c5, %c0_72, %c0_73] : memref<10x32x1920xf32, #tpu.memory_space<vmem>>, vector<1x32x1920xf32>
    %101 = vector.shape_cast %100 : vector<1x32x1920xf32> to vector<32x1920xf32>
    %cst_74 = arith.constant dense<0.000000e+00> : vector<32x1920xf32>
    %102 = tpu.matmul %99, %101, %cst_74 {dimension_numbers = #tpu.dot_dimension_numbers<[1], [0], [0], [1], [0, 0, 1, 1], [], []>} : vector<32x32xf32>, vector<32x1920xf32>, vector<32x1920xf32> -> vector<32x1920xf32>
    %103 = arith.addf %98, %102 : vector<32x1920xf32>
    %c0_75 = arith.constant 0 : index
    %c0_76 = arith.constant 0 : index
    %104 = vector.load %arg19[%c0_75, %c0_76] : memref<32x1920xf32, #tpu.memory_space<vmem>>, vector<32x1920xf32>
    tpu.vector_store %arg19[%c0_75, %c0_76], %103 {strides = array<i32>} : memref<32x1920xf32, #tpu.memory_space<vmem>>, vector<32x1920xf32>,
    %c0_77 = arith.constant 0 : index
    %c0_78 = arith.constant 0 : index
    %105 = vector.load %arg19[%c0_77, %c0_78] : memref<32x1920xf32, #tpu.memory_space<vmem>>, vector<32x1920xf32>
    %106 = vector.extract_strided_slice %0 {offsets = [6, 0], sizes = [32, 32], strides = [1, 1]} : vector<41x32xf32> to vector<32x32xf32>
    %c6 = arith.constant 6 : index
    %c0_79 = arith.constant 0 : index
    %c0_80 = arith.constant 0 : index
    %107 = vector.load %arg11[%c6, %c0_79, %c0_80] : memref<10x32x1920xf32, #tpu.memory_space<vmem>>, vector<1x32x1920xf32>
    %108 = vector.shape_cast %107 : vector<1x32x1920xf32> to vector<32x1920xf32>
    %cst_81 = arith.constant dense<0.000000e+00> : vector<32x1920xf32>
    %109 = tpu.matmul %106, %108, %cst_81 {dimension_numbers = #tpu.dot_dimension_numbers<[1], [0], [0], [1], [0, 0, 1, 1], [], []>} : vector<32x32xf32>, vector<32x1920xf32>, vector<32x1920xf32> -> vector<32x1920xf32>
    %110 = arith.addf %105, %109 : vector<32x1920xf32>
    %c0_82 = arith.constant 0 : index
    %c0_83 = arith.constant 0 : index
    %111 = vector.load %arg19[%c0_82, %c0_83] : memref<32x1920xf32, #tpu.memory_space<vmem>>, vector<32x1920xf32>
    tpu.vector_store %arg19[%c0_82, %c0_83], %110 {strides = array<i32>} : memref<32x1920xf32, #tpu.memory_space<vmem>>, vector<32x1920xf32>,
    %c0_84 = arith.constant 0 : index
    %c0_85 = arith.constant 0 : index
    %112 = vector.load %arg19[%c0_84, %c0_85] : memref<32x1920xf32, #tpu.memory_space<vmem>>, vector<32x1920xf32>
    %113 = vector.extract_strided_slice %0 {offsets = [7, 0], sizes = [32, 32], strides = [1, 1]} : vector<41x32xf32> to vector<32x32xf32>
    %c7 = arith.constant 7 : index
    %c0_86 = arith.constant 0 : index
    %c0_87 = arith.constant 0 : index
    %114 = vector.load %arg11[%c7, %c0_86, %c0_87] : memref<10x32x1920xf32, #tpu.memory_space<vmem>>, vector<1x32x1920xf32>
    %115 = vector.shape_cast %114 : vector<1x32x1920xf32> to vector<32x1920xf32>
    %cst_88 = arith.constant dense<0.000000e+00> : vector<32x1920xf32>
    %116 = tpu.matmul %113, %115, %cst_88 {dimension_numbers = #tpu.dot_dimension_numbers<[1], [0], [0], [1], [0, 0, 1, 1], [], []>} : vector<32x32xf32>, vector<32x1920xf32>, vector<32x1920xf32> -> vector<32x1920xf32>
    %117 = arith.addf %112, %116 : vector<32x1920xf32>
    %c0_89 = arith.constant 0 : index
    %c0_90 = arith.constant 0 : index
    %118 = vector.load %arg19[%c0_89, %c0_90] : memref<32x1920xf32, #tpu.memory_space<vmem>>, vector<32x1920xf32>
    tpu.vector_store %arg19[%c0_89, %c0_90], %117 {strides = array<i32>} : memref<32x1920xf32, #tpu.memory_space<vmem>>, vector<32x1920xf32>,
    %c0_91 = arith.constant 0 : index
    %c0_92 = arith.constant 0 : index
    %119 = vector.load %arg19[%c0_91, %c0_92] : memref<32x1920xf32, #tpu.memory_space<vmem>>, vector<32x1920xf32>
    %120 = vector.extract_strided_slice %0 {offsets = [8, 0], sizes = [32, 32], strides = [1, 1]} : vector<41x32xf32> to vector<32x32xf32>
    %c8 = arith.constant 8 : index
    %c0_93 = arith.constant 0 : index
    %c0_94 = arith.constant 0 : index
    %121 = vector.load %arg11[%c8, %c0_93, %c0_94] : memref<10x32x1920xf32, #tpu.memory_space<vmem>>, vector<1x32x1920xf32>
    %122 = vector.shape_cast %121 : vector<1x32x1920xf32> to vector<32x1920xf32>
    %cst_95 = arith.constant dense<0.000000e+00> : vector<32x1920xf32>
    %123 = tpu.matmul %120, %122, %cst_95 {dimension_numbers = #tpu.dot_dimension_numbers<[1], [0], [0], [1], [0, 0, 1, 1], [], []>} : vector<32x32xf32>, vector<32x1920xf32>, vector<32x1920xf32> -> vector<32x1920xf32>
    %124 = arith.addf %119, %123 : vector<32x1920xf32>
    %c0_96 = arith.constant 0 : index
    %c0_97 = arith.constant 0 : index
    %125 = vector.load %arg19[%c0_96, %c0_97] : memref<32x1920xf32, #tpu.memory_space<vmem>>, vector<32x1920xf32>
    tpu.vector_store %arg19[%c0_96, %c0_97], %124 {strides = array<i32>} : memref<32x1920xf32, #tpu.memory_space<vmem>>, vector<32x1920xf32>,
    %c0_98 = arith.constant 0 : index
    %c0_99 = arith.constant 0 : index
    %126 = vector.load %arg19[%c0_98, %c0_99] : memref<32x1920xf32, #tpu.memory_space<vmem>>, vector<32x1920xf32>
    %127 = vector.extract_strided_slice %0 {offsets = [9, 0], sizes = [32, 32], strides = [1, 1]} : vector<41x32xf32> to vector<32x32xf32>
    %c9 = arith.constant 9 : index
    %c0_100 = arith.constant 0 : index
    %c0_101 = arith.constant 0 : index
    %128 = vector.load %arg11[%c9, %c0_100, %c0_101] : memref<10x32x1920xf32, #tpu.memory_space<vmem>>, vector<1x32x1920xf32>
    %129 = vector.shape_cast %128 : vector<1x32x1920xf32> to vector<32x1920xf32>
    %cst_102 = arith.constant dense<0.000000e+00> : vector<32x1920xf32>
    %130 = tpu.matmul %127, %129, %cst_102 {dimension_numbers = #tpu.dot_dimension_numbers<[1], [0], [0], [1], [0, 0, 1, 1], [], []>} : vector<32x32xf32>, vector<32x1920xf32>, vector<32x1920xf32> -> vector<32x1920xf32>
    %131 = arith.addf %126, %130 : vector<32x1920xf32>
    %c0_103 = arith.constant 0 : index
    %c0_104 = arith.constant 0 : index
    %132 = vector.load %arg19[%c0_103, %c0_104] : memref<32x1920xf32, #tpu.memory_space<vmem>>, vector<32x1920xf32>
    tpu.vector_store %arg19[%c0_103, %c0_104], %131 {strides = array<i32>} : memref<32x1920xf32, #tpu.memory_space<vmem>>, vector<32x1920xf32>,
    %c0_105 = arith.constant 0 : index
    %c0_106 = arith.constant 0 : index
    %133 = vector.load %arg19[%c0_105, %c0_106] : memref<32x1920xf32, #tpu.memory_space<vmem>>, vector<32x1920xf32>
    %134 = vector.shape_cast %133 : vector<32x1920xf32> to vector<2x16x1920xf32>
    %135 = tpu.iota {dimensions = array<i32: 1>} : vector<2x16x1xi32>
    %c0_107 = arith.constant 0 : index
    %c0_108 = arith.constant 0 : index
    %c0_109 = arith.constant 0 : index
    %136 = vector.load %arg13[%c0_107, %c0_108, %c0_109] : memref<1x1x1920xi32, #tpu.memory_space<vmem>>, vector<1x1x1920xi32>
    %137 = vector.broadcast %135 : vector<2x16x1xi32> to vector<2x16x1920xi32>
    %138 = vector.broadcast %136 : vector<1x1x1920xi32> to vector<2x16x1920xi32>
    %139 = arith.cmpi slt, %137, %138 : vector<2x16x1920xi32>
    %c0_110 = arith.constant 0 : index
    %c0_111 = arith.constant 0 : index
    %c0_112 = arith.constant 0 : index
    %140 = vector.load %arg12[%c0_110, %c0_111, %c0_112] : memref<1x1x1920xf32, #tpu.memory_space<vmem>>, vector<1x1x1920xf32>
    %141 = vector.broadcast %140 : vector<1x1x1920xf32> to vector<2x16x1920xf32>
    %142 = arith.addf %134, %141 : vector<2x16x1920xf32>
    %cst_113 = arith.constant -1.000000e+30 : f32
    %143 = vector.broadcast %cst_113 : f32 to vector<2x16x1920xf32>
    %144 = arith.select %139, %142, %143 : vector<2x16x1920xi1>, vector<2x16x1920xf32>
    %cst_114 = arith.constant dense<0xFF800000> : vector<2x1920xf32>
    %145 = vector.multi_reduction <maximumf>, %144, %cst_114 [1] : vector<2x16x1920xf32> to vector<2x1920xf32>
    %146 = vector.extract_strided_slice %64 {offsets = [0, 0], sizes = [2, 1], strides = [1, 1]} : vector<2x5xf32> to vector<2x1xf32>
    %147 = vector.extract_strided_slice %145 {offsets = [0, 0], sizes = [2, 384], strides = [1, 1]} : vector<2x1920xf32> to vector<2x384xf32>
    %148 = vector.broadcast %146 : vector<2x1xf32> to vector<2x384xf32>
    %149 = arith.mulf %148, %147 : vector<2x384xf32>
    %150 = vector.extract_strided_slice %64 {offsets = [0, 1], sizes = [2, 1], strides = [1, 1]} : vector<2x5xf32> to vector<2x1xf32>
    %151 = vector.extract_strided_slice %145 {offsets = [0, 384], sizes = [2, 384], strides = [1, 1]} : vector<2x1920xf32> to vector<2x384xf32>
    %152 = vector.broadcast %150 : vector<2x1xf32> to vector<2x384xf32>
    %153 = arith.mulf %152, %151 : vector<2x384xf32>
    %154 = arith.addf %149, %153 : vector<2x384xf32>
    %155 = vector.extract_strided_slice %64 {offsets = [0, 2], sizes = [2, 1], strides = [1, 1]} : vector<2x5xf32> to vector<2x1xf32>
    %156 = vector.extract_strided_slice %145 {offsets = [0, 768], sizes = [2, 384], strides = [1, 1]} : vector<2x1920xf32> to vector<2x384xf32>
    %157 = vector.broadcast %155 : vector<2x1xf32> to vector<2x384xf32>
    %158 = arith.mulf %157, %156 : vector<2x384xf32>
    %159 = arith.addf %154, %158 : vector<2x384xf32>
    %160 = vector.extract_strided_slice %64 {offsets = [0, 3], sizes = [2, 1], strides = [1, 1]} : vector<2x5xf32> to vector<2x1xf32>
    %161 = vector.extract_strided_slice %145 {offsets = [0, 1152], sizes = [2, 384], strides = [1, 1]} : vector<2x1920xf32> to vector<2x384xf32>
    %162 = vector.broadcast %160 : vector<2x1xf32> to vector<2x384xf32>
    %163 = arith.mulf %162, %161 : vector<2x384xf32>
    %164 = arith.addf %159, %163 : vector<2x384xf32>
    %165 = vector.extract_strided_slice %64 {offsets = [0, 4], sizes = [2, 1], strides = [1, 1]} : vector<2x5xf32> to vector<2x1xf32>
    %166 = vector.extract_strided_slice %145 {offsets = [0, 1536], sizes = [2, 384], strides = [1, 1]} : vector<2x1920xf32> to vector<2x384xf32>
    %167 = vector.broadcast %165 : vector<2x1xf32> to vector<2x384xf32>
    %168 = arith.mulf %167, %166 : vector<2x384xf32>
    %169 = arith.addf %164, %168 : vector<2x384xf32>
    %c0_115 = arith.constant 0 : index
    %c0_116 = arith.constant 0 : index
    %170 = vector.load %arg14[%c0_115, %c0_116] : memref<384x64xf32, #tpu.memory_space<vmem>>, vector<384x64xf32>
    %cst_117 = arith.constant dense<0.000000e+00> : vector<2x64xf32>
    %171 = tpu.matmul %169, %170, %cst_117 {dimension_numbers = #tpu.dot_dimension_numbers<[1], [0], [0], [1], [0, 0, 1, 1], [], []>} : vector<2x384xf32>, vector<384x64xf32>, vector<2x64xf32> -> vector<2x64xf32>
    %c0_118 = arith.constant 0 : index
    %c0_119 = arith.constant 0 : index
    %172 = vector.load %arg15[%c0_118, %c0_119] : memref<1x64xf32, #tpu.memory_space<vmem>>, vector<1x64xf32>
    %173 = vector.broadcast %172 : vector<1x64xf32> to vector<2x64xf32>
    %174 = arith.addf %171, %173 : vector<2x64xf32>
    %cst_120 = arith.constant 0.000000e+00 : f32
    %175 = vector.broadcast %cst_120 : f32 to vector<2x64xf32>
    %176 = arith.maximumf %174, %175 : vector<2x64xf32>
    %c0_121 = arith.constant 0 : index
    %c0_122 = arith.constant 0 : index
    %177 = vector.load %arg16[%c0_121, %c0_122] : memref<64x128xf32, #tpu.memory_space<vmem>>, vector<64x128xf32>
    %cst_123 = arith.constant dense<0.000000e+00> : vector<2x128xf32>
    %178 = tpu.matmul %176, %177, %cst_123 {dimension_numbers = #tpu.dot_dimension_numbers<[1], [0], [0], [1], [0, 0, 1, 1], [], []>} : vector<2x64xf32>, vector<64x128xf32>, vector<2x128xf32> -> vector<2x128xf32>
    %c0_124 = arith.constant 0 : index
    %c0_125 = arith.constant 0 : index
    %179 = vector.load %arg17[%c0_124, %c0_125] : memref<1x128xf32, #tpu.memory_space<vmem>>, vector<1x128xf32>
    %180 = vector.broadcast %179 : vector<1x128xf32> to vector<2x128xf32>
    %181 = arith.addf %178, %180 : vector<2x128xf32>
    %182 = arith.negf %181 : vector<2x128xf32>
    %183 = math.exp %182 : vector<2x128xf32>
    %cst_126 = arith.constant 1.000000e+00 : f32
    %184 = vector.broadcast %cst_126 : f32 to vector<2x128xf32>
    %185 = arith.addf %184, %183 : vector<2x128xf32>
    %186 = arith.divf %184, %185 : vector<2x128xf32>
    %c0_127 = arith.constant 0 : index
    %c0_128 = arith.constant 0 : index
    %187 = vector.load %arg18[%c0_127, %c0_128] : memref<2x128xf32, #tpu.memory_space<vmem>>, vector<2x128xf32>
    tpu.vector_store %arg18[%c0_127, %c0_128], %186 {strides = array<i32>} : memref<2x128xf32, #tpu.memory_space<vmem>>, vector<2x128xf32>,
    return
  }
  func.func @transform_0(%arg0: i32) -> (i32, i32) {
    %c0_i32 = arith.constant 0 : i32
    %c0_i32_0 = arith.constant 0 : i32
    %c0_i32_1 = arith.constant 0 : i32
    return %c0_i32, %c0_i32_0 : i32, i32
  }
  func.func @transform_1(%arg0: i32) -> (i32, i32, i32) {
    %c0_i32 = arith.constant 0 : i32
    %c0_i32_0 = arith.constant 0 : i32
    %c0_i32_1 = arith.constant 0 : i32
    %c0_i32_2 = arith.constant 0 : i32
    return %c0_i32, %c0_i32_0, %c0_i32_1 : i32, i32, i32
  }
  func.func @transform_2(%arg0: i32) -> (i32, i32) {
    %c0_i32 = arith.constant 0 : i32
    %c0_i32_0 = arith.constant 0 : i32
    %c0_i32_1 = arith.constant 0 : i32
    return %c0_i32, %c0_i32_0 : i32, i32
  }
  func.func @transform_3(%arg0: i32) -> (i32, i32, i32) {
    %c0_i32 = arith.constant 0 : i32
    %c0_i32_0 = arith.constant 0 : i32
    %c0_i32_1 = arith.constant 0 : i32
    %c0_i32_2 = arith.constant 0 : i32
    return %c0_i32, %c0_i32_0, %c0_i32_1 : i32, i32, i32
  }
  func.func @transform_4(%arg0: i32) -> (i32, i32, i32) {
    %c0_i32 = arith.constant 0 : i32
    %c0_i32_0 = arith.constant 0 : i32
    %c0_i32_1 = arith.constant 0 : i32
    %c0_i32_2 = arith.constant 0 : i32
    return %c0_i32, %c0_i32_0, %c0_i32_1 : i32, i32, i32
  }
  func.func @transform_5(%arg0: i32) -> (i32, i32) {
    %c0_i32 = arith.constant 0 : i32
    %c0_i32_0 = arith.constant 0 : i32
    %c0_i32_1 = arith.constant 0 : i32
    return %c0_i32, %c0_i32_0 : i32, i32
  }
  func.func @transform_6(%arg0: i32) -> (i32, i32) {
    %c0_i32 = arith.constant 0 : i32
    %c0_i32_0 = arith.constant 0 : i32
    %c0_i32_1 = arith.constant 0 : i32
    return %c0_i32, %c0_i32_0 : i32, i32
  }
  func.func @transform_7(%arg0: i32) -> (i32, i32) {
    %c0_i32 = arith.constant 0 : i32
    %c0_i32_0 = arith.constant 0 : i32
    %c0_i32_1 = arith.constant 0 : i32
    return %c0_i32, %c0_i32_0 : i32, i32
  }
  func.func @transform_8(%arg0: i32) -> (i32, i32) {
    %c0_i32 = arith.constant 0 : i32
    %c0_i32_0 = arith.constant 0 : i32
    %c0_i32_1 = arith.constant 0 : i32
    return %c0_i32, %c0_i32_0 : i32, i32
  }
  func.func @transform_9(%arg0: i32) -> (i32, i32) {
    %c0_i32 = arith.constant 0 : i32
    %c0_i32_0 = arith.constant 0 : i32
    %c0_i32_1 = arith.constant 0 : i32
    return %c0_i32, %c0_i32_0 : i32, i32
  }
  func.func @transform_10(%arg0: i32) -> (i32, i32, i32) {
    %c0_i32 = arith.constant 0 : i32
    %c0_i32_0 = arith.constant 0 : i32
    %c0_i32_1 = arith.constant 0 : i32
    %c0_i32_2 = arith.constant 0 : i32
    return %c0_i32, %c0_i32_0, %c0_i32_1 : i32, i32, i32
  }
  func.func @transform_11(%arg0: i32) -> (i32, i32, i32) {
    %c0_i32 = arith.constant 0 : i32
    %c0_i32_0 = arith.constant 0 : i32
    %c0_i32_1 = arith.constant 0 : i32
    %c0_i32_2 = arith.constant 0 : i32
    return %c0_i32, %c0_i32_0, %c0_i32_1 : i32, i32, i32
  }
  func.func @transform_12(%arg0: i32) -> (i32, i32, i32) {
    %c0_i32 = arith.constant 0 : i32
    %c0_i32_0 = arith.constant 0 : i32
    %c0_i32_1 = arith.constant 0 : i32
    %c0_i32_2 = arith.constant 0 : i32
    return %c0_i32, %c0_i32_0, %c0_i32_1 : i32, i32, i32
  }
  func.func @transform_13(%arg0: i32) -> (i32, i32) {
    %c0_i32 = arith.constant 0 : i32
    %c0_i32_0 = arith.constant 0 : i32
    %c0_i32_1 = arith.constant 0 : i32
    return %c0_i32, %c0_i32_0 : i32, i32
  }
  func.func @transform_14(%arg0: i32) -> (i32, i32) {
    %c0_i32 = arith.constant 0 : i32
    %c0_i32_0 = arith.constant 0 : i32
    %c0_i32_1 = arith.constant 0 : i32
    return %c0_i32, %c0_i32_0 : i32, i32
  }
  func.func @transform_15(%arg0: i32) -> (i32, i32) {
    %c0_i32 = arith.constant 0 : i32
    %c0_i32_0 = arith.constant 0 : i32
    %c0_i32_1 = arith.constant 0 : i32
    return %c0_i32, %c0_i32_0 : i32, i32
  }
  func.func @transform_16(%arg0: i32) -> (i32, i32) {
    %c0_i32 = arith.constant 0 : i32
    %c0_i32_0 = arith.constant 0 : i32
    %c0_i32_1 = arith.constant 0 : i32
    return %c0_i32, %c0_i32_0 : i32, i32
  }
  func.func @transform_17(%arg0: i32) -> (i32, i32) {
    %c0_i32 = arith.constant 0 : i32
    %c0_i32_0 = arith.constant 0 : i32
    %c0_i32_1 = arith.constant 0 : i32
    return %c0_i32, %c0_i32_0 : i32, i32
  }
}

</mosaic_0001>

<bundles_post_ra>
// kernel: tpu_custom_call.1
= control target key start
LH: loop header
LB: loop body
LE: loop exit
PB: predicated region body
PF: predicated region fallthrough
CT: control target
= control target key end

     0   :  { %s16195_s0 = inlined_call_operand.vmem [shape: f32[41,32], index: 0, kind: input, shape index: {}]   ;;  %s16196_s1 = inlined_call_operand.vmem [shape: f32[2,16,1], index: 1, kind: input, shape index: {}]   ;;  %s16197_s2 = inlined_call_operand.vmem [shape: s32[2,1], index: 2, kind: input, shape index: {}]   ;;  %s16198_s3 = inlined_call_operand.hbm [shape: f32[1,1,32], index: 3, kind: input, shape index: {}]   ;;  %s16199_s4 = inlined_call_operand.<no memory space> [shape: f32[1,1,1], index: 4, kind: input, shape index: {}]   ;;  %s16200_s5 = inlined_call_operand.hbm [shape: f32[9,32], index: 5, kind: input, shape index: {}]   ;;  %s16201_s6 = inlined_call_operand.hbm [shape: f32[64,64], index: 6, kind: input, shape index: {}]   ;;  %s16202_s7 = inlined_call_operand.hbm [shape: f32[1,64], index: 7, kind: input, shape index: {}]   ;;  %s16203_s8 = inlined_call_operand.vmem [shape: f32[64,5], index: 8, kind: input, shape index: {}]   ;;  %s16204_s9 = inlined_call_operand.hbm [shape: f32[1,5], index: 9, kind: input, shape index: {}]   ;;  %s16205_s10 = inlined_call_operand.hbm [shape: f32[10,32,1920], index: 10, kind: input, shape index: {}]   ;;  %s16206_s11 = inlined_call_operand.hbm [shape: f32[1,1,1920], index: 11, kind: input, shape index: {}]   ;;  %s16207_s12 = inlined_call_operand.hbm [shape: s32[1,1,1920], index: 12, kind: input, shape index: {}]   ;;  %s16208_s13 = inlined_call_operand.vmem [shape: f32[384,64], index: 13, kind: input, shape index: {}]   ;;  %s16209_s14 = inlined_call_operand.hbm [shape: f32[1,64], index: 14, kind: input, shape index: {}]   ;;  %s16210_s15 = inlined_call_operand.hbm [shape: f32[64,128], index: 15, kind: input, shape index: {}]   ;;  %s16211_s16 = inlined_call_operand.hbm [shape: f32[1,128], index: 16, kind: input, shape index: {}]   ;;  %s16212_s17 = inlined_call_operand.hbm [shape: f32[2,128], index: 17, kind: output, shape index: {}]  }
   0x1   :  { %16250 = sst [smem:[#allocation175_spill]] %s16195_s0  ;;  %v22_v0 = vstv %s16199_s4 }
   0x2   :  { %16251 = sst [smem:[#allocation176_spill]] %s16196_s1  ;;  %23 = vst [vmem:[#allocation3] sm:$0x1] %v22_v0 }
   0x3   :  { %24 = vsyncpa [#allocation5], 0 }
   0x4   :  { %25 = vsyncpa [#allocation8], 0 }
   0x5   :  { %26 = vsyncpa [#allocation11], 0 }
   0x6   :  { %27 = vsyncpa [#allocation14], 0 }
   0x7   :  { %28 = vsyncpa [#allocation17], 0 }
   0x8   :  { %29 = vsyncpa [#allocation20], 0 }
   0x9   :  { %30 = vsyncpa [#allocation6], 0  ;;  %s12268_s26 = smov [#allocation7]  }
   0xa   :  { %s54_s27 = sshll.u32 %s12268_s26, 4  ;;  %s55_s27 = int_to_ptr.vmem [resolvable:$true] %s54_s27 }
   0xb   :  { %s12022_s28 = scalar_lea.vmem %s55_s27, 256  ;;  %p12027_p1 = scmp.lt.s32.totalorder %s55_s27, %s55_s27 }
   0xc   :  { %p12023_p0 = scmp.ne.s32.totalorder %s55_s27, %s12022_s28  ;;  %p12028_p2 = scmp.lt.s32.totalorder %s12022_s28, %s12022_s28 }
   0xe   :  { %p12029_p3 = por %p12028_p2, %p12027_p1 }
  0x10   :  { %p12030_p4 = pnand %p12029_p3, %p12023_p0 }
  0x12   :  { %12033 = shalt.err (!%p12030_p4)
}
  0x13   :  { %s12269_s29 = smov 128   ;;  %s12270_s4 = smov 8  }
  0x14   :  { %60 = dma.hbm_to_vmem [thread:$0]  %s16200_s5, 256, %s55_s27, [#allocation8], %s12269_s29, %s12269_s29, %s12270_s4  }
  0x15   :  { %s12271_s18 = smov [#allocation10]   ;;  %s12272_s1 = smov [#allocation13]  }
  0x16   :  { %s79_s19 = sshll.u32 %s12271_s18, 4  ;;  %s100_s20 = sshll.u32 %s12272_s1, 4  ;;  %s80_s19 = int_to_ptr.vmem [resolvable:$true] %s79_s19  ;;  %s101_s20 = int_to_ptr.vmem [resolvable:$true] %s100_s20 }
  0x17   :  { %s12042_s21 = scalar_lea.vmem %s80_s19, 16  ;;  %s12046_s22 = scalar_lea.vmem %s80_s19, 32 }
  0x18   :  { %p12043_p5 = scmp.ne.s32.totalorder %s80_s19, %s12042_s21  ;;  %p12047_p6 = scmp.lt.s32.totalorder %s80_s19, %s80_s19 }
  0x19   :  { %p12048_p7 = scmp.lt.s32.totalorder %s12046_s22, %s12042_s21 }
  0x1b   :  { %p12049_p8 = por %p12048_p7, %p12047_p6 }
  0x1d   :  { %p12050_p9 = pnand %p12049_p8, %p12043_p5 }
  0x1f   :  { %12053 = shalt.err (!%p12050_p9)
}
  0x20   :  { %82 = dma.hbm_to_vmem [thread:$0]  %s16202_s7, 16, %s80_s19, [#allocation11]  }
  0x21   :  { %s12062_s25 = scalar_lea.vmem %s101_s20, 76800  ;;  %p12067_p11 = scmp.lt.s32.totalorder %s101_s20, %s101_s20 }
  0x22   :  { %p12063_p10 = scmp.ne.s32.totalorder %s101_s20, %s12062_s25  ;;  %p12068_p12 = scmp.lt.s32.totalorder %s12062_s25, %s12062_s25 }
  0x24   :  { %p12069_p13 = por %p12068_p12, %p12067_p11 }
  0x26   :  { %p12070_p0 = pnand %p12069_p13, %p12063_p10 }
  0x28   :  { %12073 = shalt.err (!%p12070_p0)
}
  0x29   :  { %s12273_s5 = smov 1920   ;;  %s12274_s26 = smov 120  }
  0x2a   :  { %106 = dma.hbm_to_vmem [thread:$0]  %s16205_s10, 76800, %s101_s20, [#allocation14], %s12273_s5, %s12273_s5, %s12274_s26  }
  0x2b   :  { %s12275_s0 = smov [#allocation16]   ;;  %s12276_s18 = smov [#allocation19]  }
  0x2c   :  { %s123_s30 = sshll.u32 %s12275_s0, 4  ;;  %s144_s1 = sshll.u32 %s12276_s18, 4  ;;  %s124_s30 = int_to_ptr.vmem [resolvable:$true] %s123_s30  ;;  %s145_s1 = int_to_ptr.vmem [resolvable:$true] %s144_s1 }
  0x2d   :  { %s12082_s7 = scalar_lea.vmem %s124_s30, 240  ;;  %s12086_s19 = scalar_lea.vmem %s124_s30, 256 }
  0x2e   :  { %p12083_p1 = scmp.ne.s32.totalorder %s124_s30, %s12082_s7  ;;  %p12087_p2 = scmp.lt.s32.totalorder %s124_s30, %s124_s30 }
  0x2f   :  { %p12088_p3 = scmp.lt.s32.totalorder %s12086_s19, %s12082_s7 }
  0x31   :  { %p12089_p4 = por %p12088_p3, %p12087_p2 }
  0x33   :  { %p12090_p5 = pnand %p12089_p4, %p12083_p1 }
  0x35   :  { %12093 = shalt.err (!%p12090_p5)
}
  0x36   :  { %126 = dma.hbm_to_vmem [thread:$0]  %s16207_s12, 240, %s124_s30, [#allocation17]  }
  0x37   :  { %s12102_s23 = scalar_lea.vmem %s145_s1, 1024  ;;  %p12107_p7 = scmp.lt.s32.totalorder %s145_s1, %s145_s1 }
  0x38   :  { %p12103_p6 = scmp.ne.s32.totalorder %s145_s1, %s12102_s23  ;;  %p12108_p8 = scmp.lt.s32.totalorder %s12102_s23, %s12102_s23 }
  0x3a   :  { %p12109_p9 = por %p12108_p8, %p12107_p7 }
  0x3c   :  { %p12110_p10 = pnand %p12109_p9, %p12103_p6 }
  0x3e   :  { %12113 = shalt.err (!%p12110_p10)
}
  0x3f   :  { %150 = dma.hbm_to_vmem [thread:$0]  %s16210_s15, 1024, %s145_s1, [#allocation20], %s12269_s29, %s12269_s29, %s12270_s4  }
  0x40   :  { %s12277_s24 = smov [#allocation4]   ;;  %s12278_s5 = smov [#allocation9]  }
  0x41   :  { %s43_s25 = sshll.u32 %s12277_s24, 4  ;;  %s66_s12 = sshll.u32 %s12278_s5, 4  ;;  %s44_s25 = int_to_ptr.vmem [resolvable:$true] %s43_s25  ;;  %s67_s12 = int_to_ptr.vmem [resolvable:$true] %s66_s12 }
  0x42   :  { %s12122_s26 = scalar_lea.vmem %s44_s25, 16  ;;  %s12126_s27 = scalar_lea.vmem %s44_s25, 32 }
  0x43   :  { %p12123_p11 = scmp.ne.s32.totalorder %s44_s25, %s12122_s26  ;;  %p12127_p12 = scmp.lt.s32.totalorder %s44_s25, %s44_s25 }
  0x44   :  { %p12128_p13 = scmp.lt.s32.totalorder %s12126_s27, %s12122_s26 }
  0x46   :  { %p12129_p0 = por %p12128_p13, %p12127_p12 }
  0x48   :  { %p12130_p1 = pnand %p12129_p0, %p12123_p11 }
  0x4a   :  { %12133 = shalt.err (!%p12130_p1)
}
  0x4b   :  { %46 = dma.hbm_to_vmem [thread:$0]  %s16198_s3, 16, %s44_s25, [#allocation5]  }
  0x4c   :  { %s12142_s30 = scalar_lea.vmem %s67_s12, 1024  ;;  %p12147_p3 = scmp.lt.s32.totalorder %s67_s12, %s67_s12 }
  0x4d   :  { %p12143_p2 = scmp.ne.s32.totalorder %s67_s12, %s12142_s30  ;;  %p12148_p4 = scmp.lt.s32.totalorder %s12142_s30, %s12142_s30 }
  0x4f   :  { %p12149_p5 = por %p12148_p4, %p12147_p3 }
  0x51   :  { %p12150_p6 = pnand %p12149_p5, %p12143_p2 }
  0x53   :  { %12153 = shalt.err (!%p12150_p6)
}
  0x54   :  { %72 = dma.hbm_to_vmem [thread:$0]  %s16201_s6, 1024, %s67_s12, [#allocation8], %s12269_s29, %s12269_s29, %s12270_s4  }
  0x55   :  { %s12279_s1 = smov [#allocation12]   ;;  %s12280_s19 = smov [#allocation15]  }
  0x56   :  { %s91_s7 = sshll.u32 %s12279_s1, 4  ;;  %s113_s3 = sshll.u32 %s12280_s19, 4  ;;  %s92_s7 = int_to_ptr.vmem [resolvable:$true] %s91_s7  ;;  %s114_s3 = int_to_ptr.vmem [resolvable:$true] %s113_s3 }
  0x57   :  { %s12162_s21 = scalar_lea.vmem %s92_s7, 16  ;;  %s12166_s22 = scalar_lea.vmem %s92_s7, 32 }
  0x58   :  { %p12163_p7 = scmp.ne.s32.totalorder %s92_s7, %s12162_s21  ;;  %p12167_p8 = scmp.lt.s32.totalorder %s92_s7, %s92_s7 }
  0x59   :  { %p12168_p9 = scmp.lt.s32.totalorder %s12166_s22, %s12162_s21 }
  0x5b   :  { %p12169_p10 = por %p12168_p9, %p12167_p8 }
  0x5d   :  { %p12170_p11 = pnand %p12169_p10, %p12163_p7 }
  0x5f   :  { %12173 = shalt.err (!%p12170_p11)
}
  0x60   :  { %94 = dma.hbm_to_vmem [thread:$0]  %s16204_s9, 16, %s92_s7, [#allocation11]  }
  0x61   :  { %s12182_s20 = scalar_lea.vmem %s114_s3, 240  ;;  %s12186_s6 = scalar_lea.vmem %s114_s3, 256 }
  0x62   :  { %p12183_p12 = scmp.ne.s32.totalorder %s114_s3, %s12182_s20  ;;  %p12187_p13 = scmp.lt.s32.totalorder %s114_s3, %s114_s3 }
  0x63   :  { %p12188_p0 = scmp.lt.s32.totalorder %s12186_s6, %s12182_s20 }
  0x65   :  { %p12189_p1 = por %p12188_p0, %p12187_p13 }
  0x67   :  { %p12190_p2 = pnand %p12189_p1, %p12183_p12 }
  0x69   :  { %12193 = shalt.err (!%p12190_p2)
}
  0x6a   :  { %116 = dma.hbm_to_vmem [thread:$0]  %s16206_s11, 240, %s114_s3, [#allocation14]  }
  0x6b   :  { %s12281_s24 = smov [#allocation18]   ;;  %s12282_s5 = smov [#allocation21]  }
  0x6c   :  { %s135_s25 = sshll.u32 %s12281_s24, 4  ;;  %s157_s12 = sshll.u32 %s12282_s5, 4  ;;  %s136_s25 = int_to_ptr.vmem [resolvable:$true] %s135_s25  ;;  %s158_s12 = int_to_ptr.vmem [resolvable:$true] %s157_s12 }
  0x6d   :  { %s12202_s26 = scalar_lea.vmem %s136_s25, 16  ;;  %s12206_s9 = scalar_lea.vmem %s136_s25, 32 }
  0x6e   :  { %p12203_p3 = scmp.ne.s32.totalorder %s136_s25, %s12202_s26  ;;  %p12207_p4 = scmp.lt.s32.totalorder %s136_s25, %s136_s25 }
  0x6f   :  { %p12208_p5 = scmp.lt.s32.totalorder %s12206_s9, %s12202_s26 }
  0x71   :  { %p12209_p6 = por %p12208_p5, %p12207_p4 }
  0x73   :  { %p12210_p7 = pnand %p12209_p6, %p12203_p3 }
  0x75   :  { %12213 = shalt.err (!%p12210_p7)
}
  0x76   :  { %138 = dma.hbm_to_vmem [thread:$0]  %s16209_s14, 16, %s136_s25, [#allocation17]  }
  0x77   :  { %s12222_s0 = scalar_lea.vmem %s158_s12, 16  ;;  %s12226_s11 = scalar_lea.vmem %s158_s12, 32 }
  0x78   :  { %p12223_p8 = scmp.ne.s32.totalorder %s158_s12, %s12222_s0  ;;  %p12227_p9 = scmp.lt.s32.totalorder %s158_s12, %s158_s12 }
  0x79   :  { %p12228_p10 = scmp.lt.s32.totalorder %s12226_s11, %s12222_s0 }
  0x7b   :  { %p12229_p11 = por %p12228_p10, %p12227_p9 }
  0x7d   :  { %p12230_p12 = pnand %p12229_p11, %p12223_p8 }
  0x7f   :  { %12233 = shalt.err (!%p12230_p12)
}
  0x80   :  { %160 = dma.hbm_to_vmem [thread:$0]  %s16211_s16, 16, %s158_s12, [#allocation20]  }
  0x81   :  { %12254 = dma.done.wait [#allocation5], 16  }
  0x82   :  { %12255 = vsyncadd [#allocation5], 4294967280 }
  0x83   :  { %12256 = dma.done.wait [#allocation8], 1280  }
  0x84   :  { %12257 = vsyncadd [#allocation8], 4294966016 }
  0x85   :  { %12258 = dma.done.wait [#allocation11], 32  }
  0x86   :  { %12259 = vsyncadd [#allocation11], 4294967264 }
  0x87   :  { %12260 = dma.done.wait [#allocation14], 77040  }
  0x88   :  { %12261 = vsyncadd [#allocation14], 4294890256 }
  0x89   :  { %12262 = dma.done.wait [#allocation17], 256  }
  0x8a   :  { %12263 = vsyncadd [#allocation17], 4294967040 }
  0x8b   :  { %12264 = dma.done.wait [#allocation20], 1040  }
  0x8c   :  { %12265 = vsyncadd [#allocation20], 4294966256  ;;  %v12283_v1 = vmov 0   ;;  %v16217_v2 = vmov 0.0   ;;  %vm12285_vm0 = vmmov 0   ;;  %vm211_vm1 = vcmask 261120  }
  0x8d   :  { %11965 = vset.pattern.permute.xlu0 %v12283_v1  ;;  %11700 = vmatprep.subr.mxu1 %v16217_v2  ;;  %v352_v3 = vld [vmem:[%s16197_s2] sm:$0x3]  ;;  %s16252_s7 = sld [smem:[#allocation175_spill]]  ;;  %vm365_vm2 = vcmask 1040384   ;;  %v360_v10 = vld [vmem:[#allocation7 + $0x8] sm:$0x1]  ;;  %v16215_v19 = vlaneseq }
  0x8e   :  { %11966 = vset.pattern.permute.xlu1 %v12283_v1  ;;  %11718 = vmatprep.subr.mxu0 %v16217_v2  ;;  %v11203_v5 = vld [vmem:[#allocation4] ss:$0 sm:$0xff]  ;;  %v359_v11 = vld [vmem:[#allocation7] sm:$0xff]  ;;  %v442_v21 = vld [vmem:[#allocation9 + $0x18] sm:$0xff]  ;;  %vm361_vm3 = vcmask 72704   ;;  %s16253_s6 = sld [smem:[#allocation176_spill]] }
  0x8f   :  { %11704 = vmatprep.mubr.msk.f32.mxu1 %vm12285_vm0, %v16217_v2  ;;  %11726 = vmatprep.mubr.msk.f32.mxu0 %vm12285_vm0, %v16217_v2  ;;  %v351_v20 = vand.u32 127, %v16215_v19  ;;  %v441_v22 = vld [vmem:[#allocation9 + $0x10] sm:$0xff]  ;;  %v440_v23 = vld [vmem:[#allocation9 + $0x8] sm:$0xff]  ;;  %vm247_vm6 = vcmask 7168   ;;  %vm449_vm10 = vcmask 1041409   ;;  %vm1668_vm11 = vcmask 1046528  }
  0x90   :  { %354 = vperm.xlu0 %11965, %v352_v3   ;;  %11701 = vmatpush3.msk.msra.mxu1 %vm365_vm2, %v360_v10  ;;  %v11204_v28 = vld [vmem:[#allocation3] ss:$0 sm:$0xff]  ;;  %vm2635_vm12 = vcmask 1045504   ;;  %vm3602_vm13 = vcmask 1044480   ;;  %vm620_vm14 = vcmask 523264   ;;  %vm4569_vm15 = vcmask 1043456  }
  0x91   :  { %11702 = vmatprep.subr.mxu1 %v16217_v2  ;;  %11719 = vmatpush3.msra.mxu0 %v442_v21  ;;  %v1644_v19 = vld [vmem:[#allocation13 + $0x308] sm:$0xff] }
  0x92   :  { %11703 = vmatpush3.msra.mxu1 %v359_v11  ;;  %11720 = vmatprep.subr.mxu0 %v16217_v2 }
  0x93   :  { %v12438_v4 = vld [vmem:[%s16252_s7 + $0x8] sm:$0xff]  ;;  %v12444_v7 = vld [vmem:[%s16252_s7 + $0x10] sm:$0xff]  ;;  %v12450_v9 = vld [vmem:[%s16252_s7 + $0x18] sm:$0xff]  ;;  %11707 = vmatprep.subr.mxu1 %v16217_v2  ;;  %11721 = vmatpush3.msra.mxu0 %v441_v22 }
  0x94   :  { %v208_v6 = vmul.f32 %v11203_v5, %v12438_v4  ;;  %v209_v8 = vmul.f32 %v11203_v5, %v12444_v7  ;;  %v210_v14 = vmul.f32 %v11203_v5, %v12450_v9  ;;  %v12462_v16 = vld [vmem:[%s16252_s7] sm:$0xff]  ;;  %11722 = vmatprep.subr.mxu0 %v16217_v2  ;;  %v237_v27 = vld [vmem:[%s16253_s6 + $0x10] sm:$0xff]  ;;  %v238_v31 = vld [vmem:[%s16253_s6 + $0x18] sm:$0xff] }
  0x95   :  { %v207_v17 = vmul.f32 %v11203_v5, %v12462_v16  ;;  %11723 = vmatpush3.msra.mxu0 %v440_v23  ;;  %vm241_vm5 = vcmp.gt.f32.partialorder %v237_v27, 0.5  ;;  %vm242_vm7 = vcmp.gt.f32.partialorder %v238_v31, 0.5  ;;  %v236_v42 = vld [vmem:[%s16253_s6 + $0x8] sm:$0xff]  ;;  %v235_v47 = vld [vmem:[%s16253_s6] sm:$0xff] }
  0x96   :  { %v215_v12 = vsel %vm211_vm1, %v208_v6, 0.0  ;;  %v218_v13 = vsel %vm211_vm1, %v209_v8, 0.0  ;;  %v221_v15 = vsel %vm211_vm1, %v210_v14, 0.0  ;;  %11724 = vmatprep.subr.mxu0 %v16217_v2  ;;  %vm240_vm8 = vcmp.gt.f32.partialorder %v236_v42, 0.5 }
  0x97   :  { %216 = vadd.xlane.f32.xlu1 %v215_v12  ;;  %v212_v18 = vsel %vm211_vm1, %v207_v17, 0.0  ;;  %vm239_vm9 = vcmp.gt.f32.partialorder %v235_v47, 0.5  ;;  %v445_v47 = vld [vmem:[#allocation9 + $0x30] sm:$0xff] }
  0x9b   :  { %219 = vadd.xlane.f32.xlu1 %v218_v13 }
  0x9f   :  { %222 = vadd.xlane.f32.xlu1 %v221_v15 }
  0xaf   :  { %213 = vadd.xlane.f32.xlu0 %v212_v18  ;;  %v439_v18 = vld [vmem:[#allocation9] sm:$0xff] }
  0xb0   :  { %11725 = vmatpush3.msra.mxu0 %v439_v18 }
 0x10b   :  { %v355_v24 = vpop.permute.xlu0 %354 }
 0x10c   :  { %vm356_vm4 = vcmp.eq.s32.totalorder %v351_v20, %v355_v24 }
 0x10d   :  { %v11205_v25 = vsel %vm356_vm4, 1.0, %v16217_v2  ;;  %vm694_vm4 = vcmask 33792  }
 0x10e   :  { %11705 = vmatmul.mubr.msk.f32.vlgmr.msra.gmra.mxu1 %vm361_vm3, %v11205_v25  ;;  %vm5536_vm3 = vcmask 1042432  }
 0x10f   :  { %11715 = vmatprep.mubr.msk.f32.mxu1 %vm12285_vm0, %v16217_v2 }
 0x120   :  { %v217_v26 = vpop.xlane.xlu1 %216 }
 0x121   :  { %v232_v44 = vadd.f32 %v11204_v28, %v217_v26 }
 0x123   :  { %v244_v48 = vsel %vm240_vm8, %v232_v44, -1e+30 }
 0x124   :  { %v220_v29 = vpop.xlane.xlu1 %219  ;;  %v249_v55 = vsel %vm247_vm6, %v244_v48, -inf }
 0x125   :  { %v233_v30 = vadd.f32 %v11204_v28, %v220_v29 }
 0x127   :  { %v245_v32 = vsel %vm241_vm5, %v233_v30, -1e+30 }
 0x128   :  { %v223_v33 = vpop.xlane.xlu1 %222  ;;  %v257_v35 = vsel %vm247_vm6, %v245_v32, -inf }
 0x129   :  { %v234_v34 = vadd.f32 %v11204_v28, %v223_v33 }
 0x12b   :  { %v246_v36 = vsel %vm242_vm7, %v234_v34, -1e+30 }
 0x12c   :  { %v258_v37 = vsel %vm247_vm6, %v246_v36, -inf }
 0x12d   :  { %v259_v38 = vmax.f32 %v257_v35, %v258_v37 }
 0x12f   :  { %v260_v39 = vrot.slane %v259_v38, 4 }
 0x131   :  { %v261_v40 = vmax.f32 %v259_v38, %v260_v39 }
 0x133   :  { %v262_v41 = vrot.slane %v261_v40, 2 }
 0x135   :  { %v263_v43 = vmax.f32 %v261_v40, %v262_v41 }
 0x137   :  { %v264_v45 = vrot.slane %v263_v43, 1 }
 0x138   :  { %v214_v51 = vpop.xlane.xlu0 %213 }
 0x139   :  { %v265_v46 = vmax.f32 %v263_v43, %v264_v45  ;;  %v231_v54 = vadd.f32 %v11204_v28, %v214_v51  ;;  %v751_v51 = vld [vmem:[#allocation13 + $0x168] sm:$0xff] }
 0x13b   :  { %v268_v49 = vsub.f32 %v245_v32, %v265_v46  ;;  %v269_v50 = vsub.f32 %v246_v36, %v265_v46  ;;  %v243_v56 = vsel %vm239_vm9, %v231_v54, -1e+30  ;;  %v446_v46 = vld [vmem:[#allocation9 + $0x38] sm:$0xff] }
 0x13c   :  { %v248_v57 = vsel %vm247_vm6, %v243_v56, -inf  ;;  %11708 = vmatpush3.msra.mxu1 %v446_v46  ;;  %v736_v54 = vld [vmem:[#allocation13 + $0xf0] sm:$0xff]  ;;  %v714_v46 = vld [vmem:[#allocation13 + $0x40] sm:$0xff] }
 0x13d   :  { %v274_v52 = vmul.f32 1.442695, %v268_v49  ;;  %v276_v53 = vmul.f32 1.442695, %v269_v50  ;;  %v250_v58 = vmax.f32 %v248_v57, %v249_v55  ;;  %11709 = vmatprep.subr.mxu1 %v16217_v2  ;;  %v443_v49 = vld [vmem:[#allocation9 + $0x20] sm:$0xff]  ;;  %v752_v50 = vld [vmem:[#allocation13 + $0x170] sm:$0xff] }
 0x13e   :  { %11710 = vmatpush3.msra.mxu1 %v445_v47  ;;  %802 = vmatprep.subr.mxu0 %v752_v50  ;;  %v721_v57 = vld [vmem:[#allocation13 + $0x78] sm:$0xff]  ;;  %v764_v47 = vld [vmem:[#allocation13 + $0x1d0] sm:$0xff]  ;;  %v608_v50 = vld [vmem:[%s16203_s8 + $0x18] sm:$0xff] }
 0x13f   :  { %11972 = vpow2.f32 %v274_v52  ;;  %v251_v59 = vrot.slane %v250_v58, 4  ;;  %11711 = vmatprep.subr.mxu1 %v16217_v2 }
 0x140   :  { %11974 = vpow2.f32 %v276_v53  ;;  %v737_v53 = vld [vmem:[#allocation13 + $0xf8] sm:$0xff] }
 0x141   :  { %v252_v60 = vmax.f32 %v250_v58, %v251_v59  ;;  %v707_v58 = vld [vmem:[#allocation13 + $0x8] sm:$0xff]  ;;  %v706_v59 = vld [vmem:[#allocation13] sm:$0xff] }
 0x143   :  { %v253_v61 = vrot.slane %v252_v60, 2 }
 0x145   :  { %v254_v62 = vmax.f32 %v252_v60, %v253_v61 }
 0x147   :  { %v255_v63 = vrot.slane %v254_v62, 1 }
 0x149   :  { %v256_v5 = vmax.f32 %v254_v62, %v255_v63 }
 0x14b   :  { %v266_v11 = vsub.f32 %v243_v56, %v256_v5  ;;  %v267_v12 = vsub.f32 %v244_v48, %v256_v5  ;;  %v444_v48 = vld [vmem:[#allocation9 + $0x28] sm:$0xff] }
 0x14c   :  { %v11973_v0 = vpop.eup %11972  ;;  %11712 = vmatpush3.msra.mxu1 %v444_v48  ;;  %v722_v56 = vld [vmem:[#allocation13 + $0x80] sm:$0xff]  ;;  %v610_v48 = vld [vmem:[%s16203_s8 + $0x28] sm:$0xff] }
 0x14d   :  { %v11975_v1 = vpop.eup %11974  ;;  %v280_v3 = vsel %vm241_vm5, %v11973_v0, 0.0  ;;  %v270_v14 = vmul.f32 1.442695, %v266_v11  ;;  %v272_v15 = vmul.f32 1.442695, %v267_v12  ;;  %11713 = vmatprep.subr.mxu1 %v16217_v2  ;;  %vm6503_vm5 = vcmask 1041408  }
 0x14e   :  { %v281_v6 = vsel %vm242_vm7, %v11975_v1, 0.0  ;;  %v291_v8 = vsel %vm247_vm6, %v280_v3, 0.0  ;;  %11714 = vmatpush3.msra.mxu1 %v443_v49  ;;  %v609_v49 = vld [vmem:[%s16203_s8 + $0x20] sm:$0xff] }
 0x14f   :  { %v292_v10 = vsel %vm247_vm6, %v281_v6, 0.0  ;;  %11976 = vpow2.f32 %v270_v14  ;;  %11729 = vmatprep.subr.mxu1 %v16217_v2 }
 0x150   :  { %v293_v13 = vadd.f32 %v292_v10, %v291_v8  ;;  %11978 = vpow2.f32 %v272_v15 }
 0x152   :  { %v294_v17 = vrot.slane %v293_v13, 4 }
 0x154   :  { %v295_v20 = vadd.f32 %v294_v17, %v293_v13 }
 0x156   :  { %v296_v21 = vrot.slane %v295_v20, 2 }
 0x158   :  { %v297_v22 = vadd.f32 %v296_v21, %v295_v20 }
 0x15a   :  { %v298_v23 = vrot.slane %v297_v22, 1 }
 0x15c   :  { %v299_v24 = vadd.f32 %v298_v23, %v297_v22  ;;  %v11977_v26 = vpop.eup %11976 }
 0x15d   :  { %v11979_v27 = vpop.eup %11978  ;;  %v278_v28 = vsel %vm239_vm9, %v11977_v26, 0.0  ;;  %v756_v26 = vld [vmem:[#allocation13 + $0x190] sm:$0xff] }
 0x15e   :  { %v301_v25 = vadd.f32 1e-30, %v299_v24  ;;  %v279_v29 = vsel %vm240_vm8, %v11979_v27, 0.0  ;;  %v282_v30 = vsel %vm247_vm6, %v278_v28, 0.0  ;;  %v755_v27 = vld [vmem:[#allocation13 + $0x188] sm:$0xff] }
 0x15f   :  { %v283_v31 = vsel %vm247_vm6, %v279_v29, 0.0 }
 0x160   :  { %11980 = vrcp.f32 %v301_v25  ;;  %v284_v32 = vadd.f32 %v283_v31, %v282_v30 }
 0x162   :  { %v285_v33 = vrot.slane %v284_v32, 4 }
 0x164   :  { %v286_v34 = vadd.f32 %v285_v33, %v284_v32  ;;  %v726_v32 = vld [vmem:[#allocation13 + $0xa0] sm:$0xff]  ;;  %v725_v33 = vld [vmem:[#allocation13 + $0x98] sm:$0xff] }
 0x166   :  { %v287_v35 = vrot.slane %v286_v34, 2 }
 0x168   :  { %v288_v36 = vadd.f32 %v287_v35, %v286_v34  ;;  %v711_v35 = vld [vmem:[#allocation13 + $0x28] sm:$0xff] }
 0x16a   :  { %v289_v38 = vrot.slane %v288_v36, 1 }
 0x16c   :  { %v290_v40 = vadd.f32 %v289_v38, %v288_v36  ;;  %v710_v36 = vld [vmem:[#allocation13 + $0x20] sm:$0xff]  ;;  %v759_v38 = vld [vmem:[#allocation13 + $0x1a8] sm:$0xff] }
 0x16d   :  { %v11981_v37 = vpop.eup %11980 }
 0x16e   :  { %v307_v39 = vmul.f32 %v11981_v37, %v281_v6  ;;  %v300_v41 = vadd.f32 1e-30, %v290_v40  ;;  %v306_v45 = vmul.f32 %v11981_v37, %v280_v3  ;;  %v760_v37 = vld [vmem:[#allocation13 + $0x1b0] sm:$0xff] }
 0x16f   :  { %v744_v40 = vld [vmem:[#allocation13 + $0x130] sm:$0xff] }
 0x170   :  { %325 = vperm.xlu0 %11965, %v307_v39   ;;  %11982 = vrcp.f32 %v300_v41  ;;  %v745_v39 = vld [vmem:[#allocation13 + $0x138] sm:$0xff]  ;;  %v730_v41 = vld [vmem:[#allocation13 + $0xc0] sm:$0xff] }
 0x17d   :  { %v11983_v43 = vpop.eup %11982 }
 0x17e   :  { %v303_v44 = vmul.f32 %v11983_v43, %v278_v28  ;;  %v304_v42 = vmul.f32 %v11983_v43, %v279_v29  ;;  %v741_v28 = vld [vmem:[#allocation13 + $0x118] sm:$0xff]  ;;  %v740_v29 = vld [vmem:[#allocation13 + $0x110] sm:$0xff]  ;;  %v612_v43 = vld [vmem:[%s16203_s8 + $0x38] sm:$0xff] }
 0x180   :  { %310 = vperm.xlu1 %11966, %v303_v44   ;;  %v729_v44 = vld [vmem:[#allocation13 + $0xb8] sm:$0xff] }
 0x184   :  { %315 = vperm.xlu1 %11966, %v304_v42   ;;  %v715_v42 = vld [vmem:[#allocation13 + $0x48] sm:$0xff] }
 0x188   :  { %320 = vperm.xlu1 %11966, %v306_v45   ;;  %v611_v45 = vld [vmem:[%s16203_s8 + $0x30] sm:$0xff] }
 0x1ce   :  { %v435_v52 = vpop.f32.mrf.mxu1 }
 0x1cf   :  { %11727 = vmatmul.mubr.msk.f32.vlgmr.msra.gmra.mxu0 %vm211_vm1, %v435_v52  ;;  %v749_v52 = vld [vmem:[#allocation13 + $0x158] sm:$0xff] }
 0x1d0   :  { %v11706_v55 = vpop.f32.mrf.mxu1  ;;  %803 = vmatpush1.msra.mxu0 %v751_v51  ;;  %842 = vmatprep.mubr.f32.mxu0 %v16217_v2  ;;  %v763_v51 = vld [vmem:[#allocation13 + $0x1c8] sm:$0xff] }
 0x1d1   :  { %804 = vmatprep.subr.mxu0 %v737_v53  ;;  %v748_v53 = vld [vmem:[#allocation13 + $0x150] sm:$0xff]  ;;  %v733_v55 = vld [vmem:[#allocation13 + $0xd8] sm:$0xff] }
 0x1d2   :  { %805 = vmatpush1.msra.mxu0 %v736_v54  ;;  %v734_v54 = vld [vmem:[#allocation13 + $0xe0] sm:$0xff] }
 0x1d3   :  { %806 = vmatprep.subr.mxu0 %v722_v56  ;;  %v719_v56 = vld [vmem:[#allocation13 + $0x68] sm:$0xff] }
 0x1d4   :  { %807 = vmatpush1.msra.mxu0 %v721_v57  ;;  %v718_v57 = vld [vmem:[#allocation13 + $0x60] sm:$0xff] }
 0x1d5   :  { %808 = vmatprep.subr.mxu0 %v707_v58  ;;  %v1653_v58 = vld [vmem:[#allocation13 + $0x350] sm:$0xff] }
 0x1d6   :  { %809 = vmatpush1.msra.mxu0 %v706_v59  ;;  %v1652_v59 = vld [vmem:[#allocation13 + $0x348] sm:$0xff] }
 0x1d7   :  { %11213 = vmatmul.mubr.msk.f32.vlgmr.msra.gmra.mxu0 %vm211_vm1, %v12462_v16  ;;  %980 = vmatprep.subr.mxu0 %v756_v26  ;;  %v1612_v26 = vld [vmem:[#allocation13 + $0x208] sm:$0xff] }
 0x1d8   :  { %848 = vmatprep.mubr.f32.mxu0 %v16217_v2  ;;  %981 = vmatpush1.msra.mxu0 %v755_v27  ;;  %v1611_v27 = vld [vmem:[#allocation13 + $0x200] sm:$0xff] }
 0x1d9   :  { %982 = vmatprep.subr.mxu0 %v741_v28  ;;  %v605_v28 = vld [vmem:[%s16203_s8] sm:$0xff] }
 0x1da   :  { %983 = vmatpush1.msra.mxu0 %v740_v29  ;;  %v754_v29 = vld [vmem:[#allocation13 + $0x180] sm:$0xff] }
 0x1db   :  { %11214 = vmatmul.mubr.msk.f32.gmra.mxu0 %vm211_vm1, %v12438_v4  ;;  %984 = vmatprep.subr.mxu0 %v726_v32  ;;  %v1646_v32 = vld [vmem:[#allocation13 + $0x318] sm:$0xff] }
 0x1dc   :  { %854 = vmatprep.mubr.f32.mxu0 %v16217_v2  ;;  %985 = vmatpush1.msra.mxu0 %v725_v33  ;;  %v1645_v33 = vld [vmem:[#allocation13 + $0x310] sm:$0xff] }
 0x1dd   :  { %986 = vmatprep.subr.mxu0 %v711_v35  ;;  %v1630_v35 = vld [vmem:[#allocation13 + $0x298] sm:$0xff] }
 0x1de   :  { %987 = vmatpush1.msra.mxu0 %v710_v36  ;;  %v1616_v36 = vld [vmem:[#allocation13 + $0x228] sm:$0xff] }
 0x1df   :  { %11215 = vmatmul.mubr.msk.f32.gmra.mxu0 %vm211_vm1, %v12444_v7  ;;  %1158 = vmatprep.subr.mxu0 %v760_v37  ;;  %v1615_v37 = vld [vmem:[#allocation13 + $0x220] sm:$0xff] }
 0x1e0   :  { %860 = vmatprep.mubr.f32.mxu0 %v16217_v2 }
 0x1e3   :  { %11216 = vmatmul.mubr.msk.f32.gmra.mxu0 %vm211_vm1, %v12450_v9 }
 0x1e4   :  { %1020 = vmatprep.mubr.f32.mxu0 %v16217_v2 }
 0x1e7   :  { %11221 = vmatmul.mubr.msk.f32.vlgmr.msra.gmra.mxu0 %vm211_vm1, %v12462_v16 }
 0x1e8   :  { %1026 = vmatprep.mubr.f32.mxu0 %v16217_v2  ;;  %1159 = vmatpush1.msra.mxu0 %v759_v38  ;;  %v1665_v38 = vld [vmem:[#allocation13 + $0x3b0] sm:$0xff] }
 0x1e9   :  { %1160 = vmatprep.subr.mxu0 %v745_v39  ;;  %v1664_v39 = vld [vmem:[#allocation13 + $0x3a8] sm:$0xff] }
 0x1ea   :  { %1161 = vmatpush1.msra.mxu0 %v744_v40  ;;  %v1650_v40 = vld [vmem:[#allocation13 + $0x338] sm:$0xff] }
 0x1eb   :  { %v326_v62 = vpop.permute.xlu0 %325  ;;  %11222 = vmatmul.mubr.msk.f32.gmra.mxu0 %vm211_vm1, %v12438_v4  ;;  %1162 = vmatprep.subr.mxu0 %v730_v41  ;;  %v1649_v41 = vld [vmem:[#allocation13 + $0x330] sm:$0xff] }
 0x1ec   :  { %v331_v1 = vmul.f32 %v326_v62, %v12450_v9  ;;  %1032 = vmatprep.mubr.f32.mxu0 %v16217_v2  ;;  %1163 = vmatpush1.msra.mxu0 %v729_v44  ;;  %v1623_v62 = vld [vmem:[#allocation13 + $0x260] sm:$0xff]  ;;  %v1634_v44 = vld [vmem:[#allocation13 + $0x2b8] sm:$0xff] }
 0x1ed   :  { %1164 = vmatprep.subr.mxu0 %v715_v42  ;;  %v1620_v42 = vld [vmem:[#allocation13 + $0x248] sm:$0xff] }
 0x1ee   :  { %v342_v12 = vsel %vm211_vm1, %v331_v1, 0.0  ;;  %1165 = vmatpush1.msra.mxu0 %v714_v46  ;;  %v1607_v1 = vld [vmem:[#allocation13 + $0x1e0] sm:$0xff] }
 0x1ef   :  { %11223 = vmatmul.mubr.msk.f32.gmra.mxu0 %vm211_vm1, %v12444_v7  ;;  %1336 = vmatprep.subr.mxu0 %v764_v47 }
 0x1f0   :  { %1038 = vmatprep.mubr.f32.mxu0 %v16217_v2 }
 0x1f3   :  { %11224 = vmatmul.mubr.msk.f32.gmra.mxu0 %vm211_vm1, %v12450_v9 }
 0x1f4   :  { %1198 = vmatprep.mubr.f32.mxu0 %v16217_v2 }
 0x1f7   :  { %11229 = vmatmul.mubr.msk.f32.vlgmr.msra.gmra.mxu0 %vm211_vm1, %v12462_v16 }
 0x1f8   :  { %1204 = vmatprep.mubr.f32.mxu0 %v16217_v2  ;;  %1337 = vmatpush1.msra.mxu0 %v763_v51  ;;  %v2607_v51 = vld [vmem:[#allocation13 + $0x4c0] sm:$0xff] }
 0x1f9   :  { %1338 = vmatprep.subr.mxu0 %v749_v52  ;;  %v2593_v52 = vld [vmem:[#allocation13 + $0x450] sm:$0xff] }
 0x1fa   :  { %1339 = vmatpush1.msra.mxu0 %v748_v53  ;;  %v2592_v53 = vld [vmem:[#allocation13 + $0x448] sm:$0xff] }
 0x1fb   :  { %v311_v60 = vpop.permute.xlu1 %310  ;;  %11230 = vmatmul.mubr.msk.f32.gmra.mxu0 %vm211_vm1, %v12438_v4  ;;  %1340 = vmatprep.subr.mxu0 %v734_v54  ;;  %v2578_v54 = vld [vmem:[#allocation13 + $0x3d8] sm:$0xff] }
 0x1fc   :  { %v328_v61 = vmul.f32 %v311_v60, %v12462_v16  ;;  %1210 = vmatprep.mubr.f32.mxu0 %v16217_v2  ;;  %1341 = vmatpush1.msra.mxu0 %v733_v55  ;;  %v1638_v60 = vld [vmem:[#allocation13 + $0x2d8] sm:$0xff]  ;;  %v2636_v55 = vrot.slane %v12462_v16, 2 }
 0x1fd   :  { %1342 = vmatprep.subr.mxu0 %v719_v56  ;;  %v2637_v56 = vrot.slane %v12438_v4, 2 }
 0x1fe   :  { %v332_v3 = vsel %vm211_vm1, %v328_v61, 0.0  ;;  %1343 = vmatpush1.msra.mxu0 %v718_v57  ;;  %v1637_v61 = vld [vmem:[#allocation13 + $0x2d0] sm:$0xff] }
 0x1ff   :  { %v316_v63 = vpop.permute.xlu1 %315  ;;  %11231 = vmatmul.mubr.msk.f32.gmra.mxu0 %vm211_vm1, %v12444_v7  ;;  %1710 = vmatprep.subr.mxu0 %v1653_v58  ;;  %v2577_v57 = vld [vmem:[#allocation13 + $0x3d0] sm:$0xff]  ;;  %v12675_v58 = vsel %vm2635_vm12, %v2636_v55, %v2637_v56 }
 0x200   :  { %v329_v0 = vmul.f32 %v316_v63, %v12438_v4  ;;  %1216 = vmatprep.mubr.f32.mxu0 %v16217_v2  ;;  %v1622_v63 = vld [vmem:[#allocation13 + $0x258] sm:$0xff] }
 0x202   :  { %v333_v5 = vsel %vm211_vm1, %v329_v0, 0.0  ;;  %v1608_v0 = vld [vmem:[#allocation13 + $0x1e8] sm:$0xff] }
 0x203   :  { %v334_v6 = vadd.f32 %v333_v5, %v332_v3  ;;  %v321_v8 = vpop.permute.xlu1 %320  ;;  %11232 = vmatmul.mubr.msk.f32.gmra.mxu0 %vm211_vm1, %v12450_v9  ;;  %v1657_v3 = vld [vmem:[#allocation13 + $0x370] sm:$0xff]  ;;  %v1669_v5 = vrot.slane %v12462_v16, 1 }
 0x204   :  { %v330_v10 = vmul.f32 %v321_v8, %v12444_v7  ;;  %1376 = vmatprep.mubr.f32.mxu0 %v16217_v2 }
 0x205   :  { %v335_v11 = vrot.slane %v334_v6, 4 }
 0x206   :  { %v341_v13 = vsel %vm211_vm1, %v330_v10, 0.0  ;;  %v1672_v10 = vrot.slane %v12444_v7, 1 }
 0x207   :  { %v336_v14 = vadd.f32 %v335_v11, %v334_v6  ;;  %v343_v15 = vadd.f32 %v342_v12, %v341_v13  ;;  %11237 = vmatmul.mubr.msk.f32.vlgmr.msra.gmra.mxu0 %vm211_vm1, %v12462_v16  ;;  %v1670_v6 = vrot.slane %v12438_v4, 1  ;;  %v1656_v11 = vld [vmem:[#allocation13 + $0x368] sm:$0xff]  ;;  %v1674_v13 = vrot.slane %v12450_v9, 1 }
 0x208   :  { %1382 = vmatprep.mubr.f32.mxu0 %v16217_v2  ;;  %1711 = vmatpush1.msra.mxu0 %v1652_v59  ;;  %v2639_v59 = vrot.slane %v12444_v7, 2 }
 0x209   :  { %v337_v17 = vrot.slane %v336_v14, 2  ;;  %v344_v18 = vrot.slane %v343_v15, 4  ;;  %1712 = vmatprep.subr.mxu0 %v1638_v60  ;;  %v12590_v8 = vsel %vm1668_vm11, %v1669_v5, %v1670_v6  ;;  %v12596_v12 = vsel %vm1668_vm11, %v1670_v6, %v1672_v10  ;;  %v2596_v5 = vld [vmem:[#allocation13 + $0x468] sm:$0xff]  ;;  %v2582_v6 = vld [vmem:[#allocation13 + $0x3f8] sm:$0xff] }
 0x20a   :  { %1713 = vmatpush1.msra.mxu0 %v1637_v61  ;;  %16254 = vst [vmem:[#allocation30_spill] sm:$0xff] %v12596_v12  ;;  %v12682_v60 = vsel %vm2635_vm12, %v2637_v56, %v2639_v59  ;;  %v2627_v61 = vld [vmem:[#allocation13 + $0x560] sm:$0xff] }
 0x20b   :  { %v338_v20 = vadd.f32 %v337_v17, %v336_v14  ;;  %v345_v21 = vadd.f32 %v344_v18, %v343_v15  ;;  %11238 = vmatmul.mubr.msk.f32.gmra.mxu0 %vm211_vm1, %v12438_v4  ;;  %1714 = vmatprep.subr.mxu0 %v1623_v62  ;;  %v12603_v14 = vld [vmem:[%s16252_s7 + $0x20] sm:$0xff]  ;;  %v12608_v15 = vsel %vm1668_vm11, %v1672_v10, %v1674_v13  ;;  %v2641_v4 = vrot.slane %v12450_v9, 2 }
 0x20c   :  { %1388 = vmatprep.mubr.f32.mxu0 %v16217_v2  ;;  %1715 = vmatpush1.msra.mxu0 %v1622_v63  ;;  %16255 = vst [vmem:[#allocation31_spill] sm:$0xff] %v12603_v14  ;;  %16256 = vst [vmem:[#allocation32_spill] sm:$0xff] %v12608_v15  ;;  %v16216_v17 = vrot.slane %v12603_v14, 1  ;;  %v2626_v63 = vld [vmem:[#allocation13 + $0x558] sm:$0xff]  ;;  %v2581_v10 = vld [vmem:[#allocation13 + $0x3f0] sm:$0xff] }
 0x20d   :  { %v346_v22 = vrot.slane %v345_v21, 2  ;;  %v339_v23 = vrot.slane %v338_v20, 1  ;;  %1716 = vmatprep.subr.mxu0 %v1608_v0  ;;  %v12689_v62 = vsel %vm2635_vm12, %v2639_v59, %v2641_v4  ;;  %v2643_v0 = vrot.slane %v12603_v14, 2  ;;  %v753_v59 = vld [vmem:[#allocation13 + $0x178] sm:$0xff] }
 0x20e   :  { %1717 = vmatpush1.msra.mxu0 %v1607_v1  ;;  %v12618_v18 = vsel %vm1668_vm11, %v1674_v13, %v16216_v17  ;;  %v2611_v1 = vld [vmem:[#allocation13 + $0x4e0] sm:$0xff]  ;;  %v2630_v13 = vld [vmem:[#allocation13 + $0x578] sm:$0xff]  ;;  %v1628_v17 = vld [vmem:[#allocation13 + $0x288] sm:$0xff] }
 0x20f   :  { %v347_v24 = vadd.f32 %v346_v22, %v345_v21  ;;  %v340_v30 = vadd.f32 %v339_v23, %v338_v20  ;;  %11239 = vmatmul.mubr.msk.f32.gmra.mxu0 %vm211_vm1, %v12444_v7  ;;  %1888 = vmatprep.subr.mxu0 %v1657_v3  ;;  %16257 = vst [vmem:[#allocation33_spill] sm:$0xff] %v12618_v18  ;;  %v1642_v20 = vld [vmem:[#allocation13 + $0x2f8] sm:$0xff]  ;;  %v1641_v21 = vld [vmem:[#allocation13 + $0x2f0] sm:$0xff]  ;;  %v1627_v23 = vld [vmem:[#allocation13 + $0x280] sm:$0xff] }
 0x210   :  { %1394 = vmatprep.mubr.f32.mxu0 %v16217_v2  ;;  %v607_v22 = vld [vmem:[%s16203_s8 + $0x10] sm:$0xff]  ;;  %v2612_v7 = vld [vmem:[#allocation13 + $0x4e8] sm:$0xff]  ;;  %v2597_v3 = vld [vmem:[#allocation13 + $0x470] sm:$0xff] }
 0x211   :  { %v348_v25 = vrot.slane %v347_v24, 1 }
 0x213   :  { %v349_v31 = vadd.f32 %v348_v25, %v347_v24  ;;  %11240 = vmatmul.mubr.msk.f32.gmra.mxu0 %vm211_vm1, %v12450_v9  ;;  %v1626_v24 = vld [vmem:[#allocation13 + $0x278] sm:$0xff]  ;;  %v12696_v9 = vsel %vm2635_vm12, %v2641_v4, %v2643_v0  ;;  %v739_v4 = vld [vmem:[#allocation13 + $0x108] sm:$0xff]  ;;  %v738_v0 = vld [vmem:[#allocation13 + $0x100] sm:$0xff] }
 0x214   :  { %1750 = vmatprep.mubr.f32.mxu0 %v16217_v2  ;;  %v606_v25 = vld [vmem:[%s16203_s8 + $0x8] sm:$0xff] }
 0x215   :  { %v450_v34 = vsel %vm449_vm10, %v349_v31, %v340_v30  ;;  %v1661_v30 = vld [vmem:[#allocation13 + $0x390] sm:$0xff]  ;;  %v1660_v31 = vld [vmem:[#allocation13 + $0x388] sm:$0xff] }
 0x216   :  { %11716 = vmatmul.mubr.msk.f32.vlgmr.msra.gmra.mxu1 %vm211_vm1, %v450_v34  ;;  %v1631_v34 = vld [vmem:[#allocation13 + $0x2a0] sm:$0xff] }
 0x217   :  { %11745 = vmatprep.mubr.msk.f32.mxu1 %vm12285_vm0, %v16217_v2  ;;  %11730 = vmatpush3.msra.mxu1 %v612_v43  ;;  %v1635_v43 = vld [vmem:[#allocation13 + $0x2c0] sm:$0xff] }
 0x218   :  { %11731 = vmatprep.subr.mxu1 %v16217_v2  ;;  %11245 = vmatmul.mubr.msk.f32.vlgmr.msra.gmra.mxu0 %vm211_vm1, %v12590_v8 }
 0x219   :  { %11732 = vmatpush3.msra.mxu1 %v611_v45  ;;  %1756 = vmatprep.mubr.f32.mxu0 %v16217_v2  ;;  %v1619_v45 = vld [vmem:[#allocation13 + $0x240] sm:$0xff] }
 0x21a   :  { %11733 = vmatprep.subr.mxu1 %v16217_v2  ;;  %1889 = vmatpush1.msra.mxu0 %v1656_v11  ;;  %v2631_v11 = vld [vmem:[#allocation13 + $0x580] sm:$0xff] }
 0x21b   :  { %11734 = vmatpush3.msra.mxu1 %v610_v48  ;;  %1890 = vmatprep.subr.mxu0 %v1642_v20  ;;  %v2623_v48 = vld [vmem:[#allocation13 + $0x540] sm:$0xff]  ;;  %v2616_v20 = vld [vmem:[#allocation13 + $0x508] sm:$0xff] }
 0x21c   :  { %11735 = vmatprep.subr.mxu1 %v16217_v2  ;;  %11246 = vmatmul.mubr.msk.f32.gmra.mxu0 %vm211_vm1, %v12596_v12 }
 0x21d   :  { %11736 = vmatpush3.msra.mxu1 %v609_v49  ;;  %1762 = vmatprep.mubr.f32.mxu0 %v16217_v2  ;;  %v2622_v49 = vld [vmem:[#allocation13 + $0x538] sm:$0xff] }
 0x21e   :  { %11737 = vmatprep.subr.mxu1 %v16217_v2  ;;  %1891 = vmatpush1.msra.mxu0 %v1641_v21  ;;  %v2615_v21 = vld [vmem:[#allocation13 + $0x500] sm:$0xff] }
 0x21f   :  { %11738 = vmatpush3.msra.mxu1 %v608_v50  ;;  %1892 = vmatprep.subr.mxu0 %v1627_v23  ;;  %v2608_v50 = vld [vmem:[#allocation13 + $0x4c8] sm:$0xff] }
 0x220   :  { %11739 = vmatprep.subr.mxu1 %v16217_v2  ;;  %11247 = vmatmul.mubr.msk.f32.gmra.mxu0 %vm211_vm1, %v12608_v15  ;;  %v2600_v23 = vld [vmem:[#allocation13 + $0x488] sm:$0xff] }
 0x221   :  { %1768 = vmatprep.mubr.f32.mxu0 %v16217_v2  ;;  %11740 = vmatpush3.msra.mxu1 %v607_v22  ;;  %v2601_v22 = vld [vmem:[#allocation13 + $0x490] sm:$0xff] }
 0x222   :  { %11741 = vmatprep.subr.mxu1 %v16217_v2  ;;  %1893 = vmatpush1.msra.mxu0 %v1626_v24  ;;  %v2586_v24 = vld [vmem:[#allocation13 + $0x418] sm:$0xff] }
 0x223   :  { %11742 = vmatpush3.msra.mxu1 %v606_v25  ;;  %1894 = vmatprep.subr.mxu0 %v1612_v26  ;;  %v2585_v25 = vld [vmem:[#allocation13 + $0x410] sm:$0xff]  ;;  %v2634_v26 = vld [vmem:[#allocation13 + $0x598] sm:$0xff] }
 0x224   :  { %11248 = vmatmul.mubr.msk.f32.gmra.mxu0 %vm211_vm1, %v12618_v18  ;;  %11743 = vmatprep.subr.mxu1 %v16217_v2 }
 0x225   :  { %11744 = vmatpush3.msra.mxu1 %v605_v28  ;;  %1895 = vmatpush1.msra.mxu0 %v1611_v27  ;;  %v2619_v27 = vld [vmem:[#allocation13 + $0x520] sm:$0xff]  ;;  %v2604_v28 = vld [vmem:[#allocation13 + $0x4a8] sm:$0xff] }
 0x226   :  { %1928 = vmatprep.mubr.f32.mxu0 %v16217_v2  ;;  %891 = vmatprep.subr.mxu1 %v754_v29 }
 0x227   :  { %2066 = vmatprep.subr.mxu0 %v1661_v30  ;;  %v2589_v30 = vld [vmem:[#allocation13 + $0x430] sm:$0xff] }
 0x228   :  { %11253 = vmatmul.mubr.msk.f32.vlgmr.msra.gmra.mxu0 %vm211_vm1, %v12590_v8 }
 0x229   :  { %1934 = vmatprep.mubr.f32.mxu0 %v16217_v2  ;;  %2067 = vmatpush1.msra.mxu0 %v1660_v31 }
 0x22a   :  { %2068 = vmatprep.subr.mxu0 %v1646_v32  ;;  %v3588_v32 = vld [vmem:[#allocation13 + $0x710] sm:$0xff] }
 0x22b   :  { %2069 = vmatpush1.msra.mxu0 %v1645_v33  ;;  %v3587_v33 = vld [vmem:[#allocation13 + $0x708] sm:$0xff] }
 0x22c   :  { %11254 = vmatmul.mubr.msk.f32.gmra.mxu0 %vm211_vm1, %v12596_v12  ;;  %2070 = vmatprep.subr.mxu0 %v1631_v34 }
 0x22d   :  { %1940 = vmatprep.mubr.f32.mxu0 %v16217_v2  ;;  %2071 = vmatpush1.msra.mxu0 %v1630_v35  ;;  %v3573_v35 = vld [vmem:[#allocation13 + $0x698] sm:$0xff] }
 0x22e   :  { %2072 = vmatprep.subr.mxu0 %v1616_v36  ;;  %v3572_v36 = vld [vmem:[#allocation13 + $0x690] sm:$0xff] }
 0x22f   :  { %2073 = vmatpush1.msra.mxu0 %v1615_v37 }
 0x230   :  { %11255 = vmatmul.mubr.msk.f32.gmra.mxu0 %vm211_vm1, %v12608_v15  ;;  %2244 = vmatprep.subr.mxu0 %v1665_v38  ;;  %v3558_v38 = vld [vmem:[#allocation13 + $0x620] sm:$0xff] }
 0x231   :  { %1946 = vmatprep.mubr.f32.mxu0 %v16217_v2 }
 0x234   :  { %11256 = vmatmul.mubr.msk.f32.gmra.mxu0 %vm211_vm1, %v12618_v18 }
 0x235   :  { %2106 = vmatprep.mubr.f32.mxu0 %v16217_v2 }
 0x238   :  { %11261 = vmatmul.mubr.msk.f32.vlgmr.msra.gmra.mxu0 %vm211_vm1, %v12590_v8 }
 0x239   :  { %2112 = vmatprep.mubr.f32.mxu0 %v16217_v2  ;;  %2245 = vmatpush1.msra.mxu0 %v1664_v39  ;;  %v3557_v39 = vld [vmem:[#allocation13 + $0x618] sm:$0xff] }
 0x23a   :  { %2246 = vmatprep.subr.mxu0 %v1650_v40 }
 0x23b   :  { %2247 = vmatpush1.msra.mxu0 %v1649_v41  ;;  %v3543_v41 = vld [vmem:[#allocation13 + $0x5a8] sm:$0xff] }
 0x23c   :  { %11262 = vmatmul.mubr.msk.f32.gmra.mxu0 %vm211_vm1, %v12596_v12  ;;  %2248 = vmatprep.subr.mxu0 %v1635_v43  ;;  %v3603_v43 = vrot.slane %v12462_v16, 3 }
 0x23d   :  { %2118 = vmatprep.mubr.f32.mxu0 %v16217_v2  ;;  %2249 = vmatpush1.msra.mxu0 %v1634_v44  ;;  %v12747_v44 = vld [vmem:[%s16252_s7 + $0x8] sm:$0xff] }
 0x23e   :  { %2250 = vmatprep.subr.mxu0 %v1620_v42  ;;  %v3604_v42 = vrot.slane %v12747_v44, 3 }
 0x23f   :  { %2251 = vmatpush1.msra.mxu0 %v1619_v45  ;;  %v3542_v45 = vld [vmem:[#allocation13 + $0x5a0] sm:$0xff] }
 0x240   :  { %11263 = vmatmul.mubr.msk.f32.gmra.mxu0 %vm211_vm1, %v12608_v15  ;;  %2766 = vmatprep.subr.mxu0 %v2623_v48  ;;  %v11210_v48 = vld [vmem:[#allocation10] ss:$0 sm:$0xff] }
 0x241   :  { %2124 = vmatprep.mubr.f32.mxu0 %v16217_v2 }
 0x244   :  { %11264 = vmatmul.mubr.msk.f32.gmra.mxu0 %vm211_vm1, %v12618_v18 }
 0x245   :  { %2284 = vmatprep.mubr.f32.mxu0 %v16217_v2 }
 0x248   :  { %11269 = vmatmul.mubr.msk.f32.vlgmr.msra.gmra.mxu0 %vm211_vm1, %v12590_v8 }
 0x249   :  { %2290 = vmatprep.mubr.f32.mxu0 %v16217_v2  ;;  %2767 = vmatpush1.msra.mxu0 %v2622_v49 }
 0x24a   :  { %2768 = vmatprep.subr.mxu0 %v2608_v50  ;;  %v12753_v50 = vsel %vm3602_vm13, %v3603_v43, %v3604_v42  ;;  %v713_v43 = vld [vmem:[#allocation13 + $0x38] sm:$0xff] }
 0x24b   :  { %2769 = vmatpush1.msra.mxu0 %v2607_v51 }
 0x24c   :  { %11270 = vmatmul.mubr.msk.f32.gmra.mxu0 %vm211_vm1, %v12596_v12  ;;  %2770 = vmatprep.subr.mxu0 %v2593_v52 }
 0x24d   :  { %2296 = vmatprep.mubr.f32.mxu0 %v16217_v2  ;;  %2771 = vmatpush1.msra.mxu0 %v2592_v53  ;;  %v12764_v53 = vld [vmem:[%s16252_s7 + $0x10] sm:$0xff] }
 0x24e   :  { %2772 = vmatprep.subr.mxu0 %v2578_v54  ;;  %v3606_v54 = vrot.slane %v12764_v53, 3 }
 0x24f   :  { %2773 = vmatpush1.msra.mxu0 %v2577_v57 }
 0x250   :  { %11271 = vmatmul.mubr.msk.f32.gmra.mxu0 %vm211_vm1, %v12608_v15  ;;  %2944 = vmatprep.subr.mxu0 %v2627_v61 }
 0x251   :  { %2302 = vmatprep.mubr.f32.mxu0 %v16217_v2 }
 0x254   :  { %11272 = vmatmul.mubr.msk.f32.gmra.mxu0 %vm211_vm1, %v12618_v18 }
 0x255   :  { %2806 = vmatprep.mubr.f32.mxu0 %v16217_v2 }
 0x258   :  { %11281 = vmatmul.mubr.msk.f32.vlgmr.msra.gmra.mxu0 %vm211_vm1, %v12675_v58 }
 0x259   :  { %2812 = vmatprep.mubr.f32.mxu0 %v16217_v2  ;;  %2945 = vmatpush1.msra.mxu0 %v2626_v63  ;;  %v12780_v63 = vld [vmem:[%s16252_s7 + $0x18] sm:$0xff] }
 0x25a   :  { %2946 = vmatprep.subr.mxu0 %v2612_v7  ;;  %v3608_v7 = vrot.slane %v12780_v63, 3 }
 0x25b   :  { %2947 = vmatpush1.msra.mxu0 %v2611_v1  ;;  %v3592_v1 = vld [vmem:[#allocation13 + $0x730] sm:$0xff] }
 0x25c   :  { %11282 = vmatmul.mubr.msk.f32.gmra.mxu0 %vm211_vm1, %v12682_v60  ;;  %2948 = vmatprep.subr.mxu0 %v2597_v3  ;;  %v724_v3 = vld [vmem:[#allocation13 + $0x90] sm:$0xff] }
 0x25d   :  { %2818 = vmatprep.mubr.f32.mxu0 %v16217_v2  ;;  %2949 = vmatpush1.msra.mxu0 %v2596_v5 }
 0x25e   :  { %2950 = vmatprep.subr.mxu0 %v2582_v6  ;;  %v12788_v6 = vsel %vm3602_vm13, %v3606_v54, %v3608_v7 }
 0x25f   :  { %2951 = vmatpush1.msra.mxu0 %v2581_v10  ;;  %v3591_v10 = vld [vmem:[#allocation13 + $0x728] sm:$0xff] }
 0x260   :  { %11283 = vmatmul.mubr.msk.f32.gmra.mxu0 %vm211_vm1, %v12689_v62  ;;  %3122 = vmatprep.subr.mxu0 %v2631_v11  ;;  %v723_v11 = vld [vmem:[#allocation13 + $0x88] sm:$0xff] }
 0x261   :  { %2824 = vmatprep.mubr.f32.mxu0 %v16217_v2 }
 0x264   :  { %11284 = vmatmul.mubr.msk.f32.gmra.mxu0 %vm211_vm1, %v12696_v9 }
 0x265   :  { %2984 = vmatprep.mubr.f32.mxu0 %v16217_v2 }
 0x268   :  { %11289 = vmatmul.mubr.msk.f32.vlgmr.msra.gmra.mxu0 %vm211_vm1, %v12675_v58 }
 0x269   :  { %2990 = vmatprep.mubr.f32.mxu0 %v16217_v2  ;;  %3123 = vmatpush1.msra.mxu0 %v2630_v13  ;;  %v709_v13 = vld [vmem:[#allocation13 + $0x18] sm:$0xff] }
 0x26a   :  { %3124 = vmatprep.subr.mxu0 %v2616_v20 }
 0x26b   :  { %3125 = vmatpush1.msra.mxu0 %v2615_v21  ;;  %v3577_v21 = vld [vmem:[#allocation13 + $0x6b8] sm:$0xff] }
 0x26c   :  { %11290 = vmatmul.mubr.msk.f32.gmra.mxu0 %vm211_vm1, %v12682_v60  ;;  %3126 = vmatprep.subr.mxu0 %v2601_v22  ;;  %v3610_v22 = vrot.slane %v12603_v14, 3  ;;  %v1632_v14 = vld [vmem:[#allocation13 + $0x2a8] sm:$0xff] }
 0x26d   :  { %2996 = vmatprep.mubr.f32.mxu0 %v16217_v2  ;;  %3127 = vmatpush1.msra.mxu0 %v2600_v23  ;;  %v708_v23 = vld [vmem:[#allocation13 + $0x10] sm:$0xff] }
 0x26e   :  { %3128 = vmatprep.subr.mxu0 %v2586_v24  ;;  %v3576_v24 = vld [vmem:[#allocation13 + $0x6b0] sm:$0xff] }
 0x26f   :  { %3129 = vmatpush1.msra.mxu0 %v2585_v25  ;;  %v758_v25 = vld [vmem:[#allocation13 + $0x1a0] sm:$0xff] }
 0x270   :  { %11291 = vmatmul.mubr.msk.f32.gmra.mxu0 %vm211_vm1, %v12689_v62  ;;  %11776 = vmatprep.subr.mxu0 %v2634_v26 }
 0x271   :  { %3002 = vmatprep.mubr.f32.mxu0 %v16217_v2 }
 0x274   :  { %11292 = vmatmul.mubr.msk.f32.gmra.mxu0 %vm211_vm1, %v12696_v9 }
 0x275   :  { %3162 = vmatprep.mubr.f32.mxu0 %v16217_v2 }
 0x278   :  { %11297 = vmatmul.mubr.msk.f32.vlgmr.msra.gmra.mxu0 %vm211_vm1, %v12675_v58 }
 0x279   :  { %3168 = vmatprep.mubr.f32.mxu0 %v16217_v2  ;;  %11777 = vmatpush3.msra.mxu0 %v2634_v26 }
 0x27a   :  { %11778 = vmatprep.subr.mxu0 %v2619_v27 }
 0x27b   :  { %11779 = vmatpush3.msra.mxu0 %v2619_v27  ;;  %v757_v27 = vld [vmem:[#allocation13 + $0x198] sm:$0xff] }
 0x27c   :  { %11298 = vmatmul.mubr.msk.f32.gmra.mxu0 %vm211_vm1, %v12682_v60  ;;  %11780 = vmatprep.subr.mxu0 %v2604_v28 }
 0x27d   :  { %3174 = vmatprep.mubr.f32.mxu0 %v16217_v2  ;;  %11781 = vmatpush3.msra.mxu0 %v2604_v28  ;;  %v743_v28 = vld [vmem:[#allocation13 + $0x128] sm:$0xff] }
 0x27e   :  { %11782 = vmatprep.subr.mxu0 %v2589_v30 }
 0x27f   :  { %11783 = vmatpush3.msra.mxu0 %v2589_v30  ;;  %v12799_v30 = vsel %vm3602_vm13, %v3608_v7, %v3610_v22  ;;  %v732_v22 = vld [vmem:[#allocation13 + $0xd0] sm:$0xff] }
 0x280   :  { %11299 = vmatmul.mubr.msk.f32.gmra.mxu0 %vm211_vm1, %v12689_v62  ;;  %3644 = vmatprep.subr.mxu0 %v3588_v32 }
 0x281   :  { %3180 = vmatprep.mubr.f32.mxu0 %v16217_v2 }
 0x284   :  { %11300 = vmatmul.mubr.msk.f32.gmra.mxu0 %vm211_vm1, %v12696_v9 }
 0x285   :  { %11784 = vmatprep.mubr.msk.f32.mxu0 %vm211_vm1, %v12675_v58 }
 0x288   :  { %11785 = vmatmul.mubr.msk.f32.vlgmr.msra.gmra.mxu0 %vm211_vm1, %v12682_v60 }
 0x289   :  { %3645 = vmatpush1.msra.mxu0 %v3587_v33  ;;  %11787 = vmatprep.mubr.msk.f32.mxu0 %vm211_vm1, %v12689_v62  ;;  %v12806_v33 = vld [vmem:[%s16252_s7] sm:$0xff] }
 0x28a   :  { %3646 = vmatprep.subr.mxu0 %v3573_v35  ;;  %v742_v35 = vld [vmem:[#allocation13 + $0x120] sm:$0xff] }
 0x28b   :  { %3647 = vmatpush1.msra.mxu0 %v3572_v36  ;;  %v3562_v36 = vld [vmem:[#allocation13 + $0x640] sm:$0xff] }
 0x28c   :  { %11788 = vmatmul.mubr.msk.f32.gmra.mxu0 %vm211_vm1, %v12696_v9  ;;  %3648 = vmatprep.subr.mxu0 %v3558_v38  ;;  %v728_v38 = vld [vmem:[#allocation13 + $0xb0] sm:$0xff] }
 0x28d   :  { %3649 = vmatpush1.msra.mxu0 %v3557_v39  ;;  %3684 = vmatprep.mubr.f32.mxu0 %v16217_v2 }
 0x28e   :  { %3650 = vmatprep.subr.mxu0 %v3543_v41  ;;  %v727_v41 = vld [vmem:[#allocation13 + $0xa8] sm:$0xff] }
 0x28f   :  { %v12670_v46 = vpop.f32.mrf.mxu0  ;;  %3651 = vmatpush1.msra.mxu0 %v3542_v45 }
 0x290   :  { %11309 = vmatmul.mubr.msk.f32.vlgmr.msra.gmra.mxu0 %vm211_vm1, %v12753_v50  ;;  %3822 = vmatprep.subr.mxu0 %v3592_v1 }
 0x291   :  { %v11728_v47 = vpop.f32.mrf.mxu0  ;;  %3690 = vmatprep.mubr.f32.mxu0 %v16217_v2  ;;  %3823 = vmatpush1.msra.mxu0 %v3591_v10  ;;  %v747_v10 = vld [vmem:[#allocation13 + $0x148] sm:$0xff] }
 0x292   :  { %3824 = vmatprep.subr.mxu0 %v3577_v21  ;;  %v746_v21 = vld [vmem:[#allocation13 + $0x140] sm:$0xff] }
 0x293   :  { %3825 = vmatpush1.msra.mxu0 %v3576_v24  ;;  %v731_v24 = vld [vmem:[#allocation13 + $0xc8] sm:$0xff] }
 0x294   :  { %3826 = vmatprep.subr.mxu0 %v3562_v36 }
 0x297   :  { %v12722_v29 = vpop.f32.mrf.mxu0 }
 0x299   :  { %v12728_v31 = vpop.f32.mrf.mxu0 }
 0x29b   :  { %v12732_v34 = vpop.f32.mrf.mxu0 }
 0x29d   :  { %v12736_v37 = vpop.f32.mrf.mxu0 }
 0x29f   :  { %v12740_v40 = vpop.f32.mrf.mxu0 }
 0x2a1   :  { %v12750_v49 = vpop.f32.mrf.mxu0 }
 0x2a3   :  { %v12758_v52 = vpop.f32.mrf.mxu0 }
 0x2a5   :  { %v12767_v56 = vpop.f32.mrf.mxu0 }
 0x2a6   :  { %16258 = vst [vmem:[#allocation34_spill] sm:$0xff] %v12767_v56  ;;  %v4518_v56 = vld [vmem:[#allocation13 + $0x7c8] sm:$0xff] }
 0x2a7   :  { %v12774_v61 = vpop.f32.mrf.mxu0 }
 0x2a9   :  { %v12785_v5 = vpop.f32.mrf.mxu0 }
 0x2aa   :  { %16259 = vst [vmem:[#allocation35_spill] sm:$0xff] %v12785_v5 }
 0x2ab   :  { %v12792_v20 = vpop.f32.mrf.mxu0 }
 0x2ad   :  { %v12795_v26 = vpop.f32.mrf.mxu0 }
 0x2ae   :  { %16260 = vst [vmem:[#allocation36_spill] sm:$0xff] %v12795_v26  ;;  %v6468_v26 = vld [vmem:[#allocation13 + $0xc08] sm:$0xff] }
 0x2af   :  { %v12801_v32 = vpop.f32.mrf.mxu0 }
 0x2b1   :  { %v12811_v39 = vpop.f32.mrf.mxu0 }
 0x2b2   :  { %16261 = vst [vmem:[#allocation37_spill] sm:$0xff] %v12811_v39  ;;  %v4544_v39 = vld [vmem:[#allocation13 + $0x898] sm:$0xff] }
 0x2b3   :  { %v12815_v45 = vpop.f32.mrf.mxu0 }
 0x2d6   :  { %v519_v47 = vpop.f32.mrf.mxu1 }
 0x2d7   :  { %v593_v16 = vadd.f32 %v12670_v46, %v519_v47  ;;  %v12770_v46 = vsel %vm3602_vm13, %v3604_v42, %v3606_v54  ;;  %v3561_v42 = vld [vmem:[#allocation13 + $0x638] sm:$0xff]  ;;  %v712_v47 = vld [vmem:[#allocation13 + $0x30] sm:$0xff]  ;;  %v3546_v54 = vld [vmem:[#allocation13 + $0x5c0] sm:$0xff] }
 0x2d8   :  { %v11717_v51 = vpop.f32.mrf.mxu1  ;;  %11310 = vmatmul.mubr.msk.f32.gmra.mxu0 %vm211_vm1, %v12770_v46 }
 0x2d9   :  { %v603_v55 = vadd.f32 %v11210_v48, %v593_v16  ;;  %3696 = vmatprep.mubr.f32.mxu0 %v16217_v2  ;;  %v3547_v48 = vld [vmem:[#allocation13 + $0x5c8] sm:$0xff]  ;;  %v762_v16 = vld [vmem:[#allocation13 + $0x1c0] sm:$0xff]  ;;  %v12820_v51 = vpop.f32.mrf.mxu0  ;;  %3827 = vmatpush1.msra.mxu0 %v3561_v42 }
 0x2da   :  { %16262 = vst [vmem:[#allocation38_spill] sm:$0xff] %v12820_v51  ;;  %3828 = vmatprep.subr.mxu0 %v3547_v48  ;;  %v3551_v42 = vld [vmem:[#allocation13 + $0x5e8] sm:$0xff] }
 0x2db   :  { %v604_v57 = vmax.f32 %v603_v55, 0.0  ;;  %v12822_v55 = vpop.f32.mrf.mxu0  ;;  %3829 = vmatpush1.msra.mxu0 %v3546_v54 }
 0x2dc   :  { %11311 = vmatmul.mubr.msk.f32.gmra.mxu0 %vm211_vm1, %v12788_v6 }
 0x2dd   :  { %11746 = vmatmul.mubr.msk.f32.vlgmr.msra.gmra.mxu1 %vm620_vm14, %v604_v57  ;;  %3702 = vmatprep.mubr.f32.mxu0 %v16217_v2  ;;  %v3596_v57 = vld [vmem:[#allocation13 + $0x750] sm:$0xff] }
 0x2de   :  { %892 = vmatpush1.msra.mxu1 %v753_v59  ;;  %931 = vmatprep.mubr.f32.mxu1 %v16217_v2  ;;  %v12827_v59 = vpop.f32.mrf.mxu0 }
 0x2df   :  { %893 = vmatprep.subr.mxu1 %v739_v4  ;;  %16263 = vst [vmem:[#allocation39_spill] sm:$0xff] %v12827_v59  ;;  %4000 = vmatprep.subr.mxu0 %v3596_v57  ;;  %v3595_v4 = vld [vmem:[#allocation13 + $0x748] sm:$0xff] }
 0x2e0   :  { %894 = vmatpush1.msra.mxu1 %v738_v0  ;;  %11312 = vmatmul.mubr.msk.f32.gmra.mxu0 %vm211_vm1, %v12799_v30  ;;  %v12832_v7 = vpop.f32.mrf.mxu0  ;;  %v3581_v0 = vld [vmem:[#allocation13 + $0x6d8] sm:$0xff]  ;;  %v3599_v57 = vld [vmem:[#allocation13 + $0x768] sm:$0xff] }
 0x2e1   :  { %895 = vmatprep.subr.mxu1 %v724_v3  ;;  %3862 = vmatprep.mubr.f32.mxu0 %v16217_v2  ;;  %v761_v3 = vld [vmem:[#allocation13 + $0x1b8] sm:$0xff] }
 0x2e2   :  { %896 = vmatpush1.msra.mxu1 %v723_v11  ;;  %v12838_v1 = vpop.f32.mrf.mxu0  ;;  %v3580_v11 = vld [vmem:[#allocation13 + $0x6d0] sm:$0xff] }
 0x2e3   :  { %897 = vmatprep.subr.mxu1 %v709_v13  ;;  %16264 = vst [vmem:[#allocation40_spill] sm:$0xff] %v12838_v1  ;;  %v1618_v1 = vld [vmem:[#allocation13 + $0x238] sm:$0xff] }
 0x2e4   :  { %898 = vmatpush1.msra.mxu1 %v708_v23  ;;  %11317 = vmatmul.mubr.msk.f32.vlgmr.msra.gmra.mxu0 %vm211_vm1, %v12753_v50  ;;  %v12842_v13 = vpop.f32.mrf.mxu0 }
 0x2e5   :  { %11217 = vmatmul.mubr.msk.f32.vlgmr.msra.gmra.mxu1 %vm211_vm1, %v12806_v33  ;;  %1069 = vmatprep.subr.mxu1 %v758_v25  ;;  %v717_v25 = vld [vmem:[#allocation13 + $0x58] sm:$0xff] }
 0x2e6   :  { %1070 = vmatpush1.msra.mxu1 %v757_v27  ;;  %937 = vmatprep.mubr.f32.mxu1 %v16217_v2  ;;  %v12848_v23 = vpop.f32.mrf.mxu0 }
 0x2e7   :  { %1071 = vmatprep.subr.mxu1 %v743_v28  ;;  %3868 = vmatprep.mubr.f32.mxu0 %v16217_v2  ;;  %16265 = vst [vmem:[#allocation41_spill] sm:$0xff] %v12848_v23  ;;  %v716_v28 = vld [vmem:[#allocation13 + $0x50] sm:$0xff]  ;;  %v4561_v23 = vld [vmem:[#allocation13 + $0x920] sm:$0xff] }
 0x2e8   :  { %1072 = vmatpush1.msra.mxu1 %v742_v35  ;;  %4001 = vmatpush1.msra.mxu0 %v3595_v4  ;;  %v12852_v27 = vpop.f32.mrf.mxu0  ;;  %v765_v35 = vld [vmem:[#allocation13 + $0x1d8] sm:$0xff] }
 0x2e9   :  { %11218 = vmatmul.mubr.msk.f32.gmra.mxu1 %vm211_vm1, %v12747_v44  ;;  %1073 = vmatprep.subr.mxu1 %v728_v38  ;;  %v3566_v38 = vld [vmem:[#allocation13 + $0x660] sm:$0xff]  ;;  %v3585_v4 = vld [vmem:[#allocation13 + $0x6f8] sm:$0xff] }
 0x2ea   :  { %943 = vmatprep.mubr.f32.mxu1 %v16217_v2  ;;  %1074 = vmatpush1.msra.mxu1 %v727_v41  ;;  %v12857_v36 = vpop.f32.mrf.mxu0  ;;  %v3565_v41 = vld [vmem:[#allocation13 + $0x658] sm:$0xff] }
 0x2eb   :  { %1075 = vmatprep.subr.mxu1 %v713_v43  ;;  %4002 = vmatprep.subr.mxu0 %v3581_v0  ;;  %16266 = vst [vmem:[#allocation42_spill] sm:$0xff] %v12857_v36 }
 0x2ec   :  { %1076 = vmatpush1.msra.mxu1 %v712_v47  ;;  %11318 = vmatmul.mubr.msk.f32.gmra.mxu0 %vm211_vm1, %v12770_v46  ;;  %v12862_v43 = vpop.f32.mrf.mxu0  ;;  %v3550_v47 = vld [vmem:[#allocation13 + $0x5e0] sm:$0xff] }
 0x2ed   :  { %11219 = vmatmul.mubr.msk.f32.gmra.mxu1 %vm211_vm1, %v12764_v53  ;;  %1247 = vmatprep.subr.mxu1 %v762_v16  ;;  %v3600_v16 = vld [vmem:[#allocation13 + $0x770] sm:$0xff] }
 0x2ee   :  { %949 = vmatprep.mubr.f32.mxu1 %v16217_v2  ;;  %3874 = vmatprep.mubr.f32.mxu0 %v16217_v2  ;;  %v12867_v48 = vpop.f32.mrf.mxu0 }
 0x2ef   :  { %4003 = vmatpush1.msra.mxu0 %v3580_v11  ;;  %16267 = vst [vmem:[#allocation43_spill] sm:$0xff] %v12867_v48  ;;  %v735_v11 = vld [vmem:[#allocation13 + $0xe8] sm:$0xff] }
 0x2f0   :  { %11319 = vmatmul.mubr.msk.f32.gmra.mxu0 %vm211_vm1, %v12788_v6  ;;  %4004 = vmatprep.subr.mxu0 %v3566_v38  ;;  %v12870_v54 = vpop.f32.mrf.mxu0  ;;  %v3570_v38 = vld [vmem:[#allocation13 + $0x680] sm:$0xff] }
 0x2f1   :  { %11220 = vmatmul.mubr.msk.f32.gmra.mxu1 %vm211_vm1, %v12780_v63  ;;  %3880 = vmatprep.mubr.f32.mxu0 %v16217_v2 }
 0x2f2   :  { %1109 = vmatprep.mubr.f32.mxu1 %v16217_v2  ;;  %4005 = vmatpush1.msra.mxu0 %v3565_v41  ;;  %v12877_v0 = vpop.f32.mrf.mxu0 }
 0x2f3   :  { %4006 = vmatprep.subr.mxu0 %v3551_v42  ;;  %16268 = vst [vmem:[#allocation44_spill] sm:$0xff] %v12877_v0  ;;  %v3569_v42 = vld [vmem:[#allocation13 + $0x678] sm:$0xff] }
 0x2f4   :  { %11320 = vmatmul.mubr.msk.f32.gmra.mxu0 %vm211_vm1, %v12799_v30  ;;  %v4512_v0 = vld [vmem:[#allocation13 + $0x798] sm:$0xff] }
 0x2f5   :  { %11225 = vmatmul.mubr.msk.f32.vlgmr.msra.gmra.mxu1 %vm211_vm1, %v12806_v33  ;;  %4040 = vmatprep.mubr.f32.mxu0 %v16217_v2 }
 0x2f6   :  { %1248 = vmatpush1.msra.mxu1 %v761_v3  ;;  %1115 = vmatprep.mubr.f32.mxu1 %v16217_v2  ;;  %v750_v3 = vld [vmem:[#allocation13 + $0x160] sm:$0xff] }
 0x2f7   :  { %1249 = vmatprep.subr.mxu1 %v747_v10  ;;  %4007 = vmatpush1.msra.mxu0 %v3550_v47  ;;  %v12880_v10 = vpop.f32.mrf.mxu0 }
 0x2f8   :  { %1250 = vmatpush1.msra.mxu1 %v746_v21  ;;  %11325 = vmatmul.mubr.msk.f32.vlgmr.msra.gmra.mxu0 %vm211_vm1, %v12753_v50 }
 0x2f9   :  { %11226 = vmatmul.mubr.msk.f32.gmra.mxu1 %vm211_vm1, %v12747_v44  ;;  %1251 = vmatprep.subr.mxu1 %v732_v22  ;;  %v12885_v21 = vpop.f32.mrf.mxu0  ;;  %v720_v22 = vld [vmem:[#allocation13 + $0x70] sm:$0xff] }
 0x2fa   :  { %1121 = vmatprep.mubr.f32.mxu1 %v16217_v2  ;;  %1252 = vmatpush1.msra.mxu1 %v731_v24  ;;  %16269 = vst [vmem:[#allocation45_spill] sm:$0xff] %v12885_v21 }
 0x2fb   :  { %1253 = vmatprep.subr.mxu1 %v717_v25  ;;  %4046 = vmatprep.mubr.f32.mxu0 %v16217_v2  ;;  %v12890_v24 = vpop.f32.mrf.mxu0  ;;  %v1655_v25 = vld [vmem:[#allocation13 + $0x360] sm:$0xff] }
 0x2fc   :  { %1254 = vmatpush1.msra.mxu1 %v716_v28  ;;  %4178 = vmatprep.subr.mxu0 %v3600_v16  ;;  %v3555_v16 = vld [vmem:[#allocation13 + $0x608] sm:$0xff] }
 0x2fd   :  { %11227 = vmatmul.mubr.msk.f32.gmra.mxu1 %vm211_vm1, %v12764_v53  ;;  %11748 = vmatprep.subr.mxu1 %v765_v35  ;;  %v12895_v28 = vpop.f32.mrf.mxu0 }
 0x2fe   :  { %1127 = vmatprep.mubr.f32.mxu1 %v16217_v2  ;;  %4179 = vmatpush1.msra.mxu0 %v3599_v57  ;;  %16270 = vst [vmem:[#allocation46_spill] sm:$0xff] %v12895_v28  ;;  %v1614_v28 = vld [vmem:[#allocation13 + $0x218] sm:$0xff] }
 0x2ff   :  { %4180 = vmatprep.subr.mxu0 %v3585_v4  ;;  %11326 = vmatmul.mubr.msk.f32.gmra.mxu0 %vm211_vm1, %v12770_v46  ;;  %v1752_v41 = vpop.f32.mrf.mxu0  ;;  %v3554_v4 = vld [vmem:[#allocation13 + $0x600] sm:$0xff] }
 0x300   :  { %4052 = vmatprep.mubr.f32.mxu0 %v16217_v2  ;;  %v12903_v47 = vadd.f32 %v1752_v41, %v12722_v29  ;;  %v4556_v29 = vld [vmem:[#allocation13 + $0x8f8] sm:$0xff]  ;;  %v1640_v41 = vld [vmem:[#allocation13 + $0x2e8] sm:$0xff] }
 0x301   :  { %11228 = vmatmul.mubr.msk.f32.gmra.mxu1 %vm211_vm1, %v12780_v63  ;;  %v12906_v57 = vpop.f32.mrf.mxu0 }
 0x302   :  { %1287 = vmatprep.mubr.f32.mxu1 %v16217_v2 }
 0x303   :  { %11327 = vmatmul.mubr.msk.f32.gmra.mxu0 %vm211_vm1, %v12788_v6 }
 0x304   :  { %4058 = vmatprep.mubr.f32.mxu0 %v16217_v2 }
 0x305   :  { %11233 = vmatmul.mubr.msk.f32.vlgmr.msra.gmra.mxu1 %vm211_vm1, %v12806_v33 }
 0x306   :  { %11749 = vmatpush3.msra.mxu1 %v765_v35  ;;  %1293 = vmatprep.mubr.f32.mxu1 %v16217_v2  ;;  %v3584_v35 = vld [vmem:[#allocation13 + $0x6f0] sm:$0xff] }
 0x307   :  { %11750 = vmatprep.subr.mxu1 %v750_v3  ;;  %4181 = vmatpush1.msra.mxu0 %v3584_v35 }
 0x308   :  { %11751 = vmatpush3.msra.mxu1 %v750_v3  ;;  %11328 = vmatmul.mubr.msk.f32.gmra.mxu0 %vm211_vm1, %v12799_v30  ;;  %v4557_v3 = vld [vmem:[#allocation13 + $0x900] sm:$0xff] }
 0x309   :  { %11234 = vmatmul.mubr.msk.f32.gmra.mxu1 %vm211_vm1, %v12747_v44  ;;  %11752 = vmatprep.subr.mxu1 %v735_v11 }
 0x30a   :  { %1299 = vmatprep.mubr.f32.mxu1 %v16217_v2  ;;  %11753 = vmatpush3.msra.mxu1 %v735_v11  ;;  %v1758_v11 = vpop.f32.mrf.mxu0 }
 0x30b   :  { %11754 = vmatprep.subr.mxu1 %v720_v22  ;;  %4182 = vmatprep.subr.mxu0 %v3570_v38  ;;  %v1654_v38 = vld [vmem:[#allocation13 + $0x358] sm:$0xff] }
 0x30c   :  { %11755 = vmatpush3.msra.mxu1 %v720_v22  ;;  %4183 = vmatpush1.msra.mxu0 %v3569_v42  ;;  %v12914_v22 = vadd.f32 %v1758_v11, %v12732_v34  ;;  %v12918_v35 = vpop.f32.mrf.mxu0  ;;  %v1639_v34 = vld [vmem:[#allocation13 + $0x2e0] sm:$0xff] }
 0x30d   :  { %11235 = vmatmul.mubr.msk.f32.gmra.mxu1 %vm211_vm1, %v12764_v53  ;;  %1799 = vmatprep.subr.mxu1 %v1655_v25  ;;  %v4542_v25 = vld [vmem:[#allocation13 + $0x888] sm:$0xff] }
 0x30e   :  { %1305 = vmatprep.mubr.f32.mxu1 %v16217_v2  ;;  %4218 = vmatprep.mubr.f32.mxu0 %v16217_v2  ;;  %v1764_v42 = vpop.f32.mrf.mxu0 }
 0x30f   :  { %4184 = vmatprep.subr.mxu0 %v3555_v16  ;;  %v12926_v16 = vadd.f32 %v1764_v42, %v12740_v40  ;;  %v1609_v40 = vld [vmem:[#allocation13 + $0x1f0] sm:$0xff] }
 0x310   :  { %4185 = vmatpush1.msra.mxu0 %v3554_v4  ;;  %v1625_v4 = vld [vmem:[#allocation13 + $0x270] sm:$0xff]  ;;  %v12930_v11 = vpop.f32.mrf.mxu0 }
 0x311   :  { %11236 = vmatmul.mubr.msk.f32.gmra.mxu1 %vm211_vm1, %v12780_v63  ;;  %11333 = vmatmul.mubr.msk.f32.vlgmr.msra.gmra.mxu0 %vm211_vm1, %v12753_v50 }
 0x312   :  { %11756 = vmatprep.mubr.msk.f32.mxu1 %vm211_vm1, %v12806_v33  ;;  %4700 = vmatprep.subr.mxu0 %v4557_v3  ;;  %v1624_v3 = vld [vmem:[#allocation13 + $0x268] sm:$0xff] }
 0x313   :  { %4224 = vmatprep.mubr.f32.mxu0 %v16217_v2  ;;  %4701 = vmatpush1.msra.mxu0 %v4556_v29  ;;  %v1610_v29 = vld [vmem:[#allocation13 + $0x1f8] sm:$0xff] }
 0x314   :  { %4702 = vmatprep.subr.mxu0 %v4542_v25  ;;  %v1770_v25 = vpop.f32.mrf.mxu0 }
 0x315   :  { %11757 = vmatmul.mubr.msk.f32.vlgmr.msra.gmra.mxu1 %vm211_vm1, %v12747_v44  ;;  %11334 = vmatmul.mubr.msk.f32.gmra.mxu0 %vm211_vm1, %v12770_v46 }
 0x316   :  { %1800 = vmatpush1.msra.mxu1 %v1654_v38  ;;  %11759 = vmatprep.mubr.msk.f32.mxu1 %vm211_vm1, %v12764_v53  ;;  %v12938_v38 = vadd.f32 %v1770_v25, %v12758_v52  ;;  %v12941_v42 = vpop.f32.mrf.mxu0  ;;  %v1643_v52 = vld [vmem:[#allocation13 + $0x300] sm:$0xff]  ;;  %v1629_v25 = vld [vmem:[#allocation13 + $0x290] sm:$0xff] }
 0x317   :  { %1801 = vmatprep.subr.mxu1 %v1640_v41  ;;  %4230 = vmatprep.mubr.f32.mxu0 %v16217_v2  ;;  %v1659_v41 = vld [vmem:[#allocation13 + $0x380] sm:$0xff]  ;;  %16272 = vst [vmem:[#allocation48_spill] sm:$0xff] %v12941_v42 }
 0x318   :  { %1802 = vmatpush1.msra.mxu1 %v1639_v34  ;;  %16271 = vst [vmem:[#allocation47_spill] sm:$0xff] %v12938_v38  ;;  %v1658_v34 = vld [vmem:[#allocation13 + $0x378] sm:$0xff]  ;;  %v4533_v38 = vld [vmem:[#allocation13 + $0x840] sm:$0xff] }
 0x319   :  { %11760 = vmatmul.mubr.msk.f32.gmra.mxu1 %vm211_vm1, %v12780_v63  ;;  %1803 = vmatprep.subr.mxu1 %v1625_v4  ;;  %v4541_v4 = vld [vmem:[#allocation13 + $0x880] sm:$0xff] }
 0x31a   :  { %1804 = vmatpush1.msra.mxu1 %v1624_v3  ;;  %1839 = vmatprep.mubr.f32.mxu1 %v16217_v2  ;;  %v1930_v3 = vpop.f32.mrf.mxu0 }
 0x31b   :  { %1805 = vmatprep.subr.mxu1 %v1610_v29  ;;  %11335 = vmatmul.mubr.msk.f32.gmra.mxu0 %vm211_vm1, %v12788_v6  ;;  %v12950_v29 = vadd.f32 %v1930_v3, %v12774_v61  ;;  %v4570_v61 = vrot.slane %v12806_v33, 4 }
 0x31c   :  { %1806 = vmatpush1.msra.mxu1 %v1609_v40  ;;  %4236 = vmatprep.mubr.f32.mxu0 %v16217_v2  ;;  %v12952_v40 = vpop.f32.mrf.mxu0 }
 0x31d   :  { %11249 = vmatmul.mubr.msk.f32.vlgmr.msra.gmra.mxu1 %vm211_vm1, %v12590_v8  ;;  %1977 = vmatprep.subr.mxu1 %v1659_v41  ;;  %16273 = vst [vmem:[#allocation49_spill] sm:$0xff] %v12950_v29  ;;  %16274 = vst [vmem:[#allocation50_spill] sm:$0xff] %v12952_v40  ;;  %v4527_v41 = vld [vmem:[#allocation13 + $0x810] sm:$0xff] }
 0x31e   :  { %1978 = vmatpush1.msra.mxu1 %v1658_v34  ;;  %1845 = vmatprep.mubr.f32.mxu1 %v16217_v2  ;;  %v1613_v34 = vld [vmem:[#allocation13 + $0x210] sm:$0xff]  ;;  %v4526_v2 = vld [vmem:[#allocation13 + $0x808] sm:$0xff]  ;;  %v1936_v3 = vpop.f32.mrf.mxu0 }
 0x31f   :  { %1979 = vmatprep.subr.mxu1 %v1644_v19  ;;  %4703 = vmatpush1.msra.mxu0 %v4541_v4  ;;  %v4571_v19 = vrot.slane %v12747_v44, 4  ;;  %v16275_v4 = vmov 0.0   ;;  %v12962_v21 = vadd.f32 %v1936_v3, %v12792_v20  ;;  %v1662_v3 = vld [vmem:[#allocation13 + $0x398] sm:$0xff] }
 0x320   :  { %1980 = vmatpush1.msra.mxu1 %v1643_v52  ;;  %11336 = vmatmul.mubr.msk.f32.gmra.mxu0 %vm211_vm1, %v12799_v30  ;;  %v1663_v52 = vld [vmem:[#allocation13 + $0x3a0] sm:$0xff]  ;;  %v12964_v48 = vpop.f32.mrf.mxu0 }
 0x321   :  { %11250 = vmatmul.mubr.msk.f32.gmra.mxu1 %vm211_vm1, %v12596_v12  ;;  %1981 = vmatprep.subr.mxu1 %v1629_v25  ;;  %16276 = vst [vmem:[#allocation51_spill] sm:$0xff] %v12962_v21  ;;  %16277 = vst [vmem:[#allocation52_spill] sm:$0xff] %v12964_v48  ;;  %v4511_v25 = vld [vmem:[#allocation13 + $0x790] sm:$0xff]  ;;  %v12969_v36 = vsel %vm4569_vm15, %v4570_v61, %v4571_v19  ;;  %v4514_v21 = vld [vmem:[#allocation13 + $0x7a8] sm:$0xff] }
 0x322   :  { %1851 = vmatprep.mubr.f32.mxu1 %v16275_v4  ;;  %1982 = vmatpush1.msra.mxu1 %v1628_v17  ;;  %v4573_v17 = vrot.slane %v12764_v53, 4  ;;  %v1942_v20 = vpop.f32.mrf.mxu0  ;;  %v6483_v48 = vld [vmem:[#allocation13 + $0xc80] sm:$0xff] }
 0x323   :  { %1983 = vmatprep.subr.mxu1 %v1614_v28  ;;  %4704 = vmatprep.subr.mxu0 %v4527_v41  ;;  %v12974_v28 = vadd.f32 %v1942_v20, %v12801_v32  ;;  %v4575_v32 = vrot.slane %v12780_v63, 4  ;;  %v1647_v63 = vld [vmem:[#allocation13 + $0x320] sm:$0xff] }
 0x324   :  { %1984 = vmatpush1.msra.mxu1 %v1613_v34  ;;  %4705 = vmatpush1.msra.mxu0 %v4526_v2  ;;  %v4560_v2 = vld [vmem:[#allocation13 + $0x918] sm:$0xff]  ;;  %v12977_v41 = vpop.f32.mrf.mxu0  ;;  %v4546_v34 = vld [vmem:[#allocation13 + $0x8a8] sm:$0xff]  ;;  %v12985_v53 = vsel %vm4569_vm15, %v4571_v19, %v4573_v17 }
 0x325   :  { %11251 = vmatmul.mubr.msk.f32.gmra.mxu1 %vm211_vm1, %v12608_v15  ;;  %2155 = vmatprep.subr.mxu1 %v1663_v52  ;;  %16278 = vst [vmem:[#allocation53_spill] sm:$0xff] %v12974_v28  ;;  %16279 = vst [vmem:[#allocation54_spill] sm:$0xff] %v12977_v41  ;;  %v1648_v52 = vld [vmem:[#allocation13 + $0x328] sm:$0xff]  ;;  %v13000_v19 = vsel %vm4569_vm15, %v4573_v17, %v4575_v32  ;;  %v6498_v28 = vld [vmem:[#allocation13 + $0xcf8] sm:$0xff] }
 0x326   :  { %1857 = vmatprep.mubr.f32.mxu1 %v16275_v4  ;;  %4706 = vmatprep.subr.mxu0 %v4512_v0  ;;  %v1948_v0 = vpop.f32.mrf.mxu0 }
 0x327   :  { %4707 = vmatpush1.msra.mxu0 %v4511_v25  ;;  %4740 = vmatprep.mubr.f32.mxu0 %v16275_v4  ;;  %v12990_v61 = vadd.f32 %v1948_v0, %v12815_v45  ;;  %v4545_v25 = vld [vmem:[#allocation13 + $0x8a0] sm:$0xff]  ;;  %v13005_v45 = vld [vmem:[%s16252_s7 + $0x20] sm:$0xff] }
 0x328   :  { %11345 = vmatmul.mubr.msk.f32.vlgmr.msra.gmra.mxu0 %vm211_vm1, %v12969_v36  ;;  %4878 = vmatprep.subr.mxu0 %v4561_v23  ;;  %v12992_v23 = vpop.f32.mrf.mxu0  ;;  %v4577_v20 = vrot.slane %v13005_v45, 4 }
 0x329   :  { %11252 = vmatmul.mubr.msk.f32.gmra.mxu1 %vm211_vm1, %v12618_v18  ;;  %4746 = vmatprep.mubr.f32.mxu0 %v16275_v4  ;;  %16280 = vst [vmem:[#allocation55_spill] sm:$0xff] %v12990_v61  ;;  %16281 = vst [vmem:[#allocation56_spill] sm:$0xff] %v12992_v23 }
 0x32a   :  { %2017 = vmatprep.mubr.f32.mxu1 %v16275_v4  ;;  %4879 = vmatpush1.msra.mxu0 %v4560_v2  ;;  %v2108_v2 = vpop.f32.mrf.mxu0  ;;  %v13019_v59 = vsel %vm4569_vm15, %v4575_v32, %v4577_v20  ;;  %v4530_v32 = vld [vmem:[#allocation13 + $0x828] sm:$0xff] }
 0x32b   :  { %4880 = vmatprep.subr.mxu0 %v4546_v34  ;;  %v1633_v34 = vld [vmem:[#allocation13 + $0x2b0] sm:$0xff]  ;;  %v13010_v0 = vadd.f32 %v2108_v2, %v12822_v55 }
 0x32c   :  { %11346 = vmatmul.mubr.msk.f32.gmra.mxu0 %vm211_vm1, %v12985_v53  ;;  %v13012_v17 = vpop.f32.mrf.mxu0 }
 0x32d   :  { %11257 = vmatmul.mubr.msk.f32.vlgmr.msra.gmra.mxu1 %vm211_vm1, %v12590_v8  ;;  %4752 = vmatprep.mubr.f32.mxu0 %v16275_v4  ;;  %16282 = vst [vmem:[#allocation57_spill] sm:$0xff] %v13010_v0  ;;  %16283 = vst [vmem:[#allocation58_spill] sm:$0xff] %v13012_v17 }
 0x32e   :  { %2156 = vmatpush1.msra.mxu1 %v1662_v3  ;;  %2023 = vmatprep.mubr.f32.mxu1 %v16275_v4  ;;  %v1617_v3 = vld [vmem:[#allocation13 + $0x230] sm:$0xff]  ;;  %v2114_v55 = vpop.f32.mrf.mxu0 }
 0x32f   :  { %2157 = vmatprep.subr.mxu1 %v1648_v52  ;;  %4881 = vmatpush1.msra.mxu0 %v4545_v25  ;;  %v1666_v52 = vld [vmem:[#allocation13 + $0x3b8] sm:$0xff]  ;;  %v13023_v25 = vadd.f32 %v2114_v55, %v12832_v7  ;;  %v4515_v7 = vld [vmem:[#allocation13 + $0x7b0] sm:$0xff] }
 0x330   :  { %2158 = vmatpush1.msra.mxu1 %v1647_v63  ;;  %11347 = vmatmul.mubr.msk.f32.gmra.mxu0 %vm211_vm1, %v13000_v19  ;;  %v4531_v63 = vld [vmem:[#allocation13 + $0x830] sm:$0xff]  ;;  %v13026_v2 = vpop.f32.mrf.mxu0  ;;  %v4564_v55 = vld [vmem:[#allocation13 + $0x938] sm:$0xff] }
 0x331   :  { %11258 = vmatmul.mubr.msk.f32.gmra.mxu1 %vm211_vm1, %v12596_v12  ;;  %2159 = vmatprep.subr.mxu1 %v1633_v34  ;;  %16284 = vst [vmem:[#allocation59_spill] sm:$0xff] %v13023_v25  ;;  %16285 = vst [vmem:[#allocation60_spill] sm:$0xff] %v13026_v2 }
 0x332   :  { %2029 = vmatprep.mubr.f32.mxu1 %v16275_v4  ;;  %2160 = vmatpush1.msra.mxu1 %v1632_v14  ;;  %v4516_v14 = vld [vmem:[#allocation13 + $0x7b8] sm:$0xff]  ;;  %v2120_v20 = vpop.f32.mrf.mxu0 }
 0x333   :  { %2161 = vmatprep.subr.mxu1 %v1618_v1  ;;  %4758 = vmatprep.mubr.f32.mxu0 %v16275_v4  ;;  %v13034_v1 = vadd.f32 %v2120_v20, %v12842_v13  ;;  %v4550_v13 = vld [vmem:[#allocation13 + $0x8c8] sm:$0xff] }
 0x334   :  { %2162 = vmatpush1.msra.mxu1 %v1617_v3  ;;  %11348 = vmatmul.mubr.msk.f32.gmra.mxu0 %vm211_vm1, %v13019_v59  ;;  %v13037_v34 = vpop.f32.mrf.mxu0  ;;  %v4565_v3 = vld [vmem:[#allocation13 + $0x940] sm:$0xff] }
 0x335   :  { %11259 = vmatmul.mubr.msk.f32.gmra.mxu1 %vm211_vm1, %v12608_v15  ;;  %11762 = vmatprep.subr.mxu1 %v1666_v52  ;;  %16286 = vst [vmem:[#allocation61_spill] sm:$0xff] %v13034_v1  ;;  %16287 = vst [vmem:[#allocation62_spill] sm:$0xff] %v13037_v34 }
 0x336   :  { %2035 = vmatprep.mubr.f32.mxu1 %v16275_v4  ;;  %4882 = vmatprep.subr.mxu0 %v4531_v63  ;;  %v2126_v25 = vpop.f32.mrf.mxu0 }
 0x337   :  { %4883 = vmatpush1.msra.mxu0 %v4530_v32  ;;  %4918 = vmatprep.mubr.f32.mxu0 %v16275_v4  ;;  %v13045_v63 = vadd.f32 %v2126_v25, %v12852_v27  ;;  %v1621_v25 = vld [vmem:[#allocation13 + $0x250] sm:$0xff] }
 0x338   :  { %4884 = vmatprep.subr.mxu0 %v4516_v14  ;;  %v13048_v32 = vpop.f32.mrf.mxu0  ;;  %v1651_v14 = vld [vmem:[#allocation13 + $0x340] sm:$0xff] }
 0x339   :  { %11260 = vmatmul.mubr.msk.f32.gmra.mxu1 %vm211_vm1, %v12618_v18  ;;  %4885 = vmatpush1.msra.mxu0 %v4515_v7  ;;  %16288 = vst [vmem:[#allocation63_spill] sm:$0xff] %v13045_v63  ;;  %16289 = vst [vmem:[#allocation64_spill] sm:$0xff] %v13048_v32  ;;  %v1636_v7 = vld [vmem:[#allocation13 + $0x2c8] sm:$0xff]  ;;  %v5537_v32 = vrot.slane %v12806_v33, 5 }
 0x33a   :  { %2195 = vmatprep.mubr.f32.mxu1 %v16275_v4  ;;  %11353 = vmatmul.mubr.msk.f32.vlgmr.msra.gmra.mxu0 %vm211_vm1, %v12969_v36  ;;  %v2286_v20 = vpop.f32.mrf.mxu0 }
 0x33b   :  { %4924 = vmatprep.mubr.f32.mxu0 %v16275_v4  ;;  %5056 = vmatprep.subr.mxu0 %v4565_v3  ;;  %v13054_v34 = vadd.f32 %v2286_v20, %v12862_v43  ;;  %v2621_v43 = vld [vmem:[#allocation13 + $0x530] sm:$0xff]  ;;  %v4534_v20 = vld [vmem:[#allocation13 + $0x848] sm:$0xff] }
 0x33c   :  { %5057 = vmatpush1.msra.mxu0 %v4564_v55  ;;  %v13058_v27 = vpop.f32.mrf.mxu0  ;;  %v4549_v55 = vld [vmem:[#allocation13 + $0x8c0] sm:$0xff] }
 0x33d   :  { %11265 = vmatmul.mubr.msk.f32.vlgmr.msra.gmra.mxu1 %vm211_vm1, %v12590_v8  ;;  %5058 = vmatprep.subr.mxu0 %v4550_v13  ;;  %16290 = vst [vmem:[#allocation65_spill] sm:$0xff] %v13054_v34  ;;  %16291 = vst [vmem:[#allocation66_spill] sm:$0xff] %v13058_v27  ;;  %v2613_v27 = vld [vmem:[#allocation13 + $0x4f0] sm:$0xff] }
 0x33e   :  { %11763 = vmatpush3.msra.mxu1 %v1666_v52  ;;  %2201 = vmatprep.mubr.f32.mxu1 %v16275_v4  ;;  %v2292_v52 = vpop.f32.mrf.mxu0 }
 0x33f   :  { %11764 = vmatprep.subr.mxu1 %v1651_v14  ;;  %11354 = vmatmul.mubr.msk.f32.gmra.mxu0 %vm211_vm1, %v12985_v53  ;;  %v13065_v3 = vadd.f32 %v2292_v52, %v12870_v54  ;;  %v4520_v54 = vld [vmem:[#allocation13 + $0x7d8] sm:$0xff] }
 0x340   :  { %11765 = vmatpush3.msra.mxu1 %v1651_v14  ;;  %4930 = vmatprep.mubr.f32.mxu0 %v16275_v4  ;;  %v13069_v13 = vpop.f32.mrf.mxu0  ;;  %v4535_v14 = vld [vmem:[#allocation13 + $0x850] sm:$0xff] }
 0x341   :  { %11266 = vmatmul.mubr.msk.f32.gmra.mxu1 %vm211_vm1, %v12596_v12  ;;  %11766 = vmatprep.subr.mxu1 %v1636_v7  ;;  %16292 = vst [vmem:[#allocation67_spill] sm:$0xff] %v13065_v3  ;;  %16293 = vst [vmem:[#allocation68_spill] sm:$0xff] %v13069_v13  ;;  %v6445_v3 = vld [vmem:[#allocation13 + $0xb50] sm:$0xff] }
 0x342   :  { %2207 = vmatprep.mubr.f32.mxu1 %v16275_v4  ;;  %11767 = vmatpush3.msra.mxu1 %v1636_v7  ;;  %v2298_v7 = vpop.f32.mrf.mxu0 }
 0x343   :  { %11768 = vmatprep.subr.mxu1 %v1621_v25  ;;  %11355 = vmatmul.mubr.msk.f32.gmra.mxu0 %vm211_vm1, %v13000_v19  ;;  %v13076_v52 = vadd.f32 %v2298_v7, %v12880_v10  ;;  %v4553_v10 = vld [vmem:[#allocation13 + $0x8e0] sm:$0xff] }
 0x344   :  { %11769 = vmatpush3.msra.mxu1 %v1621_v25  ;;  %4936 = vmatprep.mubr.f32.mxu0 %v16275_v4  ;;  %v4519_v25 = vld [vmem:[#allocation13 + $0x7d0] sm:$0xff]  ;;  %v13080_v13 = vpop.f32.mrf.mxu0 }
 0x345   :  { %11267 = vmatmul.mubr.msk.f32.gmra.mxu1 %vm211_vm1, %v12608_v15  ;;  %2677 = vmatprep.subr.mxu1 %v2621_v43  ;;  %16294 = vst [vmem:[#allocation69_spill] sm:$0xff] %v13076_v52  ;;  %16295 = vst [vmem:[#allocation70_spill] sm:$0xff] %v13080_v13  ;;  %v4568_v43 = vld [vmem:[#allocation13 + $0x958] sm:$0xff]  ;;  %v2579_v13 = vld [vmem:[#allocation13 + $0x3e0] sm:$0xff] }
 0x346   :  { %2213 = vmatprep.mubr.f32.mxu1 %v16275_v4  ;;  %5059 = vmatpush1.msra.mxu0 %v4549_v55  ;;  %v2304_v55 = vpop.f32.mrf.mxu0  ;;  %v6446_v52 = vld [vmem:[#allocation13 + $0xb58] sm:$0xff] }
 0x347   :  { %11356 = vmatmul.mubr.msk.f32.gmra.mxu0 %vm211_vm1, %v13019_v59  ;;  %5060 = vmatprep.subr.mxu0 %v4535_v14  ;;  %v13088_v7 = vadd.f32 %v2304_v55, %v12890_v24  ;;  %v2620_v14 = vld [vmem:[#allocation13 + $0x528] sm:$0xff]  ;;  %v2590_v24 = vld [vmem:[#allocation13 + $0x438] sm:$0xff]  ;;  %v2625_v55 = vld [vmem:[#allocation13 + $0x550] sm:$0xff] }
 0x348   :  { %5061 = vmatpush1.msra.mxu0 %v4534_v20  ;;  %5096 = vmatprep.mubr.f32.mxu0 %v16275_v4  ;;  %v2606_v20 = vld [vmem:[#allocation13 + $0x4b8] sm:$0xff] }
 0x349   :  { %11268 = vmatmul.mubr.msk.f32.gmra.mxu1 %vm211_vm1, %v12618_v18  ;;  %5062 = vmatprep.subr.mxu0 %v4520_v54  ;;  %16296 = vst [vmem:[#allocation71_spill] sm:$0xff] %v13088_v7  ;;  %v2605_v54 = vld [vmem:[#allocation13 + $0x4b0] sm:$0xff]  ;;  %v5496_v7 = vld [vmem:[#allocation13 + $0xa00] sm:$0xff] }
 0x34a   :  { %11770 = vmatprep.mubr.msk.f32.mxu1 %vm211_vm1, %v12590_v8  ;;  %5063 = vmatpush1.msra.mxu0 %v4519_v25  ;;  %v2591_v8 = vld [vmem:[#allocation13 + $0x440] sm:$0xff]  ;;  %v2576_v25 = vld [vmem:[#allocation13 + $0x3c8] sm:$0xff] }
 0x34b   :  { %11361 = vmatmul.mubr.msk.f32.vlgmr.msra.gmra.mxu0 %vm211_vm1, %v12969_v36  ;;  %11804 = vmatprep.subr.mxu0 %v4568_v43 }
 0x34c   :  { %5102 = vmatprep.mubr.f32.mxu0 %v16275_v4  ;;  %11805 = vmatpush3.msra.mxu0 %v4568_v43  ;;  %v2575_v43 = vld [vmem:[#allocation13 + $0x3c0] sm:$0xff] }
 0x34d   :  { %11771 = vmatmul.mubr.msk.f32.vlgmr.msra.gmra.mxu1 %vm211_vm1, %v12596_v12  ;;  %11806 = vmatprep.subr.mxu0 %v4553_v10 }
 0x34e   :  { %2678 = vmatpush1.msra.mxu1 %v2620_v14  ;;  %11773 = vmatprep.mubr.msk.f32.mxu1 %vm211_vm1, %v12608_v15  ;;  %v2624_v14 = vld [vmem:[#allocation13 + $0x548] sm:$0xff] }
 0x34f   :  { %2679 = vmatprep.subr.mxu1 %v2606_v20  ;;  %11362 = vmatmul.mubr.msk.f32.gmra.mxu0 %vm211_vm1, %v12985_v53  ;;  %v2610_v20 = vld [vmem:[#allocation13 + $0x4d8] sm:$0xff] }
 0x350   :  { %2680 = vmatpush1.msra.mxu1 %v2605_v54  ;;  %5108 = vmatprep.mubr.f32.mxu0 %v16275_v4  ;;  %v2609_v54 = vld [vmem:[#allocation13 + $0x4d0] sm:$0xff] }
 0x351   :  { %11774 = vmatmul.mubr.msk.f32.gmra.mxu1 %vm211_vm1, %v12618_v18  ;;  %2681 = vmatprep.subr.mxu1 %v2591_v8  ;;  %v2595_v8 = vld [vmem:[#allocation13 + $0x460] sm:$0xff]  ;;  %v5538_v18 = vrot.slane %v12747_v44, 5 }
 0x352   :  { %2682 = vmatpush1.msra.mxu1 %v2590_v24  ;;  %2717 = vmatprep.mubr.f32.mxu1 %v16275_v4  ;;  %v2594_v24 = vld [vmem:[#allocation13 + $0x458] sm:$0xff]  ;;  %v2583_v44 = vld [vmem:[#allocation13 + $0x400] sm:$0xff] }
 0x353   :  { %2683 = vmatprep.subr.mxu1 %v2576_v25  ;;  %11363 = vmatmul.mubr.msk.f32.gmra.mxu0 %vm211_vm1, %v13000_v19  ;;  %v2580_v25 = vld [vmem:[#allocation13 + $0x3e8] sm:$0xff]  ;;  %v13148_v33 = vsel %vm5536_vm3, %v5537_v32, %v5538_v18  ;;  %v5526_v32 = vld [vmem:[#allocation13 + $0xaf0] sm:$0xff] }
 0x354   :  { %2684 = vmatpush1.msra.mxu1 %v2575_v43  ;;  %5114 = vmatprep.mubr.f32.mxu0 %v16275_v4  ;;  %v4538_v43 = vld [vmem:[#allocation13 + $0x868] sm:$0xff] }
 0x355   :  { %11277 = vmatmul.mubr.msk.f32.vlgmr.msra.gmra.mxu1 %vm211_vm1, %v12675_v58  ;;  %2855 = vmatprep.subr.mxu1 %v2625_v55  ;;  %v2629_v55 = vld [vmem:[#allocation13 + $0x570] sm:$0xff] }
 0x356   :  { %2856 = vmatpush1.msra.mxu1 %v2624_v14  ;;  %2723 = vmatprep.mubr.f32.mxu1 %v16275_v4  ;;  %v4523_v14 = vld [vmem:[#allocation13 + $0x7f0] sm:$0xff] }
 0x357   :  { %2857 = vmatprep.subr.mxu1 %v2610_v20  ;;  %11807 = vmatpush3.msra.mxu0 %v4553_v10  ;;  %v5522_v10 = vld [vmem:[#allocation13 + $0xad0] sm:$0xff]  ;;  %v13116_v20 = vpop.f32.mrf.mxu0 }
 0x358   :  { %2858 = vmatpush1.msra.mxu1 %v2609_v54  ;;  %11364 = vmatmul.mubr.msk.f32.gmra.mxu0 %vm211_vm1, %v13019_v59  ;;  %16297 = vst [vmem:[#allocation72_spill] sm:$0xff] %v13116_v20  ;;  %v5521_v54 = vld [vmem:[#allocation13 + $0xac8] sm:$0xff] }
 0x359   :  { %11278 = vmatmul.mubr.msk.f32.gmra.mxu1 %vm211_vm1, %v12682_v60  ;;  %2859 = vmatprep.subr.mxu1 %v2595_v8  ;;  %v5507_v8 = vld [vmem:[#allocation13 + $0xa58] sm:$0xff] }
 0x35a   :  { %2729 = vmatprep.mubr.f32.mxu1 %v16275_v4  ;;  %2860 = vmatpush1.msra.mxu1 %v2594_v24  ;;  %v13121_v24 = vpop.f32.mrf.mxu0 }
 0x35b   :  { %2861 = vmatprep.subr.mxu1 %v2580_v25  ;;  %11808 = vmatprep.subr.mxu0 %v4538_v43  ;;  %16298 = vst [vmem:[#allocation73_spill] sm:$0xff] %v13121_v24  ;;  %v5492_v25 = vld [vmem:[#allocation13 + $0x9e0] sm:$0xff]  ;;  %v2588_v24 = vld [vmem:[#allocation13 + $0x428] sm:$0xff] }
 0x35c   :  { %2862 = vmatpush1.msra.mxu1 %v2579_v13  ;;  %11809 = vmatpush3.msra.mxu0 %v4538_v43  ;;  %v5506_v13 = vld [vmem:[#allocation13 + $0xa50] sm:$0xff]  ;;  %v13127_v43 = vpop.f32.mrf.mxu0 }
 0x35d   :  { %11279 = vmatmul.mubr.msk.f32.gmra.mxu1 %vm211_vm1, %v12689_v62  ;;  %3033 = vmatprep.subr.mxu1 %v2629_v55  ;;  %16299 = vst [vmem:[#allocation74_spill] sm:$0xff] %v13127_v43  ;;  %v5491_v55 = vld [vmem:[#allocation13 + $0x9d8] sm:$0xff] }
 0x35e   :  { %2735 = vmatprep.mubr.f32.mxu1 %v16275_v4  ;;  %11810 = vmatprep.subr.mxu0 %v4523_v14  ;;  %v13132_v20 = vpop.f32.mrf.mxu0 }
 0x35f   :  { %11811 = vmatpush3.msra.mxu0 %v4523_v14  ;;  %11812 = vmatprep.mubr.msk.f32.mxu0 %vm211_vm1, %v12969_v36  ;;  %v2628_v14 = vld [vmem:[#allocation13 + $0x568] sm:$0xff]  ;;  %16300 = vst [vmem:[#allocation75_spill] sm:$0xff] %v13132_v20 }
 0x360   :  { %11813 = vmatmul.mubr.msk.f32.vlgmr.msra.gmra.mxu0 %vm211_vm1, %v12985_v53  ;;  %5578 = vmatprep.subr.mxu0 %v5522_v10  ;;  %v2614_v10 = vld [vmem:[#allocation13 + $0x4f8] sm:$0xff]  ;;  %v13140_v15 = vpop.f32.mrf.mxu0  ;;  %v2584_v20 = vld [vmem:[#allocation13 + $0x408] sm:$0xff] }
 0x361   :  { %11280 = vmatmul.mubr.msk.f32.gmra.mxu1 %vm211_vm1, %v12696_v9  ;;  %5579 = vmatpush1.msra.mxu0 %v5521_v54  ;;  %v5477_v54 = vld [vmem:[#allocation13 + $0x968] sm:$0xff]  ;;  %16301 = vst [vmem:[#allocation76_spill] sm:$0xff] %v13140_v15  ;;  %v5510_v15 = vld [vmem:[#allocation13 + $0xa70] sm:$0xff] }
 0x362   :  { %2895 = vmatprep.mubr.f32.mxu1 %v16275_v4  ;;  %5580 = vmatprep.subr.mxu0 %v5507_v8  ;;  %v5476_v8 = vld [vmem:[#allocation13 + $0x960] sm:$0xff]  ;;  %v13143_v12 = vpop.f32.mrf.mxu0 }
 0x363   :  { %11815 = vmatprep.mubr.msk.f32.mxu0 %vm211_vm1, %v13000_v19  ;;  %5581 = vmatpush1.msra.mxu0 %v5506_v13  ;;  %v2599_v13 = vld [vmem:[#allocation13 + $0x480] sm:$0xff]  ;;  %16302 = vst [vmem:[#allocation77_spill] sm:$0xff] %v13143_v12  ;;  %v2618_v12 = vld [vmem:[#allocation13 + $0x518] sm:$0xff] }
 0x364   :  { %11816 = vmatmul.mubr.msk.f32.gmra.mxu0 %vm211_vm1, %v13019_v59  ;;  %5582 = vmatprep.subr.mxu0 %v5492_v25  ;;  %v2598_v25 = vld [vmem:[#allocation13 + $0x478] sm:$0xff] }
 0x365   :  { %11285 = vmatmul.mubr.msk.f32.vlgmr.msra.gmra.mxu1 %vm211_vm1, %v12675_v58  ;;  %5583 = vmatpush1.msra.mxu0 %v5491_v55  ;;  %v13153_v55 = vld [vmem:[%s16252_s7 + $0x10] sm:$0xff] }
 0x366   :  { %3034 = vmatpush1.msra.mxu1 %v2628_v14  ;;  %2901 = vmatprep.mubr.f32.mxu1 %v16275_v4  ;;  %v5540_v14 = vrot.slane %v13153_v55, 5  ;;  %v6507_v1 = vrot.slane %v13153_v55, 6 }
 0x367   :  { %3035 = vmatprep.subr.mxu1 %v2614_v10  ;;  %5584 = vmatprep.subr.mxu0 %v5477_v54  ;;  %v13156_v10 = vpop.f32.mrf.mxu0 }
 0x368   :  { %3036 = vmatpush1.msra.mxu1 %v2613_v27  ;;  %5585 = vmatpush1.msra.mxu0 %v5476_v8  ;;  %16303 = vst [vmem:[#allocation78_spill] sm:$0xff] %v13156_v10  ;;  %v2633_v27 = vld [vmem:[#allocation13 + $0x590] sm:$0xff]  ;;  %v13167_v8 = vsel %vm5536_vm3, %v5538_v18, %v5540_v14  ;;  %v5511_v18 = vld [vmem:[#allocation13 + $0xa78] sm:$0xff] }
 0x369   :  { %11286 = vmatmul.mubr.msk.f32.gmra.mxu1 %vm211_vm1, %v12682_v60  ;;  %3037 = vmatprep.subr.mxu1 %v2599_v13  ;;  %v13160_v54 = vpop.f32.mrf.mxu0 }
 0x36a   :  { %2907 = vmatprep.mubr.f32.mxu1 %v16275_v4  ;;  %3038 = vmatpush1.msra.mxu1 %v2598_v25  ;;  %16304 = vst [vmem:[#allocation79_spill] sm:$0xff] %v13160_v54 }
 0x36b   :  { %3039 = vmatprep.subr.mxu1 %v2584_v20  ;;  %5618 = vmatprep.mubr.f32.mxu0 %v16275_v4  ;;  %v13172_v20 = vld [vmem:[%s16252_s7 + $0x18] sm:$0xff]  ;;  %v13175_v25 = vpop.f32.mrf.mxu0 }
 0x36c   :  { %3040 = vmatpush1.msra.mxu1 %v2583_v44  ;;  %11373 = vmatmul.mubr.msk.f32.vlgmr.msra.gmra.mxu0 %vm211_vm1, %v13148_v33  ;;  %v5542_v13 = vrot.slane %v13172_v20, 5  ;;  %16305 = vst [vmem:[#allocation80_spill] sm:$0xff] %v13175_v25  ;;  %v5525_v44 = vld [vmem:[#allocation13 + $0xae8] sm:$0xff]  ;;  %v5544_v25 = vrot.slane %v13005_v45, 5 }
 0x36d   :  { %11287 = vmatmul.mubr.msk.f32.gmra.mxu1 %vm211_vm1, %v12689_v62  ;;  %3211 = vmatprep.subr.mxu1 %v2633_v27  ;;  %v13179_v54 = vpop.f32.mrf.mxu0 }
 0x36e   :  { %2913 = vmatprep.mubr.f32.mxu1 %v16275_v4  ;;  %5624 = vmatprep.mubr.f32.mxu0 %v16275_v4  ;;  %16306 = vst [vmem:[#allocation81_spill] sm:$0xff] %v13179_v54  ;;  %v13187_v27 = vsel %vm5536_vm3, %v5540_v14, %v5542_v13  ;;  %v2617_v14 = vld [vmem:[#allocation13 + $0x510] sm:$0xff] }
 0x36f   :  { %5756 = vmatprep.subr.mxu0 %v5526_v32  ;;  %v13190_v10 = vpop.f32.mrf.mxu0  ;;  %v2632_v32 = vld [vmem:[#allocation13 + $0x588] sm:$0xff] }
 0x370   :  { %11374 = vmatmul.mubr.msk.f32.gmra.mxu0 %vm211_vm1, %v13167_v8  ;;  %16307 = vst [vmem:[#allocation82_spill] sm:$0xff] %v13190_v10  ;;  %v13201_v10 = vsel %vm5536_vm3, %v5542_v13, %v5544_v25  ;;  %v2587_v13 = vld [vmem:[#allocation13 + $0x420] sm:$0xff]  ;;  %v5495_v25 = vld [vmem:[#allocation13 + $0x9f8] sm:$0xff] }
 0x371   :  { %11288 = vmatmul.mubr.msk.f32.gmra.mxu1 %vm211_vm1, %v12696_v9  ;;  %5630 = vmatprep.mubr.f32.mxu0 %v16275_v4  ;;  %v13193_v54 = vpop.f32.mrf.mxu0 }
 0x372   :  { %3073 = vmatprep.mubr.f32.mxu1 %v16275_v4  ;;  %5757 = vmatpush1.msra.mxu0 %v5525_v44  ;;  %16308 = vst [vmem:[#allocation83_spill] sm:$0xff] %v13193_v54  ;;  %v2603_v44 = vld [vmem:[#allocation13 + $0x4a0] sm:$0xff] }
 0x373   :  { %5758 = vmatprep.subr.mxu0 %v5511_v18  ;;  %v13203_v43 = vpop.f32.mrf.mxu0  ;;  %v2602_v18 = vld [vmem:[#allocation13 + $0x498] sm:$0xff] }
 0x374   :  { %11375 = vmatmul.mubr.msk.f32.gmra.mxu0 %vm211_vm1, %v13187_v27  ;;  %16309 = vst [vmem:[#allocation84_spill] sm:$0xff] %v13203_v43 }
 0x375   :  { %11293 = vmatmul.mubr.msk.f32.vlgmr.msra.gmra.mxu1 %vm211_vm1, %v12675_v58  ;;  %5636 = vmatprep.mubr.f32.mxu0 %v16275_v4  ;;  %v13206_v54 = vpop.f32.mrf.mxu0 }
 0x376   :  { %3212 = vmatpush1.msra.mxu1 %v2632_v32  ;;  %3079 = vmatprep.mubr.f32.mxu1 %v16275_v4  ;;  %16310 = vst [vmem:[#allocation85_spill] sm:$0xff] %v13206_v54  ;;  %v5480_v54 = vld [vmem:[#allocation13 + $0x980] sm:$0xff] }
 0x377   :  { %3213 = vmatprep.subr.mxu1 %v2618_v12  ;;  %5759 = vmatpush1.msra.mxu0 %v5510_v15  ;;  %v13212_v32 = vpop.f32.mrf.mxu0  ;;  %v3590_v12 = vld [vmem:[#allocation13 + $0x720] sm:$0xff]  ;;  %v5481_v15 = vld [vmem:[#allocation13 + $0x988] sm:$0xff] }
 0x378   :  { %3214 = vmatpush1.msra.mxu1 %v2617_v14  ;;  %11376 = vmatmul.mubr.msk.f32.gmra.mxu0 %vm211_vm1, %v13201_v10  ;;  %16311 = vst [vmem:[#allocation86_spill] sm:$0xff] %v13212_v32 }
 0x379   :  { %11294 = vmatmul.mubr.msk.f32.gmra.mxu1 %vm211_vm1, %v12682_v60  ;;  %3215 = vmatprep.subr.mxu1 %v2603_v44  ;;  %v13215_v14 = vpop.f32.mrf.mxu0  ;;  %v5530_v44 = vld [vmem:[#allocation13 + $0xb10] sm:$0xff] }
 0x37a   :  { %3085 = vmatprep.mubr.f32.mxu1 %v16275_v4  ;;  %3216 = vmatpush1.msra.mxu1 %v2602_v18  ;;  %16312 = vst [vmem:[#allocation87_spill] sm:$0xff] %v13215_v14  ;;  %v5515_v18 = vld [vmem:[#allocation13 + $0xa98] sm:$0xff]  ;;  %v6460_v14 = vld [vmem:[#allocation13 + $0xbc8] sm:$0xff] }
 0x37b   :  { %3217 = vmatprep.subr.mxu1 %v2588_v24  ;;  %5760 = vmatprep.subr.mxu0 %v5496_v7  ;;  %v13219_v43 = vpop.f32.mrf.mxu0  ;;  %v5529_v7 = vld [vmem:[#allocation13 + $0xb08] sm:$0xff] }
 0x37c   :  { %3218 = vmatpush1.msra.mxu1 %v2587_v13  ;;  %5761 = vmatpush1.msra.mxu0 %v5495_v25  ;;  %16313 = vst [vmem:[#allocation88_spill] sm:$0xff] %v13219_v43 }
 0x37d   :  { %11295 = vmatmul.mubr.msk.f32.gmra.mxu1 %vm211_vm1, %v12689_v62  ;;  %3733 = vmatprep.subr.mxu1 %v3590_v12  ;;  %v13223_v24 = vpop.f32.mrf.mxu0  ;;  %v3575_v12 = vld [vmem:[#allocation13 + $0x6a8] sm:$0xff] }
 0x37e   :  { %3091 = vmatprep.mubr.f32.mxu1 %v16275_v4  ;;  %5762 = vmatprep.subr.mxu0 %v5481_v15  ;;  %16314 = vst [vmem:[#allocation89_spill] sm:$0xff] %v13223_v24  ;;  %v5514_v15 = vld [vmem:[#allocation13 + $0xa90] sm:$0xff] }
 0x37f   :  { %5763 = vmatpush1.msra.mxu0 %v5480_v54  ;;  %5796 = vmatprep.mubr.f32.mxu0 %v16275_v4  ;;  %v13230_v13 = vpop.f32.mrf.mxu0  ;;  %v3589_v54 = vld [vmem:[#allocation13 + $0x718] sm:$0xff] }
 0x380   :  { %11381 = vmatmul.mubr.msk.f32.vlgmr.msra.gmra.mxu0 %vm211_vm1, %v13148_v33  ;;  %5934 = vmatprep.subr.mxu0 %v5530_v44  ;;  %16315 = vst [vmem:[#allocation90_spill] sm:$0xff] %v13230_v13  ;;  %v3574_v44 = vld [vmem:[#allocation13 + $0x6a0] sm:$0xff]  ;;  %v3545_v13 = vld [vmem:[#allocation13 + $0x5b8] sm:$0xff] }
 0x381   :  { %11296 = vmatmul.mubr.msk.f32.gmra.mxu1 %vm211_vm1, %v12696_v9  ;;  %5802 = vmatprep.mubr.f32.mxu0 %v16275_v4  ;;  %v13233_v25 = vpop.f32.mrf.mxu0 }
 0x382   :  { %3251 = vmatprep.mubr.f32.mxu1 %v16275_v4  ;;  %5935 = vmatpush1.msra.mxu0 %v5529_v7  ;;  %16316 = vst [vmem:[#allocation91_spill] sm:$0xff] %v13233_v25  ;;  %v3560_v7 = vld [vmem:[#allocation13 + $0x630] sm:$0xff] }
 0x383   :  { %5936 = vmatprep.subr.mxu0 %v5515_v18  ;;  %v13240_v24 = vpop.f32.mrf.mxu0  ;;  %v3559_v18 = vld [vmem:[#allocation13 + $0x628] sm:$0xff] }
 0x384   :  { %11382 = vmatmul.mubr.msk.f32.gmra.mxu0 %vm211_vm1, %v13167_v8  ;;  %16317 = vst [vmem:[#allocation92_spill] sm:$0xff] %v13240_v24 }
 0x385   :  { %11301 = vmatmul.mubr.msk.f32.vlgmr.msra.gmra.mxu1 %vm211_vm1, %v12675_v58  ;;  %5808 = vmatprep.mubr.f32.mxu0 %v16275_v4  ;;  %v13243_v25 = vpop.f32.mrf.mxu0  ;;  %v3544_v58 = vld [vmem:[#allocation13 + $0x5b0] sm:$0xff] }
 0x386   :  { %3734 = vmatpush1.msra.mxu1 %v3589_v54  ;;  %3257 = vmatprep.mubr.f32.mxu1 %v16275_v4  ;;  %16318 = vst [vmem:[#allocation93_spill] sm:$0xff] %v13243_v25  ;;  %v3594_v54 = vld [vmem:[#allocation13 + $0x740] sm:$0xff] }
 0x387   :  { %3735 = vmatprep.subr.mxu1 %v3575_v12  ;;  %5937 = vmatpush1.msra.mxu0 %v5514_v15  ;;  %v13249_v24 = vpop.f32.mrf.mxu0  ;;  %v5500_v12 = vld [vmem:[#allocation13 + $0xa20] sm:$0xff] }
 0x388   :  { %3736 = vmatpush1.msra.mxu1 %v3574_v44  ;;  %11383 = vmatmul.mubr.msk.f32.gmra.mxu0 %vm211_vm1, %v13187_v27  ;;  %16319 = vst [vmem:[#allocation94_spill] sm:$0xff] %v13249_v24  ;;  %v5499_v44 = vld [vmem:[#allocation13 + $0xa18] sm:$0xff]  ;;  %v5488_v24 = vld [vmem:[#allocation13 + $0x9c0] sm:$0xff] }
 0x389   :  { %11302 = vmatmul.mubr.msk.f32.gmra.mxu1 %vm211_vm1, %v12682_v60  ;;  %3737 = vmatprep.subr.mxu1 %v3560_v7  ;;  %v13253_v15 = vpop.f32.mrf.mxu0  ;;  %v5485_v60 = vld [vmem:[#allocation13 + $0x9a8] sm:$0xff] }
 0x38a   :  { %3263 = vmatprep.mubr.f32.mxu1 %v16275_v4  ;;  %3738 = vmatpush1.msra.mxu1 %v3559_v18  ;;  %16320 = vst [vmem:[#allocation95_spill] sm:$0xff] %v13253_v15 }
 0x38b   :  { %3739 = vmatprep.subr.mxu1 %v3545_v13  ;;  %5814 = vmatprep.mubr.f32.mxu0 %v16275_v4  ;;  %v13259_v7 = vpop.f32.mrf.mxu0  ;;  %v5484_v13 = vld [vmem:[#allocation13 + $0x9a0] sm:$0xff] }
 0x38c   :  { %3740 = vmatpush1.msra.mxu1 %v3544_v58  ;;  %11384 = vmatmul.mubr.msk.f32.gmra.mxu0 %vm211_vm1, %v13201_v10  ;;  %16321 = vst [vmem:[#allocation96_spill] sm:$0xff] %v13259_v7  ;;  %v5534_v58 = vld [vmem:[#allocation13 + $0xb30] sm:$0xff]  ;;  %v3563_v7 = vld [vmem:[#allocation13 + $0x648] sm:$0xff] }
 0x38d   :  { %11303 = vmatmul.mubr.msk.f32.gmra.mxu1 %vm211_vm1, %v12689_v62  ;;  %3911 = vmatprep.subr.mxu1 %v3594_v54  ;;  %v13263_v18 = vpop.f32.mrf.mxu0  ;;  %v5533_v62 = vld [vmem:[#allocation13 + $0xb28] sm:$0xff] }
 0x38e   :  { %3269 = vmatprep.mubr.f32.mxu1 %v16275_v4  ;;  %5938 = vmatprep.subr.mxu0 %v5500_v12  ;;  %16322 = vst [vmem:[#allocation97_spill] sm:$0xff] %v13263_v18  ;;  %v5519_v12 = vld [vmem:[#allocation13 + $0xab8] sm:$0xff] }
 0x38f   :  { %5939 = vmatpush1.msra.mxu0 %v5499_v44  ;;  %5974 = vmatprep.mubr.f32.mxu0 %v16275_v4  ;;  %v13267_v54 = vpop.f32.mrf.mxu0  ;;  %v3593_v44 = vld [vmem:[#allocation13 + $0x738] sm:$0xff] }
 0x390   :  { %5940 = vmatprep.subr.mxu0 %v5485_v60  ;;  %16323 = vst [vmem:[#allocation98_spill] sm:$0xff] %v13267_v54  ;;  %v3579_v60 = vld [vmem:[#allocation13 + $0x6c8] sm:$0xff]  ;;  %v3564_v54 = vld [vmem:[#allocation13 + $0x650] sm:$0xff] }
 0x391   :  { %11304 = vmatmul.mubr.msk.f32.gmra.mxu1 %vm211_vm1, %v12696_v9  ;;  %5941 = vmatpush1.msra.mxu0 %v5484_v13  ;;  %v13273_v18 = vpop.f32.mrf.mxu0  ;;  %v3578_v9 = vld [vmem:[#allocation13 + $0x6c0] sm:$0xff] }
 0x392   :  { %3773 = vmatprep.mubr.f32.mxu1 %v16275_v4  ;;  %11389 = vmatmul.mubr.msk.f32.vlgmr.msra.gmra.mxu0 %vm211_vm1, %v13148_v33  ;;  %16324 = vst [vmem:[#allocation99_spill] sm:$0xff] %v13273_v18  ;;  %v5504_v18 = vld [vmem:[#allocation13 + $0xa40] sm:$0xff] }
 0x393   :  { %5980 = vmatprep.mubr.f32.mxu0 %v16275_v4  ;;  %6112 = vmatprep.subr.mxu0 %v5534_v58  ;;  %v13277_v13 = vpop.f32.mrf.mxu0 }
 0x394   :  { %6113 = vmatpush1.msra.mxu0 %v5533_v62  ;;  %16325 = vst [vmem:[#allocation100_spill] sm:$0xff] %v13277_v13  ;;  %v3549_v62 = vld [vmem:[#allocation13 + $0x5d8] sm:$0xff] }
 0x395   :  { %11313 = vmatmul.mubr.msk.f32.vlgmr.msra.gmra.mxu1 %vm211_vm1, %v12753_v50  ;;  %6114 = vmatprep.subr.mxu0 %v5519_v12  ;;  %v13282_v58 = vpop.f32.mrf.mxu0  ;;  %v3548_v12 = vld [vmem:[#allocation13 + $0x5d0] sm:$0xff]  ;;  %v11211_v13 = vld [vmem:[#allocation12] ss:$0 sm:$0xff] }
 0x396   :  { %3912 = vmatpush1.msra.mxu1 %v3593_v44  ;;  %3779 = vmatprep.mubr.f32.mxu1 %v16275_v4  ;;  %16326 = vst [vmem:[#allocation101_spill] sm:$0xff] %v13282_v58 }
 0x397   :  { %3913 = vmatprep.subr.mxu1 %v3579_v60  ;;  %11390 = vmatmul.mubr.msk.f32.gmra.mxu0 %vm211_vm1, %v13167_v8  ;;  %v13287_v44 = vpop.f32.mrf.mxu0  ;;  %v3598_v60 = vld [vmem:[#allocation13 + $0x760] sm:$0xff] }
 0x398   :  { %3914 = vmatpush1.msra.mxu1 %v3578_v9  ;;  %5986 = vmatprep.mubr.f32.mxu0 %v16275_v4  ;;  %16327 = vst [vmem:[#allocation102_spill] sm:$0xff] %v13287_v44  ;;  %v5518_v9 = vld [vmem:[#allocation13 + $0xab0] sm:$0xff] }
 0x399   :  { %11314 = vmatmul.mubr.msk.f32.gmra.mxu1 %vm211_vm1, %v12770_v46  ;;  %3915 = vmatprep.subr.mxu1 %v3564_v54  ;;  %v13292_v58 = vpop.f32.mrf.mxu0 }
 0x39a   :  { %3785 = vmatprep.mubr.f32.mxu1 %v16275_v4  ;;  %3916 = vmatpush1.msra.mxu1 %v3563_v7  ;;  %16328 = vst [vmem:[#allocation103_spill] sm:$0xff] %v13292_v58  ;;  %v5503_v7 = vld [vmem:[#allocation13 + $0xa38] sm:$0xff] }
 0x39b   :  { %3917 = vmatprep.subr.mxu1 %v3549_v62  ;;  %11391 = vmatmul.mubr.msk.f32.gmra.mxu0 %vm211_vm1, %v13187_v27  ;;  %v13297_v44 = vpop.f32.mrf.mxu0 }
 0x39c   :  { %3918 = vmatpush1.msra.mxu1 %v3548_v12  ;;  %5992 = vmatprep.mubr.f32.mxu0 %v16275_v4  ;;  %16329 = vst [vmem:[#allocation104_spill] sm:$0xff] %v13297_v44  ;;  %v5489_v12 = vld [vmem:[#allocation13 + $0x9c8] sm:$0xff] }
 0x39d   :  { %11315 = vmatmul.mubr.msk.f32.gmra.mxu1 %vm211_vm1, %v12788_v6  ;;  %v690_v54 = vpop.f32.mrf.mxu1  ;;  %4089 = vmatprep.subr.mxu1 %v3598_v60  ;;  %v13307_v60 = vpop.f32.mrf.mxu0 }
 0x39e   :  { %v13299_v62 = vadd.f32 %v11211_v13, %v690_v54  ;;  %3791 = vmatprep.mubr.f32.mxu1 %v16275_v4  ;;  %6115 = vmatpush1.msra.mxu0 %v5518_v9  ;;  %16331 = vst [vmem:[#allocation106_spill] sm:$0xff] %v13307_v60  ;;  %v6491_v13 = vld [vmem:[#allocation13 + $0xcc0] sm:$0xff]  ;;  %v6490_v9 = vld [vmem:[#allocation13 + $0xcb8] sm:$0xff]  ;;  %v3567_v60 = vld [vmem:[#allocation13 + $0x668] sm:$0xff] }
 0x39f   :  { %v11747_v15 = vpop.f32.mrf.mxu1  ;;  %11392 = vmatmul.mubr.msk.f32.gmra.mxu0 %vm211_vm1, %v13201_v10  ;;  %6116 = vmatprep.subr.mxu0 %v5504_v18  ;;  %v3583_v18 = vld [vmem:[#allocation13 + $0x6e8] sm:$0xff]  ;;  %v13314_v54 = vpop.f32.mrf.mxu0 }
 0x3a0   :  { %16330 = vst [vmem:[#allocation105_spill] sm:$0xff] %v13299_v62  ;;  %v695_v58 = vsel %vm694_vm4, %v13299_v62, -inf  ;;  %6117 = vmatpush1.msra.mxu0 %v5503_v7  ;;  %6152 = vmatprep.mubr.f32.mxu0 %v16275_v4  ;;  %v3597_v15 = vld [vmem:[#allocation13 + $0x758] sm:$0xff]  ;;  %16332 = vst [vmem:[#allocation107_spill] sm:$0xff] %v13314_v54 }
 0x3a1   :  { %11316 = vmatmul.mubr.msk.f32.gmra.mxu1 %vm211_vm1, %v12799_v30  ;;  %696 = vmax.xlane.f32.xlu1 %v695_v58  ;;  %v3582_v58 = vld [vmem:[#allocation13 + $0x6e0] sm:$0xff]  ;;  %v13326_v54 = vpop.f32.mrf.mxu0 }
 0x3a2   :  { %3951 = vmatprep.mubr.f32.mxu1 %v16275_v4  ;;  %6118 = vmatprep.subr.mxu0 %v5489_v12  ;;  %16333 = vst [vmem:[#allocation108_spill] sm:$0xff] %v13326_v54 }
 0x3a3   :  { %6119 = vmatpush1.msra.mxu0 %v5488_v24  ;;  %v3568_v24 = vld [vmem:[#allocation13 + $0x670] sm:$0xff]  ;;  %v13338_v54 = vpop.f32.mrf.mxu0 }
 0x3a4   :  { %11397 = vmatmul.mubr.msk.f32.vlgmr.msra.gmra.mxu0 %vm211_vm1, %v13148_v33  ;;  %6634 = vmatprep.subr.mxu0 %v6491_v13  ;;  %v3553_v13 = vld [vmem:[#allocation13 + $0x5f8] sm:$0xff]  ;;  %16334 = vst [vmem:[#allocation109_spill] sm:$0xff] %v13338_v54 }
 0x3a5   :  { %v13316_v7 = vpop.f32.mrf.mxu1  ;;  %11321 = vmatmul.mubr.msk.f32.vlgmr.msra.gmra.mxu1 %vm211_vm1, %v12753_v50  ;;  %6158 = vmatprep.mubr.f32.mxu0 %v16275_v4  ;;  %v13362_v34 = vpop.f32.mrf.mxu0 }
 0x3a6   :  { %4090 = vmatpush1.msra.mxu1 %v3597_v15  ;;  %3957 = vmatprep.mubr.f32.mxu1 %v16275_v4  ;;  %v3552_v15 = vld [vmem:[#allocation13 + $0x5f0] sm:$0xff]  ;;  %16335 = vst [vmem:[#allocation110_spill] sm:$0xff] %v13362_v34  ;;  %v3586_v34 = vld [vmem:[#allocation13 + $0x700] sm:$0xff] }
 0x3a7   :  { %v13322_v12 = vpop.f32.mrf.mxu1  ;;  %4091 = vmatprep.subr.mxu1 %v3583_v18  ;;  %6635 = vmatpush1.msra.mxu0 %v6490_v9  ;;  %v3601_v18 = vld [vmem:[#allocation13 + $0x778] sm:$0xff]  ;;  %v6476_v9 = vld [vmem:[#allocation13 + $0xc48] sm:$0xff]  ;;  %v13373_v2 = vpop.f32.mrf.mxu0 }
 0x3a8   :  { %4092 = vmatpush1.msra.mxu1 %v3582_v58  ;;  %11398 = vmatmul.mubr.msk.f32.gmra.mxu0 %vm211_vm1, %v13167_v8  ;;  %v6475_v58 = vld [vmem:[#allocation13 + $0xc40] sm:$0xff]  ;;  %16336 = vst [vmem:[#allocation111_spill] sm:$0xff] %v13373_v2  ;;  %v3571_v2 = vld [vmem:[#allocation13 + $0x688] sm:$0xff] }
 0x3a9   :  { %v13328_v44 = vpop.f32.mrf.mxu1  ;;  %11322 = vmatmul.mubr.msk.f32.gmra.mxu1 %vm211_vm1, %v12770_v46  ;;  %4093 = vmatprep.subr.mxu1 %v3568_v24  ;;  %v13347_v24 = vld [vmem:[%s16252_s7] sm:$0xff] }
 0x3aa   :  { %3963 = vmatprep.mubr.f32.mxu1 %v16275_v4  ;;  %4094 = vmatpush1.msra.mxu1 %v3567_v60  ;;  %v6461_v60 = vld [vmem:[#allocation13 + $0xbd0] sm:$0xff] }
 0x3ab   :  { %v13333_v25 = vpop.f32.mrf.mxu1  ;;  %4095 = vmatprep.subr.mxu1 %v3553_v13  ;;  %6164 = vmatprep.mubr.f32.mxu0 %v16275_v4  ;;  %v6504_v13 = vrot.slane %v13347_v24, 6 }
 0x3ac   :  { %4096 = vmatpush1.msra.mxu1 %v3552_v15  ;;  %11399 = vmatmul.mubr.msk.f32.gmra.mxu0 %vm211_vm1, %v13187_v27  ;;  %v13353_v15 = vld [vmem:[%s16252_s7 + $0x8] sm:$0xff] }
 0x3ad   :  { %v13340_v43 = vpop.f32.mrf.mxu1  ;;  %11323 = vmatmul.mubr.msk.f32.gmra.mxu1 %vm211_vm1, %v12788_v6  ;;  %11790 = vmatprep.subr.mxu1 %v3601_v18  ;;  %v6505_v54 = vrot.slane %v13353_v15, 6 }
 0x3ae   :  { %3969 = vmatprep.mubr.f32.mxu1 %v16275_v4  ;;  %6636 = vmatprep.subr.mxu0 %v6476_v9 }
 0x3af   :  { %v13357_v32 = vpop.f32.mrf.mxu1  ;;  %6170 = vmatprep.mubr.f32.mxu0 %v16275_v4  ;;  %6637 = vmatpush1.msra.mxu0 %v6475_v58  ;;  %v13369_v9 = vsel %vm6503_vm5, %v6504_v13, %v6505_v54  ;;  %v6495_v58 = vld [vmem:[#allocation13 + $0xce0] sm:$0xff]  ;;  %v13380_v13 = vpop.f32.mrf.mxu0 }
 0x3b0   :  { %11400 = vmatmul.mubr.msk.f32.gmra.mxu0 %vm211_vm1, %v13201_v10  ;;  %6638 = vmatprep.subr.mxu0 %v6461_v60  ;;  %16337 = vst [vmem:[#allocation112_spill] sm:$0xff] %v13380_v13  ;;  %v3556_v13 = vld [vmem:[#allocation13 + $0x610] sm:$0xff] }
 0x3b1   :  { %v13364_v63 = vpop.f32.mrf.mxu1  ;;  %11324 = vmatmul.mubr.msk.f32.gmra.mxu1 %vm211_vm1, %v12799_v30  ;;  %6639 = vmatpush1.msra.mxu0 %v6460_v14  ;;  %v6494_v14 = vld [vmem:[#allocation13 + $0xcd8] sm:$0xff] }
 0x3b2   :  { %4129 = vmatprep.mubr.f32.mxu1 %v16275_v4  ;;  %6640 = vmatprep.subr.mxu0 %v6446_v52  ;;  %v13388_v52 = vsel %vm6503_vm5, %v6505_v54, %v6507_v1 }
 0x3b3   :  { %v13375_v60 = vpop.f32.mrf.mxu1  ;;  %6641 = vmatpush1.msra.mxu0 %v6445_v3  ;;  %6674 = vmatprep.mubr.f32.mxu0 %v16275_v4  ;;  %v6509_v3 = vrot.slane %v13172_v20, 6 }
 0x3b4   :  { %11409 = vmatmul.mubr.msk.f32.vlgmr.msra.gmra.mxu0 %vm211_vm1, %v13369_v9  ;;  %6812 = vmatprep.subr.mxu0 %v6495_v58  ;;  %v13392_v58 = vpop.f32.mrf.mxu0 }
 0x3b5   :  { %v13382_v55 = vpop.f32.mrf.mxu1  ;;  %11329 = vmatmul.mubr.msk.f32.vlgmr.msra.gmra.mxu1 %vm211_vm1, %v12753_v50  ;;  %6680 = vmatprep.mubr.f32.mxu0 %v16275_v4  ;;  %16338 = vst [vmem:[#allocation113_spill] sm:$0xff] %v13392_v58  ;;  %v13405_v20 = vsel %vm6503_vm5, %v6507_v1, %v6509_v3  ;;  %v6479_v1 = vld [vmem:[#allocation13 + $0xc60] sm:$0xff] }
 0x3b6   :  { %11791 = vmatpush3.msra.mxu1 %v3601_v18  ;;  %4135 = vmatprep.mubr.f32.mxu1 %v16275_v4  ;;  %v13398_v17 = vpop.f32.mrf.mxu0  ;;  %v6511_v18 = vrot.slane %v13005_v45, 6 }
 0x3b7   :  { %v13394_v0 = vpop.f32.mrf.mxu1  ;;  %11792 = vmatprep.subr.mxu1 %v3586_v34  ;;  %6813 = vmatpush1.msra.mxu0 %v6494_v14  ;;  %16339 = vst [vmem:[#allocation114_spill] sm:$0xff] %v13398_v17  ;;  %v6480_v17 = vld [vmem:[#allocation13 + $0xc68] sm:$0xff] }
 0x3b8   :  { %11793 = vmatpush3.msra.mxu1 %v3586_v34  ;;  %11410 = vmatmul.mubr.msk.f32.gmra.mxu0 %vm211_vm1, %v13388_v52  ;;  %v4555_v34 = vld [vmem:[#allocation13 + $0x8f0] sm:$0xff]  ;;  %v13409_v14 = vpop.f32.mrf.mxu0 }
 0x3b9   :  { %v13400_v54 = vpop.f32.mrf.mxu1  ;;  %11330 = vmatmul.mubr.msk.f32.gmra.mxu1 %vm211_vm1, %v12770_v46  ;;  %11794 = vmatprep.subr.mxu1 %v3571_v2  ;;  %16340 = vst [vmem:[#allocation115_spill] sm:$0xff] %v13409_v14  ;;  %v6465_v14 = vld [vmem:[#allocation13 + $0xbf0] sm:$0xff] }
 0x3ba   :  { %4141 = vmatprep.mubr.f32.mxu1 %v16275_v4  ;;  %11795 = vmatpush3.msra.mxu1 %v3571_v2  ;;  %v13416_v61 = vpop.f32.mrf.mxu0  ;;  %v13423_v2 = vsel %vm6503_vm5, %v6509_v3, %v6511_v18 }
 0x3bb   :  { %v13411_v58 = vpop.f32.mrf.mxu1  ;;  %11796 = vmatprep.subr.mxu1 %v3556_v13  ;;  %6686 = vmatprep.mubr.f32.mxu0 %v16275_v4  ;;  %16341 = vst [vmem:[#allocation116_spill] sm:$0xff] %v13416_v61  ;;  %v6450_v61 = vld [vmem:[#allocation13 + $0xb78] sm:$0xff] }
 0x3bc   :  { %11797 = vmatpush3.msra.mxu1 %v3556_v13  ;;  %11411 = vmatmul.mubr.msk.f32.gmra.mxu0 %vm211_vm1, %v13405_v20  ;;  %v6464_v13 = vld [vmem:[#allocation13 + $0xbe8] sm:$0xff]  ;;  %v13426_v23 = vpop.f32.mrf.mxu0 }
 0x3bd   :  { %v13418_v45 = vpop.f32.mrf.mxu1  ;;  %11331 = vmatmul.mubr.msk.f32.gmra.mxu1 %vm211_vm1, %v12788_v6  ;;  %4611 = vmatprep.subr.mxu1 %v4555_v34  ;;  %16342 = vst [vmem:[#allocation117_spill] sm:$0xff] %v13426_v23  ;;  %v6449_v34 = vld [vmem:[#allocation13 + $0xb70] sm:$0xff]  ;;  %v4554_v23 = vld [vmem:[#allocation13 + $0x8e8] sm:$0xff] }
 0x3be   :  { %4147 = vmatprep.mubr.f32.mxu1 %v16275_v4  ;;  %6814 = vmatprep.subr.mxu0 %v6480_v17  ;;  %v6499_v17 = vld [vmem:[#allocation13 + $0xd00] sm:$0xff]  ;;  %v13439_v18 = vpop.f32.mrf.mxu0 }
 0x3bf   :  { %v13428_v51 = vpop.f32.mrf.mxu1  ;;  %6692 = vmatprep.mubr.f32.mxu0 %v16275_v4  ;;  %6815 = vmatpush1.msra.mxu0 %v6479_v1  ;;  %16343 = vst [vmem:[#allocation118_spill] sm:$0xff] %v13439_v18 }
 0x3c0   :  { %11412 = vmatmul.mubr.msk.f32.gmra.mxu0 %vm211_vm1, %v13423_v2  ;;  %6816 = vmatprep.subr.mxu0 %v6465_v14  ;;  %v4540_v14 = vld [vmem:[#allocation13 + $0x878] sm:$0xff] }
 0x3c1   :  { %v13433_v3 = vpop.f32.mrf.mxu1  ;;  %11332 = vmatmul.mubr.msk.f32.gmra.mxu1 %vm211_vm1, %v12799_v30  ;;  %6817 = vmatpush1.msra.mxu0 %v6464_v13  ;;  %v13446_v13 = vpop.f32.mrf.mxu0 }
 0x3c2   :  { %11798 = vmatprep.mubr.msk.f32.mxu1 %vm211_vm1, %v12753_v50  ;;  %6818 = vmatprep.subr.mxu0 %v6450_v61  ;;  %16344 = vst [vmem:[#allocation119_spill] sm:$0xff] %v13446_v13  ;;  %v4539_v50 = vld [vmem:[#allocation13 + $0x870] sm:$0xff]  ;;  %v4525_v61 = vld [vmem:[#allocation13 + $0x800] sm:$0xff]  ;;  %v4510_v13 = vld [vmem:[#allocation13 + $0x788] sm:$0xff] }
 0x3c3   :  { %v13441_v1 = vpop.f32.mrf.mxu1  ;;  %6819 = vmatpush1.msra.mxu0 %v6449_v34  ;;  %6852 = vmatprep.mubr.f32.mxu0 %v16275_v4  ;;  %v13457_v18 = vpop.f32.mrf.mxu0 }
 0x3c4   :  { %11417 = vmatmul.mubr.msk.f32.vlgmr.msra.gmra.mxu0 %vm211_vm1, %v13369_v9  ;;  %6990 = vmatprep.subr.mxu0 %v6499_v17  ;;  %v4524_v17 = vld [vmem:[#allocation13 + $0x7f8] sm:$0xff]  ;;  %16345 = vst [vmem:[#allocation120_spill] sm:$0xff] %v13457_v18 }
 0x3c5   :  { %v13448_v41 = vpop.f32.mrf.mxu1  ;;  %11799 = vmatmul.mubr.msk.f32.vlgmr.msra.gmra.mxu1 %vm211_vm1, %v12770_v46  ;;  %6858 = vmatprep.mubr.f32.mxu0 %v16275_v4 }
 0x3c6   :  { %4612 = vmatpush1.msra.mxu1 %v4554_v23  ;;  %11801 = vmatprep.mubr.msk.f32.mxu1 %vm211_vm1, %v12788_v6  ;;  %v4509_v6 = vld [vmem:[#allocation13 + $0x780] sm:$0xff]  ;;  %v13465_v23 = vpop.f32.mrf.mxu0 }
 0x3c7   :  { %v13455_v34 = vpop.f32.mrf.mxu1  ;;  %4613 = vmatprep.subr.mxu1 %v4540_v14  ;;  %6991 = vmatpush1.msra.mxu0 %v6498_v28  ;;  %16346 = vst [vmem:[#allocation121_spill] sm:$0xff] %v13465_v23  ;;  %v4559_v28 = vld [vmem:[#allocation13 + $0x910] sm:$0xff] }
 0x3c8   :  { %4614 = vmatpush1.msra.mxu1 %v4539_v50  ;;  %11418 = vmatmul.mubr.msk.f32.gmra.mxu0 %vm211_vm1, %v13388_v52  ;;  %v4558_v50 = vld [vmem:[#allocation13 + $0x908] sm:$0xff]  ;;  %v13471_v18 = vpop.f32.mrf.mxu0 }
 0x3c9   :  { %v13461_v46 = vpop.f32.mrf.mxu1  ;;  %11802 = vmatmul.mubr.msk.f32.gmra.mxu1 %vm211_vm1, %v12799_v30  ;;  %4615 = vmatprep.subr.mxu1 %v4525_v61  ;;  %16347 = vst [vmem:[#allocation122_spill] sm:$0xff] %v13471_v18  ;;  %v6484_v30 = vld [vmem:[#allocation13 + $0xc88] sm:$0xff] }
 0x3ca   :  { %4616 = vmatpush1.msra.mxu1 %v4524_v17  ;;  %4651 = vmatprep.mubr.f32.mxu1 %v16275_v4  ;;  %v4543_v17 = vld [vmem:[#allocation13 + $0x890] sm:$0xff]  ;;  %v13479_v23 = vpop.f32.mrf.mxu0 }
 0x3cb   :  { %v13468_v14 = vpop.f32.mrf.mxu1  ;;  %4617 = vmatprep.subr.mxu1 %v4510_v13  ;;  %6864 = vmatprep.mubr.f32.mxu0 %v16275_v4  ;;  %16348 = vst [vmem:[#allocation123_spill] sm:$0xff] %v13479_v23  ;;  %v4529_v13 = vld [vmem:[#allocation13 + $0x820] sm:$0xff] }
 0x3cc   :  { %4618 = vmatpush1.msra.mxu1 %v4509_v6  ;;  %11419 = vmatmul.mubr.msk.f32.gmra.mxu0 %vm211_vm1, %v13405_v20  ;;  %v4528_v6 = vld [vmem:[#allocation13 + $0x818] sm:$0xff]  ;;  %v13484_v62 = vpop.f32.mrf.mxu0 }
 0x3cd   :  { %v13475_v61 = vpop.f32.mrf.mxu1  ;;  %11341 = vmatmul.mubr.msk.f32.vlgmr.msra.gmra.mxu1 %vm211_vm1, %v12969_v36  ;;  %4789 = vmatprep.subr.mxu1 %v4559_v28  ;;  %16349 = vst [vmem:[#allocation124_spill] sm:$0xff] %v13484_v62 }
 0x3ce   :  { %4790 = vmatpush1.msra.mxu1 %v4558_v50  ;;  %4657 = vmatprep.mubr.f32.mxu1 %v16275_v4  ;;  %v4513_v50 = vld [vmem:[#allocation13 + $0x7a0] sm:$0xff]  ;;  %v13491_v23 = vpop.f32.mrf.mxu0 }
 0x3cf   :  { %v13482_v18 = vpop.f32.mrf.mxu1  ;;  %4791 = vmatprep.subr.mxu1 %v4544_v39  ;;  %6992 = vmatprep.subr.mxu0 %v6484_v30  ;;  %16350 = vst [vmem:[#allocation125_spill] sm:$0xff] %v13491_v23  ;;  %v4563_v39 = vld [vmem:[#allocation13 + $0x930] sm:$0xff] }
 0x3d0   :  { %4792 = vmatpush1.msra.mxu1 %v4543_v17  ;;  %6870 = vmatprep.mubr.f32.mxu0 %v16275_v4  ;;  %v6469_v17 = vld [vmem:[#allocation13 + $0xc10] sm:$0xff] }
 0x3d1   :  { %v13487_v28 = vpop.f32.mrf.mxu1  ;;  %11342 = vmatmul.mubr.msk.f32.gmra.mxu1 %vm211_vm1, %v12985_v53  ;;  %4793 = vmatprep.subr.mxu1 %v4529_v13  ;;  %v13496_v62 = vpop.f32.mrf.mxu0 }
 0x3d2   :  { %4663 = vmatprep.mubr.f32.mxu1 %v16275_v4  ;;  %4794 = vmatpush1.msra.mxu1 %v4528_v6  ;;  %16351 = vst [vmem:[#allocation126_spill] sm:$0xff] %v13496_v62  ;;  %v6454_v6 = vld [vmem:[#allocation13 + $0xb98] sm:$0xff] }
 0x3d3   :  { %v13494_v30 = vpop.f32.mrf.mxu1  ;;  %4795 = vmatprep.subr.mxu1 %v4514_v21  ;;  %6993 = vmatpush1.msra.mxu0 %v6483_v48  ;;  %v13504_v23 = vpop.f32.mrf.mxu0  ;;  %v6453_v48 = vld [vmem:[#allocation13 + $0xb90] sm:$0xff]  ;;  %v6502_v62 = vld [vmem:[#allocation13 + $0xd18] sm:$0xff] }
 0x3d4   :  { %4796 = vmatpush1.msra.mxu1 %v4513_v50  ;;  %11420 = vmatmul.mubr.msk.f32.gmra.mxu0 %vm211_vm1, %v13423_v2  ;;  %16352 = vst [vmem:[#allocation127_spill] sm:$0xff] %v13504_v23  ;;  %v4562_v23 = vld [vmem:[#allocation13 + $0x928] sm:$0xff] }
 0x3d5   :  { %v13500_v13 = vpop.f32.mrf.mxu1  ;;  %11343 = vmatmul.mubr.msk.f32.gmra.mxu1 %vm211_vm1, %v13000_v19  ;;  %4967 = vmatprep.subr.mxu1 %v4563_v39  ;;  %v13510_v50 = vpop.f32.mrf.mxu0 }
 0x3d6   :  { %4669 = vmatprep.mubr.f32.mxu1 %v16275_v4  ;;  %6994 = vmatprep.subr.mxu0 %v6469_v17  ;;  %16353 = vst [vmem:[#allocation128_spill] sm:$0xff] %v13510_v50  ;;  %v4548_v50 = vld [vmem:[#allocation13 + $0x8b8] sm:$0xff] }
 0x3d7   :  { %v13507_v21 = vpop.f32.mrf.mxu1  ;;  %6995 = vmatpush1.msra.mxu0 %v6468_v26  ;;  %7030 = vmatprep.mubr.f32.mxu0 %v16275_v4  ;;  %v13516_v39 = vpop.f32.mrf.mxu0  ;;  %v6487_v26 = vld [vmem:[#allocation13 + $0xca0] sm:$0xff] }
 0x3d8   :  { %6996 = vmatprep.subr.mxu0 %v6454_v6  ;;  %16354 = vst [vmem:[#allocation129_spill] sm:$0xff] %v13516_v39 }
 0x3d9   :  { %v13512_v29 = vpop.f32.mrf.mxu1  ;;  %11344 = vmatmul.mubr.msk.f32.gmra.mxu1 %vm211_vm1, %v13019_v59  ;;  %6997 = vmatpush1.msra.mxu0 %v6453_v48  ;;  %v4547_v48 = vld [vmem:[#allocation13 + $0x8b0] sm:$0xff] }
 0x3da   :  { %4829 = vmatprep.mubr.f32.mxu1 %v16275_v4  ;;  %11425 = vmatmul.mubr.msk.f32.vlgmr.msra.gmra.mxu0 %vm211_vm1, %v13369_v9 }
 0x3db   :  { %v13521_v17 = vpop.f32.mrf.mxu1  ;;  %7036 = vmatprep.mubr.f32.mxu0 %v16275_v4  ;;  %11832 = vmatprep.subr.mxu0 %v6502_v62  ;;  %v13524_v6 = vpop.f32.mrf.mxu0 }
 0x3dc   :  { %16355 = vst [vmem:[#allocation130_spill] sm:$0xff] %v13524_v6  ;;  %11833 = vmatpush3.msra.mxu0 %v6502_v62  ;;  %v4532_v6 = vld [vmem:[#allocation13 + $0x838] sm:$0xff] }
 0x3dd   :  { %v1841_v40 = vpop.f32.mrf.mxu1  ;;  %11349 = vmatmul.mubr.msk.f32.vlgmr.msra.gmra.mxu1 %vm211_vm1, %v12969_v36  ;;  %11834 = vmatprep.subr.mxu0 %v6487_v26  ;;  %v13528_v39 = vpop.f32.mrf.mxu0 }
 0x3de   :  { %16356 = vst [vmem:[#allocation131_spill] sm:$0xff] %v13528_v39  ;;  %v13531_v5 = vadd.f32 %v1841_v40, %v13316_v7  ;;  %4968 = vmatpush1.msra.mxu1 %v4562_v23  ;;  %4835 = vmatprep.mubr.f32.mxu1 %v16275_v4  ;;  %v4517_v7 = vld [vmem:[#allocation13 + $0x7c0] sm:$0xff] }
 0x3df   :  { %v1843_v42 = vpop.f32.mrf.mxu1  ;;  %4969 = vmatprep.subr.mxu1 %v4548_v50  ;;  %11426 = vmatmul.mubr.msk.f32.gmra.mxu0 %vm211_vm1, %v13388_v52 }
 0x3e0   :  { %v13537_v62 = vadd.f32 %v1843_v42, %v13322_v12  ;;  %4970 = vmatpush1.msra.mxu1 %v4547_v48  ;;  %7042 = vmatprep.mubr.f32.mxu0 %v16275_v4  ;;  %v13540_v39 = vpop.f32.mrf.mxu0  ;;  %v4567_v42 = vld [vmem:[#allocation13 + $0x950] sm:$0xff] }
 0x3e1   :  { %16357 = vst [vmem:[#allocation132_spill] sm:$0xff] %v13540_v39  ;;  %v1847_v40 = vpop.f32.mrf.mxu1  ;;  %11350 = vmatmul.mubr.msk.f32.gmra.mxu1 %vm211_vm1, %v12985_v53  ;;  %4971 = vmatprep.subr.mxu1 %v4533_v38  ;;  %v6472_v38 = vld [vmem:[#allocation13 + $0xc28] sm:$0xff] }
 0x3e2   :  { %v13545_v23 = vadd.f32 %v1847_v40, %v13328_v44  ;;  %4841 = vmatprep.mubr.f32.mxu1 %v16275_v4  ;;  %4972 = vmatpush1.msra.mxu1 %v4532_v6  ;;  %v13554_v48 = vpop.f32.mrf.mxu0 }
 0x3e3   :  { %v1849_v12 = vpop.f32.mrf.mxu1  ;;  %4973 = vmatprep.subr.mxu1 %v4518_v56  ;;  %11427 = vmatmul.mubr.msk.f32.gmra.mxu0 %vm211_vm1, %v13405_v20  ;;  %16358 = vst [vmem:[#allocation133_spill] sm:$0xff] %v13554_v48  ;;  %v6457_v56 = vld [vmem:[#allocation13 + $0xbb0] sm:$0xff]  ;;  %v4552_v48 = vld [vmem:[#allocation13 + $0x8d8] sm:$0xff] }
 0x3e4   :  { %v13551_v50 = vadd.f32 %v1849_v12, %v13333_v25  ;;  %4974 = vmatpush1.msra.mxu1 %v4517_v7  ;;  %7048 = vmatprep.mubr.f32.mxu0 %v16275_v4  ;;  %v7456_v7 = vld [vmem:[#allocation13 + $0xe90] sm:$0xff] }
 0x3e5   :  { %v1853_v44 = vpop.f32.mrf.mxu1  ;;  %11351 = vmatmul.mubr.msk.f32.gmra.mxu1 %vm211_vm1, %v13000_v19  ;;  %5145 = vmatprep.subr.mxu1 %v4567_v42 }
 0x3e6   :  { %v13559_v6 = vadd.f32 %v1853_v44, %v13340_v43  ;;  %4847 = vmatprep.mubr.f32.mxu1 %v16275_v4  ;;  %11835 = vmatpush3.msra.mxu0 %v6487_v26  ;;  %v7455_v26 = vld [vmem:[#allocation13 + $0xe88] sm:$0xff] }
 0x3e7   :  { %v1855_v25 = vpop.f32.mrf.mxu1  ;;  %11428 = vmatmul.mubr.msk.f32.gmra.mxu0 %vm211_vm1, %v13423_v2  ;;  %11836 = vmatprep.subr.mxu0 %v6472_v38 }
 0x3e8   :  { %v13565_v40 = vadd.f32 %v1855_v25, %v13357_v32  ;;  %11837 = vmatpush3.msra.mxu0 %v6472_v38  ;;  %11840 = vmatprep.mubr.msk.f32.mxu0 %vm211_vm1, %v13369_v9  ;;  %v13569_v42 = vpop.f32.mrf.mxu0  ;;  %v7441_v32 = vld [vmem:[#allocation13 + $0xe18] sm:$0xff]  ;;  %v4566_v25 = vld [vmem:[#allocation13 + $0x948] sm:$0xff] }
 0x3e9   :  { %16359 = vst [vmem:[#allocation134_spill] sm:$0xff] %v13569_v42  ;;  %v1859_v43 = vpop.f32.mrf.mxu1  ;;  %11352 = vmatmul.mubr.msk.f32.gmra.mxu1 %vm211_vm1, %v13019_v59  ;;  %11838 = vmatprep.subr.mxu0 %v6457_v56 }
 0x3ea   :  { %v13574_v12 = vadd.f32 %v1859_v43, %v13364_v63  ;;  %5007 = vmatprep.mubr.f32.mxu1 %v16275_v4  ;;  %11839 = vmatpush3.msra.mxu0 %v6457_v56  ;;  %v13577_v38 = vpop.f32.mrf.mxu0  ;;  %v7440_v63 = vld [vmem:[#allocation13 + $0xe10] sm:$0xff] }
 0x3eb   :  { %16360 = vst [vmem:[#allocation135_spill] sm:$0xff] %v13577_v38  ;;  %v1861_v44 = vpop.f32.mrf.mxu1  ;;  %11841 = vmatmul.mubr.msk.f32.vlgmr.msra.gmra.mxu0 %vm211_vm1, %v13388_v52  ;;  %7511 = vmatprep.subr.mxu0 %v7456_v7  ;;  %v4551_v38 = vld [vmem:[#allocation13 + $0x8d0] sm:$0xff] }
 0x3ec   :  { %v13582_v42 = vadd.f32 %v1861_v44, %v13375_v60  ;;  %7512 = vmatpush1.msra.mxu0 %v7455_v26  ;;  %11843 = vmatprep.mubr.msk.f32.mxu0 %vm211_vm1, %v13405_v20  ;;  %v13586_v43 = vpop.f32.mrf.mxu0  ;;  %v4537_v60 = vld [vmem:[#allocation13 + $0x860] sm:$0xff]  ;;  %v4536_v44 = vld [vmem:[#allocation13 + $0x858] sm:$0xff] }
 0x3ed   :  { %16362 = vst [vmem:[#allocation137_spill] sm:$0xff] %v13586_v43  ;;  %v2019_v56 = vpop.f32.mrf.mxu1  ;;  %11357 = vmatmul.mubr.msk.f32.vlgmr.msra.gmra.mxu1 %vm211_vm1, %v12969_v36  ;;  %7513 = vmatprep.subr.mxu0 %v7441_v32 }
 0x3ee   :  { %16361 = vst [vmem:[#allocation136_spill] sm:$0xff] %v13582_v42  ;;  %v13591_v39 = vadd.f32 %v2019_v56, %v13382_v55  ;;  %5146 = vmatpush1.msra.mxu1 %v4566_v25  ;;  %5013 = vmatprep.mubr.f32.mxu1 %v16275_v4  ;;  %v13594_v7 = vpop.f32.mrf.mxu0  ;;  %v4522_v42 = vld [vmem:[#allocation13 + $0x7e8] sm:$0xff]  ;;  %v7426_v55 = vld [vmem:[#allocation13 + $0xda0] sm:$0xff]  ;;  %v7470_v25 = vrot.slane %v13347_v24, 7  ;;  %v7471_v56 = vrot.slane %v13353_v15, 7 }
 0x3ef   :  { %16363 = vst [vmem:[#allocation138_spill] sm:$0xff] %v13594_v7  ;;  %v2021_v26 = vpop.f32.mrf.mxu1  ;;  %5147 = vmatprep.subr.mxu1 %v4552_v48  ;;  %7514 = vmatpush1.msra.mxu0 %v7440_v63  ;;  %v4521_v48 = vld [vmem:[#allocation13 + $0x7e0] sm:$0xff]  ;;  %v7411_v24 = vld [vmem:[#allocation13 + $0xd28] sm:$0xff] }
 0x3f0   :  { %v13597_v43 = vadd.f32 %v2021_v26, %v13394_v0  ;;  %5148 = vmatpush1.msra.mxu1 %v4551_v38  ;;  %11844 = vmatmul.mubr.msk.f32.gmra.mxu0 %vm211_vm1, %v13423_v2  ;;  %v13601_v32 = vpop.f32.mrf.mxu0  ;;  %v7425_v0 = vld [vmem:[#allocation13 + $0xd98] sm:$0xff]  ;;  %v5524_v63 = vld [vmem:[#allocation13 + $0xae0] sm:$0xff] }
 0x3f1   :  { %16365 = vst [vmem:[#allocation140_spill] sm:$0xff] %v13601_v32  ;;  %v2025_v7 = vpop.f32.mrf.mxu1  ;;  %11358 = vmatmul.mubr.msk.f32.gmra.mxu1 %vm211_vm1, %v12985_v53  ;;  %5149 = vmatprep.subr.mxu1 %v4537_v60  ;;  %v7410_v60 = vld [vmem:[#allocation13 + $0xd20] sm:$0xff] }
 0x3f2   :  { %16364 = vst [vmem:[#allocation139_spill] sm:$0xff] %v13597_v43  ;;  %v13608_v38 = vadd.f32 %v2025_v7, %v13400_v54  ;;  %5019 = vmatprep.mubr.f32.mxu1 %v16275_v4  ;;  %5150 = vmatpush1.msra.mxu1 %v4536_v44  ;;  %v13611_v26 = vpop.f32.mrf.mxu0  ;;  %v13619_v54 = vsel %vm365_vm2, %v7470_v25, %v7471_v56  ;;  %v13624_v7 = vld [vmem:[%s16252_s7 + $0x10] sm:$0xff] }
 0x3f3   :  { %16366 = vst [vmem:[#allocation141_spill] sm:$0xff] %v13611_v26  ;;  %v2027_v32 = vpop.f32.mrf.mxu1  ;;  %5151 = vmatprep.subr.mxu1 %v4522_v42  ;;  %7515 = vmatprep.subr.mxu0 %v7426_v55  ;;  %v7473_v42 = vrot.slane %v13624_v7, 7  ;;  %v7444_v26 = vld [vmem:[#allocation13 + $0xe30] sm:$0xff] }
 0x3f4   :  { %v13614_v15 = vadd.f32 %v2027_v32, %v13411_v58  ;;  %5152 = vmatpush1.msra.mxu1 %v4521_v48  ;;  %7516 = vmatpush1.msra.mxu0 %v7425_v0  ;;  %v13616_v43 = vpop.f32.mrf.mxu0  ;;  %v7460_v58 = vld [vmem:[#allocation13 + $0xeb0] sm:$0xff]  ;;  %v7459_v48 = vld [vmem:[#allocation13 + $0xea8] sm:$0xff] }
 0x3f5   :  { %16367 = vst [vmem:[#allocation142_spill] sm:$0xff] %v13616_v43  ;;  %v2031_v44 = vpop.f32.mrf.mxu1  ;;  %11359 = vmatmul.mubr.msk.f32.gmra.mxu1 %vm211_vm1, %v13000_v19  ;;  %5667 = vmatprep.subr.mxu1 %v5524_v63  ;;  %v7445_v63 = vld [vmem:[#allocation13 + $0xe38] sm:$0xff]  ;;  %v5509_v43 = vld [vmem:[#allocation13 + $0xa68] sm:$0xff] }
 0x3f6   :  { %v13630_v55 = vadd.f32 %v2031_v44, %v13418_v45  ;;  %5025 = vmatprep.mubr.f32.mxu1 %v16275_v4  ;;  %7517 = vmatprep.subr.mxu0 %v7411_v24  ;;  %v13633_v32 = vpop.f32.mrf.mxu0  ;;  %v13642_v45 = vsel %vm365_vm2, %v7471_v56, %v7473_v42  ;;  %v13647_v24 = vld [vmem:[%s16252_s7 + $0x18] sm:$0xff] }
 0x3f7   :  { %16368 = vst [vmem:[#allocation143_spill] sm:$0xff] %v13633_v32  ;;  %v2033_v25 = vpop.f32.mrf.mxu1  ;;  %7518 = vmatpush1.msra.mxu0 %v7410_v60  ;;  %7551 = vmatprep.mubr.f32.mxu0 %v16275_v4  ;;  %v7475_v60 = vrot.slane %v13647_v24, 7 }
 0x3f8   :  { %v13637_v0 = vadd.f32 %v2033_v25, %v13428_v51  ;;  %11437 = vmatmul.mubr.msk.f32.vlgmr.msra.gmra.mxu0 %vm211_vm1, %v13619_v54  ;;  %7689 = vmatprep.subr.mxu0 %v7460_v58  ;;  %v5523_v25 = vld [vmem:[#allocation13 + $0xad8] sm:$0xff] }
 0x3f9   :  { %v2037_v44 = vpop.f32.mrf.mxu1  ;;  %11360 = vmatmul.mubr.msk.f32.gmra.mxu1 %vm211_vm1, %v13019_v59  ;;  %7557 = vmatprep.mubr.f32.mxu0 %v16275_v4 }
 0x3fa   :  { %16369 = vst [vmem:[#allocation144_spill] sm:$0xff] %v13637_v0  ;;  %v13654_v51 = vadd.f32 %v2037_v44, %v13433_v3  ;;  %5185 = vmatprep.mubr.f32.mxu1 %v16275_v4  ;;  %7690 = vmatpush1.msra.mxu0 %v7459_v48  ;;  %v13657_v56 = vpop.f32.mrf.mxu0  ;;  %v13667_v3 = vsel %vm365_vm2, %v7473_v42, %v7475_v60  ;;  %v13672_v48 = vld [vmem:[%s16252_s7 + $0x20] sm:$0xff] }
 0x3fb   :  { %16371 = vst [vmem:[#allocation146_spill] sm:$0xff] %v13657_v56  ;;  %v2039_v58 = vpop.f32.mrf.mxu1  ;;  %7691 = vmatprep.subr.mxu0 %v7445_v63  ;;  %v7477_v63 = vrot.slane %v13672_v48, 7  ;;  %v5494_v42 = vld [vmem:[#allocation13 + $0x9f0] sm:$0xff]  ;;  %v5493_v56 = vld [vmem:[#allocation13 + $0x9e8] sm:$0xff] }
 0x3fc   :  { %16370 = vst [vmem:[#allocation145_spill] sm:$0xff] %v13654_v51  ;;  %v13660_v32 = vadd.f32 %v2039_v58, %v13441_v1  ;;  %11438 = vmatmul.mubr.msk.f32.gmra.mxu0 %vm211_vm1, %v13642_v45  ;;  %v13664_v0 = vpop.f32.mrf.mxu0  ;;  %v5508_v1 = vld [vmem:[#allocation13 + $0xa60] sm:$0xff] }
 0x3fd   :  { %16373 = vst [vmem:[#allocation148_spill] sm:$0xff] %v13664_v0  ;;  %v2197_v44 = vpop.f32.mrf.mxu1  ;;  %11365 = vmatmul.mubr.msk.f32.vlgmr.msra.gmra.mxu1 %vm211_vm1, %v12969_v36  ;;  %7563 = vmatprep.mubr.f32.mxu0 %v16275_v4  ;;  %v5479_v36 = vld [vmem:[#allocation13 + $0x978] sm:$0xff] }
 0x3fe   :  { %16372 = vst [vmem:[#allocation147_spill] sm:$0xff] %v13660_v32  ;;  %v13679_v58 = vadd.f32 %v2197_v44, %v13448_v41  ;;  %5668 = vmatpush1.msra.mxu1 %v5523_v25  ;;  %5191 = vmatprep.mubr.f32.mxu1 %v16275_v4  ;;  %v13690_v41 = vsel %vm365_vm2, %v7475_v60, %v7477_v63  ;;  %v7430_v60 = vld [vmem:[#allocation13 + $0xdc0] sm:$0xff] }
 0x3ff   :  { %v2199_v0 = vpop.f32.mrf.mxu1  ;;  %5669 = vmatprep.subr.mxu1 %v5509_v43  ;;  %7692 = vmatpush1.msra.mxu0 %v7444_v26  ;;  %v13682_v32 = vpop.f32.mrf.mxu0  ;;  %v5478_v43 = vld [vmem:[#allocation13 + $0x970] sm:$0xff] }
 0x400   :  { %16374 = vst [vmem:[#allocation149_spill] sm:$0xff] %v13682_v32  ;;  %v13685_v51 = vadd.f32 %v2199_v0, %v13455_v34  ;;  %5670 = vmatpush1.msra.mxu1 %v5508_v1  ;;  %11439 = vmatmul.mubr.msk.f32.gmra.mxu0 %vm211_vm1, %v13667_v3  ;;  %v5528_v34 = vld [vmem:[#allocation13 + $0xb00] sm:$0xff]  ;;  %v16402_v32 = vld [vmem:[#allocation51_spill] sm:$0xff] }
 0x401   :  { %v2203_v25 = vpop.f32.mrf.mxu1  ;;  %11366 = vmatmul.mubr.msk.f32.gmra.mxu1 %vm211_vm1, %v12985_v53  ;;  %5671 = vmatprep.subr.mxu1 %v5494_v42  ;;  %v13694_v26 = vpop.f32.mrf.mxu0 }
 0x402   :  { %16375 = vst [vmem:[#allocation150_spill] sm:$0xff] %v13694_v26  ;;  %v13697_v44 = vadd.f32 %v2203_v25, %v13461_v46  ;;  %5197 = vmatprep.mubr.f32.mxu1 %v16275_v4  ;;  %5672 = vmatpush1.msra.mxu1 %v5493_v56  ;;  %v7429_v46 = vld [vmem:[#allocation13 + $0xdb8] sm:$0xff]  ;;  %v7415_v56 = vld [vmem:[#allocation13 + $0xd48] sm:$0xff] }
 0x403   :  { %v2205_v0 = vpop.f32.mrf.mxu1  ;;  %5673 = vmatprep.subr.mxu1 %v5479_v36  ;;  %7569 = vmatprep.mubr.f32.mxu0 %v16275_v4  ;;  %v13701_v63 = vpop.f32.mrf.mxu0 }
 0x404   :  { %16376 = vst [vmem:[#allocation151_spill] sm:$0xff] %v13701_v63  ;;  %v13704_v53 = vadd.f32 %v2205_v0, %v13468_v14  ;;  %5674 = vmatpush1.msra.mxu1 %v5478_v43  ;;  %11440 = vmatmul.mubr.msk.f32.gmra.mxu0 %vm211_vm1, %v13690_v41  ;;  %v7414_v14 = vld [vmem:[#allocation13 + $0xd40] sm:$0xff] }
 0x405   :  { %v2209_v1 = vpop.f32.mrf.mxu1  ;;  %11367 = vmatmul.mubr.msk.f32.gmra.mxu1 %vm211_vm1, %v13000_v19  ;;  %5845 = vmatprep.subr.mxu1 %v5528_v34  ;;  %v13710_v42 = vpop.f32.mrf.mxu0  ;;  %v7464_v19 = vld [vmem:[#allocation13 + $0xed0] sm:$0xff]  ;;  %v8424_v63 = vld [vmem:[#allocation13 + $0x1080] sm:$0xff] }
 0x406   :  { %16377 = vst [vmem:[#allocation152_spill] sm:$0xff] %v13710_v42  ;;  %v13713_v36 = vadd.f32 %v2209_v1, %v13475_v61  ;;  %5203 = vmatprep.mubr.f32.mxu1 %v16275_v4  ;;  %7693 = vmatprep.subr.mxu0 %v7430_v60  ;;  %v7463_v61 = vld [vmem:[#allocation13 + $0xec8] sm:$0xff] }
 0x407   :  { %v2211_v25 = vpop.f32.mrf.mxu1  ;;  %7694 = vmatpush1.msra.mxu0 %v7429_v46  ;;  %7729 = vmatprep.mubr.f32.mxu0 %v16275_v4  ;;  %v13717_v43 = vpop.f32.mrf.mxu0 }
 0x408   :  { %16378 = vst [vmem:[#allocation153_spill] sm:$0xff] %v13717_v43  ;;  %v13720_v0 = vadd.f32 %v2211_v25, %v13482_v18  ;;  %7695 = vmatprep.subr.mxu0 %v7415_v56  ;;  %v7449_v18 = vld [vmem:[#allocation13 + $0xe58] sm:$0xff] }
 0x409   :  { %v2215_v34 = vpop.f32.mrf.mxu1  ;;  %11368 = vmatmul.mubr.msk.f32.gmra.mxu1 %vm211_vm1, %v13019_v59  ;;  %7696 = vmatpush1.msra.mxu0 %v7414_v14  ;;  %v13724_v1 = vpop.f32.mrf.mxu0  ;;  %v5527_v56 = vld [vmem:[#allocation13 + $0xaf8] sm:$0xff]  ;;  %v5513_v14 = vld [vmem:[#allocation13 + $0xa88] sm:$0xff] }
 0x40a   :  { %16379 = vst [vmem:[#allocation154_spill] sm:$0xff] %v13724_v1  ;;  %v13727_v60 = vadd.f32 %v2215_v34, %v13487_v28  ;;  %5707 = vmatprep.mubr.f32.mxu1 %v16275_v4  ;;  %11445 = vmatmul.mubr.msk.f32.vlgmr.msra.gmra.mxu0 %vm211_vm1, %v13619_v54  ;;  %v5512_v34 = vld [vmem:[#allocation13 + $0xa80] sm:$0xff] }
 0x40b   :  { %v2217_v46 = vpop.f32.mrf.mxu1  ;;  %7735 = vmatprep.mubr.f32.mxu0 %v16275_v4  ;;  %7867 = vmatprep.subr.mxu0 %v7464_v19  ;;  %v13733_v25 = vpop.f32.mrf.mxu0  ;;  %v5498_v19 = vld [vmem:[#allocation13 + $0xa10] sm:$0xff] }
 0x40c   :  { %16380 = vst [vmem:[#allocation155_spill] sm:$0xff] %v13733_v25  ;;  %v13736_v59 = vadd.f32 %v2217_v46, %v13494_v30  ;;  %7868 = vmatpush1.msra.mxu0 %v7463_v61  ;;  %v5497_v30 = vld [vmem:[#allocation13 + $0xa08] sm:$0xff] }
 0x40d   :  { %v11772_v28 = vpop.f32.mrf.mxu1  ;;  %11377 = vmatmul.mubr.msk.f32.vlgmr.msra.gmra.mxu1 %vm211_vm1, %v13148_v33  ;;  %7869 = vmatprep.subr.mxu0 %v7449_v18  ;;  %v13740_v1 = vpop.f32.mrf.mxu0  ;;  %v5483_v18 = vld [vmem:[#allocation13 + $0x998] sm:$0xff] }
 0x40e   :  { %16381 = vst [vmem:[#allocation156_spill] sm:$0xff] %v13740_v1  ;;  %v13743_v43 = vadd.f32 %v11772_v28, %v13500_v13  ;;  %5846 = vmatpush1.msra.mxu1 %v5527_v56  ;;  %5713 = vmatprep.mubr.f32.mxu1 %v16275_v4  ;;  %v5482_v56 = vld [vmem:[#allocation13 + $0x990] sm:$0xff]  ;;  %v16396_v1 = vld [vmem:[#allocation49_spill] sm:$0xff] }
 0x40f   :  { %v2375_v25 = vpop.f32.mrf.mxu1  ;;  %5847 = vmatprep.subr.mxu1 %v5513_v14  ;;  %11446 = vmatmul.mubr.msk.f32.gmra.mxu0 %vm211_vm1, %v13642_v45  ;;  %v13748_v61 = vpop.f32.mrf.mxu0 }
 0x410   :  { %16382 = vst [vmem:[#allocation157_spill] sm:$0xff] %v13748_v61  ;;  %v13751_v46 = vadd.f32 %v2375_v25, %v13507_v21  ;;  %5848 = vmatpush1.msra.mxu1 %v5512_v34  ;;  %7741 = vmatprep.mubr.f32.mxu0 %v16275_v4  ;;  %v5532_v21 = vld [vmem:[#allocation13 + $0xb20] sm:$0xff]  ;;  %v7448_v34 = vld [vmem:[#allocation13 + $0xe50] sm:$0xff] }
 0x411   :  { %v11775_v13 = vpop.f32.mrf.mxu1  ;;  %11378 = vmatmul.mubr.msk.f32.gmra.mxu1 %vm211_vm1, %v13167_v8  ;;  %5849 = vmatprep.subr.mxu1 %v5498_v19  ;;  %v13756_v14 = vpop.f32.mrf.mxu0 }
 0x412   :  { %16383 = vst [vmem:[#allocation158_spill] sm:$0xff] %v13756_v14  ;;  %v13759_v28 = vadd.f32 %v11775_v13, %v13512_v29  ;;  %5719 = vmatprep.mubr.f32.mxu1 %v16275_v4  ;;  %5850 = vmatpush1.msra.mxu1 %v5497_v30  ;;  %v7434_v29 = vld [vmem:[#allocation13 + $0xde0] sm:$0xff]  ;;  %v7433_v30 = vld [vmem:[#allocation13 + $0xdd8] sm:$0xff]  ;;  %v2395_v14 = vadd.f32 %v12906_v57, %v12728_v31  ;;  %v7467_v57 = vld [vmem:[#allocation13 + $0xee8] sm:$0xff] }
 0x413   :  { %v2385_v25 = vpop.f32.mrf.mxu1  ;;  %5851 = vmatprep.subr.mxu1 %v5483_v18  ;;  %11447 = vmatmul.mubr.msk.f32.gmra.mxu0 %vm211_vm1, %v13667_v3  ;;  %v13764_v61 = vpop.f32.mrf.mxu0 }
 0x414   :  { %16384 = vst [vmem:[#allocation159_spill] sm:$0xff] %v13764_v61  ;;  %v13767_v19 = vadd.f32 %v2385_v25, %v13521_v17  ;;  %5852 = vmatpush1.msra.mxu1 %v5482_v56  ;;  %7747 = vmatprep.mubr.f32.mxu0 %v16275_v4  ;;  %v7419_v17 = vld [vmem:[#allocation13 + $0xd68] sm:$0xff]  ;;  %v7418_v25 = vld [vmem:[#allocation13 + $0xd60] sm:$0xff] }
 0x415   :  { %v2719_v13 = vpop.f32.mrf.mxu1  ;;  %11379 = vmatmul.mubr.msk.f32.gmra.mxu1 %vm211_vm1, %v13187_v27  ;;  %6023 = vmatprep.subr.mxu1 %v5532_v21  ;;  %v13772_v18 = vpop.f32.mrf.mxu0 }
 0x416   :  { %16385 = vst [vmem:[#allocation160_spill] sm:$0xff] %v13772_v18  ;;  %v13777_v61 = vadd.f32 %v2719_v13, %v12903_v47  ;;  %5725 = vmatprep.mubr.f32.mxu1 %v16275_v4  ;;  %7870 = vmatpush1.msra.mxu0 %v7448_v34  ;;  %v7468_v18 = vld [vmem:[#allocation13 + $0xef0] sm:$0xff]  ;;  %v2410_v34 = vadd.f32 %v12918_v35, %v12736_v37  ;;  %v5516_v35 = vld [vmem:[#allocation13 + $0xaa0] sm:$0xff] }
 0x417   :  { %v2721_v56 = vpop.f32.mrf.mxu1  ;;  %11448 = vmatmul.mubr.msk.f32.gmra.mxu0 %vm211_vm1, %v13690_v41  ;;  %7871 = vmatprep.subr.mxu0 %v7434_v29 }
 0x418   :  { %v13782_v21 = vadd.f32 %v2721_v56, %v2395_v14  ;;  %7872 = vmatpush1.msra.mxu0 %v7433_v30  ;;  %7907 = vmatprep.mubr.f32.mxu0 %v16275_v4  ;;  %v13785_v31 = vpop.f32.mrf.mxu0  ;;  %v7453_v14 = vld [vmem:[#allocation13 + $0xe78] sm:$0xff] }
 0x419   :  { %16386 = vst [vmem:[#allocation161_spill] sm:$0xff] %v13785_v31  ;;  %v2725_v47 = vpop.f32.mrf.mxu1  ;;  %11380 = vmatmul.mubr.msk.f32.gmra.mxu1 %vm211_vm1, %v13201_v10  ;;  %7873 = vmatprep.subr.mxu0 %v7419_v17  ;;  %v5531_v30 = vld [vmem:[#allocation13 + $0xb18] sm:$0xff]  ;;  %v5517_v17 = vld [vmem:[#allocation13 + $0xaa8] sm:$0xff] }
 0x41a   :  { %v13792_v29 = vadd.f32 %v2725_v47, %v12914_v22  ;;  %5885 = vmatprep.mubr.f32.mxu1 %v16275_v4  ;;  %7874 = vmatpush1.msra.mxu0 %v7418_v25  ;;  %v13800_v37 = vpop.f32.mrf.mxu0  ;;  %v2425_v25 = vadd.f32 %v12930_v11, %v12750_v49  ;;  %v5486_v11 = vld [vmem:[#allocation13 + $0x9b0] sm:$0xff] }
 0x41b   :  { %v2727_v13 = vpop.f32.mrf.mxu1  ;;  %11453 = vmatmul.mubr.msk.f32.vlgmr.msra.gmra.mxu0 %vm211_vm1, %v13619_v54  ;;  %8045 = vmatprep.subr.mxu0 %v7468_v18  ;;  %16387 = vst [vmem:[#allocation162_spill] sm:$0xff] %v13800_v37  ;;  %v5502_v18 = vld [vmem:[#allocation13 + $0xa30] sm:$0xff] }
 0x41c   :  { %v13797_v56 = vadd.f32 %v2727_v13, %v2410_v34  ;;  %7913 = vmatprep.mubr.f32.mxu0 %v16275_v4  ;;  %8046 = vmatpush1.msra.mxu0 %v7467_v57  ;;  %v5501_v57 = vld [vmem:[#allocation13 + $0xa28] sm:$0xff] }
 0x41d   :  { %v2731_v22 = vpop.f32.mrf.mxu1  ;;  %11385 = vmatmul.mubr.msk.f32.vlgmr.msra.gmra.mxu1 %vm211_vm1, %v13148_v33  ;;  %8047 = vmatprep.subr.mxu0 %v7453_v14  ;;  %v5487_v14 = vld [vmem:[#allocation13 + $0x9b8] sm:$0xff]  ;;  %v16391_v37 = vld [vmem:[#allocation47_spill] sm:$0xff] }
 0x41e   :  { %v13807_v47 = vadd.f32 %v2731_v22, %v12926_v16  ;;  %6024 = vmatpush1.msra.mxu1 %v5531_v30  ;;  %5891 = vmatprep.mubr.f32.mxu1 %v16275_v4  ;;  %v16389_v30 = vld [vmem:[#allocation34_spill] sm:$0xff] }
 0x41f   :  { %v2733_v34 = vpop.f32.mrf.mxu1  ;;  %6025 = vmatprep.subr.mxu1 %v5517_v17  ;;  %11454 = vmatmul.mubr.msk.f32.gmra.mxu0 %vm211_vm1, %v13642_v45  ;;  %v16390_v17 = vld [vmem:[#allocation48_spill] sm:$0xff] }
 0x420   :  { %v13812_v13 = vadd.f32 %v2733_v34, %v2425_v25  ;;  %6026 = vmatpush1.msra.mxu1 %v5516_v35  ;;  %7919 = vmatprep.mubr.f32.mxu0 %v16275_v4  ;;  %v13815_v49 = vpop.f32.mrf.mxu0  ;;  %v2440_v22 = vadd.f32 %v16390_v17, %v16389_v30  ;;  %v5535_v35 = vld [vmem:[#allocation13 + $0xb38] sm:$0xff]  ;;  %v7438_v30 = vld [vmem:[#allocation13 + $0xe00] sm:$0xff]  ;;  %v16394_v17 = vld [vmem:[#allocation35_spill] sm:$0xff] }
 0x421   :  { %16388 = vst [vmem:[#allocation163_spill] sm:$0xff] %v13815_v49  ;;  %v2737_v16 = vpop.f32.mrf.mxu1  ;;  %11386 = vmatmul.mubr.msk.f32.gmra.mxu1 %vm211_vm1, %v13167_v8  ;;  %6027 = vmatprep.subr.mxu1 %v5502_v18  ;;  %v7452_v49 = vld [vmem:[#allocation13 + $0xe70] sm:$0xff] }
 0x422   :  { %v13822_v31 = vadd.f32 %v2737_v16, %v16391_v37  ;;  %5897 = vmatprep.mubr.f32.mxu1 %v16275_v4  ;;  %6028 = vmatpush1.msra.mxu1 %v5501_v57  ;;  %v13825_v25 = vpop.f32.mrf.mxu0  ;;  %v7437_v57 = vld [vmem:[#allocation13 + $0xdf8] sm:$0xff] }
 0x423   :  { %16392 = vst [vmem:[#allocation34_spill] sm:$0xff] %v13825_v25  ;;  %v2739_v34 = vpop.f32.mrf.mxu1  ;;  %6029 = vmatprep.subr.mxu1 %v5487_v14  ;;  %11455 = vmatmul.mubr.msk.f32.gmra.mxu0 %vm211_vm1, %v13667_v3  ;;  %v16395_v14 = vld [vmem:[#allocation50_spill] sm:$0xff] }
 0x424   :  { %v13829_v18 = vadd.f32 %v2739_v34, %v2440_v22  ;;  %6030 = vmatpush1.msra.mxu1 %v5486_v11  ;;  %7925 = vmatprep.mubr.f32.mxu0 %v16275_v4  ;;  %v13832_v37 = vpop.f32.mrf.mxu0  ;;  %v2399_v25 = vadd.f32 %v16395_v14, %v16394_v17  ;;  %v7423_v11 = vld [vmem:[#allocation13 + $0xd88] sm:$0xff]  ;;  %v7422_v34 = vld [vmem:[#allocation13 + $0xd80] sm:$0xff]  ;;  %v16401_v14 = vld [vmem:[#allocation52_spill] sm:$0xff] }
 0x425   :  { %16393 = vst [vmem:[#allocation48_spill] sm:$0xff] %v13832_v37  ;;  %v2897_v16 = vpop.f32.mrf.mxu1  ;;  %11387 = vmatmul.mubr.msk.f32.gmra.mxu1 %vm211_vm1, %v13187_v27  ;;  %11818 = vmatprep.subr.mxu1 %v5535_v35 }
 0x426   :  { %v13839_v42 = vadd.f32 %v2897_v16, %v16396_v1  ;;  %5903 = vmatprep.mubr.f32.mxu1 %v16275_v4  ;;  %8048 = vmatpush1.msra.mxu0 %v7452_v49  ;;  %v13847_v17 = vpop.f32.mrf.mxu0  ;;  %v8423_v49 = vld [vmem:[#allocation13 + $0x1078] sm:$0xff] }
 0x427   :  { %v2899_v22 = vpop.f32.mrf.mxu1  ;;  %11456 = vmatmul.mubr.msk.f32.gmra.mxu0 %vm211_vm1, %v13690_v41  ;;  %8049 = vmatprep.subr.mxu0 %v7438_v30  ;;  %16399 = vst [vmem:[#allocation50_spill] sm:$0xff] %v13847_v17  ;;  %v16400_v16 = vld [vmem:[#allocation36_spill] sm:$0xff] }
 0x428   :  { %16397 = vst [vmem:[#allocation47_spill] sm:$0xff] %v13839_v42  ;;  %v13844_v37 = vadd.f32 %v2899_v22, %v2399_v25  ;;  %8050 = vmatpush1.msra.mxu0 %v7437_v57  ;;  %8085 = vmatprep.mubr.f32.mxu0 %v16275_v4  ;;  %v2414_v26 = vadd.f32 %v16401_v14, %v16400_v16  ;;  %v8409_v57 = vld [vmem:[#allocation13 + $0x1008] sm:$0xff]  ;;  %v16404_v22 = vld [vmem:[#allocation105_spill] sm:$0xff] }
 0x429   :  { %v2903_v1 = vpop.f32.mrf.mxu1  ;;  %11388 = vmatmul.mubr.msk.f32.gmra.mxu1 %vm211_vm1, %v13201_v10  ;;  %8051 = vmatprep.subr.mxu0 %v7423_v11  ;;  %v5520_v42 = vld [vmem:[#allocation13 + $0xac0] sm:$0xff] }
 0x42a   :  { %16398 = vst [vmem:[#allocation35_spill] sm:$0xff] %v13844_v37  ;;  %v13854_v30 = vadd.f32 %v2903_v1, %v16402_v32  ;;  %v697_v25 = vpop.xlane.xlu1 %696  ;;  %6063 = vmatprep.mubr.f32.mxu1 %v16275_v4  ;;  %8052 = vmatpush1.msra.mxu0 %v7422_v34  ;;  %v16406_v34 = vld [vmem:[#allocation37_spill] sm:$0xff]  ;;  %v16407_v14 = vld [vmem:[#allocation54_spill] sm:$0xff] }
 0x42b   :  { %v698_v37 = vsub.f32 %v16404_v22, %v697_v25  ;;  %v2905_v17 = vpop.f32.mrf.mxu1  ;;  %11461 = vmatmul.mubr.msk.f32.vlgmr.msra.gmra.mxu0 %vm211_vm1, %v13619_v54  ;;  %8551 = vmatprep.subr.mxu0 %v8424_v63  ;;  %v2429_v25 = vadd.f32 %v16407_v14, %v16406_v34  ;;  %v16408_v22 = vld [vmem:[#allocation53_spill] sm:$0xff]  ;;  %v16414_v14 = vld [vmem:[#allocation55_spill] sm:$0xff] }
 0x42c   :  { %16403 = vst [vmem:[#allocation49_spill] sm:$0xff] %v13854_v30  ;;  %v13860_v11 = vadd.f32 %v2905_v17, %v2414_v26  ;;  %8091 = vmatprep.mubr.f32.mxu0 %v16275_v4  ;;  %8552 = vmatpush1.msra.mxu0 %v8423_v49  ;;  %v13863_v32 = vpop.f32.mrf.mxu0  ;;  %v5505_v26 = vld [vmem:[#allocation13 + $0xa48] sm:$0xff]  ;;  %v5490_v49 = vld [vmem:[#allocation13 + $0x9d0] sm:$0xff] }
 0x42d   :  { %16405 = vst [vmem:[#allocation36_spill] sm:$0xff] %v13863_v32  ;;  %v699_v1 = vmul.f32 1.442695, %v698_v37  ;;  %v2909_v16 = vpop.f32.mrf.mxu1  ;;  %11393 = vmatmul.mubr.msk.f32.vlgmr.msra.gmra.mxu1 %vm211_vm1, %v13148_v33  ;;  %8553 = vmatprep.subr.mxu0 %v8409_v57 }
 0x42e   :  { %v13870_v30 = vadd.f32 %v2909_v16, %v16408_v22  ;;  %11819 = vmatpush3.msra.mxu1 %v5535_v35  ;;  %6069 = vmatprep.mubr.f32.mxu1 %v16275_v4  ;;  %v13873_v63 = vpop.f32.mrf.mxu0  ;;  %v16412_v16 = vld [vmem:[#allocation38_spill] sm:$0xff] }
 0x42f   :  { %16409 = vst [vmem:[#allocation52_spill] sm:$0xff] %v13873_v63  ;;  %11984 = vpow2.f32 %v699_v1  ;;  %v2911_v17 = vpop.f32.mrf.mxu1  ;;  %11820 = vmatprep.subr.mxu1 %v5520_v42  ;;  %11462 = vmatmul.mubr.msk.f32.gmra.mxu0 %vm211_vm1, %v13642_v45  ;;  %v16413_v1 = vld [vmem:[#allocation56_spill] sm:$0xff] }
 0x430   :  { %v13877_v37 = vadd.f32 %v2911_v17, %v2429_v25  ;;  %11821 = vmatpush3.msra.mxu1 %v5520_v42  ;;  %8097 = vmatprep.mubr.f32.mxu0 %v16275_v4  ;;  %v13880_v57 = vpop.f32.mrf.mxu0  ;;  %v2444_v34 = vadd.f32 %v16413_v1, %v16412_v16  ;;  %v6489_v42 = vld [vmem:[#allocation13 + $0xcb0] sm:$0xff] }
 0x431   :  { %16411 = vst [vmem:[#allocation105_spill] sm:$0xff] %v13880_v57  ;;  %v2915_v35 = vpop.f32.mrf.mxu1  ;;  %11394 = vmatmul.mubr.msk.f32.gmra.mxu1 %vm211_vm1, %v13167_v8  ;;  %11822 = vmatprep.subr.mxu1 %v5505_v26  ;;  %v8408_v57 = vld [vmem:[#allocation13 + $0x1000] sm:$0xff]  ;;  %v8394_v16 = vld [vmem:[#allocation13 + $0xf90] sm:$0xff] }
 0x432   :  { %16410 = vst [vmem:[#allocation51_spill] sm:$0xff] %v13877_v37  ;;  %v13887_v22 = vadd.f32 %v2915_v35, %v16414_v14  ;;  %6075 = vmatprep.mubr.f32.mxu1 %v16275_v4  ;;  %11823 = vmatpush3.msra.mxu1 %v5505_v26  ;;  %v13890_v25 = vpop.f32.mrf.mxu0  ;;  %v8393_v26 = vld [vmem:[#allocation13 + $0xf88] sm:$0xff] }
 0x433   :  { %16416 = vst [vmem:[#allocation54_spill] sm:$0xff] %v13890_v25  ;;  %v2917_v17 = vpop.f32.mrf.mxu1  ;;  %11824 = vmatprep.subr.mxu1 %v5490_v49  ;;  %11463 = vmatmul.mubr.msk.f32.gmra.mxu0 %vm211_vm1, %v13667_v3  ;;  %v16419_v14 = vld [vmem:[#allocation39_spill] sm:$0xff]  ;;  %v16420_v25 = vld [vmem:[#allocation58_spill] sm:$0xff] }
 0x434   :  { %16415 = vst [vmem:[#allocation37_spill] sm:$0xff] %v13887_v22  ;;  %v13894_v63 = vadd.f32 %v2917_v17, %v2444_v34  ;;  %11825 = vmatpush3.msra.mxu1 %v5490_v49  ;;  %8103 = vmatprep.mubr.f32.mxu0 %v16275_v4  ;;  %v13897_v35 = vpop.f32.mrf.mxu0  ;;  %v2403_v32 = vadd.f32 %v16420_v25, %v16419_v14  ;;  %v16421_v22 = vld [vmem:[#allocation57_spill] sm:$0xff]  ;;  %v16425_v14 = vld [vmem:[#allocation40_spill] sm:$0xff] }
 0x435   :  { %16418 = vst [vmem:[#allocation38_spill] sm:$0xff] %v13897_v35  ;;  %v3075_v1 = vpop.f32.mrf.mxu1  ;;  %11395 = vmatmul.mubr.msk.f32.gmra.mxu1 %vm211_vm1, %v13187_v27  ;;  %6545 = vmatprep.subr.mxu1 %v6489_v42  ;;  %v8379_v49 = vld [vmem:[#allocation13 + $0xf18] sm:$0xff]  ;;  %v8378_v35 = vld [vmem:[#allocation13 + $0xf10] sm:$0xff]  ;;  %v8428_v25 = vld [vmem:[#allocation13 + $0x10a0] sm:$0xff] }
 0x436   :  { %16417 = vst [vmem:[#allocation53_spill] sm:$0xff] %v13894_v63  ;;  %v13904_v37 = vadd.f32 %v3075_v1, %v16421_v22  ;;  %6081 = vmatprep.mubr.f32.mxu1 %v16275_v4  ;;  %8554 = vmatpush1.msra.mxu0 %v8408_v57  ;;  %v13907_v34 = vpop.f32.mrf.mxu0  ;;  %v8427_v57 = vld [vmem:[#allocation13 + $0x1098] sm:$0xff]  ;;  %v16427_v63 = vld [vmem:[#allocation59_spill] sm:$0xff] }
 0x437   :  { %16423 = vst [vmem:[#allocation55_spill] sm:$0xff] %v13907_v34  ;;  %v3077_v17 = vpop.f32.mrf.mxu1  ;;  %11464 = vmatmul.mubr.msk.f32.gmra.mxu0 %vm211_vm1, %v13690_v41  ;;  %8555 = vmatprep.subr.mxu0 %v8394_v16  ;;  %v16426_v34 = vld [vmem:[#allocation60_spill] sm:$0xff] }
 0x438   :  { %16422 = vst [vmem:[#allocation56_spill] sm:$0xff] %v13904_v37  ;;  %v13911_v42 = vadd.f32 %v3077_v17, %v2403_v32  ;;  %8556 = vmatpush1.msra.mxu0 %v8393_v26  ;;  %8591 = vmatprep.mubr.f32.mxu0 %v16275_v4  ;;  %v13914_v22 = vpop.f32.mrf.mxu0  ;;  %v2418_v37 = vadd.f32 %v16426_v34, %v16425_v14  ;;  %v8413_v32 = vld [vmem:[#allocation13 + $0x1028] sm:$0xff]  ;;  %v6474_v34 = vld [vmem:[#allocation13 + $0xc38] sm:$0xff]  ;;  %v6473_v14 = vld [vmem:[#allocation13 + $0xc30] sm:$0xff] }
 0x439   :  { %16424 = vst [vmem:[#allocation39_spill] sm:$0xff] %v13914_v22  ;;  %v3081_v1 = vpop.f32.mrf.mxu1  ;;  %11396 = vmatmul.mubr.msk.f32.gmra.mxu1 %vm211_vm1, %v13201_v10  ;;  %8557 = vmatprep.subr.mxu0 %v8379_v49  ;;  %v6488_v17 = vld [vmem:[#allocation13 + $0xca8] sm:$0xff]  ;;  %v13928_v22 = vld [vmem:[%s16252_s7 + $0x8] sm:$0xff] }
 0x43a   :  { %v13921_v16 = vadd.f32 %v3081_v1, %v16427_v63  ;;  %11826 = vmatprep.mubr.msk.f32.mxu1 %vm211_vm1, %v13148_v33  ;;  %8558 = vmatpush1.msra.mxu0 %v8378_v35  ;;  %v13937_v33 = vpop.f32.mrf.mxu0 }
 0x43b   :  { %v3083_v26 = vpop.f32.mrf.mxu1  ;;  %11473 = vmatmul.mubr.msk.f32.vlgmr.msra.gmra.mxu0 %vm211_vm1, %v13928_v22  ;;  %8729 = vmatprep.subr.mxu0 %v8428_v25  ;;  %16430 = vst [vmem:[#allocation40_spill] sm:$0xff] %v13937_v33  ;;  %v16431_v25 = vld [vmem:[#allocation61_spill] sm:$0xff] }
 0x43c   :  { %16428 = vst [vmem:[#allocation58_spill] sm:$0xff] %v13921_v16  ;;  %v13932_v49 = vpop.eup %11984  ;;  %v13934_v63 = vadd.f32 %v3083_v26, %v2418_v37  ;;  %8597 = vmatprep.mubr.f32.mxu0 %v16275_v4  ;;  %8730 = vmatpush1.msra.mxu0 %v8427_v57  ;;  %v6459_v37 = vld [vmem:[#allocation13 + $0xbc0] sm:$0xff]  ;;  %v6458_v57 = vld [vmem:[#allocation13 + $0xbb8] sm:$0xff] }
 0x43d   :  { %16429 = vst [vmem:[#allocation57_spill] sm:$0xff] %v13932_v49  ;;  %v3087_v35 = vpop.f32.mrf.mxu1  ;;  %11827 = vmatmul.mubr.msk.f32.vlgmr.msra.gmra.mxu1 %vm211_vm1, %v13167_v8  ;;  %v701_v1 = vsel %vm694_vm4, %v13932_v49, 0.0  ;;  %8731 = vmatprep.subr.mxu0 %v8413_v32  ;;  %v6444_v8 = vld [vmem:[#allocation13 + $0xb48] sm:$0xff] }
 0x43e   :  { %v13944_v16 = vadd.f32 %v3087_v35, %v16431_v25  ;;  %6546 = vmatpush1.msra.mxu1 %v6488_v17  ;;  %702 = vadd.xlane.f32.xlu0 %v701_v1  ;;  %v6443_v17 = vld [vmem:[#allocation13 + $0xb40] sm:$0xff]  ;;  %v16433_v35 = vld [vmem:[#allocation63_spill] sm:$0xff] }
 0x43f   :  { %v13946_v26 = vpop.f32.mrf.mxu1  ;;  %6547 = vmatprep.subr.mxu1 %v6474_v34  ;;  %11829 = vmatprep.mubr.msk.f32.mxu1 %vm211_vm1, %v13187_v27  ;;  %v6493_v27 = vld [vmem:[#allocation13 + $0xcd0] sm:$0xff]  ;;  %v6492_v25 = vld [vmem:[#allocation13 + $0xcc8] sm:$0xff] }
 0x440   :  { %6548 = vmatpush1.msra.mxu1 %v6473_v14  ;;  %11474 = vmatmul.mubr.msk.f32.gmra.mxu0 %vm211_vm1, %v13624_v7  ;;  %v13952_v33 = vpop.f32.mrf.mxu0 }
 0x441   :  { %16432 = vst [vmem:[#allocation60_spill] sm:$0xff] %v13952_v33  ;;  %v3093_v32 = vpop.f32.mrf.mxu1  ;;  %11830 = vmatmul.mubr.msk.f32.gmra.mxu1 %vm211_vm1, %v13201_v10  ;;  %6549 = vmatprep.subr.mxu1 %v6459_v37  ;;  %v6478_v33 = vld [vmem:[#allocation13 + $0xc58] sm:$0xff] }
 0x442   :  { %v13957_v1 = vadd.f32 %v3093_v32, %v16433_v35  ;;  %6550 = vmatpush1.msra.mxu1 %v6458_v57  ;;  %6585 = vmatprep.mubr.f32.mxu1 %v16275_v4  ;;  %v13960_v34 = vpop.f32.mrf.mxu0  ;;  %v6477_v57 = vld [vmem:[#allocation13 + $0xc50] sm:$0xff]  ;;  %v8412_v32 = vld [vmem:[#allocation13 + $0x1020] sm:$0xff] }
 0x443   :  { %16435 = vst [vmem:[#allocation61_spill] sm:$0xff] %v13960_v34  ;;  %v13962_v14 = vpop.f32.mrf.mxu1  ;;  %6551 = vmatprep.subr.mxu1 %v6444_v8  ;;  %8603 = vmatprep.mubr.f32.mxu0 %v16275_v4  ;;  %v16438_v35 = vld [vmem:[#allocation65_spill] sm:$0xff] }
 0x444   :  { %16434 = vst [vmem:[#allocation59_spill] sm:$0xff] %v13957_v1  ;;  %16436 = vst [vmem:[#allocation63_spill] sm:$0xff] %v13962_v14  ;;  %6552 = vmatpush1.msra.mxu1 %v6443_v17  ;;  %11475 = vmatmul.mubr.msk.f32.gmra.mxu0 %vm211_vm1, %v13647_v24  ;;  %v13967_v10 = vpop.f32.mrf.mxu0  ;;  %v6463_v8 = vld [vmem:[#allocation13 + $0xbe0] sm:$0xff]  ;;  %v6448_v1 = vld [vmem:[#allocation13 + $0xb68] sm:$0xff] }
 0x445   :  { %16437 = vst [vmem:[#allocation164_spill] sm:$0xff] %v13967_v10  ;;  %v3253_v37 = vpop.f32.mrf.mxu1  ;;  %11405 = vmatmul.mubr.msk.f32.vlgmr.msra.gmra.mxu1 %vm211_vm1, %v13369_v9  ;;  %6723 = vmatprep.subr.mxu1 %v6493_v27  ;;  %v6462_v10 = vld [vmem:[#allocation13 + $0xbd8] sm:$0xff] }
 0x446   :  { %v13972_v34 = vadd.f32 %v3253_v37, %v16438_v35  ;;  %6724 = vmatpush1.msra.mxu1 %v6492_v25  ;;  %6591 = vmatprep.mubr.f32.mxu1 %v16275_v4  ;;  %v13975_v17 = vpop.f32.mrf.mxu0  ;;  %v6447_v25 = vld [vmem:[#allocation13 + $0xb60] sm:$0xff]  ;;  %v8398_v37 = vld [vmem:[#allocation13 + $0xfb0] sm:$0xff] }
 0x447   :  { %16440 = vst [vmem:[#allocation165_spill] sm:$0xff] %v13975_v17  ;;  %v13977_v49 = vpop.f32.mrf.mxu1  ;;  %6725 = vmatprep.subr.mxu1 %v6478_v33  ;;  %8609 = vmatprep.mubr.f32.mxu0 %v16275_v4  ;;  %v16443_v35 = vld [vmem:[#allocation67_spill] sm:$0xff] }
 0x448   :  { %16439 = vst [vmem:[#allocation65_spill] sm:$0xff] %v13972_v34  ;;  %16441 = vst [vmem:[#allocation166_spill] sm:$0xff] %v13977_v49  ;;  %6726 = vmatpush1.msra.mxu1 %v6477_v57  ;;  %8732 = vmatpush1.msra.mxu0 %v8412_v32  ;;  %v13980_v27 = vpop.f32.mrf.mxu0  ;;  %v6497_v33 = vld [vmem:[#allocation13 + $0xcf0] sm:$0xff]  ;;  %v8397_v32 = vld [vmem:[#allocation13 + $0xfa8] sm:$0xff] }
 0x449   :  { %16442 = vst [vmem:[#allocation167_spill] sm:$0xff] %v13980_v27  ;;  %v3259_v14 = vpop.f32.mrf.mxu1  ;;  %11406 = vmatmul.mubr.msk.f32.gmra.mxu1 %vm211_vm1, %v13388_v52  ;;  %6727 = vmatprep.subr.mxu1 %v6463_v8  ;;  %v8383_v8 = vld [vmem:[#allocation13 + $0xf38] sm:$0xff] }
 0x44a   :  { %v13985_v17 = vadd.f32 %v3259_v14, %v16443_v35  ;;  %6597 = vmatprep.mubr.f32.mxu1 %v16275_v4  ;;  %6728 = vmatpush1.msra.mxu1 %v6462_v10  ;;  %v13988_v34 = vpop.f32.mrf.mxu0  ;;  %v8382_v10 = vld [vmem:[#allocation13 + $0xf30] sm:$0xff]  ;;  %v16448_v35 = vld [vmem:[#allocation69_spill] sm:$0xff] }
 0x44b   :  { %16445 = vst [vmem:[#allocation168_spill] sm:$0xff] %v13988_v34  ;;  %v13990_v57 = vpop.f32.mrf.mxu1  ;;  %6729 = vmatprep.subr.mxu1 %v6448_v1  ;;  %11476 = vmatmul.mubr.msk.f32.gmra.mxu0 %vm211_vm1, %v13672_v48 }
 0x44c   :  { %16444 = vst [vmem:[#allocation67_spill] sm:$0xff] %v13985_v17  ;;  %16446 = vst [vmem:[#allocation169_spill] sm:$0xff] %v13990_v57  ;;  %6730 = vmatpush1.msra.mxu1 %v6447_v25  ;;  %8733 = vmatprep.subr.mxu0 %v8398_v37  ;;  %v13994_v27 = vpop.f32.mrf.mxu0  ;;  %v8432_v25 = vld [vmem:[#allocation13 + $0x10c0] sm:$0xff] }
 0x44d   :  { %16447 = vst [vmem:[#allocation170_spill] sm:$0xff] %v13994_v27  ;;  %v3265_v14 = vpop.f32.mrf.mxu1  ;;  %11407 = vmatmul.mubr.msk.f32.gmra.mxu1 %vm211_vm1, %v13405_v20  ;;  %6901 = vmatprep.subr.mxu1 %v6497_v33  ;;  %v8431_v33 = vld [vmem:[#allocation13 + $0x10b8] sm:$0xff] }
 0x44e   :  { %v13999_v34 = vadd.f32 %v3265_v14, %v16448_v35  ;;  %6603 = vmatprep.mubr.f32.mxu1 %v16275_v4  ;;  %8734 = vmatpush1.msra.mxu0 %v8397_v32  ;;  %v14002_v1 = vpop.f32.mrf.mxu0  ;;  %v16452_v14 = vld [vmem:[#allocation71_spill] sm:$0xff] }
 0x44f   :  { %16450 = vst [vmem:[#allocation171_spill] sm:$0xff] %v14002_v1  ;;  %v14004_v17 = vpop.f32.mrf.mxu1  ;;  %8735 = vmatprep.subr.mxu0 %v8383_v8  ;;  %8769 = vmatprep.mubr.f32.mxu0 %v16275_v4  ;;  %v16456_v1 = vld [vmem:[#allocation73_spill] sm:$0xff] }
 0x450   :  { %16449 = vst [vmem:[#allocation69_spill] sm:$0xff] %v13999_v34  ;;  %16451 = vst [vmem:[#allocation172_spill] sm:$0xff] %v14004_v17  ;;  %8736 = vmatpush1.msra.mxu0 %v8382_v10  ;;  %v6496_v10 = vld [vmem:[#allocation13 + $0xce8] sm:$0xff]  ;;  %v3363_v27 = vadd.f32 %v16456_v1, %v13531_v5  ;;  %v6482_v34 = vld [vmem:[#allocation13 + $0xc78] sm:$0xff] }
 0x451   :  { %v3271_v37 = vpop.f32.mrf.mxu1  ;;  %11408 = vmatmul.mubr.msk.f32.gmra.mxu1 %vm211_vm1, %v13423_v2  ;;  %11481 = vmatmul.mubr.msk.f32.vlgmr.msra.gmra.mxu0 %vm211_vm1, %v13928_v22  ;;  %v6467_v5 = vld [vmem:[#allocation13 + $0xc00] sm:$0xff] }
 0x452   :  { %v14012_v35 = vadd.f32 %v3271_v37, %v16452_v14  ;;  %6763 = vmatprep.mubr.f32.mxu1 %v16275_v4  ;;  %8775 = vmatprep.mubr.f32.mxu0 %v16275_v4  ;;  %v14016_v32 = vpop.f32.mrf.mxu0  ;;  %v6481_v37 = vld [vmem:[#allocation13 + $0xc70] sm:$0xff]  ;;  %v8417_v14 = vld [vmem:[#allocation13 + $0x1048] sm:$0xff] }
 0x453   :  { %16454 = vst [vmem:[#allocation173_spill] sm:$0xff] %v14016_v32  ;;  %v14018_v8 = vpop.f32.mrf.mxu1  ;;  %8907 = vmatprep.subr.mxu0 %v8432_v25  ;;  %v16458_v32 = vld [vmem:[#allocation74_spill] sm:$0xff] }
 0x454   :  { %16453 = vst [vmem:[#allocation71_spill] sm:$0xff] %v14012_v35  ;;  %16455 = vst [vmem:[#allocation174_spill] sm:$0xff] %v14018_v8  ;;  %8908 = vmatpush1.msra.mxu0 %v8431_v33  ;;  %v14022_v17 = vpop.f32.mrf.mxu0  ;;  %v3364_v35 = vadd.f32 %v16458_v32, %v13537_v62  ;;  %v6466_v33 = vld [vmem:[#allocation13 + $0xbf8] sm:$0xff]  ;;  %v16460_v8 = vld [vmem:[#allocation75_spill] sm:$0xff] }
 0x455   :  { %16457 = vst [vmem:[#allocation73_spill] sm:$0xff] %v14022_v17  ;;  %v3775_v57 = vpop.f32.mrf.mxu1  ;;  %11413 = vmatmul.mubr.msk.f32.vlgmr.msra.gmra.mxu1 %vm211_vm1, %v13369_v9  ;;  %11482 = vmatmul.mubr.msk.f32.gmra.mxu0 %vm211_vm1, %v13624_v7  ;;  %v3378_v7 = vadd.f32 %v16460_v8, %v13545_v23  ;;  %v6452_v62 = vld [vmem:[#allocation13 + $0xb88] sm:$0xff]  ;;  %v16462_v32 = vld [vmem:[#allocation76_spill] sm:$0xff]  ;;  %v8416_v8 = vld [vmem:[#allocation13 + $0x1040] sm:$0xff] }
 0x456   :  { %v14030_v25 = vadd.f32 %v3775_v57, %v3363_v27  ;;  %6902 = vmatpush1.msra.mxu1 %v6496_v10  ;;  %6769 = vmatprep.mubr.f32.mxu1 %v16275_v4  ;;  %v6451_v57 = vld [vmem:[#allocation13 + $0xb80] sm:$0xff]  ;;  %v3379_v10 = vadd.f32 %v16462_v32, %v13551_v50  ;;  %v6501_v23 = vld [vmem:[#allocation13 + $0xd10] sm:$0xff] }
 0x457   :  { %v3777_v1 = vpop.f32.mrf.mxu1  ;;  %6903 = vmatprep.subr.mxu1 %v6482_v34  ;;  %8781 = vmatprep.mubr.f32.mxu0 %v16275_v4  ;;  %v14034_v17 = vpop.f32.mrf.mxu0  ;;  %v8402_v50 = vld [vmem:[#allocation13 + $0xfd0] sm:$0xff] }
 0x458   :  { %16459 = vst [vmem:[#allocation74_spill] sm:$0xff] %v14034_v17  ;;  %v14038_v49 = vadd.f32 %v3777_v1, %v3364_v35  ;;  %6904 = vmatpush1.msra.mxu1 %v6481_v37  ;;  %8909 = vmatprep.subr.mxu0 %v8417_v14  ;;  %v16464_v14 = vld [vmem:[#allocation77_spill] sm:$0xff] }
 0x459   :  { %v3781_v27 = vpop.f32.mrf.mxu1  ;;  %11414 = vmatmul.mubr.msk.f32.gmra.mxu1 %vm211_vm1, %v13388_v52  ;;  %6905 = vmatprep.subr.mxu1 %v6467_v5  ;;  %v14042_v34 = vpop.f32.mrf.mxu0  ;;  %v3393_v5 = vadd.f32 %v16464_v14, %v13559_v6  ;;  %v8387_v6 = vld [vmem:[#allocation13 + $0xf58] sm:$0xff] }
 0x45a   :  { %16461 = vst [vmem:[#allocation75_spill] sm:$0xff] %v14042_v34  ;;  %v14046_v17 = vadd.f32 %v3781_v27, %v3378_v7  ;;  %6775 = vmatprep.mubr.f32.mxu1 %v16275_v4  ;;  %6906 = vmatpush1.msra.mxu1 %v6466_v33  ;;  %v8401_v33 = vld [vmem:[#allocation13 + $0xfc8] sm:$0xff] }
 0x45b   :  { %v3783_v35 = vpop.f32.mrf.mxu1  ;;  %6907 = vmatprep.subr.mxu1 %v6452_v62  ;;  %11483 = vmatmul.mubr.msk.f32.gmra.mxu0 %vm211_vm1, %v13647_v24  ;;  %v14051_v37 = vpop.f32.mrf.mxu0  ;;  %v16466_v24 = vld [vmem:[#allocation78_spill] sm:$0xff] }
 0x45c   :  { %16463 = vst [vmem:[#allocation76_spill] sm:$0xff] %v14051_v37  ;;  %v14055_v1 = vadd.f32 %v3783_v35, %v3379_v10  ;;  %6908 = vmatpush1.msra.mxu1 %v6451_v57  ;;  %8787 = vmatprep.mubr.f32.mxu0 %v16275_v4  ;;  %v3394_v27 = vadd.f32 %v16466_v24, %v13565_v40  ;;  %v8386_v10 = vld [vmem:[#allocation13 + $0xf50] sm:$0xff]  ;;  %v8435_v40 = vld [vmem:[#allocation13 + $0x10d8] sm:$0xff] }
 0x45d   :  { %v3787_v7 = vpop.f32.mrf.mxu1  ;;  %11415 = vmatmul.mubr.msk.f32.gmra.mxu1 %vm211_vm1, %v13405_v20  ;;  %7079 = vmatprep.subr.mxu1 %v6501_v23  ;;  %v14060_v62 = vpop.f32.mrf.mxu0  ;;  %v16468_v23 = vld [vmem:[#allocation79_spill] sm:$0xff] }
 0x45e   :  { %16465 = vst [vmem:[#allocation77_spill] sm:$0xff] %v14060_v62  ;;  %v14064_v32 = vadd.f32 %v3787_v7, %v3393_v5  ;;  %6781 = vmatprep.mubr.f32.mxu1 %v16275_v4  ;;  %8910 = vmatpush1.msra.mxu0 %v8416_v8  ;;  %v3408_v14 = vadd.f32 %v16468_v23, %v13574_v12  ;;  %v8420_v12 = vld [vmem:[#allocation13 + $0x1060] sm:$0xff] }
 0x45f   :  { %v3789_v57 = vpop.f32.mrf.mxu1  ;;  %11484 = vmatmul.mubr.msk.f32.gmra.mxu0 %vm211_vm1, %v13672_v48  ;;  %8911 = vmatprep.subr.mxu0 %v8402_v50  ;;  %v14069_v35 = vpop.f32.mrf.mxu0  ;;  %v16470_v48 = vld [vmem:[#allocation136_spill] sm:$0xff] }
 0x460   :  { %16467 = vst [vmem:[#allocation78_spill] sm:$0xff] %v14069_v35  ;;  %v14073_v62 = vadd.f32 %v3789_v57, %v3394_v27  ;;  %8912 = vmatpush1.msra.mxu0 %v8401_v33  ;;  %8947 = vmatprep.mubr.f32.mxu0 %v16275_v4  ;;  %v16471_v50 = vld [vmem:[#allocation80_spill] sm:$0xff]  ;;  %v6500_v27 = vld [vmem:[#allocation13 + $0xd08] sm:$0xff]  ;;  %v16472_v57 = vld [vmem:[#allocation81_spill] sm:$0xff] }
 0x461   :  { %v3793_v5 = vpop.f32.mrf.mxu1  ;;  %11416 = vmatmul.mubr.msk.f32.gmra.mxu1 %vm211_vm1, %v13423_v2  ;;  %8913 = vmatprep.subr.mxu0 %v8387_v6  ;;  %v14078_v8 = vpop.f32.mrf.mxu0  ;;  %v3409_v7 = vadd.f32 %v16471_v50, %v16470_v48  ;;  %v3367_v6 = vadd.f32 %v16472_v57, %v13591_v39  ;;  %v16474_v48 = vld [vmem:[#allocation139_spill] sm:$0xff]  ;;  %v16475_v50 = vld [vmem:[#allocation82_spill] sm:$0xff]  ;;  %v14106_v57 = vld [vmem:[%s16252_s7 + $0x10] sm:$0xff] }
 0x462   :  { %16469 = vst [vmem:[#allocation79_spill] sm:$0xff] %v14078_v8  ;;  %v14082_v24 = vadd.f32 %v3793_v5, %v3408_v14  ;;  %6941 = vmatprep.mubr.f32.mxu1 %v16275_v4  ;;  %8914 = vmatpush1.msra.mxu0 %v8386_v10  ;;  %v6486_v8 = vld [vmem:[#allocation13 + $0xc98] sm:$0xff]  ;;  %v6485_v10 = vld [vmem:[#allocation13 + $0xc90] sm:$0xff]  ;;  %v3368_v35 = vadd.f32 %v16475_v50, %v16474_v48  ;;  %v6471_v39 = vld [vmem:[#allocation13 + $0xc20] sm:$0xff] }
 0x463   :  { %v3795_v33 = vpop.f32.mrf.mxu1  ;;  %11489 = vmatmul.mubr.msk.f32.vlgmr.msra.gmra.mxu0 %vm211_vm1, %v13928_v22  ;;  %11860 = vmatprep.subr.mxu0 %v8435_v40  ;;  %v6456_v48 = vld [vmem:[#allocation13 + $0xba8] sm:$0xff] }
 0x464   :  { %v14089_v23 = vadd.f32 %v3795_v33, %v3409_v7  ;;  %8953 = vmatprep.mubr.f32.mxu0 %v16275_v4  ;;  %11861 = vmatpush3.msra.mxu0 %v8435_v40  ;;  %v14092_v14 = vpop.f32.mrf.mxu0  ;;  %v6470_v33 = vld [vmem:[#allocation13 + $0xc18] sm:$0xff] }
 0x465   :  { %16473 = vst [vmem:[#allocation136_spill] sm:$0xff] %v14092_v14  ;;  %v3953_v5 = vpop.f32.mrf.mxu1  ;;  %11421 = vmatmul.mubr.msk.f32.vlgmr.msra.gmra.mxu1 %vm211_vm1, %v13369_v9  ;;  %11862 = vmatprep.subr.mxu0 %v8420_v12  ;;  %v16480_v14 = vld [vmem:[#allocation84_spill] sm:$0xff] }
 0x466   :  { %v14098_v37 = vadd.f32 %v3953_v5, %v3367_v6  ;;  %7080 = vmatpush1.msra.mxu1 %v6500_v27  ;;  %6947 = vmatprep.mubr.f32.mxu1 %v16275_v4  ;;  %v14101_v7 = vpop.f32.mrf.mxu0  ;;  %v16478_v6 = vld [vmem:[#allocation83_spill] sm:$0xff]  ;;  %v3383_v34 = vadd.f32 %v16480_v14, %v13614_v15  ;;  %v16483_v15 = vld [vmem:[#allocation85_spill] sm:$0xff] }
 0x467   :  { %16477 = vst [vmem:[#allocation81_spill] sm:$0xff] %v14101_v7  ;;  %v3955_v40 = vpop.f32.mrf.mxu1  ;;  %7081 = vmatprep.subr.mxu1 %v6486_v8  ;;  %11490 = vmatmul.mubr.msk.f32.gmra.mxu0 %vm211_vm1, %v14106_v57  ;;  %v3382_v5 = vadd.f32 %v16478_v6, %v13608_v38  ;;  %v6455_v7 = vld [vmem:[#allocation13 + $0xba0] sm:$0xff]  ;;  %v3397_v14 = vadd.f32 %v16483_v15, %v13630_v55  ;;  %v8390_v55 = vld [vmem:[#allocation13 + $0xf70] sm:$0xff] }
 0x468   :  { %16476 = vst [vmem:[#allocation80_spill] sm:$0xff] %v14098_v37  ;;  %v14112_v27 = vadd.f32 %v3955_v40, %v3368_v35  ;;  %7082 = vmatpush1.msra.mxu1 %v6485_v10  ;;  %8959 = vmatprep.mubr.f32.mxu0 %v16275_v4  ;;  %v14115_v50 = vpop.f32.mrf.mxu0  ;;  %v7458_v38 = vld [vmem:[#allocation13 + $0xea0] sm:$0xff]  ;;  %v16491_v15 = vld [vmem:[#allocation87_spill] sm:$0xff] }
 0x469   :  { %16479 = vst [vmem:[#allocation139_spill] sm:$0xff] %v14115_v50  ;;  %v3959_v8 = vpop.f32.mrf.mxu1  ;;  %11422 = vmatmul.mubr.msk.f32.gmra.mxu1 %vm211_vm1, %v13388_v52  ;;  %7083 = vmatprep.subr.mxu1 %v6471_v39  ;;  %v14129_v40 = vld [vmem:[%s16252_s7 + $0x18] sm:$0xff] }
 0x46a   :  { %v14121_v37 = vadd.f32 %v3959_v8, %v3382_v5  ;;  %6953 = vmatprep.mubr.f32.mxu1 %v16275_v4  ;;  %7084 = vmatpush1.msra.mxu1 %v6470_v33  ;;  %v14124_v35 = vpop.f32.mrf.mxu0  ;;  %v8405_v33 = vld [vmem:[#allocation13 + $0xfe8] sm:$0xff] }
 0x46b   :  { %16482 = vst [vmem:[#allocation83_spill] sm:$0xff] %v14124_v35  ;;  %v3961_v10 = vpop.f32.mrf.mxu1  ;;  %7085 = vmatprep.subr.mxu1 %v6456_v48  ;;  %11491 = vmatmul.mubr.msk.f32.gmra.mxu0 %vm211_vm1, %v14129_v40  ;;  %v16486_v48 = vld [vmem:[#allocation144_spill] sm:$0xff]  ;;  %v16487_v8 = vld [vmem:[#allocation86_spill] sm:$0xff] }
 0x46c   :  { %16481 = vst [vmem:[#allocation82_spill] sm:$0xff] %v14121_v37  ;;  %v14135_v39 = vadd.f32 %v3961_v10, %v3383_v34  ;;  %7086 = vmatpush1.msra.mxu1 %v6455_v7  ;;  %8965 = vmatprep.mubr.f32.mxu0 %v16275_v4  ;;  %v14138_v6 = vpop.f32.mrf.mxu0  ;;  %v3398_v35 = vadd.f32 %v16487_v8, %v16486_v48  ;;  %v14152_v10 = vld [vmem:[%s16252_s7 + $0x20] sm:$0xff] }
 0x46d   :  { %16485 = vst [vmem:[#allocation85_spill] sm:$0xff] %v14138_v6  ;;  %v3965_v5 = vpop.f32.mrf.mxu1  ;;  %11423 = vmatmul.mubr.msk.f32.gmra.mxu1 %vm211_vm1, %v13405_v20  ;;  %7600 = vmatprep.subr.mxu1 %v7458_v38  ;;  %v16490_v38 = vld [vmem:[#allocation145_spill] sm:$0xff]  ;;  %v16493_v6 = vld [vmem:[#allocation147_spill] sm:$0xff] }
 0x46e   :  { %16484 = vst [vmem:[#allocation84_spill] sm:$0xff] %v14135_v39  ;;  %v14144_v50 = vadd.f32 %v3965_v5, %v3397_v14  ;;  %6959 = vmatprep.mubr.f32.mxu1 %v16275_v4  ;;  %11863 = vmatpush3.msra.mxu0 %v8420_v12  ;;  %v14147_v34 = vpop.f32.mrf.mxu0  ;;  %v3412_v14 = vadd.f32 %v16491_v15, %v16490_v38  ;;  %v9373_v12 = vld [vmem:[#allocation13 + $0x1250] sm:$0xff]  ;;  %v16496_v38 = vld [vmem:[#allocation89_spill] sm:$0xff] }
 0x46f   :  { %16489 = vst [vmem:[#allocation86_spill] sm:$0xff] %v14147_v34  ;;  %v3967_v7 = vpop.f32.mrf.mxu1  ;;  %11492 = vmatmul.mubr.msk.f32.gmra.mxu0 %vm211_vm1, %v14152_v10  ;;  %11864 = vmatprep.subr.mxu0 %v8405_v33  ;;  %v9372_v34 = vld [vmem:[#allocation13 + $0x1248] sm:$0xff]  ;;  %v3371_v15 = vadd.f32 %v16496_v38, %v13679_v58 }
 0x470   :  { %16488 = vst [vmem:[#allocation144_spill] sm:$0xff] %v14144_v50  ;;  %v14158_v5 = vadd.f32 %v3967_v7, %v3398_v35  ;;  %11865 = vmatpush3.msra.mxu0 %v8405_v33  ;;  %11868 = vmatprep.mubr.msk.f32.mxu0 %vm211_vm1, %v13928_v22  ;;  %v14162_v48 = vpop.f32.mrf.mxu0  ;;  %v16494_v50 = vld [vmem:[#allocation88_spill] sm:$0xff]  ;;  %v7427_v38 = vld [vmem:[#allocation13 + $0xda8] sm:$0xff] }
 0x471   :  { %16492 = vst [vmem:[#allocation145_spill] sm:$0xff] %v14162_v48  ;;  %v3971_v8 = vpop.f32.mrf.mxu1  ;;  %11424 = vmatmul.mubr.msk.f32.gmra.mxu1 %vm211_vm1, %v13423_v2  ;;  %11866 = vmatprep.subr.mxu0 %v8390_v55  ;;  %v3413_v39 = vadd.f32 %v16494_v50, %v16493_v6  ;;  %v9358_v35 = vld [vmem:[#allocation13 + $0x11d8] sm:$0xff]  ;;  %v7443_v50 = vld [vmem:[#allocation13 + $0xe28] sm:$0xff]  ;;  %v9357_v6 = vld [vmem:[#allocation13 + $0x11d0] sm:$0xff] }
 0x472   :  { %v14168_v37 = vadd.f32 %v3971_v8, %v3412_v14  ;;  %7119 = vmatprep.mubr.f32.mxu1 %v16275_v4  ;;  %11867 = vmatpush3.msra.mxu0 %v8390_v55  ;;  %v14171_v33 = vpop.f32.mrf.mxu0  ;;  %v7457_v7 = vld [vmem:[#allocation13 + $0xe98] sm:$0xff]  ;;  %v7442_v8 = vld [vmem:[#allocation13 + $0xe20] sm:$0xff] }
 0x473   :  { %16495 = vst [vmem:[#allocation87_spill] sm:$0xff] %v14171_v33  ;;  %v3973_v22 = vpop.f32.mrf.mxu1  ;;  %11869 = vmatmul.mubr.msk.f32.vlgmr.msra.gmra.mxu0 %vm211_vm1, %v14106_v57  ;;  %9416 = vmatprep.subr.mxu0 %v9373_v12  ;;  %v16499_v12 = vld [vmem:[#allocation90_spill] sm:$0xff] }
 0x474   :  { %v14177_v48 = vadd.f32 %v3973_v22, %v3413_v39  ;;  %9417 = vmatpush1.msra.mxu0 %v9372_v34  ;;  %11871 = vmatprep.mubr.msk.f32.mxu0 %vm211_vm1, %v14129_v40  ;;  %v14181_v55 = vpop.f32.mrf.mxu0  ;;  %v3372_v33 = vadd.f32 %v16499_v12, %v13685_v51  ;;  %v7428_v39 = vld [vmem:[#allocation13 + $0xdb0] sm:$0xff]  ;;  %v9343_v51 = vld [vmem:[#allocation13 + $0x1160] sm:$0xff] }
 0x475   :  { %16498 = vst [vmem:[#allocation88_spill] sm:$0xff] %v14181_v55  ;;  %v4131_v14 = vpop.f32.mrf.mxu1  ;;  %11429 = vmatmul.mubr.msk.f32.vlgmr.msra.gmra.mxu1 %vm211_vm1, %v13369_v9  ;;  %9418 = vmatprep.subr.mxu0 %v9358_v35  ;;  %v16501_v55 = vld [vmem:[#allocation91_spill] sm:$0xff]  ;;  %v7413_v35 = vld [vmem:[#allocation13 + $0xd38] sm:$0xff] }
 0x476   :  { %16497 = vst [vmem:[#allocation147_spill] sm:$0xff] %v14177_v48  ;;  %v14187_v58 = vadd.f32 %v4131_v14, %v3371_v15  ;;  %7601 = vmatpush1.msra.mxu1 %v7457_v7  ;;  %7125 = vmatprep.mubr.f32.mxu1 %v16275_v4  ;;  %v14190_v34 = vpop.f32.mrf.mxu0  ;;  %v3386_v9 = vadd.f32 %v16501_v55, %v13697_v44  ;;  %v16503_v14 = vld [vmem:[#allocation92_spill] sm:$0xff]  ;;  %v7462_v55 = vld [vmem:[#allocation13 + $0xec0] sm:$0xff] }
 0x477   :  { %16500 = vst [vmem:[#allocation89_spill] sm:$0xff] %v14190_v34  ;;  %v4133_v22 = vpop.f32.mrf.mxu1  ;;  %7602 = vmatprep.subr.mxu1 %v7443_v50  ;;  %9419 = vmatpush1.msra.mxu0 %v9357_v6  ;;  %v7412_v50 = vld [vmem:[#allocation13 + $0xd30] sm:$0xff]  ;;  %v9342_v6 = vld [vmem:[#allocation13 + $0x1158] sm:$0xff]  ;;  %v3387_v44 = vadd.f32 %v16503_v14, %v13704_v53  ;;  %v9327_v53 = vld [vmem:[#allocation13 + $0x10e0] sm:$0xff] }
 0x478   :  { %v14194_v48 = vadd.f32 %v4133_v22, %v3372_v33  ;;  %7603 = vmatpush1.msra.mxu1 %v7442_v8  ;;  %11872 = vmatmul.mubr.msk.f32.gmra.mxu0 %vm211_vm1, %v14152_v10  ;;  %v14198_v7 = vpop.f32.mrf.mxu0  ;;  %v9328_v22 = vld [vmem:[#allocation13 + $0x10e8] sm:$0xff] }
 0x479   :  { %16502 = vst [vmem:[#allocation90_spill] sm:$0xff] %v14198_v7  ;;  %v4137_v15 = vpop.f32.mrf.mxu1  ;;  %11430 = vmatmul.mubr.msk.f32.gmra.mxu1 %vm211_vm1, %v13388_v52  ;;  %7604 = vmatprep.subr.mxu1 %v7428_v39  ;;  %v16505_v52 = vld [vmem:[#allocation93_spill] sm:$0xff] }
 0x47a   :  { %v14204_v33 = vadd.f32 %v4137_v15, %v3386_v9  ;;  %7131 = vmatprep.mubr.f32.mxu1 %v16275_v4  ;;  %7605 = vmatpush1.msra.mxu1 %v7427_v38  ;;  %v14207_v8 = vpop.f32.mrf.mxu0  ;;  %v3401_v39 = vadd.f32 %v16505_v52, %v13713_v36  ;;  %v9377_v38 = vld [vmem:[#allocation13 + $0x1270] sm:$0xff] }
 0x47b   :  { %16504 = vst [vmem:[#allocation91_spill] sm:$0xff] %v14207_v8  ;;  %v4139_v12 = vpop.f32.mrf.mxu1  ;;  %7606 = vmatprep.subr.mxu1 %v7413_v35  ;;  %9420 = vmatprep.subr.mxu0 %v9343_v51  ;;  %v16507_v35 = vld [vmem:[#allocation94_spill] sm:$0xff] }
 0x47c   :  { %v14211_v7 = vadd.f32 %v4139_v12, %v3387_v44  ;;  %7607 = vmatpush1.msra.mxu1 %v7412_v50  ;;  %9421 = vmatpush1.msra.mxu0 %v9342_v6  ;;  %v14213_v9 = vpop.f32.mrf.mxu0  ;;  %v3402_v51 = vadd.f32 %v16507_v35, %v13720_v0  ;;  %v9376_v6 = vld [vmem:[#allocation13 + $0x1268] sm:$0xff]  ;;  %v9362_v0 = vld [vmem:[#allocation13 + $0x11f8] sm:$0xff] }
 0x47d   :  { %16506 = vst [vmem:[#allocation92_spill] sm:$0xff] %v14213_v9  ;;  %v4143_v15 = vpop.f32.mrf.mxu1  ;;  %11431 = vmatmul.mubr.msk.f32.gmra.mxu1 %vm211_vm1, %v13405_v20  ;;  %7778 = vmatprep.subr.mxu1 %v7462_v55  ;;  %v16509_v44 = vld [vmem:[#allocation95_spill] sm:$0xff]  ;;  %v16510_v12 = vld [vmem:[#allocation30_spill] sm:$0xff] }
 0x47e   :  { %v14219_v14 = vadd.f32 %v4143_v15, %v3401_v39  ;;  %7137 = vmatprep.mubr.f32.mxu1 %v16275_v4  ;;  %9422 = vmatprep.subr.mxu0 %v9328_v22  ;;  %v14222_v36 = vpop.f32.mrf.mxu0  ;;  %v3416_v20 = vadd.f32 %v16509_v44, %v13727_v60  ;;  %v16512_v39 = vld [vmem:[#allocation96_spill] sm:$0xff]  ;;  %v199_v60 = vld [vmem:[%s16252_s7 + $0x28] sm:$0x1] }
 0x47f   :  { %16508 = vst [vmem:[#allocation93_spill] sm:$0xff] %v14222_v36  ;;  %v4145_v50 = vpop.f32.mrf.mxu1  ;;  %9423 = vmatpush1.msra.mxu0 %v9327_v53  ;;  %9456 = vmatprep.mubr.f32.mxu0 %v16275_v4  ;;  %v3417_v53 = vadd.f32 %v16512_v39, %v13736_v59  ;;  %v7431_v36 = vld [vmem:[#allocation13 + $0xdc8] sm:$0xff] }
 0x480   :  { %v14227_v55 = vadd.f32 %v4145_v50, %v3402_v51  ;;  %11501 = vmatmul.mubr.msk.f32.vlgmr.msra.gmra.mxu0 %vm211_vm1, %v16510_v12  ;;  %9594 = vmatprep.subr.mxu0 %v9377_v38  ;;  %v14231_v52 = vpop.f32.mrf.mxu0  ;;  %v7461_v51 = vld [vmem:[#allocation13 + $0xeb8] sm:$0xff]  ;;  %v16519_v9 = vld [vmem:[#allocation99_spill] sm:$0xff] }
 0x481   :  { %16511 = vst [vmem:[#allocation94_spill] sm:$0xff] %v14231_v52  ;;  %v4149_v22 = vpop.f32.mrf.mxu1  ;;  %11432 = vmatmul.mubr.msk.f32.gmra.mxu1 %vm211_vm1, %v13423_v2  ;;  %9462 = vmatprep.mubr.f32.mxu0 %v16275_v4  ;;  %v12286_v2 = vmov 1   ;;  %v16514_v50 = vld [vmem:[#allocation97_spill] sm:$0xff]  ;;  %v3420_v8 = vadd.f32 %v16519_v9, %v13759_v28  ;;  %v16524_v28 = vld [vmem:[#allocation100_spill] sm:$0xff] }
 0x482   :  { %v14238_v15 = vadd.f32 %v4149_v22, %v3416_v20  ;;  %7640 = vmatprep.mubr.f32.mxu1 %v16275_v4  ;;  %9595 = vmatpush1.msra.mxu0 %v9376_v6  ;;  %v14244_v38 = vpop.f32.mrf.mxu0  ;;  %v3390_v44 = vadd.f32 %v16514_v50, %v13743_v43  ;;  %v7447_v20 = vld [vmem:[#allocation13 + $0xe48] sm:$0xff]  ;;  %v16515_v22 = vld [vmem:[#allocation32_spill] sm:$0xff]  ;;  %v3405_v9 = vadd.f32 %v16524_v28, %v13767_v19 }
 0x483   :  { %16513 = vst [vmem:[#allocation95_spill] sm:$0xff] %v14244_v38  ;;  %v4151_v35 = vpop.f32.mrf.mxu1  ;;  %9596 = vmatprep.subr.mxu0 %v9362_v0  ;;  %11967 = vset.pattern.permute.xlu0 %v12286_v2  ;;  %v9361_v6 = vld [vmem:[#allocation13 + $0x11f0] sm:$0xff]  ;;  %v7446_v38 = vld [vmem:[#allocation13 + $0xe40] sm:$0xff]  ;;  %v9388_v0 = vrot.slane %v199_v60, 1  ;;  %v7417_v60 = vld [vmem:[#allocation13 + $0xd58] sm:$0xff] }
 0x484   :  { %v14248_v59 = vadd.f32 %v4151_v35, %v3417_v53  ;;  %11502 = vmatmul.mubr.msk.f32.gmra.mxu0 %vm211_vm1, %v16515_v22  ;;  %v14252_v39 = vpop.f32.mrf.mxu0  ;;  %v16517_v2 = vld [vmem:[#allocation98_spill] sm:$0xff]  ;;  %v7432_v35 = vld [vmem:[#allocation13 + $0xdd0] sm:$0xff]  ;;  %v9346_v19 = vld [vmem:[#allocation13 + $0x1178] sm:$0xff] }
 0x485   :  { %16516 = vst [vmem:[#allocation30_spill] sm:$0xff] %v14252_v39  ;;  %v11800_v52 = vpop.f32.mrf.mxu1  ;;  %11441 = vmatmul.mubr.msk.f32.vlgmr.msra.gmra.mxu1 %vm211_vm1, %v13619_v54  ;;  %9468 = vmatprep.mubr.f32.mxu0 %v16275_v4  ;;  %v3375_v43 = vadd.f32 %v16517_v2, %v13751_v46  ;;  %v16520_v46 = vld [vmem:[#allocation33_spill] sm:$0xff] }
 0x486   :  { %v14259_v53 = vadd.f32 %v11800_v52, %v3390_v44  ;;  %7779 = vmatpush1.msra.mxu1 %v7461_v51  ;;  %7646 = vmatprep.mubr.f32.mxu1 %v16275_v4  ;;  %v14262_v50 = vpop.f32.mrf.mxu0  ;;  %v7416_v44 = vld [vmem:[#allocation13 + $0xd50] sm:$0xff] }
 0x487   :  { %16518 = vst [vmem:[#allocation96_spill] sm:$0xff] %v14262_v50  ;;  %v4309_v39 = vpop.f32.mrf.mxu1  ;;  %7780 = vmatprep.subr.mxu1 %v7447_v20  ;;  %9597 = vmatpush1.msra.mxu0 %v9361_v6  ;;  %v16522_v20 = vld [vmem:[#allocation31_spill] sm:$0xff] }
 0x488   :  { %v14266_v34 = vadd.f32 %v4309_v39, %v3375_v43  ;;  %7781 = vmatpush1.msra.mxu1 %v7446_v38  ;;  %11503 = vmatmul.mubr.msk.f32.gmra.mxu0 %vm211_vm1, %v16520_v46  ;;  %v14270_v52 = vpop.f32.mrf.mxu0  ;;  %v16523_v6 = vrot.slane %v16522_v20, 1  ;;  %v7466_v39 = vld [vmem:[#allocation13 + $0xee0] sm:$0xff] }
 0x489   :  { %16521 = vst [vmem:[#allocation97_spill] sm:$0xff] %v14270_v52  ;;  %v11803_v51 = vpop.f32.mrf.mxu1  ;;  %11442 = vmatmul.mubr.msk.f32.gmra.mxu1 %vm211_vm1, %v13642_v45  ;;  %7782 = vmatprep.subr.mxu1 %v7432_v35  ;;  %v9347_v35 = vld [vmem:[#allocation13 + $0x1180] sm:$0xff] }
 0x48a   :  { %v14277_v2 = vsel %vm1668_vm11, %v16523_v6, %v9388_v0  ;;  %v14281_v38 = vadd.f32 %v11803_v51, %v3420_v8  ;;  %7652 = vmatprep.mubr.f32.mxu1 %v16275_v4  ;;  %7783 = vmatpush1.msra.mxu1 %v7431_v36  ;;  %v14284_v43 = vpop.f32.mrf.mxu0  ;;  %v16526_v20 = vld [vmem:[#allocation101_spill] sm:$0xff]  ;;  %v16528_v51 = vld [vmem:[#allocation102_spill] sm:$0xff] }
 0x48b   :  { %16525 = vst [vmem:[#allocation32_spill] sm:$0xff] %v14284_v43  ;;  %v4319_v52 = vpop.f32.mrf.mxu1  ;;  %7784 = vmatprep.subr.mxu1 %v7417_v60  ;;  %9474 = vmatprep.mubr.f32.mxu0 %v16275_v4  ;;  %v4328_v0 = vadd.f32 %v16526_v20, %v13777_v61  ;;  %v9332_v60 = vld [vmem:[#allocation13 + $0x1108] sm:$0xff]  ;;  %v4329_v28 = vadd.f32 %v16528_v51, %v13782_v21  ;;  %v9331_v61 = vld [vmem:[#allocation13 + $0x1100] sm:$0xff]  ;;  %v7465_v51 = vld [vmem:[#allocation13 + $0xed8] sm:$0xff] }
 0x48c   :  { %v14289_v6 = vadd.f32 %v4319_v52, %v3405_v9  ;;  %7785 = vmatpush1.msra.mxu1 %v7416_v44  ;;  %11504 = vmatmul.mubr.msk.f32.gmra.mxu0 %vm211_vm1, %v14277_v2  ;;  %v14293_v8 = vpop.f32.mrf.mxu0  ;;  %v16529_v44 = vld [vmem:[#allocation103_spill] sm:$0xff] }
 0x48d   :  { %16527 = vst [vmem:[#allocation98_spill] sm:$0xff] %v14293_v8  ;;  %v4653_v36 = vpop.f32.mrf.mxu1  ;;  %11443 = vmatmul.mubr.msk.f32.gmra.mxu1 %vm211_vm1, %v13667_v3  ;;  %7956 = vmatprep.subr.mxu1 %v7466_v39  ;;  %v4343_v9 = vadd.f32 %v16529_v44, %v13792_v29  ;;  %v9381_v39 = vld [vmem:[#allocation13 + $0x1290] sm:$0xff]  ;;  %v9366_v29 = vld [vmem:[#allocation13 + $0x1218] sm:$0xff]  ;;  %v7451_v44 = vld [vmem:[#allocation13 + $0xe68] sm:$0xff] }
 0x48e   :  { %v14299_v43 = vadd.f32 %v4653_v36, %v4328_v0  ;;  %7658 = vmatprep.mubr.f32.mxu1 %v16275_v4  ;;  %9598 = vmatprep.subr.mxu0 %v9347_v35  ;;  %v14307_v8 = vpop.f32.mrf.mxu0  ;;  %v9380_v35 = vld [vmem:[#allocation13 + $0x1288] sm:$0xff]  ;;  %v16531_v0 = vld [vmem:[#allocation104_spill] sm:$0xff] }
 0x48f   :  { %v4655_v52 = vpop.f32.mrf.mxu1  ;;  %9599 = vmatpush1.msra.mxu0 %v9346_v19  ;;  %9634 = vmatprep.mubr.f32.mxu0 %v16275_v4  ;;  %16530 = vst [vmem:[#allocation99_spill] sm:$0xff] %v14307_v8  ;;  %v4344_v19 = vadd.f32 %v16531_v0, %v13797_v56  ;;  %v16534_v0 = vld [vmem:[#allocation107_spill] sm:$0xff] }
 0x490   :  { %v14305_v20 = vadd.f32 %v4655_v52, %v4329_v28  ;;  %9600 = vmatprep.subr.mxu0 %v9332_v60  ;;  %v16532_v28 = vld [vmem:[#allocation106_spill] sm:$0xff]  ;;  %v4359_v8 = vadd.f32 %v16534_v0, %v13812_v13  ;;  %v7421_v13 = vld [vmem:[#allocation13 + $0xd78] sm:$0xff] }
 0x491   :  { %v4659_v21 = vpop.f32.mrf.mxu1  ;;  %11444 = vmatmul.mubr.msk.f32.gmra.mxu1 %vm211_vm1, %v13690_v41  ;;  %9601 = vmatpush1.msra.mxu0 %v9331_v61  ;;  %v4358_v61 = vadd.f32 %v16532_v28, %v13807_v47  ;;  %v7436_v47 = vld [vmem:[#allocation13 + $0xdf0] sm:$0xff] }
 0x492   :  { %v14313_v36 = vadd.f32 %v4659_v21, %v4343_v9  ;;  %7818 = vmatprep.mubr.f32.mxu1 %v16275_v4  ;;  %11509 = vmatmul.mubr.msk.f32.vlgmr.msra.gmra.mxu0 %vm211_vm1, %v16510_v12  ;;  %v7450_v21 = vld [vmem:[#allocation13 + $0xe60] sm:$0xff] }
 0x493   :  { %v4661_v60 = vpop.f32.mrf.mxu1  ;;  %9640 = vmatprep.mubr.f32.mxu0 %v16275_v4  ;;  %9772 = vmatprep.subr.mxu0 %v9381_v39 }
 0x494   :  { %v14321_v52 = vadd.f32 %v4661_v60, %v4344_v19  ;;  %9773 = vmatpush1.msra.mxu0 %v9380_v35  ;;  %v14323_v56 = vpop.f32.mrf.mxu0  ;;  %v7435_v19 = vld [vmem:[#allocation13 + $0xde8] sm:$0xff]  ;;  %v16536_v60 = vld [vmem:[#allocation108_spill] sm:$0xff] }
 0x495   :  { %16533 = vst [vmem:[#allocation33_spill] sm:$0xff] %v14323_v56  ;;  %v4665_v9 = vpop.f32.mrf.mxu1  ;;  %11449 = vmatmul.mubr.msk.f32.vlgmr.msra.gmra.mxu1 %vm211_vm1, %v13619_v54  ;;  %9774 = vmatprep.subr.mxu0 %v9366_v29  ;;  %v4373_v29 = vadd.f32 %v16536_v60, %v13822_v31  ;;  %v7469_v31 = vld [vmem:[#allocation13 + $0xef8] sm:$0xff]  ;;  %v16541_v60 = vld [vmem:[#allocation47_spill] sm:$0xff] }
 0x496   :  { %v14329_v50 = vadd.f32 %v4665_v9, %v4358_v61  ;;  %7957 = vmatpush1.msra.mxu1 %v7465_v51  ;;  %7824 = vmatprep.mubr.f32.mxu1 %v16275_v4  ;;  %v14332_v39 = vpop.f32.mrf.mxu0  ;;  %v7420_v61 = vld [vmem:[#allocation13 + $0xd70] sm:$0xff] }
 0x497   :  { %16535 = vst [vmem:[#allocation31_spill] sm:$0xff] %v14332_v39  ;;  %v4667_v35 = vpop.f32.mrf.mxu1  ;;  %7958 = vmatprep.subr.mxu1 %v7451_v44  ;;  %11510 = vmatmul.mubr.msk.f32.gmra.mxu0 %vm211_vm1, %v16515_v22  ;;  %v16538_v44 = vld [vmem:[#allocation109_spill] sm:$0xff] }
 0x498   :  { %v14338_v28 = vadd.f32 %v4667_v35, %v4359_v8  ;;  %7959 = vmatpush1.msra.mxu1 %v7450_v21  ;;  %9646 = vmatprep.mubr.f32.mxu0 %v16275_v4  ;;  %v4374_v9 = vadd.f32 %v16538_v44, %v13829_v18  ;;  %v9365_v35 = vld [vmem:[#allocation13 + $0x1210] sm:$0xff]  ;;  %v9351_v18 = vld [vmem:[#allocation13 + $0x11a0] sm:$0xff] }
 0x499   :  { %v4671_v51 = vpop.f32.mrf.mxu1  ;;  %11450 = vmatmul.mubr.msk.f32.gmra.mxu1 %vm211_vm1, %v13642_v45  ;;  %7960 = vmatprep.subr.mxu1 %v7436_v47  ;;  %v16542_v47 = vld [vmem:[#allocation110_spill] sm:$0xff]  ;;  %v16546_v44 = vld [vmem:[#allocation111_spill] sm:$0xff] }
 0x49a   :  { %16537 = vst [vmem:[#allocation100_spill] sm:$0xff] %v14338_v28  ;;  %v14345_v0 = vadd.f32 %v4671_v51, %v4373_v29  ;;  %7830 = vmatprep.mubr.f32.mxu1 %v16275_v4  ;;  %7961 = vmatpush1.msra.mxu1 %v7435_v19  ;;  %v14348_v8 = vpop.f32.mrf.mxu0  ;;  %v4332_v39 = vadd.f32 %v16542_v47, %v16541_v60  ;;  %v16545_v51 = vld [vmem:[#allocation35_spill] sm:$0xff]  ;;  %v16548_v47 = vld [vmem:[#allocation49_spill] sm:$0xff] }
 0x49b   :  { %16540 = vst [vmem:[#allocation102_spill] sm:$0xff] %v14348_v8  ;;  %v4673_v21 = vpop.f32.mrf.mxu1  ;;  %7962 = vmatprep.subr.mxu1 %v7421_v13  ;;  %11511 = vmatmul.mubr.msk.f32.gmra.mxu0 %vm211_vm1, %v16520_v46  ;;  %v9350_v13 = vld [vmem:[#allocation13 + $0x1198] sm:$0xff]  ;;  %v4333_v8 = vadd.f32 %v16546_v44, %v16545_v51 }
 0x49c   :  { %16539 = vst [vmem:[#allocation101_spill] sm:$0xff] %v14345_v0  ;;  %v14354_v56 = vadd.f32 %v4673_v21, %v4374_v9  ;;  %7963 = vmatpush1.msra.mxu1 %v7420_v61  ;;  %9652 = vmatprep.mubr.f32.mxu0 %v16275_v4  ;;  %v14357_v29 = vpop.f32.mrf.mxu0  ;;  %v9336_v61 = vld [vmem:[#allocation13 + $0x1128] sm:$0xff]  ;;  %v9335_v21 = vld [vmem:[#allocation13 + $0x1120] sm:$0xff] }
 0x49d   :  { %16544 = vst [vmem:[#allocation104_spill] sm:$0xff] %v14357_v29  ;;  %v4831_v19 = vpop.f32.mrf.mxu1  ;;  %11451 = vmatmul.mubr.msk.f32.gmra.mxu1 %vm211_vm1, %v13667_v3  ;;  %11846 = vmatprep.subr.mxu1 %v7469_v31  ;;  %v16549_v29 = vld [vmem:[#allocation112_spill] sm:$0xff] }
 0x49e   :  { %16543 = vst [vmem:[#allocation103_spill] sm:$0xff] %v14354_v56  ;;  %v14363_v0 = vadd.f32 %v4831_v19, %v4332_v39  ;;  %7836 = vmatprep.mubr.f32.mxu1 %v16275_v4  ;;  %9775 = vmatpush1.msra.mxu0 %v9365_v35  ;;  %v4347_v56 = vadd.f32 %v16549_v29, %v16548_v47  ;;  %v9385_v39 = vld [vmem:[#allocation13 + $0x12b0] sm:$0xff]  ;;  %v9384_v35 = vld [vmem:[#allocation13 + $0x12a8] sm:$0xff] }
 0x49f   :  { %v4833_v9 = vpop.f32.mrf.mxu1  ;;  %11512 = vmatmul.mubr.msk.f32.gmra.mxu0 %vm211_vm1, %v14277_v2  ;;  %9776 = vmatprep.subr.mxu0 %v9351_v18  ;;  %v14368_v60 = vpop.f32.mrf.mxu0  ;;  %v16552_v18 = vld [vmem:[#allocation113_spill] sm:$0xff] }
 0x4a0   :  { %16547 = vst [vmem:[#allocation106_spill] sm:$0xff] %v14368_v60  ;;  %v14372_v28 = vadd.f32 %v4833_v9, %v4333_v8  ;;  %9777 = vmatpush1.msra.mxu0 %v9350_v13  ;;  %9812 = vmatprep.mubr.f32.mxu0 %v16275_v4  ;;  %v4348_v44 = vadd.f32 %v16552_v18, %v13860_v11  ;;  %v9370_v8 = vld [vmem:[#allocation13 + $0x1238] sm:$0xff] }
 0x4a1   :  { %v4837_v19 = vpop.f32.mrf.mxu1  ;;  %11452 = vmatmul.mubr.msk.f32.gmra.mxu1 %vm211_vm1, %v13690_v41  ;;  %9778 = vmatprep.subr.mxu0 %v9336_v61  ;;  %v14377_v51 = vpop.f32.mrf.mxu0  ;;  %v16554_v61 = vld [vmem:[#allocation114_spill] sm:$0xff] }
 0x4a2   :  { %16550 = vst [vmem:[#allocation107_spill] sm:$0xff] %v14372_v28  ;;  %16551 = vst [vmem:[#allocation108_spill] sm:$0xff] %v14377_v51  ;;  %v14381_v60 = vadd.f32 %v4837_v19, %v4347_v56  ;;  %7996 = vmatprep.mubr.f32.mxu1 %v16275_v4  ;;  %9779 = vmatpush1.msra.mxu0 %v9335_v21  ;;  %v4362_v9 = vadd.f32 %v16554_v61, %v13870_v30  ;;  %v7454_v28 = vld [vmem:[#allocation13 + $0xe80] sm:$0xff]  ;;  %v16557_v21 = vld [vmem:[#allocation51_spill] sm:$0xff] }
 0x4a3   :  { %v4839_v29 = vpop.f32.mrf.mxu1  ;;  %11517 = vmatmul.mubr.msk.f32.vlgmr.msra.gmra.mxu0 %vm211_vm1, %v16510_v12  ;;  %9950 = vmatprep.subr.mxu0 %v9385_v39  ;;  %v14386_v13 = vpop.f32.mrf.mxu0  ;;  %v16558_v39 = vld [vmem:[#allocation115_spill] sm:$0xff]  ;;  %v16570_v51 = vld [vmem:[#allocation118_spill] sm:$0xff] }
 0x4a4   :  { %16553 = vst [vmem:[#allocation109_spill] sm:$0xff] %v14386_v13  ;;  %v14390_v47 = vadd.f32 %v4839_v29, %v4348_v44  ;;  %9818 = vmatprep.mubr.f32.mxu0 %v16275_v4  ;;  %9951 = vmatpush1.msra.mxu0 %v9384_v35  ;;  %v4363_v19 = vadd.f32 %v16558_v39, %v16557_v21  ;;  %v7439_v30 = vld [vmem:[#allocation13 + $0xe08] sm:$0xff]  ;;  %v16561_v29 = vld [vmem:[#allocation37_spill] sm:$0xff]  ;;  %v7424_v21 = vld [vmem:[#allocation13 + $0xd90] sm:$0xff] }
 0x4a5   :  { %v4843_v11 = vpop.f32.mrf.mxu1  ;;  %11457 = vmatmul.mubr.msk.f32.vlgmr.msra.gmra.mxu1 %vm211_vm1, %v13619_v54  ;;  %9952 = vmatprep.subr.mxu0 %v9370_v8  ;;  %v14395_v56 = vpop.f32.mrf.mxu0  ;;  %v16562_v8 = vld [vmem:[#allocation116_spill] sm:$0xff]  ;;  %v16566_v39 = vld [vmem:[#allocation117_spill] sm:$0xff] }
 0x4a6   :  { %16555 = vst [vmem:[#allocation47_spill] sm:$0xff] %v14390_v47  ;;  %16556 = vst [vmem:[#allocation110_spill] sm:$0xff] %v14395_v56  ;;  %v14399_v18 = vadd.f32 %v4843_v11, %v4362_v9  ;;  %11847 = vmatpush3.msra.mxu1 %v7469_v31  ;;  %8002 = vmatprep.mubr.f32.mxu1 %v16275_v4  ;;  %v4377_v61 = vadd.f32 %v16562_v8, %v16561_v29  ;;  %v16565_v11 = vld [vmem:[#allocation53_spill] sm:$0xff]  ;;  %v16569_v8 = vld [vmem:[#allocation56_spill] sm:$0xff] }
 0x4a7   :  { %v4845_v44 = vpop.f32.mrf.mxu1  ;;  %11848 = vmatprep.subr.mxu1 %v7454_v28  ;;  %11518 = vmatmul.mubr.msk.f32.gmra.mxu0 %vm211_vm1, %v16515_v22  ;;  %v14404_v35 = vpop.f32.mrf.mxu0  ;;  %v4378_v13 = vadd.f32 %v16566_v39, %v16565_v11  ;;  %v16573_v39 = vld [vmem:[#allocation119_spill] sm:$0xff] }
 0x4a8   :  { %16559 = vst [vmem:[#allocation35_spill] sm:$0xff] %v14399_v18  ;;  %16560 = vst [vmem:[#allocation111_spill] sm:$0xff] %v14404_v35  ;;  %v14408_v56 = vadd.f32 %v4845_v44, %v4363_v19  ;;  %11849 = vmatpush3.msra.mxu1 %v7454_v28  ;;  %9824 = vmatprep.mubr.f32.mxu0 %v16275_v4  ;;  %v8422_v19 = vld [vmem:[#allocation13 + $0x1070] sm:$0xff] }
 0x4a9   :  { %v4849_v31 = vpop.f32.mrf.mxu1  ;;  %11458 = vmatmul.mubr.msk.f32.gmra.mxu1 %vm211_vm1, %v13642_v45  ;;  %11850 = vmatprep.subr.mxu1 %v7439_v30  ;;  %v14413_v9 = vpop.f32.mrf.mxu0  ;;  %v9369_v44 = vld [vmem:[#allocation13 + $0x1230] sm:$0xff] }
 0x4aa   :  { %16563 = vst [vmem:[#allocation49_spill] sm:$0xff] %v14408_v56  ;;  %16564 = vst [vmem:[#allocation112_spill] sm:$0xff] %v14413_v9  ;;  %v14417_v35 = vadd.f32 %v4849_v31, %v4377_v61  ;;  %8008 = vmatprep.mubr.f32.mxu1 %v16275_v4  ;;  %11851 = vmatpush3.msra.mxu1 %v7439_v30  ;;  %v4336_v9 = vadd.f32 %v16570_v51, %v16569_v8  ;;  %v9355_v61 = vld [vmem:[#allocation13 + $0x11c0] sm:$0xff]  ;;  %v9354_v30 = vld [vmem:[#allocation13 + $0x11b8] sm:$0xff] }
 0x4ab   :  { %v4851_v28 = vpop.f32.mrf.mxu1  ;;  %11852 = vmatprep.subr.mxu1 %v7424_v21  ;;  %11519 = vmatmul.mubr.msk.f32.gmra.mxu0 %vm211_vm1, %v16520_v46  ;;  %v14422_v29 = vpop.f32.mrf.mxu0  ;;  %v9340_v51 = vld [vmem:[#allocation13 + $0x1148] sm:$0xff] }
 0x4ac   :  { %16567 = vst [vmem:[#allocation113_spill] sm:$0xff] %v14417_v35  ;;  %16568 = vst [vmem:[#allocation114_spill] sm:$0xff] %v14422_v29  ;;  %v14426_v56 = vadd.f32 %v4851_v28, %v4378_v13  ;;  %11853 = vmatpush3.msra.mxu1 %v7424_v21  ;;  %9830 = vmatprep.mubr.f32.mxu0 %v16275_v4  ;;  %v4337_v29 = vadd.f32 %v16573_v39, %v13911_v42  ;;  %v9339_v21 = vld [vmem:[#allocation13 + $0x1140] sm:$0xff] }
 0x4ad   :  { %v5009_v31 = vpop.f32.mrf.mxu1  ;;  %11459 = vmatmul.mubr.msk.f32.gmra.mxu1 %vm211_vm1, %v13667_v3  ;;  %8462 = vmatprep.subr.mxu1 %v8422_v19  ;;  %v14431_v11 = vpop.f32.mrf.mxu0  ;;  %v16574_v28 = vld [vmem:[#allocation41_spill] sm:$0xff]  ;;  %v16575_v19 = vld [vmem:[#allocation62_spill] sm:$0xff] }
 0x4ae   :  { %16571 = vst [vmem:[#allocation51_spill] sm:$0xff] %v14426_v56  ;;  %16572 = vst [vmem:[#allocation115_spill] sm:$0xff] %v14431_v11  ;;  %v14435_v35 = vadd.f32 %v5009_v31, %v4336_v9  ;;  %8014 = vmatprep.mubr.f32.mxu1 %v16275_v4  ;;  %9953 = vmatpush1.msra.mxu0 %v9369_v44  ;;  %v2433_v8 = vadd.f32 %v16575_v19, %v16574_v28  ;;  %v16576_v56 = vld [vmem:[#allocation58_spill] sm:$0xff]  ;;  %v16577_v11 = vld [vmem:[#allocation120_spill] sm:$0xff] }
 0x4af   :  { %v5011_v13 = vpop.f32.mrf.mxu1  ;;  %11520 = vmatmul.mubr.msk.f32.gmra.mxu0 %vm211_vm1, %v14277_v2  ;;  %9954 = vmatprep.subr.mxu0 %v9355_v61  ;;  %v4351_v18 = vadd.f32 %v16577_v11, %v16576_v56  ;;  %v16579_v44 = vld [vmem:[#allocation121_spill] sm:$0xff]  ;;  %v16581_v11 = vld [vmem:[#allocation64_spill] sm:$0xff]  ;;  %v16585_v19 = vld [vmem:[#allocation123_spill] sm:$0xff] }
 0x4b0   :  { %v14444_v47 = vadd.f32 %v5011_v13, %v4337_v29  ;;  %9955 = vmatpush1.msra.mxu0 %v9354_v30  ;;  %9990 = vmatprep.mubr.f32.mxu0 %v16275_v4  ;;  %v14447_v42 = vpop.f32.mrf.mxu0  ;;  %v4352_v61 = vadd.f32 %v16579_v44, %v13934_v63  ;;  %v3400_v31 = vadd.f32 %v13946_v26, %v2433_v8  ;;  %v8421_v29 = vld [vmem:[#allocation13 + $0x1068] sm:$0xff]  ;;  %v8407_v26 = vld [vmem:[#allocation13 + $0xff8] sm:$0xff] }
 0x4b1   :  { %16578 = vst [vmem:[#allocation37_spill] sm:$0xff] %v14447_v42  ;;  %v5015_v9 = vpop.f32.mrf.mxu1  ;;  %11460 = vmatmul.mubr.msk.f32.gmra.mxu1 %vm211_vm1, %v13690_v41  ;;  %9956 = vmatprep.subr.mxu0 %v9340_v51  ;;  %v16580_v30 = vld [vmem:[#allocation42_spill] sm:$0xff] }
 0x4b2   :  { %v14454_v39 = vadd.f32 %v5015_v9, %v4351_v18  ;;  %11854 = vmatprep.mubr.msk.f32.mxu1 %vm211_vm1, %v13619_v54  ;;  %9957 = vmatpush1.msra.mxu0 %v9339_v21  ;;  %v2448_v13 = vadd.f32 %v16581_v11, %v16580_v30  ;;  %v16582_v51 = vld [vmem:[#allocation122_spill] sm:$0xff]  ;;  %v14467_v18 = vpop.f32.mrf.mxu0  ;;  %v8406_v21 = vld [vmem:[#allocation13 + $0xff0] sm:$0xff]  ;;  %v4367_v8 = vadd.f32 %v16585_v19, %v3400_v31 }
 0x4b3   :  { %v5017_v56 = vpop.f32.mrf.mxu1  ;;  %11525 = vmatmul.mubr.msk.f32.vlgmr.msra.gmra.mxu0 %vm211_vm1, %v16510_v12  ;;  %v4366_v28 = vadd.f32 %v16582_v51, %v13944_v16  ;;  %16584 = vst [vmem:[#allocation53_spill] sm:$0xff] %v14467_v18  ;;  %v16586_v9 = vld [vmem:[#allocation63_spill] sm:$0xff]  ;;  %v8392_v16 = vld [vmem:[#allocation13 + $0xf80] sm:$0xff]  ;;  %v16591_v31 = vld [vmem:[#allocation124_spill] sm:$0xff] }
 0x4b4   :  { %v14464_v63 = vadd.f32 %v5017_v56, %v4352_v61  ;;  %9996 = vmatprep.mubr.f32.mxu0 %v16275_v4  ;;  %v3415_v44 = vadd.f32 %v16586_v9, %v2448_v13  ;;  %v8391_v56 = vld [vmem:[#allocation13 + $0xf78] sm:$0xff]  ;;  %v16588_v11 = vld [vmem:[#allocation43_spill] sm:$0xff] }
 0x4b5   :  { %v5021_v54 = vpop.f32.mrf.mxu1  ;;  %11855 = vmatmul.mubr.msk.f32.vlgmr.msra.gmra.mxu1 %vm211_vm1, %v13642_v45  ;;  %v16589_v45 = vld [vmem:[#allocation66_spill] sm:$0xff]  ;;  %v16590_v18 = vld [vmem:[#allocation59_spill] sm:$0xff] }
 0x4b6   :  { %16583 = vst [vmem:[#allocation116_spill] sm:$0xff] %v14464_v63  ;;  %v14473_v30 = vadd.f32 %v5021_v54, %v4366_v28  ;;  %8463 = vmatpush1.msra.mxu1 %v8421_v29  ;;  %11857 = vmatprep.mubr.msk.f32.mxu1 %vm211_vm1, %v13667_v3  ;;  %v2407_v51 = vadd.f32 %v16589_v45, %v16588_v11  ;;  %v8377_v29 = vld [vmem:[#allocation13 + $0xf08] sm:$0xff]  ;;  %v16594_v54 = vld [vmem:[#allocation125_spill] sm:$0xff] }
 0x4b7   :  { %v5023_v61 = vpop.f32.mrf.mxu1  ;;  %8464 = vmatprep.subr.mxu1 %v8407_v26  ;;  %11526 = vmatmul.mubr.msk.f32.gmra.mxu0 %vm211_vm1, %v16515_v22  ;;  %v4381_v19 = vadd.f32 %v16591_v31, %v16590_v18  ;;  %v8376_v26 = vld [vmem:[#allocation13 + $0xf00] sm:$0xff]  ;;  %v4382_v9 = vadd.f32 %v16594_v54, %v3415_v44  ;;  %v8426_v18 = vld [vmem:[#allocation13 + $0x1090] sm:$0xff] }
 0x4b8   :  { %16587 = vst [vmem:[#allocation117_spill] sm:$0xff] %v14473_v30  ;;  %v14483_v13 = vadd.f32 %v5023_v61, %v4367_v8  ;;  %8465 = vmatpush1.msra.mxu1 %v8406_v21  ;;  %10002 = vmatprep.mubr.f32.mxu0 %v16275_v4  ;;  %v14486_v3 = vpop.f32.mrf.mxu0  ;;  %v16595_v11 = vld [vmem:[#allocation166_spill] sm:$0xff]  ;;  %v16600_v44 = vld [vmem:[#allocation65_spill] sm:$0xff] }
 0x4b9   :  { %16593 = vst [vmem:[#allocation118_spill] sm:$0xff] %v14486_v3  ;;  %v5027_v28 = vpop.f32.mrf.mxu1  ;;  %11858 = vmatmul.mubr.msk.f32.gmra.mxu1 %vm211_vm1, %v13690_v41  ;;  %8466 = vmatprep.subr.mxu1 %v8392_v16  ;;  %v3374_v45 = vadd.f32 %v16595_v11, %v2407_v51  ;;  %v8425_v61 = vld [vmem:[#allocation13 + $0x1088] sm:$0xff]  ;;  %v16598_v41 = vld [vmem:[#allocation44_spill] sm:$0xff] }
 0x4ba   :  { %16592 = vst [vmem:[#allocation56_spill] sm:$0xff] %v14483_v13  ;;  %v14492_v42 = vadd.f32 %v5027_v28, %v4381_v19  ;;  %8467 = vmatpush1.msra.mxu1 %v8391_v56  ;;  %8502 = vmatprep.mubr.f32.mxu1 %v16275_v4  ;;  %v14495_v21 = vpop.f32.mrf.mxu0  ;;  %v16599_v16 = vld [vmem:[#allocation68_spill] sm:$0xff]  ;;  %v16601_v54 = vld [vmem:[#allocation126_spill] sm:$0xff] }
 0x4bb   :  { %16597 = vst [vmem:[#allocation41_spill] sm:$0xff] %v14495_v21  ;;  %v5029_v8 = vpop.f32.mrf.mxu1  ;;  %8468 = vmatprep.subr.mxu1 %v8377_v29  ;;  %11527 = vmatmul.mubr.msk.f32.gmra.mxu0 %vm211_vm1, %v16520_v46  ;;  %v2422_v31 = vadd.f32 %v16599_v16, %v16598_v41  ;;  %v4340_v51 = vadd.f32 %v16601_v54, %v16600_v44  ;;  %v8411_v56 = vld [vmem:[#allocation13 + $0x1018] sm:$0xff]  ;;  %v8410_v41 = vld [vmem:[#allocation13 + $0x1010] sm:$0xff]  ;;  %v8396_v54 = vld [vmem:[#allocation13 + $0xfa0] sm:$0xff] }
 0x4bc   :  { %16596 = vst [vmem:[#allocation119_spill] sm:$0xff] %v14492_v42  ;;  %v14503_v19 = vadd.f32 %v5029_v8, %v4382_v9  ;;  %8469 = vmatpush1.msra.mxu1 %v8376_v26  ;;  %10008 = vmatprep.mubr.f32.mxu0 %v16275_v4  ;;  %v14506_v28 = vpop.f32.mrf.mxu0  ;;  %v14511_v29 = vld [vmem:[%s16252_s7 + $0x8] sm:$0xff]  ;;  %v16605_v8 = vld [vmem:[#allocation169_spill] sm:$0xff] }
 0x4bd   :  { %16603 = vst [vmem:[#allocation58_spill] sm:$0xff] %v14506_v28  ;;  %v5187_v11 = vpop.f32.mrf.mxu1  ;;  %11469 = vmatmul.mubr.msk.f32.vlgmr.msra.gmra.mxu1 %vm211_vm1, %v14511_v29  ;;  %8640 = vmatprep.subr.mxu1 %v8426_v18  ;;  %v16604_v16 = vld [vmem:[#allocation127_spill] sm:$0xff]  ;;  %v3389_v26 = vadd.f32 %v16605_v8, %v2422_v31  ;;  %v8395_v3 = vld [vmem:[#allocation13 + $0xf98] sm:$0xff] }
 0x4be   :  { %16602 = vst [vmem:[#allocation62_spill] sm:$0xff] %v14503_v19  ;;  %v4341_v9 = vadd.f32 %v16604_v16, %v3374_v45  ;;  %v14517_v44 = vadd.f32 %v5187_v11, %v4340_v51  ;;  %8641 = vmatpush1.msra.mxu1 %v8425_v61  ;;  %8508 = vmatprep.mubr.f32.mxu1 %v16275_v4  ;;  %v14520_v28 = vpop.f32.mrf.mxu0  ;;  %v16608_v18 = vld [vmem:[#allocation45_spill] sm:$0xff]  ;;  %v16609_v19 = vld [vmem:[#allocation70_spill] sm:$0xff]  ;;  %v16610_v45 = vld [vmem:[#allocation67_spill] sm:$0xff] }
 0x4bf   :  { %16607 = vst [vmem:[#allocation121_spill] sm:$0xff] %v14520_v28  ;;  %v5189_v21 = vpop.f32.mrf.mxu1  ;;  %8642 = vmatprep.subr.mxu1 %v8411_v56  ;;  %11528 = vmatmul.mubr.msk.f32.gmra.mxu0 %vm211_vm1, %v14277_v2  ;;  %v2437_v42 = vadd.f32 %v16609_v19, %v16608_v18  ;;  %v16611_v16 = vld [vmem:[#allocation128_spill] sm:$0xff]  ;;  %v8381_v61 = vld [vmem:[#allocation13 + $0xf28] sm:$0xff]  ;;  %v8380_v56 = vld [vmem:[#allocation13 + $0xf20] sm:$0xff] }
 0x4c0   :  { %16606 = vst [vmem:[#allocation120_spill] sm:$0xff] %v14517_v44  ;;  %v4355_v31 = vadd.f32 %v16611_v16, %v16610_v45  ;;  %v14528_v51 = vadd.f32 %v5189_v21, %v4341_v9  ;;  %8643 = vmatpush1.msra.mxu1 %v8410_v41  ;;  %v14530_v11 = vpop.f32.mrf.mxu0  ;;  %v16614_v28 = vld [vmem:[#allocation129_spill] sm:$0xff]  ;;  %v16615_v13 = vld [vmem:[#allocation172_spill] sm:$0xff]  ;;  %v16617_v18 = vld [vmem:[#allocation46_spill] sm:$0xff] }
 0x4c1   :  { %16613 = vst [vmem:[#allocation64_spill] sm:$0xff] %v14530_v11  ;;  %v5193_v8 = vpop.f32.mrf.mxu1  ;;  %11470 = vmatmul.mubr.msk.f32.gmra.mxu1 %vm211_vm1, %v14106_v57  ;;  %8644 = vmatprep.subr.mxu1 %v8396_v54  ;;  %v4356_v44 = vadd.f32 %v16614_v28, %v3389_v26  ;;  %v3404_v30 = vadd.f32 %v16615_v13, %v2437_v42  ;;  %v8430_v21 = vld [vmem:[#allocation13 + $0x10b0] sm:$0xff]  ;;  %v16619_v11 = vld [vmem:[#allocation69_spill] sm:$0xff]  ;;  %v16620_v54 = vld [vmem:[#allocation130_spill] sm:$0xff] }
 0x4c2   :  { %16612 = vst [vmem:[#allocation42_spill] sm:$0xff] %v14528_v51  ;;  %v14536_v19 = vadd.f32 %v5193_v8, %v4355_v31  ;;  %8514 = vmatprep.mubr.f32.mxu1 %v16275_v4  ;;  %8645 = vmatpush1.msra.mxu1 %v8395_v3  ;;  %v14539_v41 = vpop.f32.mrf.mxu0  ;;  %v16618_v45 = vld [vmem:[#allocation72_spill] sm:$0xff]  ;;  %v4370_v51 = vadd.f32 %v16620_v54, %v16619_v11  ;;  %v16622_v3 = vld [vmem:[#allocation131_spill] sm:$0xff]  ;;  %v16623_v26 = vld [vmem:[#allocation174_spill] sm:$0xff] }
 0x4c3   :  { %16616 = vst [vmem:[#allocation122_spill] sm:$0xff] %v14539_v41  ;;  %v5195_v9 = vpop.f32.mrf.mxu1  ;;  %8646 = vmatprep.subr.mxu1 %v8381_v61  ;;  %v2452_v16 = vadd.f32 %v16618_v45, %v16617_v18  ;;  %v4371_v28 = vadd.f32 %v16622_v3, %v3404_v30  ;;  %v16627_v30 = vld [vmem:[#allocation133_spill] sm:$0xff]  ;;  %v8429_v3 = vld [vmem:[#allocation13 + $0x10a8] sm:$0xff] }
 0x4c4   :  { %v14545_v63 = vadd.f32 %v5195_v9, %v4356_v44  ;;  %8647 = vmatpush1.msra.mxu1 %v8380_v56  ;;  %v14547_v42 = vpop.f32.mrf.mxu0  ;;  %v16625_v56 = vld [vmem:[#allocation71_spill] sm:$0xff]  ;;  %v16626_v9 = vld [vmem:[#allocation132_spill] sm:$0xff] }
 0x4c5   :  { %16621 = vst [vmem:[#allocation123_spill] sm:$0xff] %v14547_v42  ;;  %v5199_v13 = vpop.f32.mrf.mxu1  ;;  %11471 = vmatmul.mubr.msk.f32.gmra.mxu1 %vm211_vm1, %v14129_v40  ;;  %8818 = vmatprep.subr.mxu1 %v8430_v21  ;;  %v3419_v31 = vadd.f32 %v16623_v26, %v2452_v16  ;;  %v4385_v18 = vadd.f32 %v16626_v9, %v16625_v56  ;;  %v16629_v26 = vld [vmem:[#allocation134_spill] sm:$0xff] }
 0x4c6   :  { %v14553_v61 = vadd.f32 %v5199_v13, %v4370_v51  ;;  %8520 = vmatprep.mubr.f32.mxu1 %v16275_v4  ;;  %v14556_v8 = vpop.f32.mrf.mxu0  ;;  %v5297_v56 = vadd.f32 %v16629_v26, %v14030_v25  ;;  %v16633_v26 = vld [vmem:[#allocation137_spill] sm:$0xff]  ;;  %v8385_v42 = vld [vmem:[#allocation13 + $0xf48] sm:$0xff] }
 0x4c7   :  { %16624 = vst [vmem:[#allocation63_spill] sm:$0xff] %v14556_v8  ;;  %v5201_v44 = vpop.f32.mrf.mxu1  ;;  %v703_v11 = vpop.xlane.xlu0 %702  ;;  %v4386_v21 = vadd.f32 %v16627_v30, %v3419_v31  ;;  %v8414_v31 = vld [vmem:[#allocation13 + $0x1030] sm:$0xff] }
 0x4c8   :  { %v14560_v45 = vadd.f32 %v5201_v44, %v4371_v28  ;;  %11986 = vrcp.f32 %v703_v11  ;;  %v8415_v44 = vld [vmem:[#allocation13 + $0x1038] sm:$0xff] }
 0x4c9   :  { %v5205_v54 = vpop.f32.mrf.mxu1  ;;  %11472 = vmatmul.mubr.msk.f32.gmra.mxu1 %vm211_vm1, %v14152_v10 }
 0x4ca   :  { %v14565_v51 = vadd.f32 %v5205_v54, %v4385_v18  ;;  %8680 = vmatprep.mubr.f32.mxu1 %v16275_v4  ;;  %v14568_v16 = vpop.f32.mrf.mxu0  ;;  %v16631_v18 = vld [vmem:[#allocation135_spill] sm:$0xff] }
 0x4cb   :  { %16628 = vst [vmem:[#allocation43_spill] sm:$0xff] %v14568_v16  ;;  %v5207_v13 = vpop.f32.mrf.mxu1  ;;  %v5298_v54 = vadd.f32 %v16631_v18, %v14038_v49  ;;  %v8400_v16 = vld [vmem:[#allocation13 + $0xfc0] sm:$0xff] }
 0x4cc   :  { %v14572_v28 = vadd.f32 %v5207_v13, %v4386_v21  ;;  %v14574_v11 = vpop.f32.mrf.mxu0  ;;  %v8399_v21 = vld [vmem:[#allocation13 + $0xfb8] sm:$0xff]  ;;  %v8384_v49 = vld [vmem:[#allocation13 + $0xf40] sm:$0xff] }
 0x4cd   :  { %16630 = vst [vmem:[#allocation66_spill] sm:$0xff] %v14574_v11  ;;  %v5709_v9 = vpop.f32.mrf.mxu1  ;;  %11477 = vmatmul.mubr.msk.f32.vlgmr.msra.gmra.mxu1 %vm211_vm1, %v14511_v29  ;;  %v5312_v11 = vadd.f32 %v16633_v26, %v14046_v17  ;;  %v8434_v17 = vld [vmem:[#allocation13 + $0x10d0] sm:$0xff] }
 0x4ce   :  { %v14580_v30 = vadd.f32 %v5709_v9, %v5297_v56  ;;  %8819 = vmatpush1.msra.mxu1 %v8429_v3  ;;  %8686 = vmatprep.mubr.f32.mxu1 %v16275_v4  ;;  %v16635_v56 = vld [vmem:[#allocation138_spill] sm:$0xff] }
 0x4cf   :  { %v5711_v25 = vpop.f32.mrf.mxu1  ;;  %8820 = vmatprep.subr.mxu1 %v8415_v44  ;;  %v14583_v13 = vpop.f32.mrf.mxu0  ;;  %v5313_v44 = vadd.f32 %v16635_v56, %v14055_v1 }
 0x4d0   :  { %16632 = vst [vmem:[#allocation59_spill] sm:$0xff] %v14583_v13  ;;  %v14587_v8 = vadd.f32 %v5711_v25, %v5298_v54  ;;  %8821 = vmatpush1.msra.mxu1 %v8414_v31  ;;  %v16637_v54 = vld [vmem:[#allocation140_spill] sm:$0xff]  ;;  %v16660_v13 = vld [vmem:[#allocation151_spill] sm:$0xff] }
 0x4d1   :  { %v5715_v41 = vpop.f32.mrf.mxu1  ;;  %11478 = vmatmul.mubr.msk.f32.gmra.mxu1 %vm211_vm1, %v14106_v57  ;;  %8822 = vmatprep.subr.mxu1 %v8400_v16  ;;  %v14591_v3 = vpop.f32.mrf.mxu0  ;;  %v5327_v57 = vadd.f32 %v16637_v54, %v14064_v32  ;;  %v16644_v54 = vld [vmem:[#allocation143_spill] sm:$0xff] }
 0x4d2   :  { %16634 = vst [vmem:[#allocation124_spill] sm:$0xff] %v14591_v3  ;;  %v14595_v9 = vadd.f32 %v5715_v41, %v5312_v11  ;;  %8692 = vmatprep.mubr.f32.mxu1 %v16275_v4  ;;  %8823 = vmatpush1.msra.mxu1 %v8399_v21  ;;  %v16639_v41 = vld [vmem:[#allocation141_spill] sm:$0xff] }
 0x4d3   :  { %v5717_v18 = vpop.f32.mrf.mxu1  ;;  %8824 = vmatprep.subr.mxu1 %v8385_v42  ;;  %v14598_v31 = vpop.f32.mrf.mxu0  ;;  %v5328_v11 = vadd.f32 %v16639_v41, %v14073_v62  ;;  %v16640_v21 = vld [vmem:[#allocation57_spill] sm:$0xff] }
 0x4d4   :  { %16636 = vst [vmem:[#allocation125_spill] sm:$0xff] %v14598_v31  ;;  %v14602_v16 = vadd.f32 %v5717_v18, %v5313_v44  ;;  %8825 = vmatpush1.msra.mxu1 %v8384_v49  ;;  %v16642_v44 = vld [vmem:[#allocation142_spill] sm:$0xff] }
 0x4d5   :  { %v11987_v25 = vpop.eup %11986  ;;  %v5721_v26 = vpop.f32.mrf.mxu1  ;;  %11479 = vmatmul.mubr.msk.f32.gmra.mxu1 %vm211_vm1, %v14129_v40  ;;  %8996 = vmatprep.subr.mxu1 %v8434_v17  ;;  %v5342_v18 = vadd.f32 %v16642_v44, %v14082_v24  ;;  %v8404_v3 = vld [vmem:[#allocation13 + $0xfe0] sm:$0xff] }
 0x4d6   :  { %v14606_v1 = vpop.f32.mrf.mxu0  ;;  %v14610_v42 = vadd.f32 %v5721_v26, %v5327_v57  ;;  %8698 = vmatprep.mubr.f32.mxu1 %v16275_v4  ;;  %v14614_v32 = vmul.f32 %v11987_v25, %v16640_v21  ;;  %v5343_v57 = vadd.f32 %v16644_v54, %v14089_v23  ;;  %v8433_v26 = vld [vmem:[#allocation13 + $0x10c8] sm:$0xff]  ;;  %v8418_v23 = vld [vmem:[#allocation13 + $0x1050] sm:$0xff] }
 0x4d7   :  { %16638 = vst [vmem:[#allocation166_spill] sm:$0xff] %v14606_v1  ;;  %v5723_v56 = vpop.f32.mrf.mxu1  ;;  %v16647_v21 = vld [vmem:[#allocation146_spill] sm:$0xff] }
 0x4d8   :  { %v14616_v49 = vpop.f32.mrf.mxu0  ;;  %v14620_v40 = vadd.f32 %v5723_v56, %v5328_v11  ;;  %10805 = vperm.xlu0 %11967, %v14614_v32   ;;  %10786 = vperm.xlu1 %11966, %v14614_v32   ;;  %v16646_v11 = vld [vmem:[#allocation80_spill] sm:$0xff] }
 0x4d9   :  { %16641 = vst [vmem:[#allocation44_spill] sm:$0xff] %v14616_v49  ;;  %v5727_v62 = vpop.f32.mrf.mxu1  ;;  %11480 = vmatmul.mubr.msk.f32.gmra.mxu1 %vm211_vm1, %v14152_v10  ;;  %v5301_v56 = vadd.f32 %v16647_v21, %v16646_v11  ;;  %v12287_v49 = vmov 2   ;;  %v8419_v10 = vld [vmem:[#allocation13 + $0x1058] sm:$0xff] }
 0x4da   :  { %v14626_v17 = vpop.f32.mrf.mxu0  ;;  %v14630_v25 = vadd.f32 %v5727_v62, %v5342_v18  ;;  %8858 = vmatprep.mubr.f32.mxu1 %v16275_v4  ;;  %v16649_v62 = vld [vmem:[#allocation148_spill] sm:$0xff]  ;;  %v16653_v21 = vld [vmem:[#allocation149_spill] sm:$0xff] }
 0x4db   :  { %16643 = vst [vmem:[#allocation68_spill] sm:$0xff] %v14626_v17  ;;  %v5729_v24 = vpop.f32.mrf.mxu1  ;;  %v12288_v17 = vmov 4   ;;  %v5302_v54 = vadd.f32 %v16649_v62, %v14112_v27  ;;  %v14658_v27 = vld [vmem:[%s16252_s7 + $0x10] sm:$0xff]  ;;  %v16657_v62 = vld [vmem:[#allocation150_spill] sm:$0xff] }
 0x4dc   :  { %v14633_v41 = vpop.f32.mrf.mxu0  ;;  %v14637_v44 = vadd.f32 %v5729_v24, %v5343_v57  ;;  %11968 = vset.pattern.permute.xlu1 %v12287_v49  ;;  %11971 = vset.pattern.permute.xlu0 %v12288_v17  ;;  %v16652_v24 = vld [vmem:[#allocation82_spill] sm:$0xff] }
 0x4dd   :  { %16645 = vst [vmem:[#allocation65_spill] sm:$0xff] %v14633_v41  ;;  %v5887_v1 = vpop.f32.mrf.mxu1  ;;  %11485 = vmatmul.mubr.msk.f32.vlgmr.msra.gmra.mxu1 %vm211_vm1, %v14511_v29  ;;  %10827 = vperm.xlu1 %11968, %v14614_v32   ;;  %v5316_v41 = vadd.f32 %v16653_v21, %v16652_v24 }
 0x4de   :  { %v14642_v18 = vpop.f32.mrf.mxu0  ;;  %v14646_v11 = vadd.f32 %v5887_v1, %v5301_v56  ;;  %8997 = vmatpush1.msra.mxu1 %v8433_v26  ;;  %8864 = vmatprep.mubr.f32.mxu1 %v16275_v4  ;;  %v12289_v1 = vmov 3   ;;  %v8403_v26 = vld [vmem:[#allocation13 + $0xfd8] sm:$0xff] }
 0x4df   :  { %16648 = vst [vmem:[#allocation126_spill] sm:$0xff] %v14642_v18  ;;  %v5889_v49 = vpop.f32.mrf.mxu1  ;;  %8998 = vmatprep.subr.mxu1 %v8419_v10  ;;  %v16656_v10 = vld [vmem:[#allocation84_spill] sm:$0xff] }
 0x4e0   :  { %16650 = vst [vmem:[#allocation127_spill] sm:$0xff] %v14646_v11  ;;  %v14649_v57 = vpop.f32.mrf.mxu0  ;;  %v14653_v31 = vadd.f32 %v5889_v49, %v5302_v54  ;;  %8999 = vmatpush1.msra.mxu1 %v8418_v23  ;;  %v5317_v54 = vadd.f32 %v16657_v62, %v16656_v10  ;;  %v8389_v23 = vld [vmem:[#allocation13 + $0xf68] sm:$0xff]  ;;  %v16662_v10 = vld [vmem:[#allocation152_spill] sm:$0xff] }
 0x4e1   :  { %16651 = vst [vmem:[#allocation169_spill] sm:$0xff] %v14649_v57  ;;  %v5893_v18 = vpop.f32.mrf.mxu1  ;;  %11486 = vmatmul.mubr.msk.f32.gmra.mxu1 %vm211_vm1, %v14658_v27  ;;  %11969 = vset.pattern.permute.xlu1 %v12289_v1  ;;  %v16659_v57 = vld [vmem:[#allocation144_spill] sm:$0xff] }
 0x4e2   :  { %16654 = vst [vmem:[#allocation45_spill] sm:$0xff] %v14653_v31  ;;  %v14662_v56 = vpop.f32.mrf.mxu0  ;;  %v14666_v49 = vadd.f32 %v5893_v18, %v5316_v41  ;;  %10849 = vperm.xlu1 %11969, %v14614_v32   ;;  %8870 = vmatprep.mubr.f32.mxu1 %v16275_v4  ;;  %v5331_v1 = vadd.f32 %v16660_v13, %v16659_v57  ;;  %v14679_v41 = vld [vmem:[%s16252_s7 + $0x18] sm:$0xff] }
 0x4e3   :  { %16655 = vst [vmem:[#allocation70_spill] sm:$0xff] %v14662_v56  ;;  %v5895_v24 = vpop.f32.mrf.mxu1  ;;  %9000 = vmatprep.subr.mxu1 %v8404_v3  ;;  %v8388_v56 = vld [vmem:[#allocation13 + $0xf60] sm:$0xff]  ;;  %v5332_v13 = vadd.f32 %v16662_v10, %v14158_v5  ;;  %v12011_v5 = vld [vmem:[%s16252_s7 + $0x20] sm:$0xff]  ;;  %v9374_v10 = vld [vmem:[#allocation13 + $0x1258] sm:$0xff] }
 0x4e4   :  { %v14670_v21 = vpop.f32.mrf.mxu0  ;;  %v14674_v31 = vadd.f32 %v5895_v24, %v5317_v54  ;;  %9001 = vmatpush1.msra.mxu1 %v8403_v26  ;;  %v9375_v3 = vld [vmem:[#allocation13 + $0x1260] sm:$0xff] }
 0x4e5   :  { %16658 = vst [vmem:[#allocation67_spill] sm:$0xff] %v14670_v21  ;;  %v5899_v11 = vpop.f32.mrf.mxu1  ;;  %11487 = vmatmul.mubr.msk.f32.gmra.mxu1 %vm211_vm1, %v14679_v41  ;;  %9002 = vmatprep.subr.mxu1 %v8389_v23  ;;  %v16664_v54 = vld [vmem:[#allocation153_spill] sm:$0xff] }
 0x4e6   :  { %v14683_v18 = vpop.f32.mrf.mxu0  ;;  %v14687_v57 = vadd.f32 %v5899_v11, %v5331_v1  ;;  %11970 = vset.pattern.permute.xlu1 %v12288_v17  ;;  %8876 = vmatprep.mubr.f32.mxu1 %v16275_v4  ;;  %v5346_v23 = vadd.f32 %v16664_v54, %v14168_v37  ;;  %v16666_v11 = vld [vmem:[#allocation147_spill] sm:$0xff] }
 0x4e7   :  { %16661 = vst [vmem:[#allocation128_spill] sm:$0xff] %v14683_v18  ;;  %v5901_v26 = vpop.f32.mrf.mxu1  ;;  %10871 = vperm.xlu1 %11970, %v14614_v32   ;;  %9003 = vmatpush1.msra.mxu1 %v8388_v56  ;;  %v16667_v32 = vld [vmem:[#allocation154_spill] sm:$0xff] }
 0x4e8   :  { %v14691_v62 = vpop.f32.mrf.mxu0  ;;  %v14695_v24 = vadd.f32 %v5901_v26, %v5332_v13  ;;  %9505 = vmatprep.subr.mxu1 %v9375_v3  ;;  %v5347_v56 = vadd.f32 %v16667_v32, %v16666_v11  ;;  %v16670_v3 = vld [vmem:[#allocation155_spill] sm:$0xff] }
 0x4e9   :  { %16663 = vst [vmem:[#allocation129_spill] sm:$0xff] %v14691_v62  ;;  %v5905_v18 = vpop.f32.mrf.mxu1  ;;  %11488 = vmatmul.mubr.msk.f32.gmra.mxu1 %vm211_vm1, %v12011_v5  ;;  %v5305_v26 = vadd.f32 %v16670_v3, %v14187_v58  ;;  %v9360_v62 = vld [vmem:[#allocation13 + $0x11e8] sm:$0xff]  ;;  %v16675_v3 = vld [vmem:[#allocation157_spill] sm:$0xff] }
 0x4ea   :  { %v14701_v17 = vpop.f32.mrf.mxu0  ;;  %v14705_v1 = vadd.f32 %v5905_v18, %v5346_v23  ;;  %9036 = vmatprep.mubr.f32.mxu1 %v16275_v4  ;;  %v16673_v18 = vld [vmem:[#allocation156_spill] sm:$0xff] }
 0x4eb   :  { %16665 = vst [vmem:[#allocation172_spill] sm:$0xff] %v14701_v17  ;;  %v5907_v37 = vpop.f32.mrf.mxu1  ;;  %v9359_v17 = vld [vmem:[#allocation13 + $0x11e0] sm:$0xff]  ;;  %v5306_v23 = vadd.f32 %v16673_v18, %v14194_v48  ;;  %v9329_v48 = vld [vmem:[#allocation13 + $0x10f0] sm:$0xff] }
 0x4ec   :  { %16668 = vst [vmem:[#allocation46_spill] sm:$0xff] %v14705_v1  ;;  %v14708_v13 = vpop.f32.mrf.mxu0  ;;  %v14712_v54 = vadd.f32 %v5907_v37, %v5347_v56  ;;  %v9344_v56 = vld [vmem:[#allocation13 + $0x1168] sm:$0xff] }
 0x4ed   :  { %16669 = vst [vmem:[#allocation72_spill] sm:$0xff] %v14708_v13  ;;  %v6065_v21 = vpop.f32.mrf.mxu1  ;;  %11493 = vmatmul.mubr.msk.f32.vlgmr.msra.gmra.mxu1 %vm211_vm1, %v14511_v29  ;;  %v9345_v13 = vld [vmem:[#allocation13 + $0x1170] sm:$0xff]  ;;  %v5320_v29 = vadd.f32 %v16675_v3, %v14204_v33  ;;  %v9379_v33 = vld [vmem:[#allocation13 + $0x1280] sm:$0xff] }
 0x4ee   :  { %16671 = vst [vmem:[#allocation69_spill] sm:$0xff] %v14712_v54  ;;  %v14716_v11 = vpop.f32.mrf.mxu0  ;;  %v14720_v32 = vadd.f32 %v6065_v21, %v5305_v26  ;;  %9506 = vmatpush1.msra.mxu1 %v9374_v10  ;;  %9042 = vmatprep.mubr.f32.mxu1 %v16275_v4 }
 0x4ef   :  { %16672 = vst [vmem:[#allocation130_spill] sm:$0xff] %v14716_v11  ;;  %v6067_v58 = vpop.f32.mrf.mxu1  ;;  %9507 = vmatprep.subr.mxu1 %v9360_v62  ;;  %v9330_v11 = vld [vmem:[#allocation13 + $0x10f8] sm:$0xff]  ;;  %v16677_v62 = vld [vmem:[#allocation158_spill] sm:$0xff] }
 0x4f0   :  { %v14723_v37 = vpop.f32.mrf.mxu0  ;;  %v14727_v54 = vadd.f32 %v6067_v58, %v5306_v23  ;;  %9508 = vmatpush1.msra.mxu1 %v9359_v17  ;;  %v5321_v10 = vadd.f32 %v16677_v62, %v14211_v7  ;;  %v16679_v23 = vld [vmem:[#allocation159_spill] sm:$0xff] }
 0x4f1   :  { %16674 = vst [vmem:[#allocation131_spill] sm:$0xff] %v14723_v37  ;;  %v6071_v1 = vpop.f32.mrf.mxu1  ;;  %11494 = vmatmul.mubr.msk.f32.gmra.mxu1 %vm211_vm1, %v14658_v27  ;;  %9509 = vmatprep.subr.mxu1 %v9345_v13  ;;  %v5335_v27 = vadd.f32 %v16679_v23, %v14219_v14  ;;  %v16683_v14 = vld [vmem:[#allocation161_spill] sm:$0xff] }
 0x4f2   :  { %v14731_v21 = vpop.f32.mrf.mxu0  ;;  %v14735_v26 = vadd.f32 %v6071_v1, %v5320_v29  ;;  %9048 = vmatprep.mubr.f32.mxu1 %v16275_v4  ;;  %9510 = vmatpush1.msra.mxu1 %v9344_v56  ;;  %v16681_v1 = vld [vmem:[#allocation160_spill] sm:$0xff] }
 0x4f3   :  { %16676 = vst [vmem:[#allocation174_spill] sm:$0xff] %v14731_v21  ;;  %v6073_v18 = vpop.f32.mrf.mxu1  ;;  %9511 = vmatprep.subr.mxu1 %v9330_v11  ;;  %v5336_v56 = vadd.f32 %v16681_v1, %v14227_v55 }
 0x4f4   :  { %v14738_v17 = vpop.f32.mrf.mxu0  ;;  %v14742_v13 = vadd.f32 %v6073_v18, %v5321_v10  ;;  %9512 = vmatpush1.msra.mxu1 %v9329_v48  ;;  %v5350_v48 = vadd.f32 %v16683_v14, %v14238_v15  ;;  %v16687_v15 = vld [vmem:[#allocation163_spill] sm:$0xff]  ;;  %v9363_v14 = vld [vmem:[#allocation13 + $0x1200] sm:$0xff] }
 0x4f5   :  { %16678 = vst [vmem:[#allocation71_spill] sm:$0xff] %v14738_v17  ;;  %v6077_v58 = vpop.f32.mrf.mxu1  ;;  %11495 = vmatmul.mubr.msk.f32.gmra.mxu1 %vm211_vm1, %v14679_v41  ;;  %9683 = vmatprep.subr.mxu1 %v9379_v33  ;;  %v16685_v33 = vld [vmem:[#allocation162_spill] sm:$0xff]  ;;  %v5324_v1 = vadd.f32 %v16687_v15, %v14259_v53  ;;  %v9338_v17 = vld [vmem:[#allocation13 + $0x1138] sm:$0xff] }
 0x4f6   :  { %v14746_v7 = vpop.f32.mrf.mxu0  ;;  %v14750_v3 = vadd.f32 %v6077_v58, %v5335_v27  ;;  %9054 = vmatprep.mubr.f32.mxu1 %v16275_v4  ;;  %v5351_v55 = vadd.f32 %v16685_v33, %v14248_v59  ;;  %v9378_v27 = vld [vmem:[#allocation13 + $0x1278] sm:$0xff] }
 0x4f7   :  { %16680 = vst [vmem:[#allocation132_spill] sm:$0xff] %v14746_v7  ;;  %v6079_v11 = vpop.f32.mrf.mxu1 }
 0x4f8   :  { %v14753_v29 = vpop.f32.mrf.mxu0  ;;  %v14757_v62 = vadd.f32 %v6079_v11, %v5336_v56  ;;  %v9364_v11 = vld [vmem:[#allocation13 + $0x1208] sm:$0xff] }
 0x4f9   :  { %16682 = vst [vmem:[#allocation133_spill] sm:$0xff] %v14753_v29  ;;  %v6083_v10 = vpop.f32.mrf.mxu1  ;;  %11496 = vmatmul.mubr.msk.f32.gmra.mxu1 %vm211_vm1, %v12011_v5  ;;  %v9334_v29 = vld [vmem:[#allocation13 + $0x1118] sm:$0xff] }
 0x4fa   :  { %v14760_v41 = vpop.f32.mrf.mxu0  ;;  %v14764_v18 = vadd.f32 %v6083_v10, %v5350_v48  ;;  %9545 = vmatprep.mubr.f32.mxu1 %v16275_v4  ;;  %v16689_v48 = vld [vmem:[#allocation34_spill] sm:$0xff] }
 0x4fb   :  { %16684 = vst [vmem:[#allocation134_spill] sm:$0xff] %v14760_v41  ;;  %v6085_v23 = vpop.f32.mrf.mxu1  ;;  %v5309_v10 = vadd.f32 %v16689_v48, %v14266_v34  ;;  %v9333_v34 = vld [vmem:[#allocation13 + $0x1110] sm:$0xff] }
 0x4fc   :  { %v14767_v58 = vpop.f32.mrf.mxu0  ;;  %v14771_v56 = vadd.f32 %v6085_v23, %v5351_v55  ;;  %v9348_v55 = vld [vmem:[#allocation13 + $0x1188] sm:$0xff]  ;;  %v16690_v23 = vld [vmem:[#allocation48_spill] sm:$0xff] }
 0x4fd   :  { %16686 = vst [vmem:[#allocation135_spill] sm:$0xff] %v14767_v58  ;;  %v11828_v5 = vpop.f32.mrf.mxu1  ;;  %11505 = vmatmul.mubr.msk.f32.vlgmr.msra.gmra.mxu1 %vm211_vm1, %v16510_v12  ;;  %v9349_v58 = vld [vmem:[#allocation13 + $0x1190] sm:$0xff]  ;;  %v5354_v15 = vadd.f32 %v16690_v23, %v14281_v38  ;;  %v9383_v38 = vld [vmem:[#allocation13 + $0x12a0] sm:$0xff] }
 0x4fe   :  { %v14775_v59 = vpop.f32.mrf.mxu0  ;;  %v14779_v33 = vadd.f32 %v11828_v5, %v5324_v1  ;;  %9684 = vmatpush1.msra.mxu1 %v9378_v27  ;;  %9551 = vmatprep.mubr.f32.mxu1 %v16275_v4  ;;  %v16692_v27 = vld [vmem:[#allocation50_spill] sm:$0xff]  ;;  %v16694_v48 = vld [vmem:[#allocation36_spill] sm:$0xff] }
 0x4ff   :  { %16688 = vst [vmem:[#allocation137_spill] sm:$0xff] %v14775_v59  ;;  %v6243_v53 = vpop.f32.mrf.mxu1  ;;  %9685 = vmatprep.subr.mxu1 %v9364_v11  ;;  %v5339_v1 = vadd.f32 %v16692_v27, %v14289_v6  ;;  %v16696_v6 = vld [vmem:[#allocation52_spill] sm:$0xff] }
 0x500   :  { %v14784_v41 = vadd.f32 %v6243_v53, %v5309_v10  ;;  %9686 = vmatpush1.msra.mxu1 %v9363_v14  ;;  %v14786_v59 = vpop.f32.mrf.mxu0  ;;  %v6262_v10 = vadd.f32 %v16694_v48, %v14299_v43  ;;  %v16698_v43 = vld [vmem:[#allocation105_spill] sm:$0xff] }
 0x501   :  { %16691 = vst [vmem:[#allocation138_spill] sm:$0xff] %v14786_v59  ;;  %v11831_v7 = vpop.f32.mrf.mxu1  ;;  %11506 = vmatmul.mubr.msk.f32.gmra.mxu1 %vm211_vm1, %v16515_v22  ;;  %9687 = vmatprep.subr.mxu1 %v9349_v58 }
 0x502   :  { %v14792_v11 = vadd.f32 %v11831_v7, %v5354_v15  ;;  %9557 = vmatprep.mubr.f32.mxu1 %v16275_v4  ;;  %9688 = vmatpush1.msra.mxu1 %v9348_v55  ;;  %v14795_v5 = vpop.f32.mrf.mxu0  ;;  %v6263_v7 = vadd.f32 %v16696_v6, %v14305_v20  ;;  %v16701_v6 = vld [vmem:[#allocation38_spill] sm:$0xff] }
 0x503   :  { %16693 = vst [vmem:[#allocation140_spill] sm:$0xff] %v14795_v5  ;;  %v6253_v14 = vpop.f32.mrf.mxu1  ;;  %9689 = vmatprep.subr.mxu1 %v9334_v29 }
 0x504   :  { %v14799_v53 = vadd.f32 %v6253_v14, %v5339_v1  ;;  %9690 = vmatpush1.msra.mxu1 %v9333_v34  ;;  %v14801_v58 = vpop.f32.mrf.mxu0  ;;  %v6277_v34 = vadd.f32 %v16698_v43, %v14313_v36  ;;  %v6292_v36 = vadd.f32 %v16701_v6, %v14329_v50  ;;  %v16706_v6 = vld [vmem:[#allocation39_spill] sm:$0xff] }
 0x505   :  { %16695 = vst [vmem:[#allocation141_spill] sm:$0xff] %v14801_v58  ;;  %v6587_v23 = vpop.f32.mrf.mxu1  ;;  %11507 = vmatmul.mubr.msk.f32.gmra.mxu1 %vm211_vm1, %v16520_v46  ;;  %9861 = vmatprep.subr.mxu1 %v9383_v38  ;;  %v16699_v38 = vld [vmem:[#allocation54_spill] sm:$0xff] }
 0x506   :  { %v14807_v55 = vadd.f32 %v6587_v23, %v6262_v10  ;;  %9563 = vmatprep.mubr.f32.mxu1 %v16275_v4  ;;  %v14810_v15 = vpop.f32.mrf.mxu0  ;;  %v6278_v14 = vadd.f32 %v16699_v38, %v14321_v52  ;;  %v9382_v10 = vld [vmem:[#allocation13 + $0x1298] sm:$0xff] }
 0x507   :  { %v6589_v29 = vpop.f32.mrf.mxu1  ;;  %16697 = vst [vmem:[#allocation57_spill] sm:$0xff] %v14810_v15  ;;  %v9367_v15 = vld [vmem:[#allocation13 + $0x1220] sm:$0xff] }
 0x508   :  { %v14814_v27 = vadd.f32 %v6589_v29, %v6263_v7  ;;  %v9368_v29 = vld [vmem:[#allocation13 + $0x1228] sm:$0xff] }
 0x509   :  { %v6593_v1 = vpop.f32.mrf.mxu1  ;;  %11508 = vmatmul.mubr.msk.f32.gmra.mxu1 %vm211_vm1, %v14277_v2 }
 0x50a   :  { %v14820_v20 = vadd.f32 %v6593_v1, %v6277_v34  ;;  %9723 = vmatprep.mubr.f32.mxu1 %v16275_v4  ;;  %v16703_v34 = vld [vmem:[#allocation100_spill] sm:$0xff]  ;;  %v16704_v1 = vld [vmem:[#allocation55_spill] sm:$0xff] }
 0x50b   :  { %v6595_v48 = vpop.f32.mrf.mxu1  ;;  %v14823_v23 = vpop.f32.mrf.mxu0  ;;  %v6293_v38 = vadd.f32 %v16704_v1, %v16703_v34  ;;  %v16709_v34 = vld [vmem:[#allocation40_spill] sm:$0xff] }
 0x50c   :  { %16700 = vst [vmem:[#allocation142_spill] sm:$0xff] %v14823_v23  ;;  %v14827_v7 = vadd.f32 %v6595_v48, %v6278_v14  ;;  %v9353_v23 = vld [vmem:[#allocation13 + $0x11b0] sm:$0xff]  ;;  %v9352_v14 = vld [vmem:[#allocation13 + $0x11a8] sm:$0xff]  ;;  %v16705_v48 = vld [vmem:[#allocation101_spill] sm:$0xff] }
 0x50d   :  { %v6599_v43 = vpop.f32.mrf.mxu1  ;;  %11513 = vmatmul.mubr.msk.f32.vlgmr.msra.gmra.mxu1 %vm211_vm1, %v16510_v12  ;;  %v14831_v52 = vpop.f32.mrf.mxu0  ;;  %v6307_v5 = vadd.f32 %v16706_v6, %v16705_v48  ;;  %v16711_v48 = vld [vmem:[#allocation60_spill] sm:$0xff] }
 0x50e   :  { %16702 = vst [vmem:[#allocation143_spill] sm:$0xff] %v14831_v52  ;;  %v14835_v58 = vadd.f32 %v6599_v43, %v6292_v36  ;;  %9862 = vmatpush1.msra.mxu1 %v9382_v10  ;;  %9729 = vmatprep.mubr.f32.mxu1 %v16275_v4  ;;  %v9337_v36 = vld [vmem:[#allocation13 + $0x1130] sm:$0xff]  ;;  %v6266_v6 = vadd.f32 %v16711_v48, %v14363_v0 }
 0x50f   :  { %v6601_v50 = vpop.f32.mrf.mxu1  ;;  %9863 = vmatprep.subr.mxu1 %v9368_v29  ;;  %v16708_v43 = vld [vmem:[#allocation103_spill] sm:$0xff]  ;;  %v16715_v0 = vld [vmem:[#allocation164_spill] sm:$0xff] }
 0x510   :  { %v14840_v59 = vadd.f32 %v6601_v50, %v6293_v38  ;;  %9864 = vmatpush1.msra.mxu1 %v9367_v15  ;;  %v6308_v1 = vadd.f32 %v16709_v34, %v16708_v43  ;;  %v9386_v38 = vld [vmem:[#allocation13 + $0x12b8] sm:$0xff]  ;;  %v6281_v43 = vadd.f32 %v16715_v0, %v14381_v60  ;;  %v9371_v60 = vld [vmem:[#allocation13 + $0x1240] sm:$0xff] }
 0x511   :  { %v6605_v52 = vpop.f32.mrf.mxu1  ;;  %11514 = vmatmul.mubr.msk.f32.gmra.mxu1 %vm211_vm1, %v16515_v22  ;;  %9865 = vmatprep.subr.mxu1 %v9353_v23  ;;  %v14844_v10 = vpop.f32.mrf.mxu0 }
 0x512   :  { %16707 = vst [vmem:[#allocation80_spill] sm:$0xff] %v14844_v10  ;;  %v14848_v29 = vadd.f32 %v6605_v52, %v6307_v5  ;;  %9735 = vmatprep.mubr.f32.mxu1 %v16275_v4  ;;  %9866 = vmatpush1.msra.mxu1 %v9352_v14 }
 0x513   :  { %v6607_v50 = vpop.f32.mrf.mxu1  ;;  %9867 = vmatprep.subr.mxu1 %v9338_v17  ;;  %v14851_v15 = vpop.f32.mrf.mxu0 }
 0x514   :  { %16710 = vst [vmem:[#allocation146_spill] sm:$0xff] %v14851_v15  ;;  %v14855_v23 = vadd.f32 %v6607_v50, %v6308_v1  ;;  %9868 = vmatpush1.msra.mxu1 %v9337_v36  ;;  %v16716_v36 = vld [vmem:[#allocation47_spill] sm:$0xff]  ;;  %v16717_v1 = vld [vmem:[#allocation165_spill] sm:$0xff] }
 0x515   :  { %v6765_v10 = vpop.f32.mrf.mxu1  ;;  %11515 = vmatmul.mubr.msk.f32.gmra.mxu1 %vm211_vm1, %v16520_v46  ;;  %11874 = vmatprep.subr.mxu1 %v9386_v38  ;;  %v14859_v5 = vpop.f32.mrf.mxu0  ;;  %v6282_v50 = vadd.f32 %v16717_v1, %v16716_v36  ;;  %v16721_v15 = vld [vmem:[#allocation167_spill] sm:$0xff]  ;;  %v16724_v36 = vld [vmem:[#allocation49_spill] sm:$0xff] }
 0x516   :  { %16712 = vst [vmem:[#allocation148_spill] sm:$0xff] %v14859_v5  ;;  %v14861_v52 = vadd.f32 %v6765_v10, %v6266_v6  ;;  %9741 = vmatprep.mubr.f32.mxu1 %v16275_v4  ;;  %v16720_v5 = vld [vmem:[#allocation35_spill] sm:$0xff] }
 0x517   :  { %v14864_v17 = vpop.f32.mrf.mxu1  ;;  %v14866_v14 = vpop.f32.mrf.mxu0 }
 0x518   :  { %16713 = vst [vmem:[#allocation82_spill] sm:$0xff] %v14861_v52  ;;  %16714 = vst [vmem:[#allocation149_spill] sm:$0xff] %v14866_v14  ;;  %v6296_v14 = vadd.f32 %v16721_v15, %v16720_v5  ;;  %v16727_v5 = vld [vmem:[#allocation113_spill] sm:$0xff] }
 0x519   :  { %v6771_v34 = vpop.f32.mrf.mxu1  ;;  %11516 = vmatmul.mubr.msk.f32.gmra.mxu1 %vm211_vm1, %v14277_v2 }
 0x51a   :  { %v14874_v48 = vadd.f32 %v6771_v34, %v6281_v43  ;;  %9901 = vmatprep.mubr.f32.mxu1 %v16275_v4  ;;  %v16725_v43 = vld [vmem:[#allocation168_spill] sm:$0xff] }
 0x51b   :  { %v6773_v10 = vpop.f32.mrf.mxu1  ;;  %v14877_v6 = vpop.f32.mrf.mxu0  ;;  %v6297_v34 = vadd.f32 %v16725_v43, %v16724_v36 }
 0x51c   :  { %16718 = vst [vmem:[#allocation84_spill] sm:$0xff] %v14874_v48  ;;  %16719 = vst [vmem:[#allocation150_spill] sm:$0xff] %v14877_v6  ;;  %v14881_v21 = vadd.f32 %v6773_v10, %v6282_v50  ;;  %v9356_v6 = vld [vmem:[#allocation13 + $0x11c8] sm:$0xff] }
 0x51d   :  { %v6777_v0 = vpop.f32.mrf.mxu1  ;;  %11521 = vmatmul.mubr.msk.f32.vlgmr.msra.gmra.mxu1 %vm211_vm1, %v16510_v12  ;;  %v14885_v37 = vpop.f32.mrf.mxu0  ;;  %v16728_v50 = vld [vmem:[#allocation170_spill] sm:$0xff] }
 0x51e   :  { %16722 = vst [vmem:[#allocation144_spill] sm:$0xff] %v14881_v21  ;;  %16723 = vst [vmem:[#allocation151_spill] sm:$0xff] %v14885_v37  ;;  %v14889_v1 = vadd.f32 %v6777_v0, %v6296_v14  ;;  %11875 = vmatpush3.msra.mxu1 %v9386_v38  ;;  %9907 = vmatprep.mubr.f32.mxu1 %v16275_v4  ;;  %v6311_v10 = vadd.f32 %v16728_v50, %v16727_v5  ;;  %v9341_v37 = vld [vmem:[#allocation13 + $0x1150] sm:$0xff] }
 0x51f   :  { %v6779_v48 = vpop.f32.mrf.mxu1  ;;  %11876 = vmatprep.subr.mxu1 %v9371_v60  ;;  %v14892_v15 = vpop.f32.mrf.mxu0  ;;  %v16730_v14 = vld [vmem:[#allocation51_spill] sm:$0xff] }
 0x520   :  { %16726 = vst [vmem:[#allocation152_spill] sm:$0xff] %v14892_v15  ;;  %v14896_v21 = vadd.f32 %v6779_v48, %v6297_v34  ;;  %11877 = vmatpush3.msra.mxu1 %v9371_v60  ;;  %v16731_v0 = vld [vmem:[#allocation171_spill] sm:$0xff]  ;;  %v16733_v60 = vld [vmem:[#allocation173_spill] sm:$0xff] }
 0x521   :  { %v6783_v52 = vpop.f32.mrf.mxu1  ;;  %11522 = vmatmul.mubr.msk.f32.gmra.mxu1 %vm211_vm1, %v16515_v22  ;;  %11878 = vmatprep.subr.mxu1 %v9356_v6  ;;  %v14900_v38 = vpop.f32.mrf.mxu0  ;;  %v6312_v36 = vadd.f32 %v16731_v0, %v16730_v14  ;;  %v6270_v34 = vadd.f32 %v16733_v60, %v14435_v35 }
 0x522   :  { %16729 = vst [vmem:[#allocation153_spill] sm:$0xff] %v14900_v38  ;;  %v14904_v43 = vadd.f32 %v6783_v52, %v6311_v10  ;;  %9913 = vmatprep.mubr.f32.mxu1 %v16275_v4  ;;  %11879 = vmatpush3.msra.mxu1 %v9356_v6  ;;  %v16735_v52 = vld [vmem:[#allocation73_spill] sm:$0xff] }
 0x523   :  { %v6785_v5 = vpop.f32.mrf.mxu1  ;;  %11880 = vmatprep.subr.mxu1 %v9341_v37  ;;  %v14907_v48 = vpop.f32.mrf.mxu0  ;;  %v6271_v6 = vadd.f32 %v16735_v52, %v14444_v47  ;;  %v16740_v47 = vld [vmem:[#allocation75_spill] sm:$0xff] }
 0x524   :  { %16732 = vst [vmem:[#allocation147_spill] sm:$0xff] %v14907_v48  ;;  %v14911_v50 = vadd.f32 %v6785_v5, %v6312_v36  ;;  %11881 = vmatpush3.msra.mxu1 %v9341_v37  ;;  %v16737_v37 = vld [vmem:[#allocation74_spill] sm:$0xff]  ;;  %v16739_v48 = vld [vmem:[#allocation116_spill] sm:$0xff] }
 0x525   :  { %v6943_v15 = vpop.f32.mrf.mxu1  ;;  %11523 = vmatmul.mubr.msk.f32.gmra.mxu1 %vm211_vm1, %v16520_v46  ;;  %v14915_v14 = vpop.f32.mrf.mxu0  ;;  %11888 = vmatprep.subr.mxu1 %v16275_v4  ;;  %v6285_v36 = vadd.f32 %v16737_v37, %v14454_v39  ;;  %v16743_v39 = vld [vmem:[#allocation117_spill] sm:$0xff] }
 0x526   :  { %16734 = vst [vmem:[#allocation154_spill] sm:$0xff] %v14915_v14  ;;  %v14920_v10 = vadd.f32 %v6943_v15, %v6270_v34  ;;  %9919 = vmatprep.mubr.f32.mxu1 %v16275_v4  ;;  %v6286_v15 = vadd.f32 %v16740_v47, %v16739_v48  ;;  %v16747_v48 = vld [vmem:[#allocation56_spill] sm:$0xff] }
 0x527   :  { %v6945_v0 = vpop.f32.mrf.mxu1  ;;  %v14923_v35 = vpop.f32.mrf.mxu0 }
 0x528   :  { %16736 = vst [vmem:[#allocation155_spill] sm:$0xff] %v14923_v35  ;;  %v14927_v5 = vadd.f32 %v6945_v0, %v6271_v6  ;;  %v16744_v6 = vld [vmem:[#allocation76_spill] sm:$0xff] }
 0x529   :  { %v6949_v60 = vpop.f32.mrf.mxu1  ;;  %11524 = vmatmul.mubr.msk.f32.gmra.mxu1 %vm211_vm1, %v14277_v2  ;;  %v14931_v14 = vpop.f32.mrf.mxu0  ;;  %v6300_v0 = vadd.f32 %v16744_v6, %v16743_v39  ;;  %v16751_v39 = vld [vmem:[#allocation119_spill] sm:$0xff] }
 0x52a   :  { %16738 = vst [vmem:[#allocation156_spill] sm:$0xff] %v14931_v14  ;;  %v14935_v34 = vadd.f32 %v6949_v60, %v6285_v36  ;;  %11882 = vmatprep.mubr.msk.f32.mxu1 %vm211_vm1, %v16510_v12  ;;  %v16748_v36 = vld [vmem:[#allocation77_spill] sm:$0xff] }
 0x52b   :  { %v6951_v52 = vpop.f32.mrf.mxu1  ;;  %v14939_v35 = vpop.f32.mrf.mxu0  ;;  %v6301_v60 = vadd.f32 %v16748_v36, %v16747_v48  ;;  %v16755_v48 = vld [vmem:[#allocation62_spill] sm:$0xff] }
 0x52c   :  { %16741 = vst [vmem:[#allocation157_spill] sm:$0xff] %v14935_v34  ;;  %16742 = vst [vmem:[#allocation158_spill] sm:$0xff] %v14939_v35  ;;  %v14943_v37 = vadd.f32 %v6951_v52, %v6286_v15  ;;  %v16752_v15 = vld [vmem:[#allocation78_spill] sm:$0xff] }
 0x52d   :  { %v6955_v38 = vpop.f32.mrf.mxu1  ;;  %11883 = vmatmul.mubr.msk.f32.vlgmr.msra.gmra.mxu1 %vm211_vm1, %v16515_v22  ;;  %v14947_v14 = vpop.f32.mrf.mxu0  ;;  %v6315_v52 = vadd.f32 %v16752_v15, %v16751_v39  ;;  %v16759_v39 = vld [vmem:[#allocation120_spill] sm:$0xff] }
 0x52e   :  { %16745 = vst [vmem:[#allocation159_spill] sm:$0xff] %v14943_v37  ;;  %16746 = vst [vmem:[#allocation160_spill] sm:$0xff] %v14947_v14  ;;  %v14951_v47 = vadd.f32 %v6955_v38, %v6300_v0  ;;  %11885 = vmatprep.mubr.msk.f32.mxu1 %vm211_vm1, %v16520_v46  ;;  %v16756_v38 = vld [vmem:[#allocation79_spill] sm:$0xff] }
 0x52f   :  { %v6957_v12 = vpop.f32.mrf.mxu1  ;;  %v14955_v35 = vpop.f32.mrf.mxu0  ;;  %v6316_v0 = vadd.f32 %v16756_v38, %v16755_v48 }
 0x530   :  { %16749 = vst [vmem:[#allocation161_spill] sm:$0xff] %v14951_v47  ;;  %16750 = vst [vmem:[#allocation162_spill] sm:$0xff] %v14955_v35  ;;  %v14959_v6 = vadd.f32 %v6957_v12, %v6301_v60  ;;  %v16760_v60 = vld [vmem:[#allocation136_spill] sm:$0xff] }
 0x531   :  { %v6961_v37 = vpop.f32.mrf.mxu1  ;;  %11886 = vmatmul.mubr.msk.f32.gmra.mxu1 %vm211_vm1, %v14277_v2  ;;  %v14963_v22 = vpop.f32.mrf.mxu0  ;;  %v6274_v12 = vadd.f32 %v16760_v60, %v16759_v39 }
 0x532   :  { %16753 = vst [vmem:[#allocation163_spill] sm:$0xff] %v14959_v6  ;;  %16754 = vst [vmem:[#allocation34_spill] sm:$0xff] %v14963_v22  ;;  %v14967_v36 = vadd.f32 %v6961_v37, %v6315_v52  ;;  %11920 = vmatprep.mubr.msk.f32.mxu1 %vm12285_vm0, %v16275_v4  ;;  %v16762_v22 = vld [vmem:[#allocation42_spill] sm:$0xff]  ;;  %v16763_v6 = vld [vmem:[#allocation81_spill] sm:$0xff] }
 0x533   :  { %v6963_v46 = vpop.f32.mrf.mxu1  ;;  %v14971_v35 = vpop.f32.mrf.mxu0  ;;  %v6275_v47 = vadd.f32 %v16763_v6, %v16762_v22  ;;  %v16764_v52 = vld [vmem:[#allocation139_spill] sm:$0xff] }
 0x534   :  { %16757 = vst [vmem:[#allocation48_spill] sm:$0xff] %v14967_v36  ;;  %16758 = vst [vmem:[#allocation50_spill] sm:$0xff] %v14971_v35  ;;  %v14975_v15 = vadd.f32 %v6963_v46, %v6316_v0  ;;  %v6289_v38 = vadd.f32 %v16764_v52, %v14536_v19  ;;  %v16766_v0 = vld [vmem:[#allocation83_spill] sm:$0xff]  ;;  %v16769_v19 = vld [vmem:[#allocation86_spill] sm:$0xff] }
 0x535   :  { %v7121_v14 = vpop.f32.mrf.mxu1  ;;  %v14977_v2 = vpop.f32.mrf.mxu0  ;;  %v6290_v46 = vadd.f32 %v16766_v0, %v14545_v63 }
 0x536   :  { %16761 = vst [vmem:[#allocation36_spill] sm:$0xff] %v14977_v2  ;;  %v14981_v48 = vadd.f32 %v7121_v14, %v6274_v12  ;;  %v16767_v2 = vld [vmem:[#allocation85_spill] sm:$0xff] }
 0x537   :  { %v7123_v37 = vpop.f32.mrf.mxu1  ;;  %v6304_v6 = vadd.f32 %v16767_v2, %v14553_v61  ;;  %v16772_v61 = vld [vmem:[#allocation87_spill] sm:$0xff] }
 0x538   :  { %v14985_v36 = vadd.f32 %v7123_v37, %v6275_v47  ;;  %v14987_v35 = vpop.f32.mrf.mxu0  ;;  %v6305_v47 = vadd.f32 %v16769_v19, %v14560_v45  ;;  %v6320_v2 = vadd.f32 %v16772_v61, %v14572_v28 }
 0x539   :  { %16765 = vst [vmem:[#allocation52_spill] sm:$0xff] %v14987_v35  ;;  %v7127_v34 = vpop.f32.mrf.mxu1  ;;  %v16770_v35 = vld [vmem:[#allocation145_spill] sm:$0xff] }
 0x53a   :  { %v14991_v39 = vadd.f32 %v7127_v34, %v6289_v38  ;;  %v14997_v22 = vpop.f32.mrf.mxu0  ;;  %v6319_v63 = vadd.f32 %v16770_v35, %v14565_v51  ;;  %v16775_v51 = vld [vmem:[#allocation89_spill] sm:$0xff] }
 0x53b   :  { %v7129_v60 = vpop.f32.mrf.mxu1  ;;  %v7232_v35 = vadd.f32 %v16775_v51, %v14587_v8 }
 0x53c   :  { %v14995_v14 = vadd.f32 %v7129_v60, %v6290_v46 }
 0x53d   :  { %v7133_v12 = vpop.f32.mrf.mxu1 }
 0x53e   :  { %16768 = vst [vmem:[#allocation105_spill] sm:$0xff] %v14995_v14  ;;  %v15001_v37 = vadd.f32 %v7133_v12, %v6304_v6  ;;  %v16773_v14 = vld [vmem:[#allocation88_spill] sm:$0xff] }
 0x53f   :  { %v7135_v52 = vpop.f32.mrf.mxu1  ;;  %v7231_v45 = vadd.f32 %v16773_v14, %v14580_v30  ;;  %v16778_v30 = vld [vmem:[#allocation91_spill] sm:$0xff] }
 0x540   :  { %v15005_v34 = vadd.f32 %v7135_v52, %v6305_v47  ;;  %v15007_v38 = vpop.f32.mrf.mxu0  ;;  %v7247_v14 = vadd.f32 %v16778_v30, %v14602_v16 }
 0x541   :  { %v7139_v0 = vpop.f32.mrf.mxu1 }
 0x542   :  { %16771 = vst [vmem:[#allocation54_spill] sm:$0xff] %v15005_v34  ;;  %v15011_v46 = vadd.f32 %v7139_v0, %v6319_v63  ;;  %v15017_v12 = vpop.f32.mrf.mxu0  ;;  %v16776_v34 = vld [vmem:[#allocation90_spill] sm:$0xff] }
 0x543   :  { %v7141_v60 = vpop.f32.mrf.mxu1  ;;  %v7246_v28 = vadd.f32 %v16776_v34, %v14595_v9  ;;  %v16782_v9 = vld [vmem:[#allocation93_spill] sm:$0xff] }
 0x544   :  { %v15015_v6 = vadd.f32 %v7141_v60, %v6320_v2  ;;  %v15027_v0 = vpop.f32.mrf.mxu0  ;;  %v7262_v34 = vadd.f32 %v16782_v9, %v14620_v40 }
 0x545   :  { %v7642_v19 = vpop.f32.mrf.mxu1 }
 0x546   :  { %16774 = vst [vmem:[#allocation38_spill] sm:$0xff] %v15015_v6  ;;  %v15021_v47 = vadd.f32 %v7642_v19, %v7231_v45  ;;  %v16780_v6 = vld [vmem:[#allocation92_spill] sm:$0xff]  ;;  %v15037_v19 = vpop.f32.mrf.mxu0 }
 0x547   :  { %v7644_v52 = vpop.f32.mrf.mxu1  ;;  %v7261_v8 = vadd.f32 %v16780_v6, %v14610_v42  ;;  %v16786_v42 = vld [vmem:[#allocation95_spill] sm:$0xff] }
 0x548   :  { %v15025_v63 = vadd.f32 %v7644_v52, %v7232_v35  ;;  %v7277_v6 = vadd.f32 %v16786_v42, %v14637_v44 }
 0x549   :  { %v7648_v61 = vpop.f32.mrf.mxu1 }
 0x54a   :  { %16777 = vst [vmem:[#allocation100_spill] sm:$0xff] %v15025_v63  ;;  %v15031_v2 = vadd.f32 %v7648_v61, %v7246_v28  ;;  %v16784_v63 = vld [vmem:[#allocation94_spill] sm:$0xff]  ;;  %v15047_v61 = vpop.f32.mrf.mxu0 }
 0x54b   :  { %v7650_v60 = vpop.f32.mrf.mxu1  ;;  %v7276_v16 = vadd.f32 %v16784_v63, %v14630_v25  ;;  %v16791_v25 = vld [vmem:[#allocation45_spill] sm:$0xff]  ;;  %v16792_v63 = vld [vmem:[#allocation96_spill] sm:$0xff] }
 0x54c   :  { %16779 = vst [vmem:[#allocation55_spill] sm:$0xff] %v15031_v2  ;;  %v15035_v45 = vadd.f32 %v7650_v60, %v7247_v14  ;;  %v16789_v2 = vld [vmem:[#allocation30_spill] sm:$0xff] }
 0x54d   :  { %v7654_v51 = vpop.f32.mrf.mxu1 }
 0x54e   :  { %16781 = vst [vmem:[#allocation101_spill] sm:$0xff] %v15035_v45  ;;  %v15041_v35 = vadd.f32 %v7654_v51, %v7261_v8  ;;  %v16788_v45 = vld [vmem:[#allocation127_spill] sm:$0xff]  ;;  %v15057_v51 = vpop.f32.mrf.mxu0 }
 0x54f   :  { %v7656_v52 = vpop.f32.mrf.mxu1  ;;  %v7235_v40 = vadd.f32 %v16789_v2, %v16788_v45  ;;  %v16796_v2 = vld [vmem:[#allocation32_spill] sm:$0xff] }
 0x550   :  { %16783 = vst [vmem:[#allocation39_spill] sm:$0xff] %v15041_v35  ;;  %v15045_v28 = vadd.f32 %v7656_v52, %v7262_v34  ;;  %v7236_v34 = vadd.f32 %v16792_v63, %v16791_v25  ;;  %v16794_v35 = vld [vmem:[#allocation97_spill] sm:$0xff]  ;;  %v7251_v45 = vadd.f32 %v16796_v2, %v14674_v31 }
 0x551   :  { %v7660_v30 = vpop.f32.mrf.mxu1  ;;  %v7250_v44 = vadd.f32 %v16794_v35, %v14666_v49  ;;  %v16800_v49 = vld [vmem:[#allocation99_spill] sm:$0xff] }
 0x552   :  { %16785 = vst [vmem:[#allocation103_spill] sm:$0xff] %v15045_v28  ;;  %v15051_v14 = vadd.f32 %v7660_v30, %v7276_v16  ;;  %v15067_v30 = vpop.f32.mrf.mxu0  ;;  %v7266_v35 = vadd.f32 %v16800_v49, %v14695_v24  ;;  %v16812_v49 = vlaneseq }
 0x553   :  { %v7662_v60 = vpop.f32.mrf.mxu1 }
 0x554   :  { %16787 = vst [vmem:[#allocation40_spill] sm:$0xff] %v15051_v14  ;;  %v15055_v8 = vadd.f32 %v7662_v60, %v7277_v6 }
 0x555   :  { %v7820_v9 = vpop.f32.mrf.mxu1 }
 0x556   :  { %16790 = vst [vmem:[#allocation60_spill] sm:$0xff] %v15055_v8  ;;  %v15061_v52 = vadd.f32 %v7820_v9, %v7235_v40  ;;  %v16798_v8 = vld [vmem:[#allocation98_spill] sm:$0xff]  ;;  %v15077_v9 = vpop.f32.mrf.mxu0 }
 0x557   :  { %v7822_v28 = vpop.f32.mrf.mxu1  ;;  %v7265_v25 = vadd.f32 %v16798_v8, %v14687_v57  ;;  %v16806_v57 = vld [vmem:[#allocation69_spill] sm:$0xff]  ;;  %v16807_v8 = vld [vmem:[#allocation31_spill] sm:$0xff] }
 0x558   :  { %16793 = vst [vmem:[#allocation164_spill] sm:$0xff] %v15061_v52  ;;  %v15065_v16 = vadd.f32 %v7822_v28, %v7236_v34  ;;  %v16803_v52 = vld [vmem:[#allocation33_spill] sm:$0xff] }
 0x559   :  { %v7826_v42 = vpop.f32.mrf.mxu1 }
 0x55a   :  { %16795 = vst [vmem:[#allocation47_spill] sm:$0xff] %v15065_v16  ;;  %v15071_v6 = vadd.f32 %v7826_v42, %v7250_v44  ;;  %v16802_v16 = vld [vmem:[#allocation46_spill] sm:$0xff]  ;;  %v15087_v42 = vpop.f32.mrf.mxu0 }
 0x55b   :  { %v7828_v60 = vpop.f32.mrf.mxu1  ;;  %v7280_v31 = vadd.f32 %v16803_v52, %v16802_v16  ;;  %16805 = vst [vmem:[#allocation168_spill] sm:$0xff] %v15087_v42  ;;  %v15100_v52 = vshrl.u32 %v16812_v49, 7 }
 0x55c   :  { %16797 = vst [vmem:[#allocation165_spill] sm:$0xff] %v15071_v6  ;;  %v15075_v40 = vadd.f32 %v7828_v60, %v7251_v45  ;;  %v7281_v45 = vadd.f32 %v16807_v8, %v16806_v57  ;;  %v16809_v6 = vld [vmem:[#allocation102_spill] sm:$0xff] }
 0x55d   :  { %v7832_v63 = vpop.f32.mrf.mxu1  ;;  %v7239_v24 = vadd.f32 %v16809_v6, %v14720_v32  ;;  %v16815_v32 = vld [vmem:[#allocation106_spill] sm:$0xff] }
 0x55e   :  { %16799 = vst [vmem:[#allocation35_spill] sm:$0xff] %v15075_v40  ;;  %v15081_v28 = vadd.f32 %v7832_v63, %v7265_v25  ;;  %v15097_v63 = vpop.f32.mrf.mxu0  ;;  %v7254_v6 = vadd.f32 %v16815_v32, %v14735_v26  ;;  %v10907_v8 = vld [vmem:[%s16208_s13 + $0x78] sm:$0xff]  ;;  %v16818_v26 = vld [vmem:[#allocation108_spill] sm:$0xff]  ;;  %v16820_v32 = vld [vmem:[#allocation107_spill] sm:$0xff] }
 0x55f   :  { %v7834_v34 = vpop.f32.mrf.mxu1  ;;  %16811 = vst [vmem:[#allocation51_spill] sm:$0xff] %v15097_v63  ;;  %v7255_v49 = vadd.f32 %v16818_v26, %v14742_v13  ;;  %v10921_v13 = vld [vmem:[%s16208_s13 + $0xe8] sm:$0xff]  ;;  %v16823_v26 = vld [vmem:[#allocation110_spill] sm:$0xff] }
 0x560   :  { %16801 = vst [vmem:[#allocation167_spill] sm:$0xff] %v15081_v28  ;;  %v15085_v44 = vadd.f32 %v7834_v34, %v7266_v35  ;;  %v16813_v35 = vld [vmem:[#allocation104_spill] sm:$0xff]  ;;  %v16837_v63 = vld [vmem:[#allocation58_spill] sm:$0xff] }
 0x561   :  { %v7838_v2 = vpop.f32.mrf.mxu1  ;;  %v7240_v34 = vadd.f32 %v16813_v35, %v14727_v54  ;;  %v15128_v35 = vld [vmem:[#allocation16] sm:$0xff]  ;;  %v15227_v42 = vadd.f32 %v16837_v63, %v14820_v20 }
 0x562   :  { %16804 = vst [vmem:[#allocation49_spill] sm:$0xff] %v15085_v44  ;;  %v15091_v60 = vadd.f32 %v7838_v2, %v7280_v31  ;;  %v10923_v31 = vld [vmem:[%s16208_s13 + $0xf8] sm:$0xff]  ;;  %v15113_v2 = vpop.f32.mrf.mxu0  ;;  %v16839_v20 = vld [vmem:[#allocation64_spill] sm:$0xff] }
 0x563   :  { %v7840_v40 = vpop.f32.mrf.mxu1  ;;  %16817 = vst [vmem:[#allocation73_spill] sm:$0xff] %v15113_v2  ;;  %11639 = vmatprep.subr.mxu0 %v10923_v31  ;;  %v10906_v31 = vld [vmem:[%s16208_s13 + $0x70] sm:$0xff]  ;;  %v15243_v63 = vadd.f32 %v16839_v20, %v14835_v58 }
 0x564   :  { %16808 = vst [vmem:[#allocation113_spill] sm:$0xff] %v15091_v60  ;;  %v15095_v25 = vadd.f32 %v7840_v40, %v7281_v45  ;;  %v15119_v45 = vsub.s32 0, %v15100_v52  ;;  %11640 = vmatpush3.msra.mxu0 %v10907_v8  ;;  %v16821_v8 = vld [vmem:[#allocation61_spill] sm:$0xff]  ;;  %v15151_v28 = vpop.f32.mrf.mxu0 }
 0x565   :  { %v7998_v16 = vpop.f32.mrf.mxu1  ;;  %16826 = vst [vmem:[#allocation75_spill] sm:$0xff] %v15151_v28 }
 0x566   :  { %16810 = vst [vmem:[#allocation170_spill] sm:$0xff] %v15095_v25  ;;  %v15104_v44 = vadd.f32 %v7998_v16, %v7239_v24  ;;  %v10922_v24 = vld [vmem:[%s16208_s13 + $0xf0] sm:$0xff]  ;;  %v15220_v2 = vpop.f32.mrf.mxu0 }
 0x567   :  { %v8000_v57 = vpop.f32.mrf.mxu1  ;;  %11641 = vmatprep.subr.mxu0 %v10922_v24  ;;  %v16824_v24 = vld [vmem:[#allocation111_spill] sm:$0xff]  ;;  %16836 = vst [vmem:[#allocation56_spill] sm:$0xff] %v15220_v2 }
 0x568   :  { %16814 = vst [vmem:[#allocation171_spill] sm:$0xff] %v15104_v44  ;;  %v15111_v40 = vadd.f32 %v8000_v57, %v7240_v34  ;;  %v15130_v34 = vld [vmem:[#allocation15] sm:$0xff]  ;;  %v15133_v57 = vsub.s32 1, %v15100_v52  ;;  %11642 = vmatpush3.msra.mxu0 %v10906_v31  ;;  %v7284_v25 = vadd.f32 %v16824_v24, %v14764_v18  ;;  %v10905_v31 = vld [vmem:[%s16208_s13 + $0x68] sm:$0xff]  ;;  %v15164_v18 = vrot.slane %v15128_v35, %v15119_v45 }
 0x569   :  { %v8004_v54 = vpop.f32.mrf.mxu1  ;;  %11643 = vmatprep.subr.mxu0 %v10921_v13  ;;  %v15184_v24 = vsub.s32 4, %v15100_v52 }
 0x56a   :  { %16816 = vst [vmem:[#allocation173_spill] sm:$0xff] %v15111_v40  ;;  %v15126_v16 = vadd.f32 %v8004_v54, %v7254_v6  ;;  %v6267_v40 = vadd.f32 %v16821_v8, %v16820_v32  ;;  %v16822_v6 = vld [vmem:[#allocation109_spill] sm:$0xff]  ;;  %v16827_v32 = vld [vmem:[#allocation112_spill] sm:$0xff]  ;;  %11644 = vmatpush3.msra.mxu0 %v10905_v31  ;;  %v10904_v31 = vld [vmem:[%s16208_s13 + $0x60] sm:$0xff]  ;;  %vm10345_vm1 = vcmp.lt.s32.totalorder %v15100_v52, %v15164_v18 }
 0x56b   :  { %v8006_v44 = vpop.f32.mrf.mxu1  ;;  %v7269_v54 = vadd.f32 %v16822_v6, %v14750_v3  ;;  %v7285_v8 = vadd.f32 %v16827_v32, %v14771_v56  ;;  %v16828_v3 = vld [vmem:[#allocation114_spill] sm:$0xff]  ;;  %v16829_v56 = vld [vmem:[#allocation115_spill] sm:$0xff]  ;;  %v16831_v32 = vld [vmem:[#allocation37_spill] sm:$0xff]  ;;  %v15260_v58 = vrot.slane %v15128_v35, %v15184_v24 }
 0x56c   :  { %16819 = vst [vmem:[#allocation74_spill] sm:$0xff] %v15126_v16  ;;  %v7270_v16 = vadd.f32 %v16823_v26, %v14757_v62  ;;  %v15149_v60 = vadd.f32 %v8006_v44, %v7255_v49  ;;  %v15160_v6 = vadd.f32 %v16828_v3, %v14779_v33  ;;  %v15168_v44 = vrot.slane %v15130_v34, %v15119_v45  ;;  %v10920_v49 = vld [vmem:[%s16208_s13 + $0xe0] sm:$0xff] }
 0x56d   :  { %v8010_v62 = vpop.f32.mrf.mxu1  ;;  %v15175_v13 = vadd.f32 %v16829_v56, %v14784_v41  ;;  %v15181_v26 = vrot.slane %v15130_v34, %v15133_v57  ;;  %11645 = vmatprep.subr.mxu0 %v10920_v49  ;;  %v15191_v3 = vadd.f32 %v16831_v32, %v14792_v11  ;;  %v16832_v41 = vld [vmem:[#allocation53_spill] sm:$0xff]  ;;  %v15199_v56 = vrot.slane %v15128_v35, %v15133_v57 }
 0x56e   :  { %16825 = vst [vmem:[#allocation116_spill] sm:$0xff] %v15149_v60  ;;  %v15177_v33 = vadd.f32 %v8010_v62, %v7269_v54  ;;  %v15195_v54 = vadd.f32 %v16832_v41, %v14799_v53  ;;  %11646 = vmatpush3.msra.mxu0 %v10904_v31  ;;  %v10919_v49 = vld [vmem:[%s16208_s13 + $0xd8] sm:$0xff]  ;;  %vm10349_vm8 = vcmp.lt.s32.totalorder %v15100_v52, %v15260_v58 }
 0x56f   :  { %v8012_v62 = vpop.f32.mrf.mxu1  ;;  %v10939_v11 = vld [vmem:[%s16208_s13 + $0x178] sm:$0xff]  ;;  %11647 = vmatprep.subr.mxu0 %v10919_v49  ;;  %v10938_v49 = vld [vmem:[%s16208_s13 + $0x170] sm:$0xff]  ;;  %vm10346_vm2 = vcmp.lt.s32.totalorder %v15100_v52, %v15199_v56 }
 0x570   :  { %16830 = vst [vmem:[#allocation117_spill] sm:$0xff] %v15177_v33  ;;  %v15202_v33 = vsub.s32 5, %v15100_v52  ;;  %v16833_v53 = vld [vmem:[#allocation118_spill] sm:$0xff]  ;;  %v16834_v41 = vld [vmem:[#allocation41_spill] sm:$0xff]  ;;  %v15218_v28 = vadd.f32 %v8012_v62, %v7270_v16  ;;  %11889 = vmatpush3.msra.mxu1 %v10939_v11 }
 0x571   :  { %v15212_v32 = vadd.f32 %v16833_v53, %v14807_v55  ;;  %v15216_v60 = vadd.f32 %v16834_v41, %v14814_v27  ;;  %v10903_v31 = vld [vmem:[%s16208_s13 + $0x58] sm:$0xff]  ;;  %v7234_v27 = vadd.f32 %v14864_v17, %v6267_v40  ;;  %v8016_v16 = vpop.f32.mrf.mxu1  ;;  %11890 = vmatprep.subr.mxu1 %v16275_v4  ;;  %v10918_v62 = vld [vmem:[%s16208_s13 + $0xd0] sm:$0xff]  ;;  %v15249_v17 = vrot.slane %v15130_v34, %v15184_v24 }
 0x572   :  { %16835 = vst [vmem:[#allocation76_spill] sm:$0xff] %v15218_v28  ;;  %v16838_v55 = vld [vmem:[#allocation121_spill] sm:$0xff]  ;;  %11648 = vmatpush3.msra.mxu0 %v10903_v31  ;;  %11891 = vmatpush3.msra.mxu1 %v10938_v49  ;;  %v16842_v11 = vld [vmem:[#allocation122_spill] sm:$0xff]  ;;  %v15281_v20 = vrot.slane %v15128_v35, %v15202_v33  ;;  %v16848_v28 = vld [vmem:[#allocation63_spill] sm:$0xff] }
 0x573   :  { %v15231_v53 = vadd.f32 %v16838_v55, %v14827_v7  ;;  %v15245_v7 = vadd.f32 %v8016_v16, %v7284_v25  ;;  %16841 = vst [vmem:[#allocation119_spill] sm:$0xff] %v15249_v17  ;;  %11649 = vmatprep.subr.mxu0 %v10918_v62  ;;  %v10902_v40 = vld [vmem:[%s16208_s13 + $0x50] sm:$0xff]  ;;  %v15256_v41 = vadd.f32 %v16842_v11, %v14840_v59  ;;  %v8018_v31 = vpop.f32.mrf.mxu1  ;;  %v10917_v55 = vld [vmem:[%s16208_s13 + $0xc8] sm:$0xff]  ;;  %v15285_v11 = vld [vmem:[#allocation15 + $0x8] sm:$0xff] }
 0x574   :  { %v15264_v25 = vrot.slane %v15130_v34, %v15202_v33  ;;  %11650 = vmatpush3.msra.mxu0 %v10902_v40  ;;  %11892 = vmatprep.subr.mxu1 %v16275_v4  ;;  %v10937_v59 = vld [vmem:[%s16208_s13 + $0x168] sm:$0xff]  ;;  %v15277_v49 = vadd.f32 %v8018_v31, %v7285_v8  ;;  %v15283_v40 = vpop.f32.mrf.mxu0  ;;  %16847 = vst [vmem:[#allocation120_spill] sm:$0xff] %v15285_v11  ;;  %v16849_v8 = vld [vmem:[#allocation82_spill] sm:$0xff] }
 0x575   :  { %16840 = vst [vmem:[#allocation77_spill] sm:$0xff] %v15245_v7  ;;  %v16844_v16 = vld [vmem:[#allocation123_spill] sm:$0xff]  ;;  %16846 = vst [vmem:[#allocation79_spill] sm:$0xff] %v15283_v40  ;;  %11651 = vmatprep.subr.mxu0 %v10917_v55  ;;  %11893 = vmatpush3.msra.mxu1 %v10937_v59  ;;  %v11856_v40 = vpop.f32.mrf.mxu1  ;;  %vm10350_vm9 = vcmp.lt.s32.totalorder %v15100_v52, %v15281_v20 }
 0x576   :  { %16843 = vst [vmem:[#allocation78_spill] sm:$0xff] %v15264_v25  ;;  %v15275_v62 = vadd.f32 %v16844_v16, %v14848_v29  ;;  %16845 = vst [vmem:[#allocation62_spill] sm:$0xff] %v15277_v49  ;;  %v10901_v7 = vld [vmem:[%s16208_s13 + $0x48] sm:$0xff]  ;;  %v15292_v29 = vadd.f32 %v16848_v28, %v14855_v23  ;;  %v16851_v49 = vld [vmem:[#allocation66_spill] sm:$0xff]  ;;  %11894 = vmatprep.subr.mxu1 %v16275_v4 }
 0x577   :  { %v16850_v31 = vld [vmem:[#allocation43_spill] sm:$0xff]  ;;  %v15299_v2 = vadd.f32 %v16851_v49, %v7234_v27  ;;  %v15301_v25 = vld [vmem:[#allocation16 + $0x8] sm:$0xff]  ;;  %11652 = vmatpush3.msra.mxu0 %v10901_v7  ;;  %v15319_v7 = vadd.f32 %v11856_v40, %v15160_v6  ;;  %v10915_v6 = vld [vmem:[%s16208_s13 + $0xb8] sm:$0xff] }
 0x578   :  { %v15296_v16 = vadd.f32 %v16850_v31, %v16849_v8  ;;  %16853 = vst [vmem:[#allocation42_spill] sm:$0xff] %v15301_v25  ;;  %v10916_v55 = vld [vmem:[%s16208_s13 + $0xc0] sm:$0xff]  ;;  %v16854_v28 = vld [vmem:[#allocation84_spill] sm:$0xff] }
 0x579   :  { %16852 = vst [vmem:[#allocation136_spill] sm:$0xff] %v15299_v2  ;;  %v10936_v23 = vld [vmem:[%s16208_s13 + $0x160] sm:$0xff]  ;;  %v16857_v27 = vld [vmem:[#allocation144_spill] sm:$0xff]  ;;  %16859 = vst [vmem:[#allocation139_spill] sm:$0xff] %v15319_v7  ;;  %11653 = vmatprep.subr.mxu0 %v10916_v55  ;;  %v15350_v55 = vpop.f32.mrf.mxu0 }
 0x57a   :  { %v16855_v59 = vld [vmem:[#allocation59_spill] sm:$0xff]  ;;  %v16858_v49 = vld [vmem:[#allocation124_spill] sm:$0xff]  ;;  %11895 = vmatpush3.msra.mxu1 %v10936_v23  ;;  %v16860_v2 = vld [vmem:[#allocation125_spill] sm:$0xff]  ;;  %16865 = vst [vmem:[#allocation86_spill] sm:$0xff] %v15350_v55 }
 0x57b   :  { %v15312_v8 = vadd.f32 %v16855_v59, %v16854_v28  ;;  %v15316_v31 = vadd.f32 %v16858_v49, %v16857_v27  ;;  %v10900_v17 = vld [vmem:[%s16208_s13 + $0x40] sm:$0xff]  ;;  %v15326_v14 = vadd.f32 %v16860_v2, %v14889_v1  ;;  %v15334_v27 = vrot.slane %v15285_v11, %v15119_v45  ;;  %11896 = vmatprep.subr.mxu1 %v16275_v4  ;;  %v10935_v1 = vld [vmem:[%s16208_s13 + $0x158] sm:$0xff]  ;;  %v16863_v2 = vld [vmem:[#allocation44_spill] sm:$0xff] }
 0x57c   :  { %v16861_v28 = vld [vmem:[#allocation166_spill] sm:$0xff]  ;;  %11654 = vmatpush3.msra.mxu0 %v10900_v17  ;;  %v15354_v17 = vrot.slane %v15301_v25, %v15119_v45  ;;  %11897 = vmatpush3.msra.mxu1 %v10935_v1  ;;  %v16866_v49 = vld [vmem:[#allocation68_spill] sm:$0xff]  ;;  %v15370_v45 = vrot.slane %v15301_v25, %v15133_v57  ;;  %v16868_v1 = vld [vmem:[#allocation65_spill] sm:$0xff] }
 0x57d   :  { %16856 = vst [vmem:[#allocation81_spill] sm:$0xff] %v15312_v8  ;;  %v15330_v59 = vadd.f32 %v16861_v28, %v14896_v21  ;;  %v8176_v8 = vpop.f32.mrf.mxu1  ;;  %16862 = vst [vmem:[#allocation83_spill] sm:$0xff] %v15334_v27  ;;  %v15345_v21 = vadd.f32 %v16863_v2, %v14904_v43  ;;  %11655 = vmatprep.subr.mxu0 %v10915_v6  ;;  %v10899_v23 = vld [vmem:[%s16208_s13 + $0x38] sm:$0xff]  ;;  %v15361_v28 = vadd.f32 %v16866_v49, %v14911_v50  ;;  %v10914_v50 = vld [vmem:[%s16208_s13 + $0xb0] sm:$0xff] }
 0x57e   :  { %v15348_v40 = vadd.f32 %v8176_v8, %v15175_v13  ;;  %v15366_v13 = vadd.s32 8, %v15100_v52  ;;  %v15374_v8 = vrot.slane %v15285_v11, %v15133_v57  ;;  %11656 = vmatpush3.msra.mxu0 %v10899_v23  ;;  %11898 = vmatprep.subr.mxu1 %v16275_v4  ;;  %v10934_v6 = vld [vmem:[%s16208_s13 + $0x150] sm:$0xff]  ;;  %v15385_v2 = vadd.f32 %v16868_v1, %v14920_v10  ;;  %v16870_v49 = vld [vmem:[#allocation126_spill] sm:$0xff]  ;;  %v16874_v55 = vld [vmem:[#allocation159_spill] sm:$0xff] }
 0x57f   :  { %v11859_v43 = vpop.f32.mrf.mxu1  ;;  %11657 = vmatprep.subr.mxu0 %v10914_v50  ;;  %11899 = vmatpush3.msra.mxu1 %v10934_v6  ;;  %v10898_v23 = vld [vmem:[%s16208_s13 + $0x30] sm:$0xff]  ;;  %v16875_v10 = vld [vmem:[#allocation70_spill] sm:$0xff]  ;;  %vm10353_vm13 = vcmp.lt.s32.totalorder %v15100_v52, %v15354_v17  ;;  %vm10354_vm15 = vcmp.lt.s32.totalorder %v15100_v52, %v15370_v45 }
 0x580   :  { %16864 = vst [vmem:[#allocation85_spill] sm:$0xff] %v15348_v40  ;;  %16867 = vst [vmem:[#allocation145_spill] sm:$0xff] %v15374_v8  ;;  %v15389_v40 = vadd.f32 %v16870_v49, %v14927_v5  ;;  %v15392_v57 = vadd.f32 %v11859_v43, %v15191_v3  ;;  %v16872_v7 = vld [vmem:[#allocation157_spill] sm:$0xff]  ;;  %v15403_v1 = vadd.f32 %v16875_v10, %v16874_v55  ;;  %v16877_v5 = vld [vmem:[#allocation67_spill] sm:$0xff]  ;;  %11658 = vmatpush3.msra.mxu0 %v10898_v23 }
 0x581   :  { %16869 = vst [vmem:[#allocation87_spill] sm:$0xff] %v15385_v2  ;;  %v16873_v8 = vld [vmem:[#allocation169_spill] sm:$0xff]  ;;  %v8186_v3 = vpop.f32.mrf.mxu1  ;;  %11900 = vmatprep.subr.mxu1 %v16275_v4  ;;  %v10933_v55 = vld [vmem:[%s16208_s13 + $0x148] sm:$0xff]  ;;  %v15427_v23 = vrot.slane %v15285_v11, %v15184_v24  ;;  %vm10360_vm6 = vcmp.lt.s32.totalorder %v15366_v13, %v15164_v18  ;;  %vm10361_vm7 = vcmp.lt.s32.totalorder %v15366_v13, %v15199_v56  ;;  %v16937_v56 = vld [vmem:[#allocation78_spill] sm:$0xff] }
 0x582   :  { %16871 = vst [vmem:[#allocation88_spill] sm:$0xff] %v15392_v57  ;;  %v15399_v27 = vadd.f32 %v16873_v8, %v16872_v7  ;;  %v16876_v2 = vld [vmem:[#allocation161_spill] sm:$0xff]  ;;  %v10913_v7 = vld [vmem:[%s16208_s13 + $0xa8] sm:$0xff]  ;;  %v8239_v6 = vadd.f32 %v8186_v3, %v15195_v54  ;;  %11901 = vmatpush3.msra.mxu1 %v10933_v55  ;;  %v15440_v54 = vrot.slane %v15301_v25, %v15184_v24  ;;  %v10932_v55 = vld [vmem:[%s16208_s13 + $0x140] sm:$0xff] }
 0x583   :  { %v15407_v49 = vadd.f32 %v16877_v5, %v16876_v2  ;;  %v16879_v43 = vld [vmem:[#allocation163_spill] sm:$0xff]  ;;  %v16880_v8 = vld [vmem:[#allocation128_spill] sm:$0xff]  ;;  %v15423_v2 = vpop.f32.mrf.mxu0  ;;  %16881 = vst [vmem:[#allocation90_spill] sm:$0xff] %v15427_v23  ;;  %11659 = vmatprep.subr.mxu0 %v10913_v7  ;;  %v16883_v57 = vld [vmem:[#allocation129_spill] sm:$0xff]  ;;  %v15444_v3 = vrot.slane %v15285_v11, %v15202_v33  ;;  %v15447_v7 = vsub.s32 2, %v15100_v52  ;;  %11902 = vmatprep.subr.mxu1 %v16275_v4 }
 0x584   :  { %v15420_v50 = vadd.f32 %v16880_v8, %v16879_v43  ;;  %v10897_v10 = vld [vmem:[%s16208_s13 + $0x28] sm:$0xff]  ;;  %v8504_v43 = vpop.f32.mrf.mxu1  ;;  %v15458_v8 = vadd.f32 %v14997_v22, %v8239_v6  ;;  %11903 = vmatpush3.msra.mxu1 %v10932_v55  ;;  %v16888_v22 = vld [vmem:[#allocation130_spill] sm:$0xff]  ;;  %vm10364_vm11 = vcmp.lt.s32.totalorder %v15366_v13, %v15260_v58  ;;  %vm10365_vm12 = vcmp.lt.s32.totalorder %v15366_v13, %v15281_v20 }
 0x585   :  { %16878 = vst [vmem:[#allocation89_spill] sm:$0xff] %v15407_v49  ;;  %v16882_v5 = vld [vmem:[#allocation48_spill] sm:$0xff]  ;;  %16884 = vst [vmem:[#allocation91_spill] sm:$0xff] %v15444_v3  ;;  %11660 = vmatpush3.msra.mxu0 %v10897_v10  ;;  %v9146_v24 = vadd.f32 %v8504_v43, %v15212_v32  ;;  %v10896_v10 = vld [vmem:[%s16208_s13 + $0x20] sm:$0xff]  ;;  %v15477_v6 = vadd.f32 %v16888_v22, %v14985_v36  ;;  %v15482_v43 = vsub.s32 3, %v15100_v52  ;;  %11904 = vmatprep.subr.mxu1 %v16275_v4  ;;  %v15497_v55 = vpop.f32.mrf.mxu0 }
 0x586   :  { %v15434_v49 = vadd.f32 %v16883_v57, %v16882_v5  ;;  %v10912_v57 = vld [vmem:[%s16208_s13 + $0xa0] sm:$0xff]  ;;  %16885 = vst [vmem:[#allocation92_spill] sm:$0xff] %v15458_v8  ;;  %v15462_v5 = vrot.slane %v15301_v25, %v15202_v33  ;;  %v16886_v3 = vld [vmem:[#allocation172_spill] sm:$0xff]  ;;  %v8506_v33 = vpop.f32.mrf.mxu1  ;;  %v16892_v22 = vld [vmem:[#allocation105_spill] sm:$0xff]  ;;  %vm10368_vm3 = vcmp.lt.s32.totalorder %v15366_v13, %v15354_v17  ;;  %vm10369_vm4 = vcmp.lt.s32.totalorder %v15366_v13, %v15370_v45 }
 0x587   :  { %11661 = vmatprep.subr.mxu0 %v10912_v57  ;;  %v15469_v23 = vadd.f32 %v16886_v3, %v14975_v15  ;;  %v16887_v11 = vld [vmem:[#allocation72_spill] sm:$0xff]  ;;  %16889 = vst [vmem:[#allocation93_spill] sm:$0xff] %v15477_v6  ;;  %16890 = vst [vmem:[#allocation94_spill] sm:$0xff] %v15482_v43  ;;  %v10911_v15 = vld [vmem:[%s16208_s13 + $0x98] sm:$0xff]  ;;  %v9147_v3 = vadd.f32 %v8506_v33, %v15216_v60  ;;  %v10100_v57 = vadd.f32 %v15007_v38, %v9146_v24 }
 0x588   :  { %v15473_v32 = vadd.f32 %v16887_v11, %v14981_v48  ;;  %11662 = vmatpush3.msra.mxu0 %v10896_v10  ;;  %v10931_v48 = vld [vmem:[%s16208_s13 + $0x138] sm:$0xff]  ;;  %v16891_v36 = vld [vmem:[#allocation131_spill] sm:$0xff]  ;;  %v15512_v38 = vrot.slane %v15130_v34, %v15447_v7  ;;  %v10910_v60 = vld [vmem:[%s16208_s13 + $0x90] sm:$0xff]  ;;  %vm10357_vm5 = vcmp.lt.s32.totalorder %v15100_v52, %v15440_v54 }
 0x589   :  { %v15493_v11 = vadd.f32 %v16891_v36, %v14991_v39  ;;  %11663 = vmatprep.subr.mxu0 %v10911_v15  ;;  %11905 = vmatpush3.msra.mxu1 %v10931_v48  ;;  %v10895_v10 = vld [vmem:[%s16208_s13 + $0x18] sm:$0xff]  ;;  %v16894_v6 = vld [vmem:[#allocation71_spill] sm:$0xff]  ;;  %v8510_v36 = vpop.f32.mrf.mxu1  ;;  %v10930_v24 = vld [vmem:[%s16208_s13 + $0x130] sm:$0xff] }
 0x58a   :  { %v16893_v8 = vld [vmem:[#allocation174_spill] sm:$0xff]  ;;  %v15508_v39 = vadd.f32 %v16894_v6, %v15001_v37  ;;  %16895 = vst [vmem:[#allocation95_spill] sm:$0xff] %v15512_v38  ;;  %11664 = vmatpush3.msra.mxu0 %v10895_v10  ;;  %11906 = vmatprep.subr.mxu1 %v16275_v4  ;;  %v9161_v37 = vadd.f32 %v8510_v36, %v15227_v42  ;;  %v10894_v33 = vld [vmem:[%s16208_s13 + $0x10] sm:$0xff] }
 0x58b   :  { %v15504_v25 = vadd.f32 %v16893_v8, %v16892_v22  ;;  %v10454_v8 = vadd.f32 %v15168_v44, %v10100_v57  ;;  %v10101_v6 = vadd.f32 %v15017_v12, %v9147_v3  ;;  %11665 = vmatprep.subr.mxu0 %v10910_v60  ;;  %11907 = vmatpush3.msra.mxu1 %v10930_v24  ;;  %v16896_v15 = vld [vmem:[#allocation54_spill] sm:$0xff]  ;;  %v16897_v48 = vld [vmem:[#allocation132_spill] sm:$0xff]  ;;  %v8512_v22 = vpop.f32.mrf.mxu1 }
 0x58c   :  { %v15529_v10 = vadd.f32 %v16897_v48, %v16896_v15  ;;  %v15533_v38 = vrot.slane %v15128_v35, %v15447_v7  ;;  %v15537_v42 = vrot.slane %v15130_v34, %v15482_v43  ;;  %11666 = vmatpush3.msra.mxu0 %v10894_v33  ;;  %11908 = vmatprep.subr.mxu1 %v16275_v4  ;;  %v10909_v12 = vld [vmem:[%s16208_s13 + $0x88] sm:$0xff]  ;;  %v15552_v33 = vpop.f32.mrf.mxu0  ;;  %v16901_v48 = vld [vmem:[#allocation133_spill] sm:$0xff] }
 0x58d   :  { %v10929_v3 = vld [vmem:[%s16208_s13 + $0x128] sm:$0xff]  ;;  %v10514_v57 = vsel %vm10345_vm1, %v10454_v8, -1e+30  ;;  %v10455_v36 = vadd.f32 %v15181_v26, %v10101_v6  ;;  %v9162_v60 = vadd.f32 %v8512_v22, %v15231_v53  ;;  %v10115_v24 = vadd.f32 %v15027_v0, %v9161_v37  ;;  %11667 = vmatprep.subr.mxu0 %v10909_v12  ;;  %v16903_v8 = vld [vmem:[#allocation134_spill] sm:$0xff]  ;;  %v8516_v6 = vpop.f32.mrf.mxu1 }
 0x58e   :  { %16898 = vst [vmem:[#allocation127_spill] sm:$0xff] %v15529_v10  ;;  %16899 = vst [vmem:[#allocation30_spill] sm:$0xff] %v15533_v38  ;;  %11909 = vmatpush3.msra.mxu1 %v10929_v3  ;;  %v10893_v15 = vld [vmem:[%s16208_s13 + $0x8] sm:$0xff]  ;;  %v16902_v38 = vld [vmem:[#allocation38_spill] sm:$0xff]  ;;  %v15567_v0 = vrot.slane %v15128_v35, %v15482_v43  ;;  %v9176_v22 = vadd.f32 %v8516_v6, %v15243_v63 }
 0x58f   :  { %16900 = vst [vmem:[#allocation45_spill] sm:$0xff] %v15537_v42  ;;  %v15559_v42 = vadd.f32 %v16901_v48, %v15011_v46  ;;  %v15563_v10 = vadd.f32 %v16903_v8, %v16902_v38  ;;  %11668 = vmatpush3.msra.mxu0 %v10893_v15  ;;  %11910 = vmatprep.subr.mxu1 %v16275_v4  ;;  %v10908_v53 = vld [vmem:[%s16208_s13 + $0x80] sm:$0xff]  ;;  %v10515_v38 = vsel %vm10346_vm2, %v10455_v36, -1e+30  ;;  %v16907_v8 = vld [vmem:[#allocation100_spill] sm:$0xff]  ;;  %v16908_v43 = vld [vmem:[#allocation137_spill] sm:$0xff]  ;;  %v8518_v63 = vpop.f32.mrf.mxu1 }
 0x590   :  { %16905 = vst [vmem:[#allocation97_spill] sm:$0xff] %v15567_v0  ;;  %v10928_v46 = vld [vmem:[%s16208_s13 + $0x120] sm:$0xff]  ;;  %v10469_v37 = vadd.f32 %v15168_v44, %v10115_v24  ;;  %v10116_v12 = vadd.f32 %v15037_v19, %v9162_v60  ;;  %11669 = vmatprep.subr.mxu0 %v10908_v53  ;;  %v15598_v19 = vsub.s32 6, %v15100_v52  ;;  %v10130_v6 = vadd.f32 %v15047_v61, %v9176_v22  ;;  %v15607_v53 = vpop.f32.mrf.mxu0  ;;  %v10927_v61 = vld [vmem:[%s16208_s13 + $0x118] sm:$0xff]  ;;  %v10926_v22 = vld [vmem:[%s16208_s13 + $0x110] sm:$0xff] }
 0x591   :  { %16904 = vst [vmem:[#allocation96_spill] sm:$0xff] %v15563_v10  ;;  %11911 = vmatpush3.msra.mxu1 %v10928_v46  ;;  %v10892_v3 = vld [vmem:[%s16208_s13] sm:$0xff]  ;;  %v15591_v10 = vadd.f32 %v16908_v43, %v16907_v8  ;;  %v9177_v43 = vadd.f32 %v8518_v63, %v15256_v41  ;;  %v16913_v46 = vld [vmem:[#allocation101_spill] sm:$0xff]  ;;  %v10315_v41 = vsub.s32 7, %v15100_v52 }
 0x592   :  { %v16906_v15 = vld [vmem:[#allocation135_spill] sm:$0xff]  ;;  %v16910_v24 = vld [vmem:[#allocation138_spill] sm:$0xff]  ;;  %16912 = vst [vmem:[#allocation98_spill] sm:$0xff] %v15598_v19  ;;  %11670 = vmatpush3.msra.mxu0 %v10892_v3  ;;  %11912 = vmatprep.subr.mxu1 %v16275_v4  ;;  %v10470_v60 = vadd.f32 %v15181_v26, %v10116_v12 }
 0x593   :  { %v15587_v48 = vadd.f32 %v16906_v15, %v15021_v47  ;;  %v16909_v36 = vld [vmem:[#allocation55_spill] sm:$0xff]  ;;  %v10529_v47 = vsel %vm10360_vm6, %v10469_v37, -1e+30  ;;  %11923 = vmatprep.subr.mxu0 %v16275_v4  ;;  %v16914_v15 = vld [vmem:[#allocation140_spill] sm:$0xff]  ;;  %v8522_v37 = vpop.f32.mrf.mxu1  ;;  %11913 = vmatpush3.msra.mxu1 %v10927_v61 }
 0x594   :  { %v15595_v0 = vadd.f32 %v16910_v24, %v16909_v36  ;;  %v15612_v8 = vadd.f32 %v16914_v15, %v16913_v46  ;;  %v16916_v3 = vld [vmem:[#allocation39_spill] sm:$0xff]  ;;  %v16917_v36 = vld [vmem:[#allocation141_spill] sm:$0xff]  ;;  %v10530_v12 = vsel %vm10361_vm7, %v10470_v60, -1e+30  ;;  %v9191_v63 = vadd.f32 %v8522_v37, %v15275_v62  ;;  %11914 = vmatprep.subr.mxu1 %v16275_v4  ;;  %v15653_v37 = vpop.f32.mrf.mxu0 }
 0x595   :  { %v15616_v24 = vadd.f32 %v16917_v36, %v16916_v3  ;;  %v16919_v46 = vld [vmem:[#allocation103_spill] sm:$0xff]  ;;  %v16920_v15 = vld [vmem:[#allocation57_spill] sm:$0xff]  ;;  %v15641_v60 = vrot.slane %v15130_v34, %v15598_v19  ;;  %11915 = vmatpush3.msra.mxu1 %v10926_v22 }
 0x596   :  { %16911 = vst [vmem:[#allocation32_spill] sm:$0xff] %v15595_v0  ;;  %16915 = vst [vmem:[#allocation99_spill] sm:$0xff] %v15612_v8  ;;  %v10574_v0 = vmax.f32 %v10514_v57, %v10529_v47  ;;  %v10484_v57 = vadd.f32 %v15168_v44, %v10130_v6  ;;  %v10131_v47 = vadd.f32 %v15057_v51, %v9177_v43  ;;  %v8524_v8 = vpop.f32.mrf.mxu1  ;;  %v10925_v51 = vld [vmem:[%s16208_s13 + $0x108] sm:$0xff]  ;;  %11916 = vmatprep.subr.mxu1 %v16275_v4 }
 0x597   :  { %16918 = vst [vmem:[#allocation46_spill] sm:$0xff] %v15616_v24  ;;  %v15635_v3 = vadd.f32 %v16920_v15, %v16919_v46  ;;  %v10581_v24 = vmax.f32 %v10515_v38, %v10530_v12  ;;  %16921 = vst [vmem:[#allocation33_spill] sm:$0xff] %v15641_v60  ;;  %v9192_v43 = vadd.f32 %v8524_v8, %v15292_v29  ;;  %11917 = vmatpush3.msra.mxu1 %v10925_v51 }
 0x598   :  { %v10575_v36 = vrot.slane %v10574_v0, 4  ;;  %v10544_v62 = vsel %vm10345_vm1, %v10484_v57, -1e+30  ;;  %v10485_v38 = vadd.f32 %v15181_v26, %v10131_v47  ;;  %v10145_v6 = vadd.f32 %v15067_v30, %v9191_v63  ;;  %v8682_v46 = vpop.f32.mrf.mxu1  ;;  %v10924_v30 = vld [vmem:[%s16208_s13 + $0x100] sm:$0xff]  ;;  %v16923_v63 = vld [vmem:[#allocation40_spill] sm:$0xff]  ;;  %11918 = vmatprep.subr.mxu1 %v16275_v4  ;;  %s12290_s13 = smov [#allocation22]  }
 0x599   :  { %v10582_v12 = vrot.slane %v10581_v24, 4  ;;  %v15659_v15 = vrot.slane %v15128_v35, %v15598_v19  ;;  %v15662_v57 = vrot.slane %v15130_v34, %v10315_v41  ;;  %v9150_v8 = vadd.f32 %v8682_v46, %v15296_v16  ;;  %v16924_v34 = vld [vmem:[#allocation142_spill] sm:$0xff]  ;;  %v16926_v16 = vld [vmem:[#allocation136_spill] sm:$0xff]  ;;  %11919 = vmatpush3.msra.mxu1 %v10924_v30  ;;  %s11189_s19 = sshll.u32 %s12290_s13, 4  ;;  %s11190_s19 = int_to_ptr.vmem [resolvable:$true] %s11189_s19 }
 0x59a   :  { %v10576_v61 = vmax.f32 %v10574_v0, %v10575_v36  ;;  %v10545_v29 = vsel %vm10346_vm2, %v10485_v38, -1e+30  ;;  %v10499_v0 = vadd.f32 %v15168_v44, %v10145_v6  ;;  %v10146_v22 = vadd.f32 %v15077_v9, %v9192_v43  ;;  %v8684_v19 = vpop.f32.mrf.mxu1  ;;  %v16927_v38 = vld [vmem:[#allocation168_spill] sm:$0xff]  ;;  %s12234_s3 = scalar_lea.vmem %s11190_s19, 32  ;;  %p12239_p0 = scmp.lt.s32.totalorder %s11190_s19, %s11190_s19 }
 0x59b   :  { %16922 = vst [vmem:[#allocation69_spill] sm:$0xff] %v15662_v57  ;;  %v15676_v47 = vadd.f32 %v16924_v34, %v16923_v63  ;;  %v10583_v57 = vmax.f32 %v10581_v24, %v10582_v12  ;;  %v15681_v60 = vrot.slane %v15128_v35, %v10315_v41  ;;  %v9151_v51 = vadd.f32 %v8684_v19, %v16926_v16  ;;  %v15690_v24 = vpop.f32.mrf.mxu0  ;;  %v16928_v6 = vld [vmem:[#allocation60_spill] sm:$0xff]  ;;  %v16929_v12 = vld [vmem:[#allocation143_spill] sm:$0xff]  ;;  %v16932_v19 = vld [vmem:[#allocation81_spill] sm:$0xff]  ;;  %p12235_p13 = scmp.ne.s32.totalorder %s11190_s19, %s12234_s3  ;;  %p12240_p1 = scmp.lt.s32.totalorder %s12234_s3, %s12234_s3 }
 0x59c   :  { %v10577_v36 = vrot.slane %v10576_v61, 2  ;;  %v10559_v9 = vsel %vm10360_vm6, %v10499_v0, -1e+30  ;;  %v10500_v44 = vadd.f32 %v15181_v26, %v10146_v22  ;;  %v10104_v43 = vadd.f32 %v16927_v38, %v9150_v8  ;;  %v8688_v34 = vpop.f32.mrf.mxu1  ;;  %v16931_v26 = vld [vmem:[#allocation119_spill] sm:$0xff]  ;;  %v16934_v38 = vld [vmem:[#allocation164_spill] sm:$0xff] }
 0x59d   :  { %16925 = vst [vmem:[#allocation31_spill] sm:$0xff] %v15681_v60  ;;  %v15694_v46 = vadd.f32 %v16929_v12, %v16928_v6  ;;  %v10584_v41 = vrot.slane %v10583_v57, 2  ;;  %v10679_v63 = vmax.f32 %v10544_v62, %v10559_v9  ;;  %v9165_v22 = vadd.f32 %v8688_v34, %v16932_v19  ;;  %v16933_v8 = vld [vmem:[#allocation51_spill] sm:$0xff]  ;;  %v16935_v30 = vld [vmem:[#allocation80_spill] sm:$0xff]  ;;  %v15712_v19 = vpop.f32.mrf.mxu0  ;;  %p12241_p2 = por %p12240_p1, %p12239_p0 }
 0x59e   :  { %v10578_v35 = vmax.f32 %v10576_v61, %v10577_v36  ;;  %v10560_v18 = vsel %vm10361_vm7, %v10500_v44, -1e+30  ;;  %v10458_v0 = vadd.f32 %v16931_v26, %v10104_v43  ;;  %v10105_v16 = vadd.f32 %v16933_v8, %v9151_v51  ;;  %v8690_v36 = vpop.f32.mrf.mxu1  ;;  %v16938_v43 = vld [vmem:[#allocation73_spill] sm:$0xff]  ;;  %v16939_v51 = vld [vmem:[#allocation47_spill] sm:$0xff]  ;;  %v16940_v8 = vld [vmem:[#allocation146_spill] sm:$0xff] }
 0x59f   :  { %16930 = vst [vmem:[#allocation102_spill] sm:$0xff] %v15694_v46  ;;  %v15704_v4 = vadd.f32 %v16935_v30, %v16934_v38  ;;  %v10680_v12 = vrot.slane %v10679_v63, 4  ;;  %v10686_v61 = vmax.f32 %v10545_v29, %v10560_v18  ;;  %v9166_v44 = vadd.f32 %v8690_v36, %v15316_v31  ;;  %v16941_v36 = vld [vmem:[#allocation75_spill] sm:$0xff]  ;;  %v16943_v46 = vld [vmem:[#allocation148_spill] sm:$0xff]  ;;  %p12242_p3 = pnand %p12241_p2, %p12235_p13 }
 0x5a0   :  { %v10579_v6 = vrot.slane %v10578_v35, 1  ;;  %v10518_v62 = vsel %vm10349_vm8, %v10458_v0, -1e+30  ;;  %v10459_v9 = vadd.f32 %v16937_v56, %v10105_v16  ;;  %v10119_v34 = vadd.f32 %v16938_v43, %v9165_v22  ;;  %v8694_v18 = vpop.f32.mrf.mxu1  ;;  %v16942_v43 = vld [vmem:[#allocation165_spill] sm:$0xff] }
 0x5a1   :  { %16936 = vst [vmem:[#allocation104_spill] sm:$0xff] %v15704_v4  ;;  %v15716_v38 = vadd.f32 %v16940_v8, %v16939_v51  ;;  %v10585_v30 = vmax.f32 %v10583_v57, %v10584_v41  ;;  %v10681_v4 = vmax.f32 %v10679_v63, %v10680_v12  ;;  %v10687_v29 = vrot.slane %v10686_v61, 4 }
 0x5a2   :  { %v10519_v0 = vsel %vm10350_vm9, %v10459_v9, -1e+30  ;;  %v10473_v16 = vadd.f32 %v16931_v26, %v10119_v34  ;;  %v9180_v31 = vadd.f32 %v8694_v18, %v15326_v14  ;;  %v10120_v22 = vadd.f32 %v16941_v36, %v9166_v44  ;;  %v8696_v41 = vpop.f32.mrf.mxu1  ;;  %v16945_v34 = vld [vmem:[#allocation56_spill] sm:$0xff]  ;;  %v15734_v18 = vpop.f32.mrf.mxu0 }
 0x5a3   :  { %v15726_v60 = vadd.f32 %v16943_v46, %v16942_v43  ;;  %v10580_v51 = vmax.f32 %v10578_v35, %v10579_v6  ;;  %v10682_v8 = vrot.slane %v10681_v4, 2  ;;  %v10688_v57 = vmax.f32 %v10686_v61, %v10687_v29 }
 0x5a4   :  { %v10533_v63 = vsel %vm10364_vm11, %v10473_v16, -1e+30  ;;  %v10474_v12 = vadd.f32 %v16937_v56, %v10120_v22  ;;  %v9181_v9 = vadd.f32 %v8696_v41, %v15330_v59  ;;  %v10134_v14 = vadd.f32 %v16945_v34, %v9180_v31  ;;  %v8700_v35 = vpop.f32.mrf.mxu1  ;;  %v16946_v16 = vld [vmem:[#allocation79_spill] sm:$0xff] }
 0x5a5   :  { %16944 = vst [vmem:[#allocation106_spill] sm:$0xff] %v15726_v60  ;;  %v10586_v44 = vrot.slane %v10585_v30, 1  ;;  %v10683_v36 = vmax.f32 %v10681_v4, %v10682_v8  ;;  %v10689_v46 = vrot.slane %v10688_v57, 2  ;;  %v10602_v43 = vmax.f32 %v10518_v62, %v10533_v63  ;;  %v16947_v8 = vld [vmem:[#allocation86_spill] sm:$0xff] }
 0x5a6   :  { %v10534_v6 = vsel %vm10365_vm12, %v10474_v12, -1e+30  ;;  %v10488_v61 = vadd.f32 %v16931_v26, %v10134_v14  ;;  %v9195_v29 = vadd.f32 %v8700_v35, %v15345_v21  ;;  %v10135_v22 = vadd.f32 %v16946_v16, %v9181_v9  ;;  %v8702_v60 = vpop.f32.mrf.mxu1 }
 0x5a7   :  { %v10684_v59 = vrot.slane %v10683_v36, 1  ;;  %v10690_v41 = vmax.f32 %v10688_v57, %v10689_v46  ;;  %v10603_v31 = vrot.slane %v10602_v43, 4  ;;  %v10609_v34 = vmax.f32 %v10519_v0, %v10534_v6  ;;  %v15752_v57 = vpop.f32.mrf.mxu0 }
 0x5a8   :  { %v10548_v4 = vsel %vm10349_vm8, %v10488_v61, -1e+30  ;;  %v10489_v62 = vadd.f32 %v16937_v56, %v10135_v22  ;;  %v9196_v21 = vadd.f32 %v8702_v60, %v15361_v28  ;;  %v10149_v63 = vadd.f32 %v16947_v8, %v9195_v29  ;;  %v8860_v46 = vpop.f32.mrf.mxu1  ;;  %v16948_v61 = vld [vmem:[#allocation87_spill] sm:$0xff] }
 0x5a9   :  { %v10685_v0 = vmax.f32 %v10683_v36, %v10684_v59  ;;  %v10691_v12 = vrot.slane %v10690_v41, 1  ;;  %v10604_v9 = vmax.f32 %v10602_v43, %v10603_v31  ;;  %v10610_v14 = vrot.slane %v10609_v34, 4 }
 0x5aa   :  { %v10549_v35 = vsel %vm10350_vm9, %v10489_v62, -1e+30  ;;  %v10503_v6 = vadd.f32 %v16931_v26, %v10149_v63  ;;  %v9154_v28 = vadd.f32 %v8860_v46, %v16948_v61  ;;  %v10150_v60 = vadd.f32 %v15423_v2, %v9196_v21  ;;  %v8862_v22 = vpop.f32.mrf.mxu1  ;;  %v15772_v2 = vpop.f32.mrf.mxu0 }
 0x5ab   :  { %v15763_v29 = vsel %vm449_vm10, %v10685_v0, %v10580_v51  ;;  %v10692_v36 = vmax.f32 %v10690_v41, %v10691_v12  ;;  %v10605_v43 = vrot.slane %v10604_v9, 2  ;;  %v10611_v16 = vmax.f32 %v10609_v34, %v10610_v14 }
 0x5ac   :  { %v10587_v59 = vmax.f32 %v10585_v30, %v10586_v44  ;;  %v10563_v31 = vsel %vm10364_vm11, %v10503_v6, -1e+30  ;;  %v10504_v62 = vadd.f32 %v16937_v56, %v10150_v60  ;;  %v9155_v26 = vadd.f32 %v8862_v22, %v15389_v40  ;;  %v8866_v8 = vpop.f32.mrf.mxu1  ;;  %v15787_v61 = vpop.f32.mrf.mxu0  ;;  %v16953_v22 = vld [vmem:[#allocation89_spill] sm:$0xff] }
 0x5ad   :  { %v10606_v51 = vmax.f32 %v10604_v9, %v10605_v43  ;;  %v10612_v21 = vrot.slane %v10611_v16, 2  ;;  %v10707_v41 = vmax.f32 %v10548_v4, %v10563_v31  ;;  %v10108_v34 = vadd.f32 %v15497_v55, %v9154_v28  ;;  %v16949_v4 = vld [vmem:[#allocation83_spill] sm:$0xff]  ;;  %v16950_v55 = vld [vmem:[#allocation145_spill] sm:$0xff] }
 0x5ae   :  { %v10564_v58 = vsel %vm10365_vm12, %v10504_v62, -1e+30  ;;  %v9169_v30 = vadd.f32 %v8866_v8, %v15399_v27  ;;  %v10109_v56 = vadd.f32 %v15552_v33, %v9155_v26  ;;  %v15781_v40 = vsel %vm449_vm10, %v10692_v36, %v10587_v59  ;;  %v8868_v9 = vpop.f32.mrf.mxu1  ;;  %v16951_v27 = vld [vmem:[#allocation35_spill] sm:$0xff]  ;;  %v16952_v33 = vld [vmem:[#allocation149_spill] sm:$0xff]  ;;  %v16955_v62 = vld [vmem:[#allocation150_spill] sm:$0xff] }
 0x5af   :  { %v10607_v44 = vrot.slane %v10606_v51, 1  ;;  %v10613_v63 = vmax.f32 %v10611_v16, %v10612_v21  ;;  %v10708_v0 = vrot.slane %v10707_v41, 4  ;;  %v10714_v12 = vmax.f32 %v10549_v35, %v10564_v58  ;;  %v16954_v31 = vld [vmem:[#allocation167_spill] sm:$0xff] }
 0x5b0   :  { %v10462_v14 = vadd.f32 %v16949_v4, %v10108_v34  ;;  %v10463_v46 = vadd.f32 %v16950_v55, %v10109_v56  ;;  %v9170_v6 = vadd.f32 %v8868_v9, %v15403_v1  ;;  %v10123_v20 = vadd.f32 %v15607_v53, %v9169_v30  ;;  %v8872_v16 = vpop.f32.mrf.mxu1  ;;  %v15811_v9 = vpop.f32.mrf.mxu0 }
 0x5b1   :  { %v15791_v28 = vadd.f32 %v16952_v33, %v16951_v27  ;;  %v10614_v60 = vrot.slane %v10613_v63, 1  ;;  %v10709_v36 = vmax.f32 %v10707_v41, %v10708_v0  ;;  %v10715_v43 = vrot.slane %v10714_v12, 4 }
 0x5b2   :  { %v10522_v35 = vsel %vm10353_vm13, %v10462_v14, -1e+30  ;;  %v10523_v1 = vsel %vm10354_vm15, %v10463_v46, -1e+30  ;;  %v10477_v53 = vadd.f32 %v16949_v4, %v10123_v20  ;;  %v9184_v59 = vadd.f32 %v8872_v16, %v16953_v22  ;;  %v8874_v8 = vpop.f32.mrf.mxu1 }
 0x5b3   :  { %v15803_v26 = vadd.f32 %v16955_v62, %v16954_v31  ;;  %v10710_v21 = vrot.slane %v10709_v36, 2  ;;  %v10716_v41 = vmax.f32 %v10714_v12, %v10715_v43  ;;  %v10124_v34 = vadd.f32 %v15653_v37, %v9170_v6 }
 0x5b4   :  { %v10608_v58 = vmax.f32 %v10606_v51, %v10607_v44  ;;  %v10537_v30 = vsel %vm10368_vm3, %v10477_v53, -1e+30  ;;  %v9185_v56 = vadd.f32 %v8874_v8, %v15420_v50  ;;  %v10138_v0 = vadd.f32 %v15690_v24, %v9184_v59  ;;  %v8878_v12 = vpop.f32.mrf.mxu1 }
 0x5b5   :  { %v10711_v14 = vmax.f32 %v10709_v36, %v10710_v21  ;;  %v10717_v46 = vrot.slane %v10716_v41, 2  ;;  %v10630_v20 = vmax.f32 %v10522_v35, %v10537_v30  ;;  %v10478_v27 = vadd.f32 %v16950_v55, %v10124_v34 }
 0x5b6   :  { %v10615_v33 = vmax.f32 %v10613_v63, %v10614_v60  ;;  %v10492_v37 = vadd.f32 %v16949_v4, %v10138_v0  ;;  %v9199_v51 = vadd.f32 %v8878_v12, %v15434_v49  ;;  %v10139_v44 = vadd.f32 %v15712_v19, %v9185_v56  ;;  %v8880_v43 = vpop.f32.mrf.mxu1  ;;  %v10000_v60 = vpop.f32.mrf.mxu0 }
 0x5b7   :  { %v10712_v50 = vrot.slane %v10711_v14, 1  ;;  %v10718_v24 = vmax.f32 %v10716_v41, %v10717_v46  ;;  %v10631_v6 = vrot.slane %v10630_v20, 4  ;;  %v10538_v36 = vsel %vm10369_vm4, %v10478_v27, -1e+30 }
 0x5b8   :  { %v10637_v16 = vmax.f32 %v10523_v1, %v10538_v36  ;;  %v10552_v63 = vsel %vm10353_vm13, %v10492_v37, -1e+30  ;;  %v10493_v49 = vadd.f32 %v16950_v55, %v10139_v44  ;;  %v9200_v19 = vadd.f32 %v8880_v43, %v15469_v23  ;;  %v9038_v31 = vpop.f32.mrf.mxu1 }
 0x5b9   :  { %v10713_v35 = vmax.f32 %v10711_v14, %v10712_v50  ;;  %v10719_v53 = vrot.slane %v10718_v24, 1  ;;  %v10632_v22 = vmax.f32 %v10630_v20, %v10631_v6  ;;  %v10153_v59 = vadd.f32 %v15734_v18, %v9199_v51  ;;  %v16956_v14 = vld [vmem:[#allocation93_spill] sm:$0xff]  ;;  %v16958_v6 = vld [vmem:[#allocation90_spill] sm:$0xff] }
 0x5ba   :  { %vm10358_vm1 = vcmp.lt.s32.totalorder %v15100_v52, %v15462_v5  ;;  %v10638_v62 = vrot.slane %v10637_v16, 4  ;;  %v10553_v1 = vsel %vm10354_vm15, %v10493_v49, -1e+30  ;;  %v9158_v21 = vadd.f32 %v9038_v31, %v15473_v32  ;;  %v9040_v8 = vpop.f32.mrf.mxu1  ;;  %v10004_v32 = vpop.f32.mrf.mxu0 }
 0x5bb   :  { %v10154_v41 = vadd.f32 %v15752_v57, %v9200_v19  ;;  %vm10372_vm2 = vcmp.lt.s32.totalorder %v15366_v13, %v15440_v54  ;;  %v10720_v23 = vmax.f32 %v10718_v24, %v10719_v53  ;;  %v10633_v34 = vrot.slane %v10632_v22, 2  ;;  %v15844_v57 = vpop.permute.xlu0 %10805 }
 0x5bc   :  { %v10507_v18 = vadd.f32 %v16949_v4, %v10153_v59  ;;  %v10815_v30 = vsel %vm449_vm10, %v10713_v35, %v10608_v58  ;;  %v10639_v56 = vmax.f32 %v10637_v16, %v10638_v62  ;;  %v9159_v46 = vadd.f32 %v9040_v8, %v16956_v14  ;;  %v9044_v12 = vpop.f32.mrf.mxu1  ;;  %v15862_v16 = vpop.permute.xlu1 %10786 }
 0x5bd   :  { %v10508_v0 = vadd.f32 %v16950_v55, %v10154_v41  ;;  %v10112_v20 = vadd.f32 %v15772_v2, %v9158_v21  ;;  %vm10373_vm6 = vcmp.lt.s32.totalorder %v15366_v13, %v15462_v5  ;;  %v15847_v27 = vsel %vm449_vm10, %v10720_v23, %v10615_v33  ;;  %v16957_v55 = vld [vmem:[#allocation120_spill] sm:$0xff]  ;;  %v10006_v53 = vpop.f32.mrf.mxu0  ;;  %v16959_v21 = vld [vmem:[#allocation91_spill] sm:$0xff]  ;;  %v16979_v5 = vld [vmem:[#allocation154_spill] sm:$0xff] }
 0x5be   :  { %v10634_v4 = vmax.f32 %v10632_v22, %v10633_v34  ;;  %v10567_v58 = vsel %vm10368_vm3, %v10507_v18, -1e+30  ;;  %v15854_v37 = vrot.slane %v16957_v55, %v15447_v7  ;;  %v10640_v2 = vrot.slane %v10639_v56, 2  ;;  %v9046_v43 = vpop.f32.mrf.mxu1 }
 0x5bf   :  { %v10735_v51 = vmax.f32 %v10552_v63, %v10567_v58  ;;  %v10568_v44 = vsel %vm10369_vm4, %v10508_v0, -1e+30  ;;  %v10821_v50 = vmul.f32 %v10815_v30, %v15844_v57  ;;  %v10466_v36 = vadd.f32 %v16958_v6, %v10112_v20  ;;  %v10010_v14 = vpop.f32.mrf.mxu0 }
 0x5c0   :  { %v10635_v33 = vrot.slane %v10634_v4, 1  ;;  %v10742_v24 = vmax.f32 %v10553_v1, %v10568_v44  ;;  %v9173_v17 = vadd.f32 %v9044_v12, %v15493_v11  ;;  %v10641_v49 = vmax.f32 %v10639_v56, %v10640_v2  ;;  %v9050_v31 = vpop.f32.mrf.mxu1 }
 0x5c1   :  { %v10736_v19 = vrot.slane %v10735_v51, 4  ;;  %v10113_v35 = vadd.f32 %v15787_v61, %v9159_v46  ;;  %v9174_v63 = vadd.f32 %v9046_v43, %v15504_v25  ;;  %v10526_v22 = vsel %vm10357_vm5, %v10466_v36, -1e+30  ;;  %v16961_v46 = vld [vmem:[#allocation30_spill] sm:$0xff] }
 0x5c2   :  { %v10743_v45 = vrot.slane %v10742_v24, 4  ;;  %v10127_v59 = vadd.f32 %v15811_v9, %v9173_v17  ;;  %v10802_v11 = vmul.f32 %v15781_v40, %v15862_v16  ;;  %v10642_v62 = vrot.slane %v10641_v49, 1  ;;  %v9052_v18 = vpop.f32.mrf.mxu1  ;;  %v16960_v40 = vld [vmem:[#allocation127_spill] sm:$0xff] }
 0x5c3   :  { %v10737_v1 = vmax.f32 %v10735_v51, %v10736_v19  ;;  %v10467_v41 = vadd.f32 %v16959_v21, %v10113_v35  ;;  %v9188_v61 = vadd.f32 %v9050_v31, %v15508_v39  ;;  %v10128_v34 = vadd.f32 %v10000_v60, %v9174_v63 }
 0x5c4   :  { %v10744_v23 = vmax.f32 %v10742_v24, %v10743_v45  ;;  %v10481_v25 = vadd.f32 %v16958_v6, %v10127_v59  ;;  %v15875_v8 = vadd.f32 %v10821_v50, %v10802_v11  ;;  %v10636_v30 = vmax.f32 %v10634_v4, %v10635_v33  ;;  %v9056_v4 = vpop.f32.mrf.mxu1  ;;  %v16962_v50 = vld [vmem:[#allocation97_spill] sm:$0xff]  ;;  %v10012_v45 = vpop.f32.mrf.mxu0 }
 0x5c5   :  { %v10738_v56 = vrot.slane %v10737_v1, 2  ;;  %v10527_v9 = vsel %vm10358_vm1, %v10467_v41, -1e+30  ;;  %v9189_v0 = vadd.f32 %v9052_v18, %v16960_v40  ;;  %vm10347_vm7 = vcmp.lt.s32.totalorder %v15100_v52, %v16961_v46 }
 0x5c6   :  { %v10745_v39 = vrot.slane %v10744_v23, 2  ;;  %v10541_v60 = vsel %vm10372_vm2, %v10481_v25, -1e+30  ;;  %v10482_v20 = vadd.f32 %v16959_v21, %v10128_v34  ;;  %v10142_v58 = vadd.f32 %v10004_v32, %v9188_v61  ;;  %v9058_v43 = vpop.f32.mrf.mxu1 }
 0x5c7   :  { %v10739_v12 = vmax.f32 %v10737_v1, %v10738_v56  ;;  %v10658_v2 = vmax.f32 %v10526_v22, %v10541_v60  ;;  %v9203_v51 = vadd.f32 %v9056_v4, %v15559_v42  ;;  %v10143_v44 = vadd.f32 %v10006_v53, %v9189_v0  ;;  %v16963_v53 = vld [vmem:[#allocation96_spill] sm:$0xff]  ;;  %v16964_v56 = vld [vmem:[#allocation49_spill] sm:$0xff] }
 0x5c8   :  { %vm10348_vm8 = vcmp.lt.s32.totalorder %v15100_v52, %v16962_v50  ;;  %v10643_v33 = vmax.f32 %v10641_v49, %v10642_v62  ;;  %v10746_v24 = vmax.f32 %v10744_v23, %v10745_v39  ;;  %v10542_v36 = vsel %vm10373_vm6, %v10482_v20, -1e+30  ;;  %v9547_v31 = vpop.f32.mrf.mxu1 }
 0x5c9   :  { %v10496_v17 = vadd.f32 %v16958_v6, %v10142_v58  ;;  %v10740_v19 = vrot.slane %v10739_v12, 1  ;;  %v10659_v32 = vrot.slane %v10658_v2, 4  ;;  %v10665_v35 = vmax.f32 %v10527_v9, %v10542_v36  ;;  %v16965_v9 = vld [vmem:[#allocation151_spill] sm:$0xff] }
 0x5ca   :  { %v10497_v63 = vadd.f32 %v16959_v21, %v10143_v44  ;;  %vm10362_vm9 = vcmp.lt.s32.totalorder %v15366_v13, %v16961_v46  ;;  %v10747_v42 = vrot.slane %v10746_v24, 1  ;;  %v9204_v22 = vadd.f32 %v9058_v43, %v16963_v53  ;;  %v9549_v18 = vpop.f32.mrf.mxu1  ;;  %v16969_v44 = vld [vmem:[#allocation42_spill] sm:$0xff] }
 0x5cb   :  { %v10556_v49 = vsel %vm10357_vm5, %v10496_v17, -1e+30  ;;  %v10157_v59 = vadd.f32 %v10010_v14, %v9203_v51  ;;  %v10741_v11 = vmax.f32 %v10739_v12, %v10740_v19  ;;  %v10660_v62 = vmax.f32 %v10658_v2, %v10659_v32  ;;  %v16967_v12 = vld [vmem:[#allocation113_spill] sm:$0xff]  ;;  %v16968_v2 = vld [vmem:[#allocation152_spill] sm:$0xff] }
 0x5cc   :  { %v10666_v1 = vrot.slane %v10665_v35, 4  ;;  %v10557_v41 = vsel %vm10358_vm1, %v10497_v63, -1e+30  ;;  %vm10363_vm11 = vcmp.lt.s32.totalorder %v15366_v13, %v16962_v50  ;;  %v10748_v61 = vmax.f32 %v10746_v24, %v10747_v42  ;;  %v9553_v4 = vpop.f32.mrf.mxu1  ;;  %v16971_v17 = vld [vmem:[#allocation45_spill] sm:$0xff]  ;;  %v16972_v19 = vld [vmem:[#allocation32_spill] sm:$0xff]  ;;  %v16973_v42 = vld [vmem:[#allocation99_spill] sm:$0xff] }
 0x5cd   :  { %v10511_v23 = vadd.f32 %v16958_v6, %v10157_v59  ;;  %v10102_v25 = vadd.f32 %v9547_v31, %v15587_v48  ;;  %v10158_v34 = vadd.f32 %v10012_v45, %v9204_v22  ;;  %v15910_v40 = vadd.f32 %v16965_v9, %v16964_v56  ;;  %v16966_v6 = vld [vmem:[#allocation95_spill] sm:$0xff]  ;;  %v16974_v31 = vld [vmem:[#allocation170_spill] sm:$0xff] }
 0x5ce   :  { %v15913_v0 = vsel %vm449_vm10, %v10741_v11, %v10636_v30  ;;  %v10661_v14 = vrot.slane %v10660_v62, 2  ;;  %v10103_v39 = vadd.f32 %v9549_v18, %v15591_v10  ;;  %v15917_v60 = vsel %vm449_vm10, %v10748_v61, %v10643_v33  ;;  %v16970_v10 = vld [vmem:[#allocation94_spill] sm:$0xff]  ;;  %v16975_v11 = vld [vmem:[#allocation153_spill] sm:$0xff]  ;;  %v16977_v61 = vld [vmem:[#allocation147_spill] sm:$0xff] }
 0x5cf   :  { %v10667_v20 = vmax.f32 %v10665_v35, %v10666_v1  ;;  %v10571_v48 = vsel %vm10372_vm2, %v10511_v23, -1e+30  ;;  %v10456_v58 = vadd.f32 %v16966_v6, %v10102_v25  ;;  %v15925_v51 = vadd.f32 %v16968_v2, %v16967_v12  ;;  %v9555_v35 = vpop.f32.mrf.mxu1  ;;  %v16976_v1 = vld [vmem:[#allocation171_spill] sm:$0xff]  ;;  %v16978_v18 = vld [vmem:[#allocation173_spill] sm:$0xff] }
 0x5d0   :  { %v10763_v30 = vmax.f32 %v10556_v49, %v10571_v48  ;;  %v15929_v24 = vrot.slane %v16969_v44, %v15447_v7  ;;  %v15933_v33 = vrot.slane %v16957_v55, %v16970_v10  ;;  %v10512_v36 = vadd.f32 %v16959_v21, %v10158_v34 }
 0x5d1   :  { %v10516_v54 = vsel %vm10347_vm7, %v10456_v58, -1e+30  ;;  %v10457_v43 = vadd.f32 %v16971_v17, %v10103_v39  ;;  %v10117_v32 = vadd.f32 %v9553_v4, %v16972_v19  ;;  %v10662_v63 = vmax.f32 %v10660_v62, %v10661_v14  ;;  %v9559_v59 = vpop.f32.mrf.mxu1  ;;  %v16980_v39 = vld [vmem:[#allocation46_spill] sm:$0xff] }
 0x5d2   :  { %v10764_v45 = vrot.slane %v10763_v30, 4  ;;  %v10118_v7 = vadd.f32 %v9555_v35, %v16973_v42  ;;  %v15944_v49 = vrot.slane %v16969_v44, %v16970_v10  ;;  %v10668_v55 = vrot.slane %v10667_v20, 2  ;;  %v16981_v42 = vld [vmem:[#allocation74_spill] sm:$0xff] }
 0x5d3   :  { %v10572_v53 = vsel %vm10373_vm6, %v10512_v36, -1e+30  ;;  %v10517_v21 = vsel %vm10348_vm8, %v10457_v43, -1e+30  ;;  %v10471_v22 = vadd.f32 %v16966_v6, %v10117_v32  ;;  %v15955_v62 = vadd.f32 %v16975_v11, %v16974_v31  ;;  %v9561_v58 = vpop.f32.mrf.mxu1 }
 0x5d4   :  { %v15959_v23 = vadd.f32 %v16977_v61, %v16976_v1  ;;  %v10765_v25 = vmax.f32 %v10763_v30, %v10764_v45  ;;  %v10770_v34 = vmax.f32 %v10557_v41, %v10572_v53  ;;  %v15963_v56 = vadd.f32 %v16979_v5, %v16978_v18 }
 0x5d5   :  { %v10531_v9 = vsel %vm10362_vm9, %v10471_v22, -1e+30  ;;  %v10472_v14 = vadd.f32 %v16971_v17, %v10118_v7  ;;  %v10132_v48 = vadd.f32 %v9559_v59, %v16980_v39  ;;  %v10133_v44 = vadd.f32 %v9561_v58, %v15635_v3  ;;  %v9565_v43 = vpop.f32.mrf.mxu1  ;;  %v16983_v22 = vld [vmem:[#allocation31_spill] sm:$0xff]  ;;  %v16986_v58 = vld [vmem:[#allocation156_spill] sm:$0xff] }
 0x5d6   :  { %v10766_v4 = vrot.slane %v10765_v25, 2  ;;  %v10771_v12 = vrot.slane %v10770_v34, 4  ;;  %v10588_v2 = vmax.f32 %v10516_v54, %v10531_v9  ;;  %vm10351_vm12 = vcmp.lt.s32.totalorder %v15100_v52, %v15659_v15  ;;  %v16982_v54 = vld [vmem:[#allocation155_spill] sm:$0xff] }
 0x5d7   :  { %v10663_v41 = vrot.slane %v10662_v63, 1  ;;  %v10669_v30 = vmax.f32 %v10667_v20, %v10668_v55  ;;  %v10532_v10 = vsel %vm10363_vm11, %v10472_v14, -1e+30  ;;  %v10486_v36 = vadd.f32 %v16966_v6, %v10132_v48  ;;  %v9567_v53 = vpop.f32.mrf.mxu1  ;;  %v16985_v48 = vld [vmem:[#allocation116_spill] sm:$0xff] }
 0x5d8   :  { %v10767_v19 = vmax.f32 %v10765_v25, %v10766_v4  ;;  %v10772_v32 = vmax.f32 %v10770_v34, %v10771_v12  ;;  %v10589_v35 = vrot.slane %v10588_v2, 4  ;;  %v10595_v45 = vmax.f32 %v10517_v21, %v10532_v10  ;;  %v16984_v34 = vld [vmem:[#allocation102_spill] sm:$0xff]  ;;  %v16987_v12 = vld [vmem:[#allocation104_spill] sm:$0xff] }
 0x5d9   :  { %v15979_v7 = vadd.f32 %v16982_v54, %v16981_v42  ;;  %v10546_v3 = vsel %vm10347_vm7, %v10486_v36, -1e+30  ;;  %v10487_v20 = vadd.f32 %v16971_v17, %v10133_v44  ;;  %v10147_v55 = vadd.f32 %v9565_v43, %v15676_v47  ;;  %v9725_v18 = vpop.f32.mrf.mxu1  ;;  %v16990_v42 = vld [vmem:[#allocation33_spill] sm:$0xff] }
 0x5da   :  { %vm10352_vm13 = vcmp.lt.s32.totalorder %v15100_v52, %v16983_v22  ;;  %v10768_v59 = vrot.slane %v10767_v19, 1  ;;  %v10773_v31 = vrot.slane %v10772_v32, 2  ;;  %v10590_v11 = vmax.f32 %v10588_v2, %v10589_v35 }
 0x5db   :  { %v10596_v21 = vrot.slane %v10595_v45, 4  ;;  %vm10366_vm15 = vcmp.lt.s32.totalorder %v15366_v13, %v15659_v15  ;;  %v10664_v1 = vmax.f32 %v10662_v63, %v10663_v41  ;;  %v10547_v61 = vsel %vm10348_vm8, %v10487_v20, -1e+30  ;;  %v9727_v44 = vpop.f32.mrf.mxu1 }
 0x5dc   :  { %v10501_v25 = vadd.f32 %v16966_v6, %v10147_v55  ;;  %v10148_v47 = vadd.f32 %v9567_v53, %v16984_v34  ;;  %v10670_v5 = vrot.slane %v10669_v30, 1  ;;  %v10769_v9 = vmax.f32 %v10767_v19, %v10768_v59  ;;  %v16988_v19 = vld [vmem:[#allocation117_spill] sm:$0xff]  ;;  %v12012_v53 = vld [vmem:[#allocation15 + $0x8] sm:$0xff] }
 0x5dd   :  { %v10774_v14 = vmax.f32 %v10772_v32, %v10773_v31  ;;  %v10597_v39 = vmax.f32 %v10595_v45, %v10596_v21  ;;  %vm10367_vm3 = vcmp.lt.s32.totalorder %v15366_v13, %v16983_v22  ;;  %v15999_v4 = vadd.f32 %v16986_v58, %v16985_v48  ;;  %v16989_v32 = vld [vmem:[#allocation158_spill] sm:$0xff]  ;;  %v9731_v54 = vpop.f32.mrf.mxu1 }
 0x5de   :  { %v10561_v63 = vsel %vm10362_vm9, %v10501_v25, -1e+30  ;;  %v10502_v6 = vadd.f32 %v16971_v17, %v10148_v47  ;;  %v10106_v2 = vadd.f32 %v9725_v18, %v16987_v12  ;;  %v16007_v41 = vsel %vm449_vm10, %v10769_v9, %v10664_v1  ;;  %v16991_v59 = vld [vmem:[#allocation98_spill] sm:$0xff]  ;;  %v16994_v12 = vld [vmem:[#allocation76_spill] sm:$0xff] }
 0x5df   :  { %v10775_v10 = vrot.slane %v10774_v14, 1  ;;  %v10591_v36 = vrot.slane %v10590_v11, 2  ;;  %v10598_v43 = vrot.slane %v10597_v39, 2  ;;  %v16011_v35 = vadd.f32 %v16989_v32, %v16988_v19  ;;  %v16992_v25 = vld [vmem:[#allocation106_spill] sm:$0xff]  ;;  %v9733_v50 = vpop.f32.mrf.mxu1 }
 0x5e0   :  { %v10693_v45 = vmax.f32 %v10546_v3, %v10561_v63  ;;  %v10562_v46 = vsel %vm10363_vm11, %v10502_v6, -1e+30  ;;  %v10460_v17 = vadd.f32 %v16990_v42, %v10106_v2  ;;  %v10107_v55 = vadd.f32 %v9727_v44, %v15716_v38  ;;  %v16995_v2 = vld [vmem:[#allocation160_spill] sm:$0xff] }
 0x5e1   :  { %v10700_v20 = vmax.f32 %v10547_v61, %v10562_v46  ;;  %v16019_v31 = vrot.slane %v12012_v53, %v16991_v59  ;;  %v10671_v21 = vmax.f32 %v10669_v30, %v10670_v5  ;;  %v10121_v34 = vadd.f32 %v9731_v54, %v16992_v25  ;;  %v16993_v61 = vld [vmem:[#allocation69_spill] sm:$0xff]  ;;  %v9737_v30 = vpop.f32.mrf.mxu1 }
 0x5e2   :  { %v10694_v1 = vrot.slane %v10693_v45, 4  ;;  %v10520_v3 = vsel %vm10351_vm12, %v10460_v17, -1e+30  ;;  %v10776_v47 = vmax.f32 %v10774_v14, %v10775_v10  ;;  %v10592_v18 = vmax.f32 %v10590_v11, %v10591_v36 }
 0x5e3   :  { %v10599_v9 = vmax.f32 %v10597_v39, %v10598_v43  ;;  %v10701_v48 = vrot.slane %v10700_v20, 4  ;;  %v10461_v58 = vadd.f32 %v16993_v61, %v10107_v55  ;;  %v10475_v63 = vadd.f32 %v16990_v42, %v10121_v34  ;;  %v9739_v36 = vpop.f32.mrf.mxu1  ;;  %v12013_v43 = vld [vmem:[#allocation16 + $0x8] sm:$0xff] }
 0x5e4   :  { %v10695_v38 = vmax.f32 %v10693_v45, %v10694_v1  ;;  %v10122_v6 = vadd.f32 %v9733_v50, %v15791_v28  ;;  %v16029_v5 = vsel %vm449_vm10, %v10776_v47, %v10671_v21  ;;  %v16033_v44 = vadd.f32 %v16995_v2, %v16994_v12  ;;  %v16996_v34 = vld [vmem:[#allocation77_spill] sm:$0xff] }
 0x5e5   :  { %v10702_v19 = vmax.f32 %v10700_v20, %v10701_v48  ;;  %v10521_v11 = vsel %vm10352_vm13, %v10461_v58, -1e+30  ;;  %v10136_v14 = vadd.f32 %v9737_v30, %v15803_v26  ;;  %v10535_v28 = vsel %vm10366_vm15, %v10475_v63, -1e+30  ;;  %v9743_v21 = vpop.f32.mrf.mxu1 }
 0x5e6   :  { %v10696_v39 = vrot.slane %v10695_v38, 2  ;;  %v10476_v10 = vadd.f32 %v16993_v61, %v10122_v6  ;;  %v16044_v32 = vrot.slane %v12013_v43, %v16991_v59  ;;  %v10616_v46 = vmax.f32 %v10520_v3, %v10535_v28 }
 0x5e7   :  { %v10703_v45 = vrot.slane %v10702_v19, 2  ;;  %v10490_v17 = vadd.f32 %v16990_v42, %v10136_v14  ;;  %v10137_v54 = vadd.f32 %v9739_v36, %v15910_v40  ;;  %vm10355_vm4 = vcmp.lt.s32.totalorder %v15100_v52, %v15929_v24  ;;  %v16997_v40 = vld [vmem:[#allocation162_spill] sm:$0xff] }
 0x5e8   :  { %v10593_v26 = vrot.slane %v10592_v18, 1  ;;  %v10600_v20 = vrot.slane %v10599_v9, 1  ;;  %v10697_v55 = vmax.f32 %v10695_v38, %v10696_v39  ;;  %v10536_v53 = vsel %vm10367_vm3, %v10476_v10, -1e+30  ;;  %v9745_v38 = vpop.f32.mrf.mxu1 }
 0x5e9   :  { %v10704_v1 = vmax.f32 %v10702_v19, %v10703_v45  ;;  %v10617_v59 = vrot.slane %v10616_v46, 4  ;;  %v10623_v25 = vmax.f32 %v10521_v11, %v10536_v53  ;;  %v10550_v3 = vsel %vm10351_vm12, %v10490_v17, -1e+30 }
 0x5ea   :  { %v16058_v50 = vadd.f32 %v16997_v40, %v16996_v34  ;;  %v10698_v47 = vrot.slane %v10697_v55, 1  ;;  %v10491_v48 = vadd.f32 %v16993_v61, %v10137_v54  ;;  %v10151_v58 = vadd.f32 %v9743_v21, %v15925_v51  ;;  %v9903_v39 = vpop.f32.mrf.mxu1  ;;  %v16085_v54 = vpop.permute.xlu1 %10827 }
 0x5eb   :  { %v10705_v63 = vrot.slane %v10704_v1, 1  ;;  %v10618_v6 = vmax.f32 %v10616_v46, %v10617_v59  ;;  %v10624_v30 = vrot.slane %v10623_v25, 4  ;;  %v10152_v12 = vadd.f32 %v9745_v38, %v15955_v62 }
 0x5ec   :  { %vm10356_vm5 = vcmp.lt.s32.totalorder %v15100_v52, %v15944_v49  ;;  %v10594_v2 = vmax.f32 %v10592_v18, %v10593_v26  ;;  %v10699_v19 = vmax.f32 %v10697_v55, %v10698_v47  ;;  %v10551_v11 = vsel %vm10352_vm13, %v10491_v48, -1e+30  ;;  %v9905_v45 = vpop.f32.mrf.mxu1 }
 0x5ed   :  { %v10505_v14 = vadd.f32 %v16990_v42, %v10151_v58  ;;  %vm10370_vm1 = vcmp.lt.s32.totalorder %v15366_v13, %v15929_v24  ;;  %v10601_v51 = vmax.f32 %v10599_v9, %v10600_v20  ;;  %v10706_v28 = vmax.f32 %v10704_v1, %v10705_v63 }
 0x5ee   :  { %v10619_v10 = vrot.slane %v10618_v6, 2  ;;  %v10506_v62 = vadd.f32 %v16993_v61, %v10152_v12  ;;  %vm10371_vm2 = vcmp.lt.s32.totalorder %v15366_v13, %v15944_v49  ;;  %v10801_v18 = vmul.f32 %v15763_v29, %v15862_v16  ;;  %v9909_v20 = vpop.f32.mrf.mxu1  ;;  %v17001_v12 = vld [vmem:[#allocation50_spill] sm:$0xff] }
 0x5ef   :  { %v10797_v36 = vsel %vm449_vm10, %v10699_v19, %v10594_v2  ;;  %v10565_v42 = vsel %vm10366_vm15, %v10505_v14, -1e+30  ;;  %v10110_v43 = vadd.f32 %v9903_v39, %v15959_v23  ;;  %v10822_v9 = vmul.f32 %v15847_v27, %v15844_v57 }
 0x5f0   :  { %v10803_v61 = vmul.f32 %v10797_v36, %v15862_v16  ;;  %v10814_v46 = vsel %vm449_vm10, %v10706_v28, %v10601_v51  ;;  %v10625_v17 = vmax.f32 %v10623_v25, %v10624_v30  ;;  %v10721_v26 = vmax.f32 %v10550_v3, %v10565_v42  ;;  %v9911_v22 = vpop.f32.mrf.mxu1  ;;  %v16998_v25 = vld [vmem:[#allocation62_spill] sm:$0xff]  ;;  %v17000_v30 = vld [vmem:[#allocation139_spill] sm:$0xff] }
 0x5f1   :  { %v10820_v29 = vmul.f32 %v10814_v46, %v15844_v57  ;;  %v10566_v15 = vsel %vm10367_vm3, %v10506_v62, -1e+30  ;;  %v10464_v23 = vadd.f32 %v15854_v37, %v10110_v43  ;;  %v10844_v27 = vmul.f32 %v15913_v0, %v16085_v54  ;;  %v16999_v3 = vld [vmem:[#allocation34_spill] sm:$0xff] }
 0x5f2   :  { %v10825_v55 = vadd.f32 %v10822_v9, %v10803_v61  ;;  %v10620_v16 = vmax.f32 %v10618_v6, %v10619_v10  ;;  %v10728_v53 = vmax.f32 %v10551_v11, %v10566_v15  ;;  %v10722_v1 = vrot.slane %v10721_v26, 4  ;;  %v9915_v63 = vpop.f32.mrf.mxu1 }
 0x5f3   :  { %v16094_v21 = vadd.f32 %v10820_v29, %v10801_v18  ;;  %v10524_v57 = vsel %vm10355_vm4, %v10464_v23, -1e+30  ;;  %v10111_v59 = vadd.f32 %v9905_v45, %v15963_v56  ;;  %v9202_v34 = vadd.f32 %v16999_v3, %v16998_v25 }
 0x5f4   :  { %v10626_v40 = vrot.slane %v10625_v17, 2  ;;  %v10729_v47 = vrot.slane %v10728_v53, 4  ;;  %v10125_v0 = vadd.f32 %v9909_v20, %v15979_v7  ;;  %v10723_v48 = vmax.f32 %v10721_v26, %v10722_v1 }
 0x5f5   :  { %v10465_v58 = vadd.f32 %v15933_v33, %v10111_v59  ;;  %v10126_v38 = vadd.f32 %v9911_v22, %v15999_v4  ;;  %v16105_v6 = vadd.f32 %v10844_v27, %v10825_v55  ;;  %v9175_v2 = vadd.f32 %v17001_v12, %v17000_v30  ;;  %v9917_v4 = vpop.f32.mrf.mxu1 }
 0x5f6   :  { %v10730_v56 = vmax.f32 %v10728_v53, %v10729_v47  ;;  %v10479_v19 = vadd.f32 %v15854_v37, %v10125_v0  ;;  %v10140_v11 = vadd.f32 %v9915_v63, %v16011_v35  ;;  %v10621_v14 = vrot.slane %v10620_v16, 1 }
 0x5f7   :  { %v10724_v39 = vrot.slane %v10723_v48, 2  ;;  %v10525_v7 = vsel %vm10356_vm5, %v10465_v58, -1e+30  ;;  %v10480_v51 = vadd.f32 %v15933_v33, %v10126_v38  ;;  %v10141_v18 = vadd.f32 %v9917_v4, %v16033_v44  ;;  %v9921_v45 = vpop.f32.mrf.mxu1  ;;  %v17002_v44 = vld [vmem:[#allocation85_spill] sm:$0xff]  ;;  %v17005_v38 = vld [vmem:[#allocation52_spill] sm:$0xff] }
 0x5f8   :  { %v10731_v28 = vrot.slane %v10730_v56, 2  ;;  %v10539_v10 = vsel %vm10370_vm1, %v10479_v19, -1e+30  ;;  %v10494_v62 = vadd.f32 %v15854_v37, %v10140_v11  ;;  %vm10374_vm6 = vcmp.lt.s32.totalorder %v15366_v13, %v16044_v32 }
 0x5f9   :  { %v10627_v35 = vmax.f32 %v10625_v17, %v10626_v40  ;;  %v10725_v36 = vmax.f32 %v10723_v48, %v10724_v39  ;;  %v10644_v42 = vmax.f32 %v10524_v57, %v10539_v10  ;;  %v10540_v43 = vsel %vm10371_vm2, %v10480_v51, -1e+30  ;;  %v17003_v17 = vld [vmem:[#allocation36_spill] sm:$0xff]  ;;  %v9923_v27 = vpop.f32.mrf.mxu1 }
 0x5fa   :  { %v10732_v9 = vmax.f32 %v10730_v56, %v10731_v28  ;;  %v10651_v61 = vmax.f32 %v10525_v7, %v10540_v43  ;;  %v10554_v46 = vsel %vm10355_vm4, %v10494_v62, -1e+30  ;;  %v10495_v29 = vadd.f32 %v15933_v33, %v10141_v18 }
 0x5fb   :  { %vm10359_vm7 = vcmp.lt.s32.totalorder %v15100_v52, %v16044_v32  ;;  %v9160_v26 = vadd.f32 %v17003_v17, %v17002_v44  ;;  %v10726_v15 = vrot.slane %v10725_v36, 1  ;;  %v10645_v23 = vrot.slane %v10644_v42, 4  ;;  %v11884_v40 = vpop.f32.mrf.mxu1 }
 0x5fc   :  { %v10155_v20 = vadd.f32 %v9921_v45, %v16058_v50  ;;  %v10622_v55 = vmax.f32 %v10620_v16, %v10621_v14  ;;  %v10652_v53 = vrot.slane %v10651_v61, 4  ;;  %v10555_v1 = vsel %vm10356_vm5, %v10495_v29, -1e+30  ;;  %v16139_v50 = vpop.permute.xlu1 %10849  ;;  %v17004_v16 = vld [vmem:[#allocation88_spill] sm:$0xff] }
 0x5fd   :  { %v10156_v57 = vadd.f32 %v9923_v27, %v9202_v34  ;;  %v10727_v59 = vmax.f32 %v10725_v36, %v10726_v15  ;;  %v10733_v22 = vrot.slane %v10732_v9, 1  ;;  %v10646_v25 = vmax.f32 %v10644_v42, %v10645_v23  ;;  %v10081_v56 = vpop.f32.mrf.mxu1 }
 0x5fe   :  { %v10509_v3 = vadd.f32 %v15854_v37, %v10155_v20  ;;  %v10628_v47 = vrot.slane %v10627_v35, 1  ;;  %v10653_v0 = vmax.f32 %v10651_v61, %v10652_v53  ;;  %v10129_v58 = vadd.f32 %v11884_v40, %v9175_v2  ;;  %v17006_v61 = vld [vmem:[#allocation92_spill] sm:$0xff] }
 0x5ff   :  { %v10510_v48 = vadd.f32 %v15933_v33, %v10156_v57  ;;  %v9205_v63 = vadd.f32 %v17005_v38, %v17004_v16  ;;  %v10836_v30 = vsel %vm449_vm10, %v10727_v59, %v10622_v55  ;;  %v10647_v12 = vrot.slane %v10646_v25, 2  ;;  %v11887_v51 = vpop.f32.mrf.mxu1 }
 0x600   :  { %v10569_v34 = vsel %vm10370_vm1, %v10509_v3, -1e+30  ;;  %v10842_v37 = vmul.f32 %v10836_v30, %v16085_v54  ;;  %v10654_v19 = vrot.slane %v10653_v0, 2  ;;  %v10734_v2 = vmax.f32 %v10732_v9, %v10733_v22 }
 0x601   :  { %v10749_v11 = vmax.f32 %v10554_v46, %v10569_v34  ;;  %v10570_v33 = vsel %vm10371_vm2, %v10510_v48, -1e+30  ;;  %v10483_v39 = vadd.f32 %v16019_v31, %v10129_v58  ;;  %v10114_v7 = vadd.f32 %v10081_v56, %v9160_v26  ;;  %v10091_v42 = vpop.f32.mrf.mxu1 }
 0x602   :  { %v10756_v14 = vmax.f32 %v10555_v1, %v10570_v33  ;;  %v10629_v4 = vmax.f32 %v10627_v35, %v10628_v47  ;;  %v10845_v28 = vadd.f32 %v10842_v37, %v16094_v21  ;;  %v10159_v10 = vadd.f32 %v11887_v51, %v9205_v63  ;;  %v10872_v35 = vpop.permute.xlu1 %10871 }
 0x603   :  { %v10750_v24 = vrot.slane %v10749_v11, 4  ;;  %v10648_v62 = vmax.f32 %v10646_v25, %v10647_v12  ;;  %v10543_v36 = vsel %vm10374_vm6, %v10483_v39, -1e+30  ;;  %v10468_v49 = vadd.f32 %v16019_v31, %v10114_v7  ;;  %v11095_v7 = vld [vmem:[#allocation19 + $0x38] sm:$0xff] }
 0x604   :  { %v10757_v18 = vrot.slane %v10756_v14, 4  ;;  %v10655_v43 = vmax.f32 %v10653_v0, %v10654_v19  ;;  %v10513_v9 = vadd.f32 %v16019_v31, %v10159_v10  ;;  %v10144_v46 = vadd.f32 %v10091_v42, %v17006_v61  ;;  %v11093_v10 = vld [vmem:[#allocation19 + $0x28] sm:$0xff]  ;;  %v11088_v42 = vld [vmem:[#allocation19] sm:$0xff] }
 0x605   :  { %v10751_v45 = vmax.f32 %v10749_v11, %v10750_v24  ;;  %v10864_v21 = vmul.f32 %v15917_v60, %v16139_v50  ;;  %v10528_v44 = vsel %vm10359_vm7, %v10468_v49, -1e+30  ;;  %v10837_v17 = vsel %vm449_vm10, %v10734_v2, %v10629_v4  ;;  %v11089_v49 = vld [vmem:[#allocation19 + $0x8] sm:$0xff] }
 0x606   :  { %v10758_v29 = vmax.f32 %v10756_v14, %v10757_v18  ;;  %v10886_v26 = vmul.f32 %v16007_v41, %v10872_v35  ;;  %v10672_v23 = vmax.f32 %v10528_v44, %v10543_v36  ;;  %v10573_v20 = vsel %vm10374_vm6, %v10513_v9, -1e+30  ;;  %v11091_v18 = vld [vmem:[#allocation19 + $0x18] sm:$0xff]  ;;  %v11090_v36 = vld [vmem:[#allocation19 + $0x10] sm:$0xff] }
 0x607   :  { %v10752_v15 = vrot.slane %v10751_v45, 2  ;;  %v10498_v55 = vadd.f32 %v16019_v31, %v10144_v46  ;;  %v10843_v60 = vmul.f32 %v10837_v17, %v16085_v54  ;;  %v10867_v53 = vadd.f32 %v10864_v21, %v10845_v28  ;;  %v11094_v28 = vld [vmem:[#allocation19 + $0x30] sm:$0xff]  ;;  %v11533_v9 = vld [vmem:[#allocation18] ss:$0 sm:$0xff]  ;;  %v11534_v17 = vld [vmem:[#allocation21] ss:$0 sm:$0xff] }
 0x608   :  { %v10759_v27 = vrot.slane %v10758_v29, 2  ;;  %v10649_v1 = vrot.slane %v10648_v62, 1  ;;  %v10656_v57 = vrot.slane %v10655_v43, 1  ;;  %v10673_v22 = vrot.slane %v10672_v23, 4 }
 0x609   :  { %v10753_v59 = vmax.f32 %v10751_v45, %v10752_v15  ;;  %v10558_v41 = vsel %vm10359_vm7, %v10498_v55, -1e+30  ;;  %v10846_v3 = vadd.f32 %v10843_v60, %v15875_v8  ;;  %v10889_v40 = vadd.f32 %v10886_v26, %v10867_v53 }
 0x60a   :  { %v10760_v25 = vmax.f32 %v10758_v29, %v10759_v27  ;;  %v10674_v47 = vmax.f32 %v10672_v23, %v10673_v22  ;;  %v10777_v0 = vmax.f32 %v10558_v41, %v10573_v20  ;;  %v10650_v31 = vmax.f32 %v10648_v62, %v10649_v1  ;;  %v11092_v62 = vld [vmem:[#allocation19 + $0x20] sm:$0xff] }
 0x60b   :  { %v10754_v13 = vrot.slane %v10753_v59, 1  ;;  %v10657_v38 = vmax.f32 %v10655_v43, %v10656_v57  ;;  %v10887_v19 = vmul.f32 %v16029_v5, %v10872_v35  ;;  %v17007_v24 = vmov 0.0  }
 0x60c   :  { %v10761_v48 = vrot.slane %v10760_v25, 1  ;;  %v10675_v54 = vrot.slane %v10674_v47, 2  ;;  %v10778_v16 = vrot.slane %v10777_v0, 4 }
 0x60d   :  { %v10755_v58 = vmax.f32 %v10753_v59, %v10754_v13 }
 0x60e   :  { %v10762_v63 = vmax.f32 %v10760_v25, %v10761_v48  ;;  %v10676_v30 = vmax.f32 %v10674_v47, %v10675_v54  ;;  %v10779_v12 = vmax.f32 %v10777_v0, %v10778_v16 }
 0x60f   :  { %v10859_v34 = vsel %vm449_vm10, %v10755_v58, %v10650_v31 }
 0x610   :  { %v10860_v52 = vsel %vm449_vm10, %v10762_v63, %v10657_v38  ;;  %v10865_v32 = vmul.f32 %v10859_v34, %v16139_v50  ;;  %v10780_v56 = vrot.slane %v10779_v12, 2  ;;  %v10677_v33 = vrot.slane %v10676_v30, 1 }
 0x611   :  { %v10866_v8 = vmul.f32 %v10860_v52, %v16139_v50 }
 0x612   :  { %v10868_v37 = vadd.f32 %v10865_v32, %v10846_v3  ;;  %v10781_v2 = vmax.f32 %v10779_v12, %v10780_v56  ;;  %v10678_v51 = vmax.f32 %v10676_v30, %v10677_v33 }
 0x613   :  { %v10869_v11 = vadd.f32 %v10866_v8, %v16105_v6 }
 0x614   :  { %v10890_v14 = vadd.f32 %v10887_v19, %v10868_v37  ;;  %v10782_v39 = vrot.slane %v10781_v2, 1 }
 0x616   :  { %11011 = vmatprep.mubr.f32.mxu0 %v10890_v14  ;;  %v10783_v4 = vmax.f32 %v10781_v2, %v10782_v39 }
 0x617   :  { %11012 = vmatmul.mubr.f32.vlgmr.msra.gmra.mxu0 %v10889_v40 }
 0x618   :  { %11924 = vmatpush3.msra.mxu0 %v11095_v7  ;;  %11939 = vmatprep.mubr.msk.f32.mxu0 %vm12285_vm0, %v17007_v24  ;;  %v10882_v50 = vsel %vm449_vm10, %v10783_v4, %v10678_v51 }
 0x619   :  { %11925 = vmatprep.subr.mxu0 %v17007_v24  ;;  %v10888_v5 = vmul.f32 %v10882_v50, %v10872_v35 }
 0x61a   :  { %11926 = vmatpush3.msra.mxu0 %v11094_v28 }
 0x61b   :  { %11927 = vmatprep.subr.mxu0 %v17007_v24  ;;  %v10891_v6 = vadd.f32 %v10888_v5, %v10869_v11 }
 0x61c   :  { %11928 = vmatpush3.msra.mxu0 %v11093_v10 }
 0x61d   :  { %11921 = vmatmul.mubr.f32.vlgmr.msra.gmra.mxu1 %v10891_v6  ;;  %11929 = vmatprep.subr.mxu0 %v17007_v24 }
 0x61e   :  { %11930 = vmatpush3.msra.mxu0 %v11092_v62 }
 0x61f   :  { %11931 = vmatprep.subr.mxu0 %v17007_v24 }
 0x620   :  { %11932 = vmatpush3.msra.mxu0 %v11091_v18 }
 0x621   :  { %11933 = vmatprep.subr.mxu0 %v17007_v24 }
 0x622   :  { %11934 = vmatpush3.msra.mxu0 %v11090_v36 }
 0x623   :  { %11935 = vmatprep.subr.mxu0 %v17007_v24 }
 0x624   :  { %11936 = vmatpush3.msra.mxu0 %v11089_v49 }
 0x625   :  { %11937 = vmatprep.subr.mxu0 %v17007_v24 }
 0x626   :  { %11938 = vmatpush3.msra.mxu0 %v11088_v42 }
 0x6d7   :  { %v11671_v43 = vpop.f32.mrf.mxu0 }
 0x6d9   :  { %v11672_v45 = vpop.f32.mrf.mxu0 }
 0x6da   :  { %v11673_v61 = vadd.f32 %v11672_v45, %v11671_v43 }
 0x6dc   :  { %v11014_v46 = vadd.f32 %v11673_v61, %v11533_v9 }
 0x6dd   :  { %v11083_v35 = vpop.f32.mrf.mxu1 }
 0x6de   :  { %v11084_v21 = vadd.f32 %v11083_v35, %v11014_v46 }
 0x6df   :  { %v11922_v29 = vpop.f32.mrf.mxu1 }
 0x6e0   :  { %v11087_v44 = vmax.f32 %v11084_v21, 0.0 }
 0x6e2   :  { %11940 = vmatmul.mubr.msk.f32.vlgmr.msra.gmra.mxu0 %vm620_vm14, %v11087_v44 }
 0x7a2   :  { %v11172_v26 = vpop.f32.mrf.mxu0 }
 0x7a3   :  { %v11173_v15 = vadd.f32 %v11534_v17, %v11172_v26 }
 0x7a4   :  { %v11941_v23 = vpop.f32.mrf.mxu0 }
 0x7a5   :  { %v11536_v20 = vmul.f32 -1.442695, %v11173_v15 }
 0x7a7   :  { %11988 = vpow2.f32 %v11536_v20 }
 0x7b4   :  { %v11989_v27 = vpop.eup %11988 }
 0x7b5   :  { %v11179_v55 = vadd.f32 1.0, %v11989_v27 }
 0x7b7   :  { %11990 = vrcp.f32 %v11179_v55 }
 0x7c4   :  { %v11991_v60 = vpop.eup %11990 }
 0x7c5   :  { %11182 = vst [vmem:[#allocation22] sm:$0x3] %v11991_v60 }
 0x7c6   :  { %12245 = shalt.err (!%p12242_p3)
}
 0x7c7   :  { %11192 = dma.vmem_to_hbm [thread:$0]  %s11190_s19, 32, %s16212_s17, [#allocation6]  }
 0x7c8   :  { %12266 = dma.done.wait [#allocation6], 32  }
 0x7c9   :  { %12267 = vsyncadd [#allocation6], 4294967264 }
 0x7ca   :  { %11196 = vsyncpa [#allocation5], 1 }
 0x7cb   :  { %11197 = vsyncpa [#allocation8], 1 }
 0x7cc   :  { %11198 = vsyncpa [#allocation11], 1 }
 0x7cd   :  { %11199 = vsyncpa [#allocation14], 1 }
 0x7ce   :  { %11200 = vsyncpa [#allocation17], 1 }
 0x7cf   :  { %11201 = vsyncpa [#allocation20], 1 }
 0x7d0   :  { %11202 = vsyncpa [#allocation6], 1 }

</bundles_post_ra>
